<compile_context>
chip_gen: v5e
topology: v5e:2x2
jax: 0.10.0
libtpu: 0.0.40
codegen_flags: <defaults>
</compile_context>

<pallas_src>
import functools

import jax
import jax.numpy as jnp
from jax.experimental import pallas as pl
from jax.experimental.pallas import tpu as pltpu

KSIZE = 7
PAD = KSIZE // 2

# Aligned origin of the pooled-map interior inside the padded VMEM scratch: row offset 8
# (sublane-tile aligned), lane offset 128 (lane-tile aligned).  Only PAD=3 zero rows/cols
# are strictly needed; the aligned origin keeps the interior *stores* unshifted.
ROW0 = 8
COL0 = 128


def _round_up(x, m):
    return (x + m - 1) // m * m


def _largest_divisor_leq(n, cap):
    for d in range(min(n, max(cap, 1)), 0, -1):
        if n % d == 0:
            return d
    return 1


def _vmem_capacity_bytes():
    try:
        cap = int(pltpu.get_tpu_info().vmem_capacity_bytes)
        if cap > 0:
            return cap
    except Exception:
        pass
    return 64 << 20  # conservative default: v7x per-TensorCore VMEM


def _pick_tiling(N, C, H, W, itemsize, block_c_cap):
    """VMEM-budgeted block sizes, derived per generation (v5e/v6e 128 MiB, v7x 64 MiB)."""
    cap = _vmem_capacity_bytes()
    budget = cap // 2  # double-buffered input + scratch + output target
    HW = H * W
    hs = ROW0 + H + PAD
    ws = _round_up(COL0 + W + PAD, 128)

    def est(bn, bc):
        in_b = 2 * bn * _round_up(bc, 8) * _round_up(HW, 128) * itemsize   # 2x: pipelined
        scr_b = 2 * bn * _round_up(hs, 8) * ws * 4                          # avg + max maps
        out_b = 2 * bn * _round_up(H, 8) * _round_up(W, 128) * 4
        return in_b + scr_b + out_b

    # Keep >= 2 steps on the "parallel" batch axis so v7x's two TensorCores both get work.
    bn = _largest_divisor_leq(N, min(8, max(1, N // 2)))

    cap_c = C if block_c_cap is None else min(C, block_c_cap)
    cands = [d for d in range(C, 0, -1)
             if C % d == 0 and (d == C or d % 8 == 0) and d <= cap_c]
    if not cands:
        cands = [d for d in range(C, 0, -1) if C % d == 0 and (d == C or d % 8 == 0)]
    bc = cands[-1]
    for d in cands:                       # largest channel block that fits the budget
        if est(bn, d) <= budget:
            bc = d
            break
    while bn > 1 and est(bn, bc) > budget:
        bn = _largest_divisor_leq(N, bn - 1)

    vmem_limit = int(min(cap * 3 // 4, max(est(bn, bc) + (8 << 20), 32 << 20)))
    return bn, bc, vmem_limit


def _pick_row_block(H, W):
    """Row-chunk size: divisor of H, <= 8 rows, preferring 128-lane-aligned flat chunks."""
    limit = min(8, max(1, 1024 // max(W, 1)))
    best = None
    for d in range(min(H, limit), 0, -1):
        if H % d == 0:
            if best is None:
                best = d
            if (d * W) % 128 == 0:
                return d
    return best or 1


def _spatial_attention_kernel(x_ref, w_ref, b_ref, o_ref, avg_ref, max_ref, *,
                              img_h, img_w, row_blk, ch_blk):
    # x_ref  : VMEM (bn, bc, H*W)  activations, compact lane-dense layout straight from HBM
    # w_ref  : SMEM (2*K*K,)       conv weights, avg-branch pre-scaled by 1/C in the wrapper
    # b_ref  : SMEM (1,)           conv bias
    # o_ref  : VMEM (bn, 1, H, W)  sigmoid(conv(...)) output block
    # avg_ref/max_ref : VMEM (bn, ROW0+H+PAD, COL0+W+PAD~) padded pooled-map scratch
    c_idx = pl.program_id(1)
    n_c = pl.num_programs(1)
    bn, bc, _ = x_ref.shape
    n_cgrp = bc // ch_blk

    # ---- once per image block: zero the padded scratch.  This *is* the conv's zero
    #      border; the interior is overwritten by the reduction below.
    @pl.when(c_idx == 0)
    def _():
        avg_ref[...] = jnp.zeros_like(avg_ref)
        max_ref[...] = jnp.zeros_like(max_ref)

    # ---- phase 1: channel sum / max reduction, row-chunked + channel-grouped so the
    #      accumulators plus one channel-group slice stay well under 64 vregs.
    for r0 in range(0, img_h, row_blk):
        lane0 = r0 * img_w
        nlane = row_blk * img_w

        def cgroup(g, carry):
            s, m = carry
            xg = x_ref[:, pl.ds(g * ch_blk, ch_blk), lane0:lane0 + nlane]
            xg = xg.astype(jnp.float32)          # bf16 inputs are upcast after the DMA
            return (s + jnp.sum(xg, axis=1),
                    jnp.maximum(m, jnp.max(xg, axis=1)))

        init = (jnp.zeros((bn, nlane), jnp.float32),
                jnp.full((bn, nlane), -jnp.inf, jnp.float32))
        psum, pmax = jax.lax.fori_loop(0, n_cgrp, cgroup, init,
                                       unroll=n_cgrp <= 4)
        psum = psum.reshape(bn, row_blk, img_w)
        pmax = pmax.reshape(bn, row_blk, img_w)

        rows = slice(ROW0 + r0, ROW0 + r0 + row_blk)   # tile-aligned interior origin
        cols = slice(COL0, COL0 + img_w)

        @pl.when(c_idx == 0)
        def _():
            avg_ref[:, rows, cols] = psum
            max_ref[:, rows, cols] = pmax

        @pl.when(c_idx > 0)
        def _():
            avg_ref[:, rows, cols] = avg_ref[:, rows, cols] + psum
            max_ref[:, rows, cols] = jnp.maximum(max_ref[:, rows, cols], pmax)

    # ---- phase 2 (last channel step only): 98-tap conv + bias + sigmoid, row-chunked.
    #      Tap windows are loaded directly from the VMEM scratch refs (no register-value
    #      slicing); live state per chunk = accumulator + one window.
    @pl.when(c_idx == n_c - 1)
    def _():
        wts = [w_ref[i] for i in range(2 * KSIZE * KSIZE)]   # hoist SMEM scalar reads
        bias = b_ref[0]
        n_chunks = img_h // row_blk

        def conv_chunk(ci, carry):
            r0 = ci * row_blk
            acc = jnp.full((bn, row_blk, img_w), bias, dtype=jnp.float32)
            for m, pooled in enumerate((avg_ref, max_ref)):
                for dy in range(KSIZE):
                    row_ds = pl.ds(ROW0 - PAD + dy + r0, row_blk)
                    for dx in range(KSIZE):
                        c0 = COL0 - PAD + dx
                        win = pooled[:, row_ds, c0:c0 + img_w]
                        acc = acc + wts[m * KSIZE * KSIZE + dy * KSIZE + dx] * win
            o_ref[:, 0, pl.ds(r0, row_blk), :] = (
                jax.nn.sigmoid(acc).astype(o_ref.dtype))   # exp rides the EUP slot
            return carry

        jax.lax.fori_loop(0, n_chunks, conv_chunk, 0, unroll=n_chunks <= 4)


def spatial_attention(x, weight, bias, *, block_c_cap=None):
    """x: (N, C, H, W) f32/bf16, weight: (1, 2, 7, 7), bias: (1,) -> (N, 1, H, W)."""
    N, C, H, W = x.shape
    assert weight.shape == (1, 2, KSIZE, KSIZE) and bias.shape == (1,)
    HW = H * W
    hs = ROW0 + H + PAD
    ws = _round_up(COL0 + W + PAD, 128)

    # Fold 1/C into the avg-branch weights: the kernel accumulates the channel SUM and
    # conv(sum, w/C) == conv(mean, w).  Saves a full-map scaling pass in the kernel.
    w_f = weight.astype(jnp.float32)
    w_f = w_f.at[:, 0, :, :].multiply(1.0 / C)
    w_flat = w_f.reshape(-1)
    b_flat = bias.reshape(-1).astype(jnp.float32)

    # Free metadata-only reshape: no padded copy of x is ever written to HBM.
    x_flat = x.reshape(N, C, HW)

    bn, bc, vmem_limit = _pick_tiling(N, C, H, W, x.dtype.itemsize, block_c_cap)
    row_blk = _pick_row_block(H, W)
    ch_blk = _largest_divisor_leq(bc, 8)
    n_steps, c_steps = N // bn, C // bc

    kernel = functools.partial(_spatial_attention_kernel,
                               img_h=H, img_w=W, row_blk=row_blk, ch_blk=ch_blk)

    x_spec_kwargs = {}
    if c_steps >= 3:
        # Deeper input pipelining hides the conv epilogue bubble on the last channel step.
        x_spec_kwargs["pipeline_mode"] = pl.Buffered(3)
    in_specs = [
        pl.BlockSpec((bn, bc, HW), lambda n, c: (n, c, 0), **x_spec_kwargs),
        pl.BlockSpec(memory_space=pltpu.MemorySpace.SMEM),   # conv weights (98 scalars)
        pl.BlockSpec(memory_space=pltpu.MemorySpace.SMEM),   # conv bias
    ]
    out_specs = pl.BlockSpec((bn, 1, H, W), lambda n, c: (n, 0, 0, 0))

    out = pl.pallas_call(
        kernel,
        out_shape=jax.ShapeDtypeStruct((N, 1, H, W), x.dtype),
        grid=(n_steps, c_steps),
        in_specs=in_specs,
        out_specs=out_specs,
        scratch_shapes=[pltpu.VMEM((bn, hs, ws), jnp.float32),
                        pltpu.VMEM((bn, hs, ws), jnp.float32)],
        compiler_params=pltpu.CompilerParams(
            dimension_semantics=("parallel", "arbitrary"),
            vmem_limit_bytes=vmem_limit),
    )(x_flat, w_flat, b_flat)
    return out


def reference(x, weight, bias):
    x = x.astype(jnp.float32)
    avg = jnp.mean(x, axis=1, keepdims=True)
    mx = jnp.max(x, axis=1, keepdims=True)
    inp = jnp.concatenate([avg, mx], axis=1)
    out = jax.lax.conv_general_dilated(
        inp, weight.astype(jnp.float32), window_strides=(1, 1),
        padding=((PAD, PAD), (PAD, PAD)),
        dimension_numbers=("NCHW", "OIHW", "NCHW"))
    return jax.nn.sigmoid(out + bias.reshape(1, -1, 1, 1))


if __name__ == "__main__":
    key = jax.random.PRNGKey(0)
    kx, kw, kx2 = jax.random.split(key, 3)

    N, C, H, W = 2, 4, 16, 16
    x = jax.random.normal(kx, (N, C, H, W), dtype=jnp.float32)
    # Deterministic synthetic nn.Conv2d(2, 1, 7, padding=3) parameters.
    weight = 0.1 * jax.random.normal(kw, (1, 2, KSIZE, KSIZE), dtype=jnp.float32)
    bias = jnp.array([0.05], dtype=jnp.float32)

    out = jax.block_until_ready(spatial_attention(x, weight, bias))
    ref = reference(x, weight, bias)
    assert out.shape == (N, 1, H, W)
    assert jnp.allclose(out, ref, atol=1e-5, rtol=1e-5), "f32 mismatch vs reference"

    # Multi-step channel reduction path (block_c capped below C -> 2 "arbitrary" steps).
    x2 = jax.random.normal(kx2, (2, 16, 16, 16), dtype=jnp.float32)
    out2 = jax.block_until_ready(spatial_attention(x2, weight, bias, block_c_cap=8))
    ref2 = reference(x2, weight, bias)
    assert jnp.allclose(out2, ref2, atol=1e-5, rtol=1e-5), "multi-step mismatch"

    # bf16 activations: DMA'd as bf16 (half the HBM traffic), reduced/accumulated in f32.
    out_bf = jax.block_until_ready(
        spatial_attention(x.astype(jnp.bfloat16), weight, bias))
    assert out_bf.dtype == jnp.bfloat16
    assert jnp.allclose(out_bf.astype(jnp.float32), ref, atol=1e-2, rtol=1e-2), \
        "bf16 mismatch vs reference"

    print("KERNEL_OK")
</pallas_src>

<mosaic_0001>
module attributes {stable_mosaic.version = 11 : i64} {
  func.func @_spatial_attention_kernel(%arg0: i32, %arg1: i32, %arg2: memref<1x4x256xf32, #tpu.memory_space<vmem>>, %arg3: memref<98xf32, #tpu.memory_space<smem>>, %arg4: memref<1xf32, #tpu.memory_space<smem>>, %arg5: memref<1x1x16x16xf32, #tpu.memory_space<vmem>>, %arg6: memref<1x27x256xf32, #tpu.memory_space<vmem>>, %arg7: memref<1x27x256xf32, #tpu.memory_space<vmem>>) attributes {dimension_semantics = [#tpu.dimension_semantics<parallel>, #tpu.dimension_semantics<arbitrary>], iteration_bounds = array<i64: 2, 1>, scalar_prefetch = 0 : i64, scratch_operands = 2 : i64, tpu.core_type = #tpu.core_type<tc>, window_params = [{transform_indices = @transform_0, window_bounds = array<i64: 1, 4, 256>}, {transform_indices = @transform_1, window_bounds = array<i64: 98>}, {transform_indices = @transform_2, window_bounds = array<i64: 1>}, {transform_indices = @transform_3, window_bounds = array<i64: 1, 1, 16, 16>}]} {
    %c0_i32 = arith.constant 0 : i32
    %0 = arith.cmpi eq, %arg1, %c0_i32 : i32
    %1 = arith.extui %0 : i1 to i32
    %c0_i32_0 = arith.constant 0 : i32
    %2 = arith.cmpi ne, %1, %c0_i32_0 : i32
    scf.if %2 {
      %cst_24 = arith.constant 0.000000e+00 : f32
      %40 = vector.broadcast %cst_24 : f32 to vector<1x27x256xf32>
      %c0_25 = arith.constant 0 : index
      %c0_26 = arith.constant 0 : index
      %c0_27 = arith.constant 0 : index
      %41 = vector.load %arg6[%c0_25, %c0_26, %c0_27] : memref<1x27x256xf32, #tpu.memory_space<vmem>>, vector<1x27x256xf32>
      tpu.vector_store %arg6[%c0_25, %c0_26, %c0_27], %40 {strides = array<i32>} : memref<1x27x256xf32, #tpu.memory_space<vmem>>, vector<1x27x256xf32>,
      %cst_28 = arith.constant 0.000000e+00 : f32
      %42 = vector.broadcast %cst_28 : f32 to vector<1x27x256xf32>
      %c0_29 = arith.constant 0 : index
      %c0_30 = arith.constant 0 : index
      %c0_31 = arith.constant 0 : index
      %43 = vector.load %arg7[%c0_29, %c0_30, %c0_31] : memref<1x27x256xf32, #tpu.memory_space<vmem>>, vector<1x27x256xf32>
      tpu.vector_store %arg7[%c0_29, %c0_30, %c0_31], %42 {strides = array<i32>} : memref<1x27x256xf32, #tpu.memory_space<vmem>>, vector<1x27x256xf32>,
    } else {
    }
    %cst = arith.constant 0.000000e+00 : f32
    %3 = vector.broadcast %cst : f32 to vector<1x128xf32>
    %cst_1 = arith.constant 0xFF800000 : f32
    %4 = vector.broadcast %cst_1 : f32 to vector<1x128xf32>
    %c0_i32_2 = arith.constant 0 : i32
    %c4_i32 = arith.constant 4 : i32
    %5 = arith.muli %c0_i32_2, %c4_i32 : i32
    %c0 = arith.constant 0 : index
    %6 = arith.index_cast %5 : i32 to index
    %c0_3 = arith.constant 0 : index
    %7 = vector.load %arg2[%c0, %6, %c0_3] : memref<1x4x256xf32, #tpu.memory_space<vmem>>, vector<1x4x128xf32>
    %cst_4 = arith.constant dense<0.000000e+00> : vector<1x128xf32>
    %8 = vector.multi_reduction <add>, %7, %cst_4 [1] : vector<1x4x128xf32> to vector<1x128xf32>
    %9 = arith.addf %3, %8 : vector<1x128xf32>
    %cst_5 = arith.constant dense<0xFF800000> : vector<1x128xf32>
    %10 = vector.multi_reduction <maximumf>, %7, %cst_5 [1] : vector<1x4x128xf32> to vector<1x128xf32>
    %11 = arith.maximumf %4, %10 : vector<1x128xf32>
    %c1_i32 = arith.constant 1 : i32
    %12 = vector.shape_cast %9 : vector<1x128xf32> to vector<1x8x16xf32>
    %13 = vector.shape_cast %11 : vector<1x128xf32> to vector<1x8x16xf32>
    %c0_i32_6 = arith.constant 0 : i32
    %14 = arith.cmpi eq, %arg1, %c0_i32_6 : i32
    %15 = arith.extui %14 : i1 to i32
    %c0_i32_7 = arith.constant 0 : i32
    %16 = arith.cmpi ne, %15, %c0_i32_7 : i32
    scf.if %16 {
      %c0_24 = arith.constant 0 : index
      %c8 = arith.constant 8 : index
      %c128_25 = arith.constant 128 : index
      %40 = vector.load %arg6[%c0_24, %c8, %c128_25] : memref<1x27x256xf32, #tpu.memory_space<vmem>>, vector<1x8x16xf32>
      tpu.vector_store %arg6[%c0_24, %c8, %c128_25], %12 {strides = array<i32>} : memref<1x27x256xf32, #tpu.memory_space<vmem>>, vector<1x8x16xf32>,
      %c0_26 = arith.constant 0 : index
      %c8_27 = arith.constant 8 : index
      %c128_28 = arith.constant 128 : index
      %41 = vector.load %arg7[%c0_26, %c8_27, %c128_28] : memref<1x27x256xf32, #tpu.memory_space<vmem>>, vector<1x8x16xf32>
      tpu.vector_store %arg7[%c0_26, %c8_27, %c128_28], %13 {strides = array<i32>} : memref<1x27x256xf32, #tpu.memory_space<vmem>>, vector<1x8x16xf32>,
    } else {
    }
    %c0_i32_8 = arith.constant 0 : i32
    %17 = arith.cmpi sgt, %arg1, %c0_i32_8 : i32
    %18 = arith.extui %17 : i1 to i32
    %c0_i32_9 = arith.constant 0 : i32
    %19 = arith.cmpi ne, %18, %c0_i32_9 : i32
    scf.if %19 {
      %c0_24 = arith.constant 0 : index
      %c8 = arith.constant 8 : index
      %c128_25 = arith.constant 128 : index
      %40 = vector.load %arg6[%c0_24, %c8, %c128_25] : memref<1x27x256xf32, #tpu.memory_space<vmem>>, vector<1x8x16xf32>
      %41 = arith.addf %40, %12 : vector<1x8x16xf32>
      %c0_26 = arith.constant 0 : index
      %c8_27 = arith.constant 8 : index
      %c128_28 = arith.constant 128 : index
      %42 = vector.load %arg6[%c0_26, %c8_27, %c128_28] : memref<1x27x256xf32, #tpu.memory_space<vmem>>, vector<1x8x16xf32>
      tpu.vector_store %arg6[%c0_26, %c8_27, %c128_28], %41 {strides = array<i32>} : memref<1x27x256xf32, #tpu.memory_space<vmem>>, vector<1x8x16xf32>,
      %c0_29 = arith.constant 0 : index
      %c8_30 = arith.constant 8 : index
      %c128_31 = arith.constant 128 : index
      %43 = vector.load %arg7[%c0_29, %c8_30, %c128_31] : memref<1x27x256xf32, #tpu.memory_space<vmem>>, vector<1x8x16xf32>
      %44 = arith.maximumf %43, %13 : vector<1x8x16xf32>
      %c0_32 = arith.constant 0 : index
      %c8_33 = arith.constant 8 : index
      %c128_34 = arith.constant 128 : index
      %45 = vector.load %arg7[%c0_32, %c8_33, %c128_34] : memref<1x27x256xf32, #tpu.memory_space<vmem>>, vector<1x8x16xf32>
      tpu.vector_store %arg7[%c0_32, %c8_33, %c128_34], %44 {strides = array<i32>} : memref<1x27x256xf32, #tpu.memory_space<vmem>>, vector<1x8x16xf32>,
    } else {
    }
    %cst_10 = arith.constant 0.000000e+00 : f32
    %20 = vector.broadcast %cst_10 : f32 to vector<1x128xf32>
    %cst_11 = arith.constant 0xFF800000 : f32
    %21 = vector.broadcast %cst_11 : f32 to vector<1x128xf32>
    %c0_i32_12 = arith.constant 0 : i32
    %c4_i32_13 = arith.constant 4 : i32
    %22 = arith.muli %c0_i32_12, %c4_i32_13 : i32
    %c0_14 = arith.constant 0 : index
    %23 = arith.index_cast %22 : i32 to index
    %c128 = arith.constant 128 : index
    %24 = vector.load %arg2[%c0_14, %23, %c128] : memref<1x4x256xf32, #tpu.memory_space<vmem>>, vector<1x4x128xf32>
    %cst_15 = arith.constant dense<0.000000e+00> : vector<1x128xf32>
    %25 = vector.multi_reduction <add>, %24, %cst_15 [1] : vector<1x4x128xf32> to vector<1x128xf32>
    %26 = arith.addf %20, %25 : vector<1x128xf32>
    %cst_16 = arith.constant dense<0xFF800000> : vector<1x128xf32>
    %27 = vector.multi_reduction <maximumf>, %24, %cst_16 [1] : vector<1x4x128xf32> to vector<1x128xf32>
    %28 = arith.maximumf %21, %27 : vector<1x128xf32>
    %c1_i32_17 = arith.constant 1 : i32
    %29 = vector.shape_cast %26 : vector<1x128xf32> to vector<1x8x16xf32>
    %30 = vector.shape_cast %28 : vector<1x128xf32> to vector<1x8x16xf32>
    %c0_i32_18 = arith.constant 0 : i32
    %31 = arith.cmpi eq, %arg1, %c0_i32_18 : i32
    %32 = arith.extui %31 : i1 to i32
    %c0_i32_19 = arith.constant 0 : i32
    %33 = arith.cmpi ne, %32, %c0_i32_19 : i32
    scf.if %33 {
      %c0_24 = arith.constant 0 : index
      %c16 = arith.constant 16 : index
      %c128_25 = arith.constant 128 : index
      %40 = vector.load %arg6[%c0_24, %c16, %c128_25] : memref<1x27x256xf32, #tpu.memory_space<vmem>>, vector<1x8x16xf32>
      tpu.vector_store %arg6[%c0_24, %c16, %c128_25], %29 {strides = array<i32>} : memref<1x27x256xf32, #tpu.memory_space<vmem>>, vector<1x8x16xf32>,
      %c0_26 = arith.constant 0 : index
      %c16_27 = arith.constant 16 : index
      %c128_28 = arith.constant 128 : index
      %41 = vector.load %arg7[%c0_26, %c16_27, %c128_28] : memref<1x27x256xf32, #tpu.memory_space<vmem>>, vector<1x8x16xf32>
      tpu.vector_store %arg7[%c0_26, %c16_27, %c128_28], %30 {strides = array<i32>} : memref<1x27x256xf32, #tpu.memory_space<vmem>>, vector<1x8x16xf32>,
    } else {
    }
    %c0_i32_20 = arith.constant 0 : i32
    %34 = arith.cmpi sgt, %arg1, %c0_i32_20 : i32
    %35 = arith.extui %34 : i1 to i32
    %c0_i32_21 = arith.constant 0 : i32
    %36 = arith.cmpi ne, %35, %c0_i32_21 : i32
    scf.if %36 {
      %c0_24 = arith.constant 0 : index
      %c16 = arith.constant 16 : index
      %c128_25 = arith.constant 128 : index
      %40 = vector.load %arg6[%c0_24, %c16, %c128_25] : memref<1x27x256xf32, #tpu.memory_space<vmem>>, vector<1x8x16xf32>
      %41 = arith.addf %40, %29 : vector<1x8x16xf32>
      %c0_26 = arith.constant 0 : index
      %c16_27 = arith.constant 16 : index
      %c128_28 = arith.constant 128 : index
      %42 = vector.load %arg6[%c0_26, %c16_27, %c128_28] : memref<1x27x256xf32, #tpu.memory_space<vmem>>, vector<1x8x16xf32>
      tpu.vector_store %arg6[%c0_26, %c16_27, %c128_28], %41 {strides = array<i32>} : memref<1x27x256xf32, #tpu.memory_space<vmem>>, vector<1x8x16xf32>,
      %c0_29 = arith.constant 0 : index
      %c16_30 = arith.constant 16 : index
      %c128_31 = arith.constant 128 : index
      %43 = vector.load %arg7[%c0_29, %c16_30, %c128_31] : memref<1x27x256xf32, #tpu.memory_space<vmem>>, vector<1x8x16xf32>
      %44 = arith.maximumf %43, %30 : vector<1x8x16xf32>
      %c0_32 = arith.constant 0 : index
      %c16_33 = arith.constant 16 : index
      %c128_34 = arith.constant 128 : index
      %45 = vector.load %arg7[%c0_32, %c16_33, %c128_34] : memref<1x27x256xf32, #tpu.memory_space<vmem>>, vector<1x8x16xf32>
      tpu.vector_store %arg7[%c0_32, %c16_33, %c128_34], %44 {strides = array<i32>} : memref<1x27x256xf32, #tpu.memory_space<vmem>>, vector<1x8x16xf32>,
    } else {
    }
    %c0_i32_22 = arith.constant 0 : i32
    %37 = arith.cmpi eq, %arg1, %c0_i32_22 : i32
    %38 = arith.extui %37 : i1 to i32
    %c0_i32_23 = arith.constant 0 : i32
    %39 = arith.cmpi ne, %38, %c0_i32_23 : i32
    scf.if %39 {
      %c0_24 = arith.constant 0 : index
      %40 = memref.load %arg3[%c0_24] : memref<98xf32, #tpu.memory_space<smem>>
      %c1 = arith.constant 1 : index
      %41 = memref.load %arg3[%c1] : memref<98xf32, #tpu.memory_space<smem>>
      %c2 = arith.constant 2 : index
      %42 = memref.load %arg3[%c2] : memref<98xf32, #tpu.memory_space<smem>>
      %c3 = arith.constant 3 : index
      %43 = memref.load %arg3[%c3] : memref<98xf32, #tpu.memory_space<smem>>
      %c4 = arith.constant 4 : index
      %44 = memref.load %arg3[%c4] : memref<98xf32, #tpu.memory_space<smem>>
      %c5 = arith.constant 5 : index
      %45 = memref.load %arg3[%c5] : memref<98xf32, #tpu.memory_space<smem>>
      %c6 = arith.constant 6 : index
      %46 = memref.load %arg3[%c6] : memref<98xf32, #tpu.memory_space<smem>>
      %c7 = arith.constant 7 : index
      %47 = memref.load %arg3[%c7] : memref<98xf32, #tpu.memory_space<smem>>
      %c8 = arith.constant 8 : index
      %48 = memref.load %arg3[%c8] : memref<98xf32, #tpu.memory_space<smem>>
      %c9 = arith.constant 9 : index
      %49 = memref.load %arg3[%c9] : memref<98xf32, #tpu.memory_space<smem>>
      %c10 = arith.constant 10 : index
      %50 = memref.load %arg3[%c10] : memref<98xf32, #tpu.memory_space<smem>>
      %c11 = arith.constant 11 : index
      %51 = memref.load %arg3[%c11] : memref<98xf32, #tpu.memory_space<smem>>
      %c12 = arith.constant 12 : index
      %52 = memref.load %arg3[%c12] : memref<98xf32, #tpu.memory_space<smem>>
      %c13 = arith.constant 13 : index
      %53 = memref.load %arg3[%c13] : memref<98xf32, #tpu.memory_space<smem>>
      %c14 = arith.constant 14 : index
      %54 = memref.load %arg3[%c14] : memref<98xf32, #tpu.memory_space<smem>>
      %c15 = arith.constant 15 : index
      %55 = memref.load %arg3[%c15] : memref<98xf32, #tpu.memory_space<smem>>
      %c16 = arith.constant 16 : index
      %56 = memref.load %arg3[%c16] : memref<98xf32, #tpu.memory_space<smem>>
      %c17 = arith.constant 17 : index
      %57 = memref.load %arg3[%c17] : memref<98xf32, #tpu.memory_space<smem>>
      %c18 = arith.constant 18 : index
      %58 = memref.load %arg3[%c18] : memref<98xf32, #tpu.memory_space<smem>>
      %c19 = arith.constant 19 : index
      %59 = memref.load %arg3[%c19] : memref<98xf32, #tpu.memory_space<smem>>
      %c20 = arith.constant 20 : index
      %60 = memref.load %arg3[%c20] : memref<98xf32, #tpu.memory_space<smem>>
      %c21 = arith.constant 21 : index
      %61 = memref.load %arg3[%c21] : memref<98xf32, #tpu.memory_space<smem>>
      %c22 = arith.constant 22 : index
      %62 = memref.load %arg3[%c22] : memref<98xf32, #tpu.memory_space<smem>>
      %c23 = arith.constant 23 : index
      %63 = memref.load %arg3[%c23] : memref<98xf32, #tpu.memory_space<smem>>
      %c24 = arith.constant 24 : index
      %64 = memref.load %arg3[%c24] : memref<98xf32, #tpu.memory_space<smem>>
      %c25 = arith.constant 25 : index
      %65 = memref.load %arg3[%c25] : memref<98xf32, #tpu.memory_space<smem>>
      %c26 = arith.constant 26 : index
      %66 = memref.load %arg3[%c26] : memref<98xf32, #tpu.memory_space<smem>>
      %c27 = arith.constant 27 : index
      %67 = memref.load %arg3[%c27] : memref<98xf32, #tpu.memory_space<smem>>
      %c28 = arith.constant 28 : index
      %68 = memref.load %arg3[%c28] : memref<98xf32, #tpu.memory_space<smem>>
      %c29 = arith.constant 29 : index
      %69 = memref.load %arg3[%c29] : memref<98xf32, #tpu.memory_space<smem>>
      %c30 = arith.constant 30 : index
      %70 = memref.load %arg3[%c30] : memref<98xf32, #tpu.memory_space<smem>>
      %c31 = arith.constant 31 : index
      %71 = memref.load %arg3[%c31] : memref<98xf32, #tpu.memory_space<smem>>
      %c32 = arith.constant 32 : index
      %72 = memref.load %arg3[%c32] : memref<98xf32, #tpu.memory_space<smem>>
      %c33 = arith.constant 33 : index
      %73 = memref.load %arg3[%c33] : memref<98xf32, #tpu.memory_space<smem>>
      %c34 = arith.constant 34 : index
      %74 = memref.load %arg3[%c34] : memref<98xf32, #tpu.memory_space<smem>>
      %c35 = arith.constant 35 : index
      %75 = memref.load %arg3[%c35] : memref<98xf32, #tpu.memory_space<smem>>
      %c36 = arith.constant 36 : index
      %76 = memref.load %arg3[%c36] : memref<98xf32, #tpu.memory_space<smem>>
      %c37 = arith.constant 37 : index
      %77 = memref.load %arg3[%c37] : memref<98xf32, #tpu.memory_space<smem>>
      %c38 = arith.constant 38 : index
      %78 = memref.load %arg3[%c38] : memref<98xf32, #tpu.memory_space<smem>>
      %c39 = arith.constant 39 : index
      %79 = memref.load %arg3[%c39] : memref<98xf32, #tpu.memory_space<smem>>
      %c40 = arith.constant 40 : index
      %80 = memref.load %arg3[%c40] : memref<98xf32, #tpu.memory_space<smem>>
      %c41 = arith.constant 41 : index
      %81 = memref.load %arg3[%c41] : memref<98xf32, #tpu.memory_space<smem>>
      %c42 = arith.constant 42 : index
      %82 = memref.load %arg3[%c42] : memref<98xf32, #tpu.memory_space<smem>>
      %c43 = arith.constant 43 : index
      %83 = memref.load %arg3[%c43] : memref<98xf32, #tpu.memory_space<smem>>
      %c44 = arith.constant 44 : index
      %84 = memref.load %arg3[%c44] : memref<98xf32, #tpu.memory_space<smem>>
      %c45 = arith.constant 45 : index
      %85 = memref.load %arg3[%c45] : memref<98xf32, #tpu.memory_space<smem>>
      %c46 = arith.constant 46 : index
      %86 = memref.load %arg3[%c46] : memref<98xf32, #tpu.memory_space<smem>>
      %c47 = arith.constant 47 : index
      %87 = memref.load %arg3[%c47] : memref<98xf32, #tpu.memory_space<smem>>
      %c48 = arith.constant 48 : index
      %88 = memref.load %arg3[%c48] : memref<98xf32, #tpu.memory_space<smem>>
      %c49 = arith.constant 49 : index
      %89 = memref.load %arg3[%c49] : memref<98xf32, #tpu.memory_space<smem>>
      %c50 = arith.constant 50 : index
      %90 = memref.load %arg3[%c50] : memref<98xf32, #tpu.memory_space<smem>>
      %c51 = arith.constant 51 : index
      %91 = memref.load %arg3[%c51] : memref<98xf32, #tpu.memory_space<smem>>
      %c52 = arith.constant 52 : index
      %92 = memref.load %arg3[%c52] : memref<98xf32, #tpu.memory_space<smem>>
      %c53 = arith.constant 53 : index
      %93 = memref.load %arg3[%c53] : memref<98xf32, #tpu.memory_space<smem>>
      %c54 = arith.constant 54 : index
      %94 = memref.load %arg3[%c54] : memref<98xf32, #tpu.memory_space<smem>>
      %c55 = arith.constant 55 : index
      %95 = memref.load %arg3[%c55] : memref<98xf32, #tpu.memory_space<smem>>
      %c56 = arith.constant 56 : index
      %96 = memref.load %arg3[%c56] : memref<98xf32, #tpu.memory_space<smem>>
      %c57 = arith.constant 57 : index
      %97 = memref.load %arg3[%c57] : memref<98xf32, #tpu.memory_space<smem>>
      %c58 = arith.constant 58 : index
      %98 = memref.load %arg3[%c58] : memref<98xf32, #tpu.memory_space<smem>>
      %c59 = arith.constant 59 : index
      %99 = memref.load %arg3[%c59] : memref<98xf32, #tpu.memory_space<smem>>
      %c60 = arith.constant 60 : index
      %100 = memref.load %arg3[%c60] : memref<98xf32, #tpu.memory_space<smem>>
      %c61 = arith.constant 61 : index
      %101 = memref.load %arg3[%c61] : memref<98xf32, #tpu.memory_space<smem>>
      %c62 = arith.constant 62 : index
      %102 = memref.load %arg3[%c62] : memref<98xf32, #tpu.memory_space<smem>>
      %c63 = arith.constant 63 : index
      %103 = memref.load %arg3[%c63] : memref<98xf32, #tpu.memory_space<smem>>
      %c64 = arith.constant 64 : index
      %104 = memref.load %arg3[%c64] : memref<98xf32, #tpu.memory_space<smem>>
      %c65 = arith.constant 65 : index
      %105 = memref.load %arg3[%c65] : memref<98xf32, #tpu.memory_space<smem>>
      %c66 = arith.constant 66 : index
      %106 = memref.load %arg3[%c66] : memref<98xf32, #tpu.memory_space<smem>>
      %c67 = arith.constant 67 : index
      %107 = memref.load %arg3[%c67] : memref<98xf32, #tpu.memory_space<smem>>
      %c68 = arith.constant 68 : index
      %108 = memref.load %arg3[%c68] : memref<98xf32, #tpu.memory_space<smem>>
      %c69 = arith.constant 69 : index
      %109 = memref.load %arg3[%c69] : memref<98xf32, #tpu.memory_space<smem>>
      %c70 = arith.constant 70 : index
      %110 = memref.load %arg3[%c70] : memref<98xf32, #tpu.memory_space<smem>>
      %c71 = arith.constant 71 : index
      %111 = memref.load %arg3[%c71] : memref<98xf32, #tpu.memory_space<smem>>
      %c72 = arith.constant 72 : index
      %112 = memref.load %arg3[%c72] : memref<98xf32, #tpu.memory_space<smem>>
      %c73 = arith.constant 73 : index
      %113 = memref.load %arg3[%c73] : memref<98xf32, #tpu.memory_space<smem>>
      %c74 = arith.constant 74 : index
      %114 = memref.load %arg3[%c74] : memref<98xf32, #tpu.memory_space<smem>>
      %c75 = arith.constant 75 : index
      %115 = memref.load %arg3[%c75] : memref<98xf32, #tpu.memory_space<smem>>
      %c76 = arith.constant 76 : index
      %116 = memref.load %arg3[%c76] : memref<98xf32, #tpu.memory_space<smem>>
      %c77 = arith.constant 77 : index
      %117 = memref.load %arg3[%c77] : memref<98xf32, #tpu.memory_space<smem>>
      %c78 = arith.constant 78 : index
      %118 = memref.load %arg3[%c78] : memref<98xf32, #tpu.memory_space<smem>>
      %c79 = arith.constant 79 : index
      %119 = memref.load %arg3[%c79] : memref<98xf32, #tpu.memory_space<smem>>
      %c80 = arith.constant 80 : index
      %120 = memref.load %arg3[%c80] : memref<98xf32, #tpu.memory_space<smem>>
      %c81 = arith.constant 81 : index
      %121 = memref.load %arg3[%c81] : memref<98xf32, #tpu.memory_space<smem>>
      %c82 = arith.constant 82 : index
      %122 = memref.load %arg3[%c82] : memref<98xf32, #tpu.memory_space<smem>>
      %c83 = arith.constant 83 : index
      %123 = memref.load %arg3[%c83] : memref<98xf32, #tpu.memory_space<smem>>
      %c84 = arith.constant 84 : index
      %124 = memref.load %arg3[%c84] : memref<98xf32, #tpu.memory_space<smem>>
      %c85 = arith.constant 85 : index
      %125 = memref.load %arg3[%c85] : memref<98xf32, #tpu.memory_space<smem>>
      %c86 = arith.constant 86 : index
      %126 = memref.load %arg3[%c86] : memref<98xf32, #tpu.memory_space<smem>>
      %c87 = arith.constant 87 : index
      %127 = memref.load %arg3[%c87] : memref<98xf32, #tpu.memory_space<smem>>
      %c88 = arith.constant 88 : index
      %128 = memref.load %arg3[%c88] : memref<98xf32, #tpu.memory_space<smem>>
      %c89 = arith.constant 89 : index
      %129 = memref.load %arg3[%c89] : memref<98xf32, #tpu.memory_space<smem>>
      %c90 = arith.constant 90 : index
      %130 = memref.load %arg3[%c90] : memref<98xf32, #tpu.memory_space<smem>>
      %c91 = arith.constant 91 : index
      %131 = memref.load %arg3[%c91] : memref<98xf32, #tpu.memory_space<smem>>
      %c92 = arith.constant 92 : index
      %132 = memref.load %arg3[%c92] : memref<98xf32, #tpu.memory_space<smem>>
      %c93 = arith.constant 93 : index
      %133 = memref.load %arg3[%c93] : memref<98xf32, #tpu.memory_space<smem>>
      %c94 = arith.constant 94 : index
      %134 = memref.load %arg3[%c94] : memref<98xf32, #tpu.memory_space<smem>>
      %c95 = arith.constant 95 : index
      %135 = memref.load %arg3[%c95] : memref<98xf32, #tpu.memory_space<smem>>
      %c96 = arith.constant 96 : index
      %136 = memref.load %arg3[%c96] : memref<98xf32, #tpu.memory_space<smem>>
      %c97 = arith.constant 97 : index
      %137 = memref.load %arg3[%c97] : memref<98xf32, #tpu.memory_space<smem>>
      %c0_25 = arith.constant 0 : index
      %138 = memref.load %arg4[%c0_25] : memref<1xf32, #tpu.memory_space<smem>>
      %c0_i32_26 = arith.constant 0 : i32
      %c8_i32 = arith.constant 8 : i32
      %139 = arith.muli %c0_i32_26, %c8_i32 : i32
      %140 = vector.broadcast %138 : f32 to vector<1x8x16xf32>
      %c5_i32 = arith.constant 5 : i32
      %141 = arith.addi %c5_i32, %139 : i32
      %c0_27 = arith.constant 0 : index
      %142 = arith.index_cast %141 : i32 to index
      %c125 = arith.constant 125 : index
      %143 = vector.load %arg6[%c0_27, %142, %c125] : memref<1x27x256xf32, #tpu.memory_space<vmem>>, vector<1x8x16xf32>
      %144 = vector.broadcast %40 : f32 to vector<1x8x16xf32>
      %145 = arith.mulf %144, %143 : vector<1x8x16xf32>
      %146 = arith.addf %140, %145 : vector<1x8x16xf32>
      %c0_28 = arith.constant 0 : index
      %147 = arith.index_cast %141 : i32 to index
      %c126 = arith.constant 126 : index
      %148 = vector.load %arg6[%c0_28, %147, %c126] : memref<1x27x256xf32, #tpu.memory_space<vmem>>, vector<1x8x16xf32>
      %149 = vector.broadcast %41 : f32 to vector<1x8x16xf32>
      %150 = arith.mulf %149, %148 : vector<1x8x16xf32>
      %151 = arith.addf %146, %150 : vector<1x8x16xf32>
      %c0_29 = arith.constant 0 : index
      %152 = arith.index_cast %141 : i32 to index
      %c127 = arith.constant 127 : index
      %153 = vector.load %arg6[%c0_29, %152, %c127] : memref<1x27x256xf32, #tpu.memory_space<vmem>>, vector<1x8x16xf32>
      %154 = vector.broadcast %42 : f32 to vector<1x8x16xf32>
      %155 = arith.mulf %154, %153 : vector<1x8x16xf32>
      %156 = arith.addf %151, %155 : vector<1x8x16xf32>
      %c0_30 = arith.constant 0 : index
      %157 = arith.index_cast %141 : i32 to index
      %c128_31 = arith.constant 128 : index
      %158 = vector.load %arg6[%c0_30, %157, %c128_31] : memref<1x27x256xf32, #tpu.memory_space<vmem>>, vector<1x8x16xf32>
      %159 = vector.broadcast %43 : f32 to vector<1x8x16xf32>
      %160 = arith.mulf %159, %158 : vector<1x8x16xf32>
      %161 = arith.addf %156, %160 : vector<1x8x16xf32>
      %c0_32 = arith.constant 0 : index
      %162 = arith.index_cast %141 : i32 to index
      %c129 = arith.constant 129 : index
      %163 = vector.load %arg6[%c0_32, %162, %c129] : memref<1x27x256xf32, #tpu.memory_space<vmem>>, vector<1x8x16xf32>
      %164 = vector.broadcast %44 : f32 to vector<1x8x16xf32>
      %165 = arith.mulf %164, %163 : vector<1x8x16xf32>
      %166 = arith.addf %161, %165 : vector<1x8x16xf32>
      %c0_33 = arith.constant 0 : index
      %167 = arith.index_cast %141 : i32 to index
      %c130 = arith.constant 130 : index
      %168 = vector.load %arg6[%c0_33, %167, %c130] : memref<1x27x256xf32, #tpu.memory_space<vmem>>, vector<1x8x16xf32>
      %169 = vector.broadcast %45 : f32 to vector<1x8x16xf32>
      %170 = arith.mulf %169, %168 : vector<1x8x16xf32>
      %171 = arith.addf %166, %170 : vector<1x8x16xf32>
      %c0_34 = arith.constant 0 : index
      %172 = arith.index_cast %141 : i32 to index
      %c131 = arith.constant 131 : index
      %173 = vector.load %arg6[%c0_34, %172, %c131] : memref<1x27x256xf32, #tpu.memory_space<vmem>>, vector<1x8x16xf32>
      %174 = vector.broadcast %46 : f32 to vector<1x8x16xf32>
      %175 = arith.mulf %174, %173 : vector<1x8x16xf32>
      %176 = arith.addf %171, %175 : vector<1x8x16xf32>
      %c6_i32 = arith.constant 6 : i32
      %177 = arith.addi %c6_i32, %139 : i32
      %c0_35 = arith.constant 0 : index
      %178 = arith.index_cast %177 : i32 to index
      %c125_36 = arith.constant 125 : index
      %179 = vector.load %arg6[%c0_35, %178, %c125_36] : memref<1x27x256xf32, #tpu.memory_space<vmem>>, vector<1x8x16xf32>
      %180 = vector.broadcast %47 : f32 to vector<1x8x16xf32>
      %181 = arith.mulf %180, %179 : vector<1x8x16xf32>
      %182 = arith.addf %176, %181 : vector<1x8x16xf32>
      %c0_37 = arith.constant 0 : index
      %183 = arith.index_cast %177 : i32 to index
      %c126_38 = arith.constant 126 : index
      %184 = vector.load %arg6[%c0_37, %183, %c126_38] : memref<1x27x256xf32, #tpu.memory_space<vmem>>, vector<1x8x16xf32>
      %185 = vector.broadcast %48 : f32 to vector<1x8x16xf32>
      %186 = arith.mulf %185, %184 : vector<1x8x16xf32>
      %187 = arith.addf %182, %186 : vector<1x8x16xf32>
      %c0_39 = arith.constant 0 : index
      %188 = arith.index_cast %177 : i32 to index
      %c127_40 = arith.constant 127 : index
      %189 = vector.load %arg6[%c0_39, %188, %c127_40] : memref<1x27x256xf32, #tpu.memory_space<vmem>>, vector<1x8x16xf32>
      %190 = vector.broadcast %49 : f32 to vector<1x8x16xf32>
      %191 = arith.mulf %190, %189 : vector<1x8x16xf32>
      %192 = arith.addf %187, %191 : vector<1x8x16xf32>
      %c0_41 = arith.constant 0 : index
      %193 = arith.index_cast %177 : i32 to index
      %c128_42 = arith.constant 128 : index
      %194 = vector.load %arg6[%c0_41, %193, %c128_42] : memref<1x27x256xf32, #tpu.memory_space<vmem>>, vector<1x8x16xf32>
      %195 = vector.broadcast %50 : f32 to vector<1x8x16xf32>
      %196 = arith.mulf %195, %194 : vector<1x8x16xf32>
      %197 = arith.addf %192, %196 : vector<1x8x16xf32>
      %c0_43 = arith.constant 0 : index
      %198 = arith.index_cast %177 : i32 to index
      %c129_44 = arith.constant 129 : index
      %199 = vector.load %arg6[%c0_43, %198, %c129_44] : memref<1x27x256xf32, #tpu.memory_space<vmem>>, vector<1x8x16xf32>
      %200 = vector.broadcast %51 : f32 to vector<1x8x16xf32>
      %201 = arith.mulf %200, %199 : vector<1x8x16xf32>
      %202 = arith.addf %197, %201 : vector<1x8x16xf32>
      %c0_45 = arith.constant 0 : index
      %203 = arith.index_cast %177 : i32 to index
      %c130_46 = arith.constant 130 : index
      %204 = vector.load %arg6[%c0_45, %203, %c130_46] : memref<1x27x256xf32, #tpu.memory_space<vmem>>, vector<1x8x16xf32>
      %205 = vector.broadcast %52 : f32 to vector<1x8x16xf32>
      %206 = arith.mulf %205, %204 : vector<1x8x16xf32>
      %207 = arith.addf %202, %206 : vector<1x8x16xf32>
      %c0_47 = arith.constant 0 : index
      %208 = arith.index_cast %177 : i32 to index
      %c131_48 = arith.constant 131 : index
      %209 = vector.load %arg6[%c0_47, %208, %c131_48] : memref<1x27x256xf32, #tpu.memory_space<vmem>>, vector<1x8x16xf32>
      %210 = vector.broadcast %53 : f32 to vector<1x8x16xf32>
      %211 = arith.mulf %210, %209 : vector<1x8x16xf32>
      %212 = arith.addf %207, %211 : vector<1x8x16xf32>
      %c7_i32 = arith.constant 7 : i32
      %213 = arith.addi %c7_i32, %139 : i32
      %c0_49 = arith.constant 0 : index
      %214 = arith.index_cast %213 : i32 to index
      %c125_50 = arith.constant 125 : index
      %215 = vector.load %arg6[%c0_49, %214, %c125_50] : memref<1x27x256xf32, #tpu.memory_space<vmem>>, vector<1x8x16xf32>
      %216 = vector.broadcast %54 : f32 to vector<1x8x16xf32>
      %217 = arith.mulf %216, %215 : vector<1x8x16xf32>
      %218 = arith.addf %212, %217 : vector<1x8x16xf32>
      %c0_51 = arith.constant 0 : index
      %219 = arith.index_cast %213 : i32 to index
      %c126_52 = arith.constant 126 : index
      %220 = vector.load %arg6[%c0_51, %219, %c126_52] : memref<1x27x256xf32, #tpu.memory_space<vmem>>, vector<1x8x16xf32>
      %221 = vector.broadcast %55 : f32 to vector<1x8x16xf32>
      %222 = arith.mulf %221, %220 : vector<1x8x16xf32>
      %223 = arith.addf %218, %222 : vector<1x8x16xf32>
      %c0_53 = arith.constant 0 : index
      %224 = arith.index_cast %213 : i32 to index
      %c127_54 = arith.constant 127 : index
      %225 = vector.load %arg6[%c0_53, %224, %c127_54] : memref<1x27x256xf32, #tpu.memory_space<vmem>>, vector<1x8x16xf32>
      %226 = vector.broadcast %56 : f32 to vector<1x8x16xf32>
      %227 = arith.mulf %226, %225 : vector<1x8x16xf32>
      %228 = arith.addf %223, %227 : vector<1x8x16xf32>
      %c0_55 = arith.constant 0 : index
      %229 = arith.index_cast %213 : i32 to index
      %c128_56 = arith.constant 128 : index
      %230 = vector.load %arg6[%c0_55, %229, %c128_56] : memref<1x27x256xf32, #tpu.memory_space<vmem>>, vector<1x8x16xf32>
      %231 = vector.broadcast %57 : f32 to vector<1x8x16xf32>
      %232 = arith.mulf %231, %230 : vector<1x8x16xf32>
      %233 = arith.addf %228, %232 : vector<1x8x16xf32>
      %c0_57 = arith.constant 0 : index
      %234 = arith.index_cast %213 : i32 to index
      %c129_58 = arith.constant 129 : index
      %235 = vector.load %arg6[%c0_57, %234, %c129_58] : memref<1x27x256xf32, #tpu.memory_space<vmem>>, vector<1x8x16xf32>
      %236 = vector.broadcast %58 : f32 to vector<1x8x16xf32>
      %237 = arith.mulf %236, %235 : vector<1x8x16xf32>
      %238 = arith.addf %233, %237 : vector<1x8x16xf32>
      %c0_59 = arith.constant 0 : index
      %239 = arith.index_cast %213 : i32 to index
      %c130_60 = arith.constant 130 : index
      %240 = vector.load %arg6[%c0_59, %239, %c130_60] : memref<1x27x256xf32, #tpu.memory_space<vmem>>, vector<1x8x16xf32>
      %241 = vector.broadcast %59 : f32 to vector<1x8x16xf32>
      %242 = arith.mulf %241, %240 : vector<1x8x16xf32>
      %243 = arith.addf %238, %242 : vector<1x8x16xf32>
      %c0_61 = arith.constant 0 : index
      %244 = arith.index_cast %213 : i32 to index
      %c131_62 = arith.constant 131 : index
      %245 = vector.load %arg6[%c0_61, %244, %c131_62] : memref<1x27x256xf32, #tpu.memory_space<vmem>>, vector<1x8x16xf32>
      %246 = vector.broadcast %60 : f32 to vector<1x8x16xf32>
      %247 = arith.mulf %246, %245 : vector<1x8x16xf32>
      %248 = arith.addf %243, %247 : vector<1x8x16xf32>
      %c8_i32_63 = arith.constant 8 : i32
      %249 = arith.addi %c8_i32_63, %139 : i32
      %c0_64 = arith.constant 0 : index
      %250 = arith.index_cast %249 : i32 to index
      %c125_65 = arith.constant 125 : index
      %251 = vector.load %arg6[%c0_64, %250, %c125_65] : memref<1x27x256xf32, #tpu.memory_space<vmem>>, vector<1x8x16xf32>
      %252 = vector.broadcast %61 : f32 to vector<1x8x16xf32>
      %253 = arith.mulf %252, %251 : vector<1x8x16xf32>
      %254 = arith.addf %248, %253 : vector<1x8x16xf32>
      %c0_66 = arith.constant 0 : index
      %255 = arith.index_cast %249 : i32 to index
      %c126_67 = arith.constant 126 : index
      %256 = vector.load %arg6[%c0_66, %255, %c126_67] : memref<1x27x256xf32, #tpu.memory_space<vmem>>, vector<1x8x16xf32>
      %257 = vector.broadcast %62 : f32 to vector<1x8x16xf32>
      %258 = arith.mulf %257, %256 : vector<1x8x16xf32>
      %259 = arith.addf %254, %258 : vector<1x8x16xf32>
      %c0_68 = arith.constant 0 : index
      %260 = arith.index_cast %249 : i32 to index
      %c127_69 = arith.constant 127 : index
      %261 = vector.load %arg6[%c0_68, %260, %c127_69] : memref<1x27x256xf32, #tpu.memory_space<vmem>>, vector<1x8x16xf32>
      %262 = vector.broadcast %63 : f32 to vector<1x8x16xf32>
      %263 = arith.mulf %262, %261 : vector<1x8x16xf32>
      %264 = arith.addf %259, %263 : vector<1x8x16xf32>
      %c0_70 = arith.constant 0 : index
      %265 = arith.index_cast %249 : i32 to index
      %c128_71 = arith.constant 128 : index
      %266 = vector.load %arg6[%c0_70, %265, %c128_71] : memref<1x27x256xf32, #tpu.memory_space<vmem>>, vector<1x8x16xf32>
      %267 = vector.broadcast %64 : f32 to vector<1x8x16xf32>
      %268 = arith.mulf %267, %266 : vector<1x8x16xf32>
      %269 = arith.addf %264, %268 : vector<1x8x16xf32>
      %c0_72 = arith.constant 0 : index
      %270 = arith.index_cast %249 : i32 to index
      %c129_73 = arith.constant 129 : index
      %271 = vector.load %arg6[%c0_72, %270, %c129_73] : memref<1x27x256xf32, #tpu.memory_space<vmem>>, vector<1x8x16xf32>
      %272 = vector.broadcast %65 : f32 to vector<1x8x16xf32>
      %273 = arith.mulf %272, %271 : vector<1x8x16xf32>
      %274 = arith.addf %269, %273 : vector<1x8x16xf32>
      %c0_74 = arith.constant 0 : index
      %275 = arith.index_cast %249 : i32 to index
      %c130_75 = arith.constant 130 : index
      %276 = vector.load %arg6[%c0_74, %275, %c130_75] : memref<1x27x256xf32, #tpu.memory_space<vmem>>, vector<1x8x16xf32>
      %277 = vector.broadcast %66 : f32 to vector<1x8x16xf32>
      %278 = arith.mulf %277, %276 : vector<1x8x16xf32>
      %279 = arith.addf %274, %278 : vector<1x8x16xf32>
      %c0_76 = arith.constant 0 : index
      %280 = arith.index_cast %249 : i32 to index
      %c131_77 = arith.constant 131 : index
      %281 = vector.load %arg6[%c0_76, %280, %c131_77] : memref<1x27x256xf32, #tpu.memory_space<vmem>>, vector<1x8x16xf32>
      %282 = vector.broadcast %67 : f32 to vector<1x8x16xf32>
      %283 = arith.mulf %282, %281 : vector<1x8x16xf32>
      %284 = arith.addf %279, %283 : vector<1x8x16xf32>
      %c9_i32 = arith.constant 9 : i32
      %285 = arith.addi %c9_i32, %139 : i32
      %c0_78 = arith.constant 0 : index
      %286 = arith.index_cast %285 : i32 to index
      %c125_79 = arith.constant 125 : index
      %287 = vector.load %arg6[%c0_78, %286, %c125_79] : memref<1x27x256xf32, #tpu.memory_space<vmem>>, vector<1x8x16xf32>
      %288 = vector.broadcast %68 : f32 to vector<1x8x16xf32>
      %289 = arith.mulf %288, %287 : vector<1x8x16xf32>
      %290 = arith.addf %284, %289 : vector<1x8x16xf32>
      %c0_80 = arith.constant 0 : index
      %291 = arith.index_cast %285 : i32 to index
      %c126_81 = arith.constant 126 : index
      %292 = vector.load %arg6[%c0_80, %291, %c126_81] : memref<1x27x256xf32, #tpu.memory_space<vmem>>, vector<1x8x16xf32>
      %293 = vector.broadcast %69 : f32 to vector<1x8x16xf32>
      %294 = arith.mulf %293, %292 : vector<1x8x16xf32>
      %295 = arith.addf %290, %294 : vector<1x8x16xf32>
      %c0_82 = arith.constant 0 : index
      %296 = arith.index_cast %285 : i32 to index
      %c127_83 = arith.constant 127 : index
      %297 = vector.load %arg6[%c0_82, %296, %c127_83] : memref<1x27x256xf32, #tpu.memory_space<vmem>>, vector<1x8x16xf32>
      %298 = vector.broadcast %70 : f32 to vector<1x8x16xf32>
      %299 = arith.mulf %298, %297 : vector<1x8x16xf32>
      %300 = arith.addf %295, %299 : vector<1x8x16xf32>
      %c0_84 = arith.constant 0 : index
      %301 = arith.index_cast %285 : i32 to index
      %c128_85 = arith.constant 128 : index
      %302 = vector.load %arg6[%c0_84, %301, %c128_85] : memref<1x27x256xf32, #tpu.memory_space<vmem>>, vector<1x8x16xf32>
      %303 = vector.broadcast %71 : f32 to vector<1x8x16xf32>
      %304 = arith.mulf %303, %302 : vector<1x8x16xf32>
      %305 = arith.addf %300, %304 : vector<1x8x16xf32>
      %c0_86 = arith.constant 0 : index
      %306 = arith.index_cast %285 : i32 to index
      %c129_87 = arith.constant 129 : index
      %307 = vector.load %arg6[%c0_86, %306, %c129_87] : memref<1x27x256xf32, #tpu.memory_space<vmem>>, vector<1x8x16xf32>
      %308 = vector.broadcast %72 : f32 to vector<1x8x16xf32>
      %309 = arith.mulf %308, %307 : vector<1x8x16xf32>
      %310 = arith.addf %305, %309 : vector<1x8x16xf32>
      %c0_88 = arith.constant 0 : index
      %311 = arith.index_cast %285 : i32 to index
      %c130_89 = arith.constant 130 : index
      %312 = vector.load %arg6[%c0_88, %311, %c130_89] : memref<1x27x256xf32, #tpu.memory_space<vmem>>, vector<1x8x16xf32>
      %313 = vector.broadcast %73 : f32 to vector<1x8x16xf32>
      %314 = arith.mulf %313, %312 : vector<1x8x16xf32>
      %315 = arith.addf %310, %314 : vector<1x8x16xf32>
      %c0_90 = arith.constant 0 : index
      %316 = arith.index_cast %285 : i32 to index
      %c131_91 = arith.constant 131 : index
      %317 = vector.load %arg6[%c0_90, %316, %c131_91] : memref<1x27x256xf32, #tpu.memory_space<vmem>>, vector<1x8x16xf32>
      %318 = vector.broadcast %74 : f32 to vector<1x8x16xf32>
      %319 = arith.mulf %318, %317 : vector<1x8x16xf32>
      %320 = arith.addf %315, %319 : vector<1x8x16xf32>
      %c10_i32 = arith.constant 10 : i32
      %321 = arith.addi %c10_i32, %139 : i32
      %c0_92 = arith.constant 0 : index
      %322 = arith.index_cast %321 : i32 to index
      %c125_93 = arith.constant 125 : index
      %323 = vector.load %arg6[%c0_92, %322, %c125_93] : memref<1x27x256xf32, #tpu.memory_space<vmem>>, vector<1x8x16xf32>
      %324 = vector.broadcast %75 : f32 to vector<1x8x16xf32>
      %325 = arith.mulf %324, %323 : vector<1x8x16xf32>
      %326 = arith.addf %320, %325 : vector<1x8x16xf32>
      %c0_94 = arith.constant 0 : index
      %327 = arith.index_cast %321 : i32 to index
      %c126_95 = arith.constant 126 : index
      %328 = vector.load %arg6[%c0_94, %327, %c126_95] : memref<1x27x256xf32, #tpu.memory_space<vmem>>, vector<1x8x16xf32>
      %329 = vector.broadcast %76 : f32 to vector<1x8x16xf32>
      %330 = arith.mulf %329, %328 : vector<1x8x16xf32>
      %331 = arith.addf %326, %330 : vector<1x8x16xf32>
      %c0_96 = arith.constant 0 : index
      %332 = arith.index_cast %321 : i32 to index
      %c127_97 = arith.constant 127 : index
      %333 = vector.load %arg6[%c0_96, %332, %c127_97] : memref<1x27x256xf32, #tpu.memory_space<vmem>>, vector<1x8x16xf32>
      %334 = vector.broadcast %77 : f32 to vector<1x8x16xf32>
      %335 = arith.mulf %334, %333 : vector<1x8x16xf32>
      %336 = arith.addf %331, %335 : vector<1x8x16xf32>
      %c0_98 = arith.constant 0 : index
      %337 = arith.index_cast %321 : i32 to index
      %c128_99 = arith.constant 128 : index
      %338 = vector.load %arg6[%c0_98, %337, %c128_99] : memref<1x27x256xf32, #tpu.memory_space<vmem>>, vector<1x8x16xf32>
      %339 = vector.broadcast %78 : f32 to vector<1x8x16xf32>
      %340 = arith.mulf %339, %338 : vector<1x8x16xf32>
      %341 = arith.addf %336, %340 : vector<1x8x16xf32>
      %c0_100 = arith.constant 0 : index
      %342 = arith.index_cast %321 : i32 to index
      %c129_101 = arith.constant 129 : index
      %343 = vector.load %arg6[%c0_100, %342, %c129_101] : memref<1x27x256xf32, #tpu.memory_space<vmem>>, vector<1x8x16xf32>
      %344 = vector.broadcast %79 : f32 to vector<1x8x16xf32>
      %345 = arith.mulf %344, %343 : vector<1x8x16xf32>
      %346 = arith.addf %341, %345 : vector<1x8x16xf32>
      %c0_102 = arith.constant 0 : index
      %347 = arith.index_cast %321 : i32 to index
      %c130_103 = arith.constant 130 : index
      %348 = vector.load %arg6[%c0_102, %347, %c130_103] : memref<1x27x256xf32, #tpu.memory_space<vmem>>, vector<1x8x16xf32>
      %349 = vector.broadcast %80 : f32 to vector<1x8x16xf32>
      %350 = arith.mulf %349, %348 : vector<1x8x16xf32>
      %351 = arith.addf %346, %350 : vector<1x8x16xf32>
      %c0_104 = arith.constant 0 : index
      %352 = arith.index_cast %321 : i32 to index
      %c131_105 = arith.constant 131 : index
      %353 = vector.load %arg6[%c0_104, %352, %c131_105] : memref<1x27x256xf32, #tpu.memory_space<vmem>>, vector<1x8x16xf32>
      %354 = vector.broadcast %81 : f32 to vector<1x8x16xf32>
      %355 = arith.mulf %354, %353 : vector<1x8x16xf32>
      %356 = arith.addf %351, %355 : vector<1x8x16xf32>
      %c11_i32 = arith.constant 11 : i32
      %357 = arith.addi %c11_i32, %139 : i32
      %c0_106 = arith.constant 0 : index
      %358 = arith.index_cast %357 : i32 to index
      %c125_107 = arith.constant 125 : index
      %359 = vector.load %arg6[%c0_106, %358, %c125_107] : memref<1x27x256xf32, #tpu.memory_space<vmem>>, vector<1x8x16xf32>
      %360 = vector.broadcast %82 : f32 to vector<1x8x16xf32>
      %361 = arith.mulf %360, %359 : vector<1x8x16xf32>
      %362 = arith.addf %356, %361 : vector<1x8x16xf32>
      %c0_108 = arith.constant 0 : index
      %363 = arith.index_cast %357 : i32 to index
      %c126_109 = arith.constant 126 : index
      %364 = vector.load %arg6[%c0_108, %363, %c126_109] : memref<1x27x256xf32, #tpu.memory_space<vmem>>, vector<1x8x16xf32>
      %365 = vector.broadcast %83 : f32 to vector<1x8x16xf32>
      %366 = arith.mulf %365, %364 : vector<1x8x16xf32>
      %367 = arith.addf %362, %366 : vector<1x8x16xf32>
      %c0_110 = arith.constant 0 : index
      %368 = arith.index_cast %357 : i32 to index
      %c127_111 = arith.constant 127 : index
      %369 = vector.load %arg6[%c0_110, %368, %c127_111] : memref<1x27x256xf32, #tpu.memory_space<vmem>>, vector<1x8x16xf32>
      %370 = vector.broadcast %84 : f32 to vector<1x8x16xf32>
      %371 = arith.mulf %370, %369 : vector<1x8x16xf32>
      %372 = arith.addf %367, %371 : vector<1x8x16xf32>
      %c0_112 = arith.constant 0 : index
      %373 = arith.index_cast %357 : i32 to index
      %c128_113 = arith.constant 128 : index
      %374 = vector.load %arg6[%c0_112, %373, %c128_113] : memref<1x27x256xf32, #tpu.memory_space<vmem>>, vector<1x8x16xf32>
      %375 = vector.broadcast %85 : f32 to vector<1x8x16xf32>
      %376 = arith.mulf %375, %374 : vector<1x8x16xf32>
      %377 = arith.addf %372, %376 : vector<1x8x16xf32>
      %c0_114 = arith.constant 0 : index
      %378 = arith.index_cast %357 : i32 to index
      %c129_115 = arith.constant 129 : index
      %379 = vector.load %arg6[%c0_114, %378, %c129_115] : memref<1x27x256xf32, #tpu.memory_space<vmem>>, vector<1x8x16xf32>
      %380 = vector.broadcast %86 : f32 to vector<1x8x16xf32>
      %381 = arith.mulf %380, %379 : vector<1x8x16xf32>
      %382 = arith.addf %377, %381 : vector<1x8x16xf32>
      %c0_116 = arith.constant 0 : index
      %383 = arith.index_cast %357 : i32 to index
      %c130_117 = arith.constant 130 : index
      %384 = vector.load %arg6[%c0_116, %383, %c130_117] : memref<1x27x256xf32, #tpu.memory_space<vmem>>, vector<1x8x16xf32>
      %385 = vector.broadcast %87 : f32 to vector<1x8x16xf32>
      %386 = arith.mulf %385, %384 : vector<1x8x16xf32>
      %387 = arith.addf %382, %386 : vector<1x8x16xf32>
      %c0_118 = arith.constant 0 : index
      %388 = arith.index_cast %357 : i32 to index
      %c131_119 = arith.constant 131 : index
      %389 = vector.load %arg6[%c0_118, %388, %c131_119] : memref<1x27x256xf32, #tpu.memory_space<vmem>>, vector<1x8x16xf32>
      %390 = vector.broadcast %88 : f32 to vector<1x8x16xf32>
      %391 = arith.mulf %390, %389 : vector<1x8x16xf32>
      %392 = arith.addf %387, %391 : vector<1x8x16xf32>
      %c5_i32_120 = arith.constant 5 : i32
      %393 = arith.addi %c5_i32_120, %139 : i32
      %c0_121 = arith.constant 0 : index
      %394 = arith.index_cast %393 : i32 to index
      %c125_122 = arith.constant 125 : index
      %395 = vector.load %arg7[%c0_121, %394, %c125_122] : memref<1x27x256xf32, #tpu.memory_space<vmem>>, vector<1x8x16xf32>
      %396 = vector.broadcast %89 : f32 to vector<1x8x16xf32>
      %397 = arith.mulf %396, %395 : vector<1x8x16xf32>
      %398 = arith.addf %392, %397 : vector<1x8x16xf32>
      %c0_123 = arith.constant 0 : index
      %399 = arith.index_cast %393 : i32 to index
      %c126_124 = arith.constant 126 : index
      %400 = vector.load %arg7[%c0_123, %399, %c126_124] : memref<1x27x256xf32, #tpu.memory_space<vmem>>, vector<1x8x16xf32>
      %401 = vector.broadcast %90 : f32 to vector<1x8x16xf32>
      %402 = arith.mulf %401, %400 : vector<1x8x16xf32>
      %403 = arith.addf %398, %402 : vector<1x8x16xf32>
      %c0_125 = arith.constant 0 : index
      %404 = arith.index_cast %393 : i32 to index
      %c127_126 = arith.constant 127 : index
      %405 = vector.load %arg7[%c0_125, %404, %c127_126] : memref<1x27x256xf32, #tpu.memory_space<vmem>>, vector<1x8x16xf32>
      %406 = vector.broadcast %91 : f32 to vector<1x8x16xf32>
      %407 = arith.mulf %406, %405 : vector<1x8x16xf32>
      %408 = arith.addf %403, %407 : vector<1x8x16xf32>
      %c0_127 = arith.constant 0 : index
      %409 = arith.index_cast %393 : i32 to index
      %c128_128 = arith.constant 128 : index
      %410 = vector.load %arg7[%c0_127, %409, %c128_128] : memref<1x27x256xf32, #tpu.memory_space<vmem>>, vector<1x8x16xf32>
      %411 = vector.broadcast %92 : f32 to vector<1x8x16xf32>
      %412 = arith.mulf %411, %410 : vector<1x8x16xf32>
      %413 = arith.addf %408, %412 : vector<1x8x16xf32>
      %c0_129 = arith.constant 0 : index
      %414 = arith.index_cast %393 : i32 to index
      %c129_130 = arith.constant 129 : index
      %415 = vector.load %arg7[%c0_129, %414, %c129_130] : memref<1x27x256xf32, #tpu.memory_space<vmem>>, vector<1x8x16xf32>
      %416 = vector.broadcast %93 : f32 to vector<1x8x16xf32>
      %417 = arith.mulf %416, %415 : vector<1x8x16xf32>
      %418 = arith.addf %413, %417 : vector<1x8x16xf32>
      %c0_131 = arith.constant 0 : index
      %419 = arith.index_cast %393 : i32 to index
      %c130_132 = arith.constant 130 : index
      %420 = vector.load %arg7[%c0_131, %419, %c130_132] : memref<1x27x256xf32, #tpu.memory_space<vmem>>, vector<1x8x16xf32>
      %421 = vector.broadcast %94 : f32 to vector<1x8x16xf32>
      %422 = arith.mulf %421, %420 : vector<1x8x16xf32>
      %423 = arith.addf %418, %422 : vector<1x8x16xf32>
      %c0_133 = arith.constant 0 : index
      %424 = arith.index_cast %393 : i32 to index
      %c131_134 = arith.constant 131 : index
      %425 = vector.load %arg7[%c0_133, %424, %c131_134] : memref<1x27x256xf32, #tpu.memory_space<vmem>>, vector<1x8x16xf32>
      %426 = vector.broadcast %95 : f32 to vector<1x8x16xf32>
      %427 = arith.mulf %426, %425 : vector<1x8x16xf32>
      %428 = arith.addf %423, %427 : vector<1x8x16xf32>
      %c6_i32_135 = arith.constant 6 : i32
      %429 = arith.addi %c6_i32_135, %139 : i32
      %c0_136 = arith.constant 0 : index
      %430 = arith.index_cast %429 : i32 to index
      %c125_137 = arith.constant 125 : index
      %431 = vector.load %arg7[%c0_136, %430, %c125_137] : memref<1x27x256xf32, #tpu.memory_space<vmem>>, vector<1x8x16xf32>
      %432 = vector.broadcast %96 : f32 to vector<1x8x16xf32>
      %433 = arith.mulf %432, %431 : vector<1x8x16xf32>
      %434 = arith.addf %428, %433 : vector<1x8x16xf32>
      %c0_138 = arith.constant 0 : index
      %435 = arith.index_cast %429 : i32 to index
      %c126_139 = arith.constant 126 : index
      %436 = vector.load %arg7[%c0_138, %435, %c126_139] : memref<1x27x256xf32, #tpu.memory_space<vmem>>, vector<1x8x16xf32>
      %437 = vector.broadcast %97 : f32 to vector<1x8x16xf32>
      %438 = arith.mulf %437, %436 : vector<1x8x16xf32>
      %439 = arith.addf %434, %438 : vector<1x8x16xf32>
      %c0_140 = arith.constant 0 : index
      %440 = arith.index_cast %429 : i32 to index
      %c127_141 = arith.constant 127 : index
      %441 = vector.load %arg7[%c0_140, %440, %c127_141] : memref<1x27x256xf32, #tpu.memory_space<vmem>>, vector<1x8x16xf32>
      %442 = vector.broadcast %98 : f32 to vector<1x8x16xf32>
      %443 = arith.mulf %442, %441 : vector<1x8x16xf32>
      %444 = arith.addf %439, %443 : vector<1x8x16xf32>
      %c0_142 = arith.constant 0 : index
      %445 = arith.index_cast %429 : i32 to index
      %c128_143 = arith.constant 128 : index
      %446 = vector.load %arg7[%c0_142, %445, %c128_143] : memref<1x27x256xf32, #tpu.memory_space<vmem>>, vector<1x8x16xf32>
      %447 = vector.broadcast %99 : f32 to vector<1x8x16xf32>
      %448 = arith.mulf %447, %446 : vector<1x8x16xf32>
      %449 = arith.addf %444, %448 : vector<1x8x16xf32>
      %c0_144 = arith.constant 0 : index
      %450 = arith.index_cast %429 : i32 to index
      %c129_145 = arith.constant 129 : index
      %451 = vector.load %arg7[%c0_144, %450, %c129_145] : memref<1x27x256xf32, #tpu.memory_space<vmem>>, vector<1x8x16xf32>
      %452 = vector.broadcast %100 : f32 to vector<1x8x16xf32>
      %453 = arith.mulf %452, %451 : vector<1x8x16xf32>
      %454 = arith.addf %449, %453 : vector<1x8x16xf32>
      %c0_146 = arith.constant 0 : index
      %455 = arith.index_cast %429 : i32 to index
      %c130_147 = arith.constant 130 : index
      %456 = vector.load %arg7[%c0_146, %455, %c130_147] : memref<1x27x256xf32, #tpu.memory_space<vmem>>, vector<1x8x16xf32>
      %457 = vector.broadcast %101 : f32 to vector<1x8x16xf32>
      %458 = arith.mulf %457, %456 : vector<1x8x16xf32>
      %459 = arith.addf %454, %458 : vector<1x8x16xf32>
      %c0_148 = arith.constant 0 : index
      %460 = arith.index_cast %429 : i32 to index
      %c131_149 = arith.constant 131 : index
      %461 = vector.load %arg7[%c0_148, %460, %c131_149] : memref<1x27x256xf32, #tpu.memory_space<vmem>>, vector<1x8x16xf32>
      %462 = vector.broadcast %102 : f32 to vector<1x8x16xf32>
      %463 = arith.mulf %462, %461 : vector<1x8x16xf32>
      %464 = arith.addf %459, %463 : vector<1x8x16xf32>
      %c7_i32_150 = arith.constant 7 : i32
      %465 = arith.addi %c7_i32_150, %139 : i32
      %c0_151 = arith.constant 0 : index
      %466 = arith.index_cast %465 : i32 to index
      %c125_152 = arith.constant 125 : index
      %467 = vector.load %arg7[%c0_151, %466, %c125_152] : memref<1x27x256xf32, #tpu.memory_space<vmem>>, vector<1x8x16xf32>
      %468 = vector.broadcast %103 : f32 to vector<1x8x16xf32>
      %469 = arith.mulf %468, %467 : vector<1x8x16xf32>
      %470 = arith.addf %464, %469 : vector<1x8x16xf32>
      %c0_153 = arith.constant 0 : index
      %471 = arith.index_cast %465 : i32 to index
      %c126_154 = arith.constant 126 : index
      %472 = vector.load %arg7[%c0_153, %471, %c126_154] : memref<1x27x256xf32, #tpu.memory_space<vmem>>, vector<1x8x16xf32>
      %473 = vector.broadcast %104 : f32 to vector<1x8x16xf32>
      %474 = arith.mulf %473, %472 : vector<1x8x16xf32>
      %475 = arith.addf %470, %474 : vector<1x8x16xf32>
      %c0_155 = arith.constant 0 : index
      %476 = arith.index_cast %465 : i32 to index
      %c127_156 = arith.constant 127 : index
      %477 = vector.load %arg7[%c0_155, %476, %c127_156] : memref<1x27x256xf32, #tpu.memory_space<vmem>>, vector<1x8x16xf32>
      %478 = vector.broadcast %105 : f32 to vector<1x8x16xf32>
      %479 = arith.mulf %478, %477 : vector<1x8x16xf32>
      %480 = arith.addf %475, %479 : vector<1x8x16xf32>
      %c0_157 = arith.constant 0 : index
      %481 = arith.index_cast %465 : i32 to index
      %c128_158 = arith.constant 128 : index
      %482 = vector.load %arg7[%c0_157, %481, %c128_158] : memref<1x27x256xf32, #tpu.memory_space<vmem>>, vector<1x8x16xf32>
      %483 = vector.broadcast %106 : f32 to vector<1x8x16xf32>
      %484 = arith.mulf %483, %482 : vector<1x8x16xf32>
      %485 = arith.addf %480, %484 : vector<1x8x16xf32>
      %c0_159 = arith.constant 0 : index
      %486 = arith.index_cast %465 : i32 to index
      %c129_160 = arith.constant 129 : index
      %487 = vector.load %arg7[%c0_159, %486, %c129_160] : memref<1x27x256xf32, #tpu.memory_space<vmem>>, vector<1x8x16xf32>
      %488 = vector.broadcast %107 : f32 to vector<1x8x16xf32>
      %489 = arith.mulf %488, %487 : vector<1x8x16xf32>
      %490 = arith.addf %485, %489 : vector<1x8x16xf32>
      %c0_161 = arith.constant 0 : index
      %491 = arith.index_cast %465 : i32 to index
      %c130_162 = arith.constant 130 : index
      %492 = vector.load %arg7[%c0_161, %491, %c130_162] : memref<1x27x256xf32, #tpu.memory_space<vmem>>, vector<1x8x16xf32>
      %493 = vector.broadcast %108 : f32 to vector<1x8x16xf32>
      %494 = arith.mulf %493, %492 : vector<1x8x16xf32>
      %495 = arith.addf %490, %494 : vector<1x8x16xf32>
      %c0_163 = arith.constant 0 : index
      %496 = arith.index_cast %465 : i32 to index
      %c131_164 = arith.constant 131 : index
      %497 = vector.load %arg7[%c0_163, %496, %c131_164] : memref<1x27x256xf32, #tpu.memory_space<vmem>>, vector<1x8x16xf32>
      %498 = vector.broadcast %109 : f32 to vector<1x8x16xf32>
      %499 = arith.mulf %498, %497 : vector<1x8x16xf32>
      %500 = arith.addf %495, %499 : vector<1x8x16xf32>
      %c8_i32_165 = arith.constant 8 : i32
      %501 = arith.addi %c8_i32_165, %139 : i32
      %c0_166 = arith.constant 0 : index
      %502 = arith.index_cast %501 : i32 to index
      %c125_167 = arith.constant 125 : index
      %503 = vector.load %arg7[%c0_166, %502, %c125_167] : memref<1x27x256xf32, #tpu.memory_space<vmem>>, vector<1x8x16xf32>
      %504 = vector.broadcast %110 : f32 to vector<1x8x16xf32>
      %505 = arith.mulf %504, %503 : vector<1x8x16xf32>
      %506 = arith.addf %500, %505 : vector<1x8x16xf32>
      %c0_168 = arith.constant 0 : index
      %507 = arith.index_cast %501 : i32 to index
      %c126_169 = arith.constant 126 : index
      %508 = vector.load %arg7[%c0_168, %507, %c126_169] : memref<1x27x256xf32, #tpu.memory_space<vmem>>, vector<1x8x16xf32>
      %509 = vector.broadcast %111 : f32 to vector<1x8x16xf32>
      %510 = arith.mulf %509, %508 : vector<1x8x16xf32>
      %511 = arith.addf %506, %510 : vector<1x8x16xf32>
      %c0_170 = arith.constant 0 : index
      %512 = arith.index_cast %501 : i32 to index
      %c127_171 = arith.constant 127 : index
      %513 = vector.load %arg7[%c0_170, %512, %c127_171] : memref<1x27x256xf32, #tpu.memory_space<vmem>>, vector<1x8x16xf32>
      %514 = vector.broadcast %112 : f32 to vector<1x8x16xf32>
      %515 = arith.mulf %514, %513 : vector<1x8x16xf32>
      %516 = arith.addf %511, %515 : vector<1x8x16xf32>
      %c0_172 = arith.constant 0 : index
      %517 = arith.index_cast %501 : i32 to index
      %c128_173 = arith.constant 128 : index
      %518 = vector.load %arg7[%c0_172, %517, %c128_173] : memref<1x27x256xf32, #tpu.memory_space<vmem>>, vector<1x8x16xf32>
      %519 = vector.broadcast %113 : f32 to vector<1x8x16xf32>
      %520 = arith.mulf %519, %518 : vector<1x8x16xf32>
      %521 = arith.addf %516, %520 : vector<1x8x16xf32>
      %c0_174 = arith.constant 0 : index
      %522 = arith.index_cast %501 : i32 to index
      %c129_175 = arith.constant 129 : index
      %523 = vector.load %arg7[%c0_174, %522, %c129_175] : memref<1x27x256xf32, #tpu.memory_space<vmem>>, vector<1x8x16xf32>
      %524 = vector.broadcast %114 : f32 to vector<1x8x16xf32>
      %525 = arith.mulf %524, %523 : vector<1x8x16xf32>
      %526 = arith.addf %521, %525 : vector<1x8x16xf32>
      %c0_176 = arith.constant 0 : index
      %527 = arith.index_cast %501 : i32 to index
      %c130_177 = arith.constant 130 : index
      %528 = vector.load %arg7[%c0_176, %527, %c130_177] : memref<1x27x256xf32, #tpu.memory_space<vmem>>, vector<1x8x16xf32>
      %529 = vector.broadcast %115 : f32 to vector<1x8x16xf32>
      %530 = arith.mulf %529, %528 : vector<1x8x16xf32>
      %531 = arith.addf %526, %530 : vector<1x8x16xf32>
      %c0_178 = arith.constant 0 : index
      %532 = arith.index_cast %501 : i32 to index
      %c131_179 = arith.constant 131 : index
      %533 = vector.load %arg7[%c0_178, %532, %c131_179] : memref<1x27x256xf32, #tpu.memory_space<vmem>>, vector<1x8x16xf32>
      %534 = vector.broadcast %116 : f32 to vector<1x8x16xf32>
      %535 = arith.mulf %534, %533 : vector<1x8x16xf32>
      %536 = arith.addf %531, %535 : vector<1x8x16xf32>
      %c9_i32_180 = arith.constant 9 : i32
      %537 = arith.addi %c9_i32_180, %139 : i32
      %c0_181 = arith.constant 0 : index
      %538 = arith.index_cast %537 : i32 to index
      %c125_182 = arith.constant 125 : index
      %539 = vector.load %arg7[%c0_181, %538, %c125_182] : memref<1x27x256xf32, #tpu.memory_space<vmem>>, vector<1x8x16xf32>
      %540 = vector.broadcast %117 : f32 to vector<1x8x16xf32>
      %541 = arith.mulf %540, %539 : vector<1x8x16xf32>
      %542 = arith.addf %536, %541 : vector<1x8x16xf32>
      %c0_183 = arith.constant 0 : index
      %543 = arith.index_cast %537 : i32 to index
      %c126_184 = arith.constant 126 : index
      %544 = vector.load %arg7[%c0_183, %543, %c126_184] : memref<1x27x256xf32, #tpu.memory_space<vmem>>, vector<1x8x16xf32>
      %545 = vector.broadcast %118 : f32 to vector<1x8x16xf32>
      %546 = arith.mulf %545, %544 : vector<1x8x16xf32>
      %547 = arith.addf %542, %546 : vector<1x8x16xf32>
      %c0_185 = arith.constant 0 : index
      %548 = arith.index_cast %537 : i32 to index
      %c127_186 = arith.constant 127 : index
      %549 = vector.load %arg7[%c0_185, %548, %c127_186] : memref<1x27x256xf32, #tpu.memory_space<vmem>>, vector<1x8x16xf32>
      %550 = vector.broadcast %119 : f32 to vector<1x8x16xf32>
      %551 = arith.mulf %550, %549 : vector<1x8x16xf32>
      %552 = arith.addf %547, %551 : vector<1x8x16xf32>
      %c0_187 = arith.constant 0 : index
      %553 = arith.index_cast %537 : i32 to index
      %c128_188 = arith.constant 128 : index
      %554 = vector.load %arg7[%c0_187, %553, %c128_188] : memref<1x27x256xf32, #tpu.memory_space<vmem>>, vector<1x8x16xf32>
      %555 = vector.broadcast %120 : f32 to vector<1x8x16xf32>
      %556 = arith.mulf %555, %554 : vector<1x8x16xf32>
      %557 = arith.addf %552, %556 : vector<1x8x16xf32>
      %c0_189 = arith.constant 0 : index
      %558 = arith.index_cast %537 : i32 to index
      %c129_190 = arith.constant 129 : index
      %559 = vector.load %arg7[%c0_189, %558, %c129_190] : memref<1x27x256xf32, #tpu.memory_space<vmem>>, vector<1x8x16xf32>
      %560 = vector.broadcast %121 : f32 to vector<1x8x16xf32>
      %561 = arith.mulf %560, %559 : vector<1x8x16xf32>
      %562 = arith.addf %557, %561 : vector<1x8x16xf32>
      %c0_191 = arith.constant 0 : index
      %563 = arith.index_cast %537 : i32 to index
      %c130_192 = arith.constant 130 : index
      %564 = vector.load %arg7[%c0_191, %563, %c130_192] : memref<1x27x256xf32, #tpu.memory_space<vmem>>, vector<1x8x16xf32>
      %565 = vector.broadcast %122 : f32 to vector<1x8x16xf32>
      %566 = arith.mulf %565, %564 : vector<1x8x16xf32>
      %567 = arith.addf %562, %566 : vector<1x8x16xf32>
      %c0_193 = arith.constant 0 : index
      %568 = arith.index_cast %537 : i32 to index
      %c131_194 = arith.constant 131 : index
      %569 = vector.load %arg7[%c0_193, %568, %c131_194] : memref<1x27x256xf32, #tpu.memory_space<vmem>>, vector<1x8x16xf32>
      %570 = vector.broadcast %123 : f32 to vector<1x8x16xf32>
      %571 = arith.mulf %570, %569 : vector<1x8x16xf32>
      %572 = arith.addf %567, %571 : vector<1x8x16xf32>
      %c10_i32_195 = arith.constant 10 : i32
      %573 = arith.addi %c10_i32_195, %139 : i32
      %c0_196 = arith.constant 0 : index
      %574 = arith.index_cast %573 : i32 to index
      %c125_197 = arith.constant 125 : index
      %575 = vector.load %arg7[%c0_196, %574, %c125_197] : memref<1x27x256xf32, #tpu.memory_space<vmem>>, vector<1x8x16xf32>
      %576 = vector.broadcast %124 : f32 to vector<1x8x16xf32>
      %577 = arith.mulf %576, %575 : vector<1x8x16xf32>
      %578 = arith.addf %572, %577 : vector<1x8x16xf32>
      %c0_198 = arith.constant 0 : index
      %579 = arith.index_cast %573 : i32 to index
      %c126_199 = arith.constant 126 : index
      %580 = vector.load %arg7[%c0_198, %579, %c126_199] : memref<1x27x256xf32, #tpu.memory_space<vmem>>, vector<1x8x16xf32>
      %581 = vector.broadcast %125 : f32 to vector<1x8x16xf32>
      %582 = arith.mulf %581, %580 : vector<1x8x16xf32>
      %583 = arith.addf %578, %582 : vector<1x8x16xf32>
      %c0_200 = arith.constant 0 : index
      %584 = arith.index_cast %573 : i32 to index
      %c127_201 = arith.constant 127 : index
      %585 = vector.load %arg7[%c0_200, %584, %c127_201] : memref<1x27x256xf32, #tpu.memory_space<vmem>>, vector<1x8x16xf32>
      %586 = vector.broadcast %126 : f32 to vector<1x8x16xf32>
      %587 = arith.mulf %586, %585 : vector<1x8x16xf32>
      %588 = arith.addf %583, %587 : vector<1x8x16xf32>
      %c0_202 = arith.constant 0 : index
      %589 = arith.index_cast %573 : i32 to index
      %c128_203 = arith.constant 128 : index
      %590 = vector.load %arg7[%c0_202, %589, %c128_203] : memref<1x27x256xf32, #tpu.memory_space<vmem>>, vector<1x8x16xf32>
      %591 = vector.broadcast %127 : f32 to vector<1x8x16xf32>
      %592 = arith.mulf %591, %590 : vector<1x8x16xf32>
      %593 = arith.addf %588, %592 : vector<1x8x16xf32>
      %c0_204 = arith.constant 0 : index
      %594 = arith.index_cast %573 : i32 to index
      %c129_205 = arith.constant 129 : index
      %595 = vector.load %arg7[%c0_204, %594, %c129_205] : memref<1x27x256xf32, #tpu.memory_space<vmem>>, vector<1x8x16xf32>
      %596 = vector.broadcast %128 : f32 to vector<1x8x16xf32>
      %597 = arith.mulf %596, %595 : vector<1x8x16xf32>
      %598 = arith.addf %593, %597 : vector<1x8x16xf32>
      %c0_206 = arith.constant 0 : index
      %599 = arith.index_cast %573 : i32 to index
      %c130_207 = arith.constant 130 : index
      %600 = vector.load %arg7[%c0_206, %599, %c130_207] : memref<1x27x256xf32, #tpu.memory_space<vmem>>, vector<1x8x16xf32>
      %601 = vector.broadcast %129 : f32 to vector<1x8x16xf32>
      %602 = arith.mulf %601, %600 : vector<1x8x16xf32>
      %603 = arith.addf %598, %602 : vector<1x8x16xf32>
      %c0_208 = arith.constant 0 : index
      %604 = arith.index_cast %573 : i32 to index
      %c131_209 = arith.constant 131 : index
      %605 = vector.load %arg7[%c0_208, %604, %c131_209] : memref<1x27x256xf32, #tpu.memory_space<vmem>>, vector<1x8x16xf32>
      %606 = vector.broadcast %130 : f32 to vector<1x8x16xf32>
      %607 = arith.mulf %606, %605 : vector<1x8x16xf32>
      %608 = arith.addf %603, %607 : vector<1x8x16xf32>
      %c11_i32_210 = arith.constant 11 : i32
      %609 = arith.addi %c11_i32_210, %139 : i32
      %c0_211 = arith.constant 0 : index
      %610 = arith.index_cast %609 : i32 to index
      %c125_212 = arith.constant 125 : index
      %611 = vector.load %arg7[%c0_211, %610, %c125_212] : memref<1x27x256xf32, #tpu.memory_space<vmem>>, vector<1x8x16xf32>
      %612 = vector.broadcast %131 : f32 to vector<1x8x16xf32>
      %613 = arith.mulf %612, %611 : vector<1x8x16xf32>
      %614 = arith.addf %608, %613 : vector<1x8x16xf32>
      %c0_213 = arith.constant 0 : index
      %615 = arith.index_cast %609 : i32 to index
      %c126_214 = arith.constant 126 : index
      %616 = vector.load %arg7[%c0_213, %615, %c126_214] : memref<1x27x256xf32, #tpu.memory_space<vmem>>, vector<1x8x16xf32>
      %617 = vector.broadcast %132 : f32 to vector<1x8x16xf32>
      %618 = arith.mulf %617, %616 : vector<1x8x16xf32>
      %619 = arith.addf %614, %618 : vector<1x8x16xf32>
      %c0_215 = arith.constant 0 : index
      %620 = arith.index_cast %609 : i32 to index
      %c127_216 = arith.constant 127 : index
      %621 = vector.load %arg7[%c0_215, %620, %c127_216] : memref<1x27x256xf32, #tpu.memory_space<vmem>>, vector<1x8x16xf32>
      %622 = vector.broadcast %133 : f32 to vector<1x8x16xf32>
      %623 = arith.mulf %622, %621 : vector<1x8x16xf32>
      %624 = arith.addf %619, %623 : vector<1x8x16xf32>
      %c0_217 = arith.constant 0 : index
      %625 = arith.index_cast %609 : i32 to index
      %c128_218 = arith.constant 128 : index
      %626 = vector.load %arg7[%c0_217, %625, %c128_218] : memref<1x27x256xf32, #tpu.memory_space<vmem>>, vector<1x8x16xf32>
      %627 = vector.broadcast %134 : f32 to vector<1x8x16xf32>
      %628 = arith.mulf %627, %626 : vector<1x8x16xf32>
      %629 = arith.addf %624, %628 : vector<1x8x16xf32>
      %c0_219 = arith.constant 0 : index
      %630 = arith.index_cast %609 : i32 to index
      %c129_220 = arith.constant 129 : index
      %631 = vector.load %arg7[%c0_219, %630, %c129_220] : memref<1x27x256xf32, #tpu.memory_space<vmem>>, vector<1x8x16xf32>
      %632 = vector.broadcast %135 : f32 to vector<1x8x16xf32>
      %633 = arith.mulf %632, %631 : vector<1x8x16xf32>
      %634 = arith.addf %629, %633 : vector<1x8x16xf32>
      %c0_221 = arith.constant 0 : index
      %635 = arith.index_cast %609 : i32 to index
      %c130_222 = arith.constant 130 : index
      %636 = vector.load %arg7[%c0_221, %635, %c130_222] : memref<1x27x256xf32, #tpu.memory_space<vmem>>, vector<1x8x16xf32>
      %637 = vector.broadcast %136 : f32 to vector<1x8x16xf32>
      %638 = arith.mulf %637, %636 : vector<1x8x16xf32>
      %639 = arith.addf %634, %638 : vector<1x8x16xf32>
      %c0_223 = arith.constant 0 : index
      %640 = arith.index_cast %609 : i32 to index
      %c131_224 = arith.constant 131 : index
      %641 = vector.load %arg7[%c0_223, %640, %c131_224] : memref<1x27x256xf32, #tpu.memory_space<vmem>>, vector<1x8x16xf32>
      %642 = vector.broadcast %137 : f32 to vector<1x8x16xf32>
      %643 = arith.mulf %642, %641 : vector<1x8x16xf32>
      %644 = arith.addf %639, %643 : vector<1x8x16xf32>
      %645 = arith.negf %644 : vector<1x8x16xf32>
      %646 = math.exp %645 : vector<1x8x16xf32>
      %cst_225 = arith.constant 1.000000e+00 : f32
      %647 = vector.broadcast %cst_225 : f32 to vector<1x8x16xf32>
      %648 = arith.addf %647, %646 : vector<1x8x16xf32>
      %649 = arith.divf %647, %648 : vector<1x8x16xf32>
      %c0_226 = arith.constant 0 : index
      %c0_227 = arith.constant 0 : index
      %650 = arith.index_cast %139 : i32 to index
      %c0_228 = arith.constant 0 : index
      %651 = vector.load %arg5[%c0_226, %c0_227, %650, %c0_228] : memref<1x1x16x16xf32, #tpu.memory_space<vmem>>, vector<1x1x8x16xf32>
      %652 = vector.shape_cast %651 : vector<1x1x8x16xf32> to vector<1x8x16xf32>
      %653 = vector.shape_cast %649 : vector<1x8x16xf32> to vector<1x1x8x16xf32>
      tpu.vector_store %arg5[%c0_226, %c0_227, %650, %c0_228], %653 {strides = array<i32>} : memref<1x1x16x16xf32, #tpu.memory_space<vmem>>, vector<1x1x8x16xf32>,
      %c1_i32_229 = arith.constant 1 : i32
      %c8_i32_230 = arith.constant 8 : i32
      %654 = arith.muli %c1_i32_229, %c8_i32_230 : i32
      %655 = vector.broadcast %138 : f32 to vector<1x8x16xf32>
      %c5_i32_231 = arith.constant 5 : i32
      %656 = arith.addi %c5_i32_231, %654 : i32
      %c0_232 = arith.constant 0 : index
      %657 = arith.index_cast %656 : i32 to index
      %c125_233 = arith.constant 125 : index
      %658 = vector.load %arg6[%c0_232, %657, %c125_233] : memref<1x27x256xf32, #tpu.memory_space<vmem>>, vector<1x8x16xf32>
      %659 = vector.broadcast %40 : f32 to vector<1x8x16xf32>
      %660 = arith.mulf %659, %658 : vector<1x8x16xf32>
      %661 = arith.addf %655, %660 : vector<1x8x16xf32>
      %c0_234 = arith.constant 0 : index
      %662 = arith.index_cast %656 : i32 to index
      %c126_235 = arith.constant 126 : index
      %663 = vector.load %arg6[%c0_234, %662, %c126_235] : memref<1x27x256xf32, #tpu.memory_space<vmem>>, vector<1x8x16xf32>
      %664 = vector.broadcast %41 : f32 to vector<1x8x16xf32>
      %665 = arith.mulf %664, %663 : vector<1x8x16xf32>
      %666 = arith.addf %661, %665 : vector<1x8x16xf32>
      %c0_236 = arith.constant 0 : index
      %667 = arith.index_cast %656 : i32 to index
      %c127_237 = arith.constant 127 : index
      %668 = vector.load %arg6[%c0_236, %667, %c127_237] : memref<1x27x256xf32, #tpu.memory_space<vmem>>, vector<1x8x16xf32>
      %669 = vector.broadcast %42 : f32 to vector<1x8x16xf32>
      %670 = arith.mulf %669, %668 : vector<1x8x16xf32>
      %671 = arith.addf %666, %670 : vector<1x8x16xf32>
      %c0_238 = arith.constant 0 : index
      %672 = arith.index_cast %656 : i32 to index
      %c128_239 = arith.constant 128 : index
      %673 = vector.load %arg6[%c0_238, %672, %c128_239] : memref<1x27x256xf32, #tpu.memory_space<vmem>>, vector<1x8x16xf32>
      %674 = vector.broadcast %43 : f32 to vector<1x8x16xf32>
      %675 = arith.mulf %674, %673 : vector<1x8x16xf32>
      %676 = arith.addf %671, %675 : vector<1x8x16xf32>
      %c0_240 = arith.constant 0 : index
      %677 = arith.index_cast %656 : i32 to index
      %c129_241 = arith.constant 129 : index
      %678 = vector.load %arg6[%c0_240, %677, %c129_241] : memref<1x27x256xf32, #tpu.memory_space<vmem>>, vector<1x8x16xf32>
      %679 = vector.broadcast %44 : f32 to vector<1x8x16xf32>
      %680 = arith.mulf %679, %678 : vector<1x8x16xf32>
      %681 = arith.addf %676, %680 : vector<1x8x16xf32>
      %c0_242 = arith.constant 0 : index
      %682 = arith.index_cast %656 : i32 to index
      %c130_243 = arith.constant 130 : index
      %683 = vector.load %arg6[%c0_242, %682, %c130_243] : memref<1x27x256xf32, #tpu.memory_space<vmem>>, vector<1x8x16xf32>
      %684 = vector.broadcast %45 : f32 to vector<1x8x16xf32>
      %685 = arith.mulf %684, %683 : vector<1x8x16xf32>
      %686 = arith.addf %681, %685 : vector<1x8x16xf32>
      %c0_244 = arith.constant 0 : index
      %687 = arith.index_cast %656 : i32 to index
      %c131_245 = arith.constant 131 : index
      %688 = vector.load %arg6[%c0_244, %687, %c131_245] : memref<1x27x256xf32, #tpu.memory_space<vmem>>, vector<1x8x16xf32>
      %689 = vector.broadcast %46 : f32 to vector<1x8x16xf32>
      %690 = arith.mulf %689, %688 : vector<1x8x16xf32>
      %691 = arith.addf %686, %690 : vector<1x8x16xf32>
      %c6_i32_246 = arith.constant 6 : i32
      %692 = arith.addi %c6_i32_246, %654 : i32
      %c0_247 = arith.constant 0 : index
      %693 = arith.index_cast %692 : i32 to index
      %c125_248 = arith.constant 125 : index
      %694 = vector.load %arg6[%c0_247, %693, %c125_248] : memref<1x27x256xf32, #tpu.memory_space<vmem>>, vector<1x8x16xf32>
      %695 = vector.broadcast %47 : f32 to vector<1x8x16xf32>
      %696 = arith.mulf %695, %694 : vector<1x8x16xf32>
      %697 = arith.addf %691, %696 : vector<1x8x16xf32>
      %c0_249 = arith.constant 0 : index
      %698 = arith.index_cast %692 : i32 to index
      %c126_250 = arith.constant 126 : index
      %699 = vector.load %arg6[%c0_249, %698, %c126_250] : memref<1x27x256xf32, #tpu.memory_space<vmem>>, vector<1x8x16xf32>
      %700 = vector.broadcast %48 : f32 to vector<1x8x16xf32>
      %701 = arith.mulf %700, %699 : vector<1x8x16xf32>
      %702 = arith.addf %697, %701 : vector<1x8x16xf32>
      %c0_251 = arith.constant 0 : index
      %703 = arith.index_cast %692 : i32 to index
      %c127_252 = arith.constant 127 : index
      %704 = vector.load %arg6[%c0_251, %703, %c127_252] : memref<1x27x256xf32, #tpu.memory_space<vmem>>, vector<1x8x16xf32>
      %705 = vector.broadcast %49 : f32 to vector<1x8x16xf32>
      %706 = arith.mulf %705, %704 : vector<1x8x16xf32>
      %707 = arith.addf %702, %706 : vector<1x8x16xf32>
      %c0_253 = arith.constant 0 : index
      %708 = arith.index_cast %692 : i32 to index
      %c128_254 = arith.constant 128 : index
      %709 = vector.load %arg6[%c0_253, %708, %c128_254] : memref<1x27x256xf32, #tpu.memory_space<vmem>>, vector<1x8x16xf32>
      %710 = vector.broadcast %50 : f32 to vector<1x8x16xf32>
      %711 = arith.mulf %710, %709 : vector<1x8x16xf32>
      %712 = arith.addf %707, %711 : vector<1x8x16xf32>
      %c0_255 = arith.constant 0 : index
      %713 = arith.index_cast %692 : i32 to index
      %c129_256 = arith.constant 129 : index
      %714 = vector.load %arg6[%c0_255, %713, %c129_256] : memref<1x27x256xf32, #tpu.memory_space<vmem>>, vector<1x8x16xf32>
      %715 = vector.broadcast %51 : f32 to vector<1x8x16xf32>
      %716 = arith.mulf %715, %714 : vector<1x8x16xf32>
      %717 = arith.addf %712, %716 : vector<1x8x16xf32>
      %c0_257 = arith.constant 0 : index
      %718 = arith.index_cast %692 : i32 to index
      %c130_258 = arith.constant 130 : index
      %719 = vector.load %arg6[%c0_257, %718, %c130_258] : memref<1x27x256xf32, #tpu.memory_space<vmem>>, vector<1x8x16xf32>
      %720 = vector.broadcast %52 : f32 to vector<1x8x16xf32>
      %721 = arith.mulf %720, %719 : vector<1x8x16xf32>
      %722 = arith.addf %717, %721 : vector<1x8x16xf32>
      %c0_259 = arith.constant 0 : index
      %723 = arith.index_cast %692 : i32 to index
      %c131_260 = arith.constant 131 : index
      %724 = vector.load %arg6[%c0_259, %723, %c131_260] : memref<1x27x256xf32, #tpu.memory_space<vmem>>, vector<1x8x16xf32>
      %725 = vector.broadcast %53 : f32 to vector<1x8x16xf32>
      %726 = arith.mulf %725, %724 : vector<1x8x16xf32>
      %727 = arith.addf %722, %726 : vector<1x8x16xf32>
      %c7_i32_261 = arith.constant 7 : i32
      %728 = arith.addi %c7_i32_261, %654 : i32
      %c0_262 = arith.constant 0 : index
      %729 = arith.index_cast %728 : i32 to index
      %c125_263 = arith.constant 125 : index
      %730 = vector.load %arg6[%c0_262, %729, %c125_263] : memref<1x27x256xf32, #tpu.memory_space<vmem>>, vector<1x8x16xf32>
      %731 = vector.broadcast %54 : f32 to vector<1x8x16xf32>
      %732 = arith.mulf %731, %730 : vector<1x8x16xf32>
      %733 = arith.addf %727, %732 : vector<1x8x16xf32>
      %c0_264 = arith.constant 0 : index
      %734 = arith.index_cast %728 : i32 to index
      %c126_265 = arith.constant 126 : index
      %735 = vector.load %arg6[%c0_264, %734, %c126_265] : memref<1x27x256xf32, #tpu.memory_space<vmem>>, vector<1x8x16xf32>
      %736 = vector.broadcast %55 : f32 to vector<1x8x16xf32>
      %737 = arith.mulf %736, %735 : vector<1x8x16xf32>
      %738 = arith.addf %733, %737 : vector<1x8x16xf32>
      %c0_266 = arith.constant 0 : index
      %739 = arith.index_cast %728 : i32 to index
      %c127_267 = arith.constant 127 : index
      %740 = vector.load %arg6[%c0_266, %739, %c127_267] : memref<1x27x256xf32, #tpu.memory_space<vmem>>, vector<1x8x16xf32>
      %741 = vector.broadcast %56 : f32 to vector<1x8x16xf32>
      %742 = arith.mulf %741, %740 : vector<1x8x16xf32>
      %743 = arith.addf %738, %742 : vector<1x8x16xf32>
      %c0_268 = arith.constant 0 : index
      %744 = arith.index_cast %728 : i32 to index
      %c128_269 = arith.constant 128 : index
      %745 = vector.load %arg6[%c0_268, %744, %c128_269] : memref<1x27x256xf32, #tpu.memory_space<vmem>>, vector<1x8x16xf32>
      %746 = vector.broadcast %57 : f32 to vector<1x8x16xf32>
      %747 = arith.mulf %746, %745 : vector<1x8x16xf32>
      %748 = arith.addf %743, %747 : vector<1x8x16xf32>
      %c0_270 = arith.constant 0 : index
      %749 = arith.index_cast %728 : i32 to index
      %c129_271 = arith.constant 129 : index
      %750 = vector.load %arg6[%c0_270, %749, %c129_271] : memref<1x27x256xf32, #tpu.memory_space<vmem>>, vector<1x8x16xf32>
      %751 = vector.broadcast %58 : f32 to vector<1x8x16xf32>
      %752 = arith.mulf %751, %750 : vector<1x8x16xf32>
      %753 = arith.addf %748, %752 : vector<1x8x16xf32>
      %c0_272 = arith.constant 0 : index
      %754 = arith.index_cast %728 : i32 to index
      %c130_273 = arith.constant 130 : index
      %755 = vector.load %arg6[%c0_272, %754, %c130_273] : memref<1x27x256xf32, #tpu.memory_space<vmem>>, vector<1x8x16xf32>
      %756 = vector.broadcast %59 : f32 to vector<1x8x16xf32>
      %757 = arith.mulf %756, %755 : vector<1x8x16xf32>
      %758 = arith.addf %753, %757 : vector<1x8x16xf32>
      %c0_274 = arith.constant 0 : index
      %759 = arith.index_cast %728 : i32 to index
      %c131_275 = arith.constant 131 : index
      %760 = vector.load %arg6[%c0_274, %759, %c131_275] : memref<1x27x256xf32, #tpu.memory_space<vmem>>, vector<1x8x16xf32>
      %761 = vector.broadcast %60 : f32 to vector<1x8x16xf32>
      %762 = arith.mulf %761, %760 : vector<1x8x16xf32>
      %763 = arith.addf %758, %762 : vector<1x8x16xf32>
      %c8_i32_276 = arith.constant 8 : i32
      %764 = arith.addi %c8_i32_276, %654 : i32
      %c0_277 = arith.constant 0 : index
      %765 = arith.index_cast %764 : i32 to index
      %c125_278 = arith.constant 125 : index
      %766 = vector.load %arg6[%c0_277, %765, %c125_278] : memref<1x27x256xf32, #tpu.memory_space<vmem>>, vector<1x8x16xf32>
      %767 = vector.broadcast %61 : f32 to vector<1x8x16xf32>
      %768 = arith.mulf %767, %766 : vector<1x8x16xf32>
      %769 = arith.addf %763, %768 : vector<1x8x16xf32>
      %c0_279 = arith.constant 0 : index
      %770 = arith.index_cast %764 : i32 to index
      %c126_280 = arith.constant 126 : index
      %771 = vector.load %arg6[%c0_279, %770, %c126_280] : memref<1x27x256xf32, #tpu.memory_space<vmem>>, vector<1x8x16xf32>
      %772 = vector.broadcast %62 : f32 to vector<1x8x16xf32>
      %773 = arith.mulf %772, %771 : vector<1x8x16xf32>
      %774 = arith.addf %769, %773 : vector<1x8x16xf32>
      %c0_281 = arith.constant 0 : index
      %775 = arith.index_cast %764 : i32 to index
      %c127_282 = arith.constant 127 : index
      %776 = vector.load %arg6[%c0_281, %775, %c127_282] : memref<1x27x256xf32, #tpu.memory_space<vmem>>, vector<1x8x16xf32>
      %777 = vector.broadcast %63 : f32 to vector<1x8x16xf32>
      %778 = arith.mulf %777, %776 : vector<1x8x16xf32>
      %779 = arith.addf %774, %778 : vector<1x8x16xf32>
      %c0_283 = arith.constant 0 : index
      %780 = arith.index_cast %764 : i32 to index
      %c128_284 = arith.constant 128 : index
      %781 = vector.load %arg6[%c0_283, %780, %c128_284] : memref<1x27x256xf32, #tpu.memory_space<vmem>>, vector<1x8x16xf32>
      %782 = vector.broadcast %64 : f32 to vector<1x8x16xf32>
      %783 = arith.mulf %782, %781 : vector<1x8x16xf32>
      %784 = arith.addf %779, %783 : vector<1x8x16xf32>
      %c0_285 = arith.constant 0 : index
      %785 = arith.index_cast %764 : i32 to index
      %c129_286 = arith.constant 129 : index
      %786 = vector.load %arg6[%c0_285, %785, %c129_286] : memref<1x27x256xf32, #tpu.memory_space<vmem>>, vector<1x8x16xf32>
      %787 = vector.broadcast %65 : f32 to vector<1x8x16xf32>
      %788 = arith.mulf %787, %786 : vector<1x8x16xf32>
      %789 = arith.addf %784, %788 : vector<1x8x16xf32>
      %c0_287 = arith.constant 0 : index
      %790 = arith.index_cast %764 : i32 to index
      %c130_288 = arith.constant 130 : index
      %791 = vector.load %arg6[%c0_287, %790, %c130_288] : memref<1x27x256xf32, #tpu.memory_space<vmem>>, vector<1x8x16xf32>
      %792 = vector.broadcast %66 : f32 to vector<1x8x16xf32>
      %793 = arith.mulf %792, %791 : vector<1x8x16xf32>
      %794 = arith.addf %789, %793 : vector<1x8x16xf32>
      %c0_289 = arith.constant 0 : index
      %795 = arith.index_cast %764 : i32 to index
      %c131_290 = arith.constant 131 : index
      %796 = vector.load %arg6[%c0_289, %795, %c131_290] : memref<1x27x256xf32, #tpu.memory_space<vmem>>, vector<1x8x16xf32>
      %797 = vector.broadcast %67 : f32 to vector<1x8x16xf32>
      %798 = arith.mulf %797, %796 : vector<1x8x16xf32>
      %799 = arith.addf %794, %798 : vector<1x8x16xf32>
      %c9_i32_291 = arith.constant 9 : i32
      %800 = arith.addi %c9_i32_291, %654 : i32
      %c0_292 = arith.constant 0 : index
      %801 = arith.index_cast %800 : i32 to index
      %c125_293 = arith.constant 125 : index
      %802 = vector.load %arg6[%c0_292, %801, %c125_293] : memref<1x27x256xf32, #tpu.memory_space<vmem>>, vector<1x8x16xf32>
      %803 = vector.broadcast %68 : f32 to vector<1x8x16xf32>
      %804 = arith.mulf %803, %802 : vector<1x8x16xf32>
      %805 = arith.addf %799, %804 : vector<1x8x16xf32>
      %c0_294 = arith.constant 0 : index
      %806 = arith.index_cast %800 : i32 to index
      %c126_295 = arith.constant 126 : index
      %807 = vector.load %arg6[%c0_294, %806, %c126_295] : memref<1x27x256xf32, #tpu.memory_space<vmem>>, vector<1x8x16xf32>
      %808 = vector.broadcast %69 : f32 to vector<1x8x16xf32>
      %809 = arith.mulf %808, %807 : vector<1x8x16xf32>
      %810 = arith.addf %805, %809 : vector<1x8x16xf32>
      %c0_296 = arith.constant 0 : index
      %811 = arith.index_cast %800 : i32 to index
      %c127_297 = arith.constant 127 : index
      %812 = vector.load %arg6[%c0_296, %811, %c127_297] : memref<1x27x256xf32, #tpu.memory_space<vmem>>, vector<1x8x16xf32>
      %813 = vector.broadcast %70 : f32 to vector<1x8x16xf32>
      %814 = arith.mulf %813, %812 : vector<1x8x16xf32>
      %815 = arith.addf %810, %814 : vector<1x8x16xf32>
      %c0_298 = arith.constant 0 : index
      %816 = arith.index_cast %800 : i32 to index
      %c128_299 = arith.constant 128 : index
      %817 = vector.load %arg6[%c0_298, %816, %c128_299] : memref<1x27x256xf32, #tpu.memory_space<vmem>>, vector<1x8x16xf32>
      %818 = vector.broadcast %71 : f32 to vector<1x8x16xf32>
      %819 = arith.mulf %818, %817 : vector<1x8x16xf32>
      %820 = arith.addf %815, %819 : vector<1x8x16xf32>
      %c0_300 = arith.constant 0 : index
      %821 = arith.index_cast %800 : i32 to index
      %c129_301 = arith.constant 129 : index
      %822 = vector.load %arg6[%c0_300, %821, %c129_301] : memref<1x27x256xf32, #tpu.memory_space<vmem>>, vector<1x8x16xf32>
      %823 = vector.broadcast %72 : f32 to vector<1x8x16xf32>
      %824 = arith.mulf %823, %822 : vector<1x8x16xf32>
      %825 = arith.addf %820, %824 : vector<1x8x16xf32>
      %c0_302 = arith.constant 0 : index
      %826 = arith.index_cast %800 : i32 to index
      %c130_303 = arith.constant 130 : index
      %827 = vector.load %arg6[%c0_302, %826, %c130_303] : memref<1x27x256xf32, #tpu.memory_space<vmem>>, vector<1x8x16xf32>
      %828 = vector.broadcast %73 : f32 to vector<1x8x16xf32>
      %829 = arith.mulf %828, %827 : vector<1x8x16xf32>
      %830 = arith.addf %825, %829 : vector<1x8x16xf32>
      %c0_304 = arith.constant 0 : index
      %831 = arith.index_cast %800 : i32 to index
      %c131_305 = arith.constant 131 : index
      %832 = vector.load %arg6[%c0_304, %831, %c131_305] : memref<1x27x256xf32, #tpu.memory_space<vmem>>, vector<1x8x16xf32>
      %833 = vector.broadcast %74 : f32 to vector<1x8x16xf32>
      %834 = arith.mulf %833, %832 : vector<1x8x16xf32>
      %835 = arith.addf %830, %834 : vector<1x8x16xf32>
      %c10_i32_306 = arith.constant 10 : i32
      %836 = arith.addi %c10_i32_306, %654 : i32
      %c0_307 = arith.constant 0 : index
      %837 = arith.index_cast %836 : i32 to index
      %c125_308 = arith.constant 125 : index
      %838 = vector.load %arg6[%c0_307, %837, %c125_308] : memref<1x27x256xf32, #tpu.memory_space<vmem>>, vector<1x8x16xf32>
      %839 = vector.broadcast %75 : f32 to vector<1x8x16xf32>
      %840 = arith.mulf %839, %838 : vector<1x8x16xf32>
      %841 = arith.addf %835, %840 : vector<1x8x16xf32>
      %c0_309 = arith.constant 0 : index
      %842 = arith.index_cast %836 : i32 to index
      %c126_310 = arith.constant 126 : index
      %843 = vector.load %arg6[%c0_309, %842, %c126_310] : memref<1x27x256xf32, #tpu.memory_space<vmem>>, vector<1x8x16xf32>
      %844 = vector.broadcast %76 : f32 to vector<1x8x16xf32>
      %845 = arith.mulf %844, %843 : vector<1x8x16xf32>
      %846 = arith.addf %841, %845 : vector<1x8x16xf32>
      %c0_311 = arith.constant 0 : index
      %847 = arith.index_cast %836 : i32 to index
      %c127_312 = arith.constant 127 : index
      %848 = vector.load %arg6[%c0_311, %847, %c127_312] : memref<1x27x256xf32, #tpu.memory_space<vmem>>, vector<1x8x16xf32>
      %849 = vector.broadcast %77 : f32 to vector<1x8x16xf32>
      %850 = arith.mulf %849, %848 : vector<1x8x16xf32>
      %851 = arith.addf %846, %850 : vector<1x8x16xf32>
      %c0_313 = arith.constant 0 : index
      %852 = arith.index_cast %836 : i32 to index
      %c128_314 = arith.constant 128 : index
      %853 = vector.load %arg6[%c0_313, %852, %c128_314] : memref<1x27x256xf32, #tpu.memory_space<vmem>>, vector<1x8x16xf32>
      %854 = vector.broadcast %78 : f32 to vector<1x8x16xf32>
      %855 = arith.mulf %854, %853 : vector<1x8x16xf32>
      %856 = arith.addf %851, %855 : vector<1x8x16xf32>
      %c0_315 = arith.constant 0 : index
      %857 = arith.index_cast %836 : i32 to index
      %c129_316 = arith.constant 129 : index
      %858 = vector.load %arg6[%c0_315, %857, %c129_316] : memref<1x27x256xf32, #tpu.memory_space<vmem>>, vector<1x8x16xf32>
      %859 = vector.broadcast %79 : f32 to vector<1x8x16xf32>
      %860 = arith.mulf %859, %858 : vector<1x8x16xf32>
      %861 = arith.addf %856, %860 : vector<1x8x16xf32>
      %c0_317 = arith.constant 0 : index
      %862 = arith.index_cast %836 : i32 to index
      %c130_318 = arith.constant 130 : index
      %863 = vector.load %arg6[%c0_317, %862, %c130_318] : memref<1x27x256xf32, #tpu.memory_space<vmem>>, vector<1x8x16xf32>
      %864 = vector.broadcast %80 : f32 to vector<1x8x16xf32>
      %865 = arith.mulf %864, %863 : vector<1x8x16xf32>
      %866 = arith.addf %861, %865 : vector<1x8x16xf32>
      %c0_319 = arith.constant 0 : index
      %867 = arith.index_cast %836 : i32 to index
      %c131_320 = arith.constant 131 : index
      %868 = vector.load %arg6[%c0_319, %867, %c131_320] : memref<1x27x256xf32, #tpu.memory_space<vmem>>, vector<1x8x16xf32>
      %869 = vector.broadcast %81 : f32 to vector<1x8x16xf32>
      %870 = arith.mulf %869, %868 : vector<1x8x16xf32>
      %871 = arith.addf %866, %870 : vector<1x8x16xf32>
      %c11_i32_321 = arith.constant 11 : i32
      %872 = arith.addi %c11_i32_321, %654 : i32
      %c0_322 = arith.constant 0 : index
      %873 = arith.index_cast %872 : i32 to index
      %c125_323 = arith.constant 125 : index
      %874 = vector.load %arg6[%c0_322, %873, %c125_323] : memref<1x27x256xf32, #tpu.memory_space<vmem>>, vector<1x8x16xf32>
      %875 = vector.broadcast %82 : f32 to vector<1x8x16xf32>
      %876 = arith.mulf %875, %874 : vector<1x8x16xf32>
      %877 = arith.addf %871, %876 : vector<1x8x16xf32>
      %c0_324 = arith.constant 0 : index
      %878 = arith.index_cast %872 : i32 to index
      %c126_325 = arith.constant 126 : index
      %879 = vector.load %arg6[%c0_324, %878, %c126_325] : memref<1x27x256xf32, #tpu.memory_space<vmem>>, vector<1x8x16xf32>
      %880 = vector.broadcast %83 : f32 to vector<1x8x16xf32>
      %881 = arith.mulf %880, %879 : vector<1x8x16xf32>
      %882 = arith.addf %877, %881 : vector<1x8x16xf32>
      %c0_326 = arith.constant 0 : index
      %883 = arith.index_cast %872 : i32 to index
      %c127_327 = arith.constant 127 : index
      %884 = vector.load %arg6[%c0_326, %883, %c127_327] : memref<1x27x256xf32, #tpu.memory_space<vmem>>, vector<1x8x16xf32>
      %885 = vector.broadcast %84 : f32 to vector<1x8x16xf32>
      %886 = arith.mulf %885, %884 : vector<1x8x16xf32>
      %887 = arith.addf %882, %886 : vector<1x8x16xf32>
      %c0_328 = arith.constant 0 : index
      %888 = arith.index_cast %872 : i32 to index
      %c128_329 = arith.constant 128 : index
      %889 = vector.load %arg6[%c0_328, %888, %c128_329] : memref<1x27x256xf32, #tpu.memory_space<vmem>>, vector<1x8x16xf32>
      %890 = vector.broadcast %85 : f32 to vector<1x8x16xf32>
      %891 = arith.mulf %890, %889 : vector<1x8x16xf32>
      %892 = arith.addf %887, %891 : vector<1x8x16xf32>
      %c0_330 = arith.constant 0 : index
      %893 = arith.index_cast %872 : i32 to index
      %c129_331 = arith.constant 129 : index
      %894 = vector.load %arg6[%c0_330, %893, %c129_331] : memref<1x27x256xf32, #tpu.memory_space<vmem>>, vector<1x8x16xf32>
      %895 = vector.broadcast %86 : f32 to vector<1x8x16xf32>
      %896 = arith.mulf %895, %894 : vector<1x8x16xf32>
      %897 = arith.addf %892, %896 : vector<1x8x16xf32>
      %c0_332 = arith.constant 0 : index
      %898 = arith.index_cast %872 : i32 to index
      %c130_333 = arith.constant 130 : index
      %899 = vector.load %arg6[%c0_332, %898, %c130_333] : memref<1x27x256xf32, #tpu.memory_space<vmem>>, vector<1x8x16xf32>
      %900 = vector.broadcast %87 : f32 to vector<1x8x16xf32>
      %901 = arith.mulf %900, %899 : vector<1x8x16xf32>
      %902 = arith.addf %897, %901 : vector<1x8x16xf32>
      %c0_334 = arith.constant 0 : index
      %903 = arith.index_cast %872 : i32 to index
      %c131_335 = arith.constant 131 : index
      %904 = vector.load %arg6[%c0_334, %903, %c131_335] : memref<1x27x256xf32, #tpu.memory_space<vmem>>, vector<1x8x16xf32>
      %905 = vector.broadcast %88 : f32 to vector<1x8x16xf32>
      %906 = arith.mulf %905, %904 : vector<1x8x16xf32>
      %907 = arith.addf %902, %906 : vector<1x8x16xf32>
      %c5_i32_336 = arith.constant 5 : i32
      %908 = arith.addi %c5_i32_336, %654 : i32
      %c0_337 = arith.constant 0 : index
      %909 = arith.index_cast %908 : i32 to index
      %c125_338 = arith.constant 125 : index
      %910 = vector.load %arg7[%c0_337, %909, %c125_338] : memref<1x27x256xf32, #tpu.memory_space<vmem>>, vector<1x8x16xf32>
      %911 = vector.broadcast %89 : f32 to vector<1x8x16xf32>
      %912 = arith.mulf %911, %910 : vector<1x8x16xf32>
      %913 = arith.addf %907, %912 : vector<1x8x16xf32>
      %c0_339 = arith.constant 0 : index
      %914 = arith.index_cast %908 : i32 to index
      %c126_340 = arith.constant 126 : index
      %915 = vector.load %arg7[%c0_339, %914, %c126_340] : memref<1x27x256xf32, #tpu.memory_space<vmem>>, vector<1x8x16xf32>
      %916 = vector.broadcast %90 : f32 to vector<1x8x16xf32>
      %917 = arith.mulf %916, %915 : vector<1x8x16xf32>
      %918 = arith.addf %913, %917 : vector<1x8x16xf32>
      %c0_341 = arith.constant 0 : index
      %919 = arith.index_cast %908 : i32 to index
      %c127_342 = arith.constant 127 : index
      %920 = vector.load %arg7[%c0_341, %919, %c127_342] : memref<1x27x256xf32, #tpu.memory_space<vmem>>, vector<1x8x16xf32>
      %921 = vector.broadcast %91 : f32 to vector<1x8x16xf32>
      %922 = arith.mulf %921, %920 : vector<1x8x16xf32>
      %923 = arith.addf %918, %922 : vector<1x8x16xf32>
      %c0_343 = arith.constant 0 : index
      %924 = arith.index_cast %908 : i32 to index
      %c128_344 = arith.constant 128 : index
      %925 = vector.load %arg7[%c0_343, %924, %c128_344] : memref<1x27x256xf32, #tpu.memory_space<vmem>>, vector<1x8x16xf32>
      %926 = vector.broadcast %92 : f32 to vector<1x8x16xf32>
      %927 = arith.mulf %926, %925 : vector<1x8x16xf32>
      %928 = arith.addf %923, %927 : vector<1x8x16xf32>
      %c0_345 = arith.constant 0 : index
      %929 = arith.index_cast %908 : i32 to index
      %c129_346 = arith.constant 129 : index
      %930 = vector.load %arg7[%c0_345, %929, %c129_346] : memref<1x27x256xf32, #tpu.memory_space<vmem>>, vector<1x8x16xf32>
      %931 = vector.broadcast %93 : f32 to vector<1x8x16xf32>
      %932 = arith.mulf %931, %930 : vector<1x8x16xf32>
      %933 = arith.addf %928, %932 : vector<1x8x16xf32>
      %c0_347 = arith.constant 0 : index
      %934 = arith.index_cast %908 : i32 to index
      %c130_348 = arith.constant 130 : index
      %935 = vector.load %arg7[%c0_347, %934, %c130_348] : memref<1x27x256xf32, #tpu.memory_space<vmem>>, vector<1x8x16xf32>
      %936 = vector.broadcast %94 : f32 to vector<1x8x16xf32>
      %937 = arith.mulf %936, %935 : vector<1x8x16xf32>
      %938 = arith.addf %933, %937 : vector<1x8x16xf32>
      %c0_349 = arith.constant 0 : index
      %939 = arith.index_cast %908 : i32 to index
      %c131_350 = arith.constant 131 : index
      %940 = vector.load %arg7[%c0_349, %939, %c131_350] : memref<1x27x256xf32, #tpu.memory_space<vmem>>, vector<1x8x16xf32>
      %941 = vector.broadcast %95 : f32 to vector<1x8x16xf32>
      %942 = arith.mulf %941, %940 : vector<1x8x16xf32>
      %943 = arith.addf %938, %942 : vector<1x8x16xf32>
      %c6_i32_351 = arith.constant 6 : i32
      %944 = arith.addi %c6_i32_351, %654 : i32
      %c0_352 = arith.constant 0 : index
      %945 = arith.index_cast %944 : i32 to index
      %c125_353 = arith.constant 125 : index
      %946 = vector.load %arg7[%c0_352, %945, %c125_353] : memref<1x27x256xf32, #tpu.memory_space<vmem>>, vector<1x8x16xf32>
      %947 = vector.broadcast %96 : f32 to vector<1x8x16xf32>
      %948 = arith.mulf %947, %946 : vector<1x8x16xf32>
      %949 = arith.addf %943, %948 : vector<1x8x16xf32>
      %c0_354 = arith.constant 0 : index
      %950 = arith.index_cast %944 : i32 to index
      %c126_355 = arith.constant 126 : index
      %951 = vector.load %arg7[%c0_354, %950, %c126_355] : memref<1x27x256xf32, #tpu.memory_space<vmem>>, vector<1x8x16xf32>
      %952 = vector.broadcast %97 : f32 to vector<1x8x16xf32>
      %953 = arith.mulf %952, %951 : vector<1x8x16xf32>
      %954 = arith.addf %949, %953 : vector<1x8x16xf32>
      %c0_356 = arith.constant 0 : index
      %955 = arith.index_cast %944 : i32 to index
      %c127_357 = arith.constant 127 : index
      %956 = vector.load %arg7[%c0_356, %955, %c127_357] : memref<1x27x256xf32, #tpu.memory_space<vmem>>, vector<1x8x16xf32>
      %957 = vector.broadcast %98 : f32 to vector<1x8x16xf32>
      %958 = arith.mulf %957, %956 : vector<1x8x16xf32>
      %959 = arith.addf %954, %958 : vector<1x8x16xf32>
      %c0_358 = arith.constant 0 : index
      %960 = arith.index_cast %944 : i32 to index
      %c128_359 = arith.constant 128 : index
      %961 = vector.load %arg7[%c0_358, %960, %c128_359] : memref<1x27x256xf32, #tpu.memory_space<vmem>>, vector<1x8x16xf32>
      %962 = vector.broadcast %99 : f32 to vector<1x8x16xf32>
      %963 = arith.mulf %962, %961 : vector<1x8x16xf32>
      %964 = arith.addf %959, %963 : vector<1x8x16xf32>
      %c0_360 = arith.constant 0 : index
      %965 = arith.index_cast %944 : i32 to index
      %c129_361 = arith.constant 129 : index
      %966 = vector.load %arg7[%c0_360, %965, %c129_361] : memref<1x27x256xf32, #tpu.memory_space<vmem>>, vector<1x8x16xf32>
      %967 = vector.broadcast %100 : f32 to vector<1x8x16xf32>
      %968 = arith.mulf %967, %966 : vector<1x8x16xf32>
      %969 = arith.addf %964, %968 : vector<1x8x16xf32>
      %c0_362 = arith.constant 0 : index
      %970 = arith.index_cast %944 : i32 to index
      %c130_363 = arith.constant 130 : index
      %971 = vector.load %arg7[%c0_362, %970, %c130_363] : memref<1x27x256xf32, #tpu.memory_space<vmem>>, vector<1x8x16xf32>
      %972 = vector.broadcast %101 : f32 to vector<1x8x16xf32>
      %973 = arith.mulf %972, %971 : vector<1x8x16xf32>
      %974 = arith.addf %969, %973 : vector<1x8x16xf32>
      %c0_364 = arith.constant 0 : index
      %975 = arith.index_cast %944 : i32 to index
      %c131_365 = arith.constant 131 : index
      %976 = vector.load %arg7[%c0_364, %975, %c131_365] : memref<1x27x256xf32, #tpu.memory_space<vmem>>, vector<1x8x16xf32>
      %977 = vector.broadcast %102 : f32 to vector<1x8x16xf32>
      %978 = arith.mulf %977, %976 : vector<1x8x16xf32>
      %979 = arith.addf %974, %978 : vector<1x8x16xf32>
      %c7_i32_366 = arith.constant 7 : i32
      %980 = arith.addi %c7_i32_366, %654 : i32
      %c0_367 = arith.constant 0 : index
      %981 = arith.index_cast %980 : i32 to index
      %c125_368 = arith.constant 125 : index
      %982 = vector.load %arg7[%c0_367, %981, %c125_368] : memref<1x27x256xf32, #tpu.memory_space<vmem>>, vector<1x8x16xf32>
      %983 = vector.broadcast %103 : f32 to vector<1x8x16xf32>
      %984 = arith.mulf %983, %982 : vector<1x8x16xf32>
      %985 = arith.addf %979, %984 : vector<1x8x16xf32>
      %c0_369 = arith.constant 0 : index
      %986 = arith.index_cast %980 : i32 to index
      %c126_370 = arith.constant 126 : index
      %987 = vector.load %arg7[%c0_369, %986, %c126_370] : memref<1x27x256xf32, #tpu.memory_space<vmem>>, vector<1x8x16xf32>
      %988 = vector.broadcast %104 : f32 to vector<1x8x16xf32>
      %989 = arith.mulf %988, %987 : vector<1x8x16xf32>
      %990 = arith.addf %985, %989 : vector<1x8x16xf32>
      %c0_371 = arith.constant 0 : index
      %991 = arith.index_cast %980 : i32 to index
      %c127_372 = arith.constant 127 : index
      %992 = vector.load %arg7[%c0_371, %991, %c127_372] : memref<1x27x256xf32, #tpu.memory_space<vmem>>, vector<1x8x16xf32>
      %993 = vector.broadcast %105 : f32 to vector<1x8x16xf32>
      %994 = arith.mulf %993, %992 : vector<1x8x16xf32>
      %995 = arith.addf %990, %994 : vector<1x8x16xf32>
      %c0_373 = arith.constant 0 : index
      %996 = arith.index_cast %980 : i32 to index
      %c128_374 = arith.constant 128 : index
      %997 = vector.load %arg7[%c0_373, %996, %c128_374] : memref<1x27x256xf32, #tpu.memory_space<vmem>>, vector<1x8x16xf32>
      %998 = vector.broadcast %106 : f32 to vector<1x8x16xf32>
      %999 = arith.mulf %998, %997 : vector<1x8x16xf32>
      %1000 = arith.addf %995, %999 : vector<1x8x16xf32>
      %c0_375 = arith.constant 0 : index
      %1001 = arith.index_cast %980 : i32 to index
      %c129_376 = arith.constant 129 : index
      %1002 = vector.load %arg7[%c0_375, %1001, %c129_376] : memref<1x27x256xf32, #tpu.memory_space<vmem>>, vector<1x8x16xf32>
      %1003 = vector.broadcast %107 : f32 to vector<1x8x16xf32>
      %1004 = arith.mulf %1003, %1002 : vector<1x8x16xf32>
      %1005 = arith.addf %1000, %1004 : vector<1x8x16xf32>
      %c0_377 = arith.constant 0 : index
      %1006 = arith.index_cast %980 : i32 to index
      %c130_378 = arith.constant 130 : index
      %1007 = vector.load %arg7[%c0_377, %1006, %c130_378] : memref<1x27x256xf32, #tpu.memory_space<vmem>>, vector<1x8x16xf32>
      %1008 = vector.broadcast %108 : f32 to vector<1x8x16xf32>
      %1009 = arith.mulf %1008, %1007 : vector<1x8x16xf32>
      %1010 = arith.addf %1005, %1009 : vector<1x8x16xf32>
      %c0_379 = arith.constant 0 : index
      %1011 = arith.index_cast %980 : i32 to index
      %c131_380 = arith.constant 131 : index
      %1012 = vector.load %arg7[%c0_379, %1011, %c131_380] : memref<1x27x256xf32, #tpu.memory_space<vmem>>, vector<1x8x16xf32>
      %1013 = vector.broadcast %109 : f32 to vector<1x8x16xf32>
      %1014 = arith.mulf %1013, %1012 : vector<1x8x16xf32>
      %1015 = arith.addf %1010, %1014 : vector<1x8x16xf32>
      %c8_i32_381 = arith.constant 8 : i32
      %1016 = arith.addi %c8_i32_381, %654 : i32
      %c0_382 = arith.constant 0 : index
      %1017 = arith.index_cast %1016 : i32 to index
      %c125_383 = arith.constant 125 : index
      %1018 = vector.load %arg7[%c0_382, %1017, %c125_383] : memref<1x27x256xf32, #tpu.memory_space<vmem>>, vector<1x8x16xf32>
      %1019 = vector.broadcast %110 : f32 to vector<1x8x16xf32>
      %1020 = arith.mulf %1019, %1018 : vector<1x8x16xf32>
      %1021 = arith.addf %1015, %1020 : vector<1x8x16xf32>
      %c0_384 = arith.constant 0 : index
      %1022 = arith.index_cast %1016 : i32 to index
      %c126_385 = arith.constant 126 : index
      %1023 = vector.load %arg7[%c0_384, %1022, %c126_385] : memref<1x27x256xf32, #tpu.memory_space<vmem>>, vector<1x8x16xf32>
      %1024 = vector.broadcast %111 : f32 to vector<1x8x16xf32>
      %1025 = arith.mulf %1024, %1023 : vector<1x8x16xf32>
      %1026 = arith.addf %1021, %1025 : vector<1x8x16xf32>
      %c0_386 = arith.constant 0 : index
      %1027 = arith.index_cast %1016 : i32 to index
      %c127_387 = arith.constant 127 : index
      %1028 = vector.load %arg7[%c0_386, %1027, %c127_387] : memref<1x27x256xf32, #tpu.memory_space<vmem>>, vector<1x8x16xf32>
      %1029 = vector.broadcast %112 : f32 to vector<1x8x16xf32>
      %1030 = arith.mulf %1029, %1028 : vector<1x8x16xf32>
      %1031 = arith.addf %1026, %1030 : vector<1x8x16xf32>
      %c0_388 = arith.constant 0 : index
      %1032 = arith.index_cast %1016 : i32 to index
      %c128_389 = arith.constant 128 : index
      %1033 = vector.load %arg7[%c0_388, %1032, %c128_389] : memref<1x27x256xf32, #tpu.memory_space<vmem>>, vector<1x8x16xf32>
      %1034 = vector.broadcast %113 : f32 to vector<1x8x16xf32>
      %1035 = arith.mulf %1034, %1033 : vector<1x8x16xf32>
      %1036 = arith.addf %1031, %1035 : vector<1x8x16xf32>
      %c0_390 = arith.constant 0 : index
      %1037 = arith.index_cast %1016 : i32 to index
      %c129_391 = arith.constant 129 : index
      %1038 = vector.load %arg7[%c0_390, %1037, %c129_391] : memref<1x27x256xf32, #tpu.memory_space<vmem>>, vector<1x8x16xf32>
      %1039 = vector.broadcast %114 : f32 to vector<1x8x16xf32>
      %1040 = arith.mulf %1039, %1038 : vector<1x8x16xf32>
      %1041 = arith.addf %1036, %1040 : vector<1x8x16xf32>
      %c0_392 = arith.constant 0 : index
      %1042 = arith.index_cast %1016 : i32 to index
      %c130_393 = arith.constant 130 : index
      %1043 = vector.load %arg7[%c0_392, %1042, %c130_393] : memref<1x27x256xf32, #tpu.memory_space<vmem>>, vector<1x8x16xf32>
      %1044 = vector.broadcast %115 : f32 to vector<1x8x16xf32>
      %1045 = arith.mulf %1044, %1043 : vector<1x8x16xf32>
      %1046 = arith.addf %1041, %1045 : vector<1x8x16xf32>
      %c0_394 = arith.constant 0 : index
      %1047 = arith.index_cast %1016 : i32 to index
      %c131_395 = arith.constant 131 : index
      %1048 = vector.load %arg7[%c0_394, %1047, %c131_395] : memref<1x27x256xf32, #tpu.memory_space<vmem>>, vector<1x8x16xf32>
      %1049 = vector.broadcast %116 : f32 to vector<1x8x16xf32>
      %1050 = arith.mulf %1049, %1048 : vector<1x8x16xf32>
      %1051 = arith.addf %1046, %1050 : vector<1x8x16xf32>
      %c9_i32_396 = arith.constant 9 : i32
      %1052 = arith.addi %c9_i32_396, %654 : i32
      %c0_397 = arith.constant 0 : index
      %1053 = arith.index_cast %1052 : i32 to index
      %c125_398 = arith.constant 125 : index
      %1054 = vector.load %arg7[%c0_397, %1053, %c125_398] : memref<1x27x256xf32, #tpu.memory_space<vmem>>, vector<1x8x16xf32>
      %1055 = vector.broadcast %117 : f32 to vector<1x8x16xf32>
      %1056 = arith.mulf %1055, %1054 : vector<1x8x16xf32>
      %1057 = arith.addf %1051, %1056 : vector<1x8x16xf32>
      %c0_399 = arith.constant 0 : index
      %1058 = arith.index_cast %1052 : i32 to index
      %c126_400 = arith.constant 126 : index
      %1059 = vector.load %arg7[%c0_399, %1058, %c126_400] : memref<1x27x256xf32, #tpu.memory_space<vmem>>, vector<1x8x16xf32>
      %1060 = vector.broadcast %118 : f32 to vector<1x8x16xf32>
      %1061 = arith.mulf %1060, %1059 : vector<1x8x16xf32>
      %1062 = arith.addf %1057, %1061 : vector<1x8x16xf32>
      %c0_401 = arith.constant 0 : index
      %1063 = arith.index_cast %1052 : i32 to index
      %c127_402 = arith.constant 127 : index
      %1064 = vector.load %arg7[%c0_401, %1063, %c127_402] : memref<1x27x256xf32, #tpu.memory_space<vmem>>, vector<1x8x16xf32>
      %1065 = vector.broadcast %119 : f32 to vector<1x8x16xf32>
      %1066 = arith.mulf %1065, %1064 : vector<1x8x16xf32>
      %1067 = arith.addf %1062, %1066 : vector<1x8x16xf32>
      %c0_403 = arith.constant 0 : index
      %1068 = arith.index_cast %1052 : i32 to index
      %c128_404 = arith.constant 128 : index
      %1069 = vector.load %arg7[%c0_403, %1068, %c128_404] : memref<1x27x256xf32, #tpu.memory_space<vmem>>, vector<1x8x16xf32>
      %1070 = vector.broadcast %120 : f32 to vector<1x8x16xf32>
      %1071 = arith.mulf %1070, %1069 : vector<1x8x16xf32>
      %1072 = arith.addf %1067, %1071 : vector<1x8x16xf32>
      %c0_405 = arith.constant 0 : index
      %1073 = arith.index_cast %1052 : i32 to index
      %c129_406 = arith.constant 129 : index
      %1074 = vector.load %arg7[%c0_405, %1073, %c129_406] : memref<1x27x256xf32, #tpu.memory_space<vmem>>, vector<1x8x16xf32>
      %1075 = vector.broadcast %121 : f32 to vector<1x8x16xf32>
      %1076 = arith.mulf %1075, %1074 : vector<1x8x16xf32>
      %1077 = arith.addf %1072, %1076 : vector<1x8x16xf32>
      %c0_407 = arith.constant 0 : index
      %1078 = arith.index_cast %1052 : i32 to index
      %c130_408 = arith.constant 130 : index
      %1079 = vector.load %arg7[%c0_407, %1078, %c130_408] : memref<1x27x256xf32, #tpu.memory_space<vmem>>, vector<1x8x16xf32>
      %1080 = vector.broadcast %122 : f32 to vector<1x8x16xf32>
      %1081 = arith.mulf %1080, %1079 : vector<1x8x16xf32>
      %1082 = arith.addf %1077, %1081 : vector<1x8x16xf32>
      %c0_409 = arith.constant 0 : index
      %1083 = arith.index_cast %1052 : i32 to index
      %c131_410 = arith.constant 131 : index
      %1084 = vector.load %arg7[%c0_409, %1083, %c131_410] : memref<1x27x256xf32, #tpu.memory_space<vmem>>, vector<1x8x16xf32>
      %1085 = vector.broadcast %123 : f32 to vector<1x8x16xf32>
      %1086 = arith.mulf %1085, %1084 : vector<1x8x16xf32>
      %1087 = arith.addf %1082, %1086 : vector<1x8x16xf32>
      %c10_i32_411 = arith.constant 10 : i32
      %1088 = arith.addi %c10_i32_411, %654 : i32
      %c0_412 = arith.constant 0 : index
      %1089 = arith.index_cast %1088 : i32 to index
      %c125_413 = arith.constant 125 : index
      %1090 = vector.load %arg7[%c0_412, %1089, %c125_413] : memref<1x27x256xf32, #tpu.memory_space<vmem>>, vector<1x8x16xf32>
      %1091 = vector.broadcast %124 : f32 to vector<1x8x16xf32>
      %1092 = arith.mulf %1091, %1090 : vector<1x8x16xf32>
      %1093 = arith.addf %1087, %1092 : vector<1x8x16xf32>
      %c0_414 = arith.constant 0 : index
      %1094 = arith.index_cast %1088 : i32 to index
      %c126_415 = arith.constant 126 : index
      %1095 = vector.load %arg7[%c0_414, %1094, %c126_415] : memref<1x27x256xf32, #tpu.memory_space<vmem>>, vector<1x8x16xf32>
      %1096 = vector.broadcast %125 : f32 to vector<1x8x16xf32>
      %1097 = arith.mulf %1096, %1095 : vector<1x8x16xf32>
      %1098 = arith.addf %1093, %1097 : vector<1x8x16xf32>
      %c0_416 = arith.constant 0 : index
      %1099 = arith.index_cast %1088 : i32 to index
      %c127_417 = arith.constant 127 : index
      %1100 = vector.load %arg7[%c0_416, %1099, %c127_417] : memref<1x27x256xf32, #tpu.memory_space<vmem>>, vector<1x8x16xf32>
      %1101 = vector.broadcast %126 : f32 to vector<1x8x16xf32>
      %1102 = arith.mulf %1101, %1100 : vector<1x8x16xf32>
      %1103 = arith.addf %1098, %1102 : vector<1x8x16xf32>
      %c0_418 = arith.constant 0 : index
      %1104 = arith.index_cast %1088 : i32 to index
      %c128_419 = arith.constant 128 : index
      %1105 = vector.load %arg7[%c0_418, %1104, %c128_419] : memref<1x27x256xf32, #tpu.memory_space<vmem>>, vector<1x8x16xf32>
      %1106 = vector.broadcast %127 : f32 to vector<1x8x16xf32>
      %1107 = arith.mulf %1106, %1105 : vector<1x8x16xf32>
      %1108 = arith.addf %1103, %1107 : vector<1x8x16xf32>
      %c0_420 = arith.constant 0 : index
      %1109 = arith.index_cast %1088 : i32 to index
      %c129_421 = arith.constant 129 : index
      %1110 = vector.load %arg7[%c0_420, %1109, %c129_421] : memref<1x27x256xf32, #tpu.memory_space<vmem>>, vector<1x8x16xf32>
      %1111 = vector.broadcast %128 : f32 to vector<1x8x16xf32>
      %1112 = arith.mulf %1111, %1110 : vector<1x8x16xf32>
      %1113 = arith.addf %1108, %1112 : vector<1x8x16xf32>
      %c0_422 = arith.constant 0 : index
      %1114 = arith.index_cast %1088 : i32 to index
      %c130_423 = arith.constant 130 : index
      %1115 = vector.load %arg7[%c0_422, %1114, %c130_423] : memref<1x27x256xf32, #tpu.memory_space<vmem>>, vector<1x8x16xf32>
      %1116 = vector.broadcast %129 : f32 to vector<1x8x16xf32>
      %1117 = arith.mulf %1116, %1115 : vector<1x8x16xf32>
      %1118 = arith.addf %1113, %1117 : vector<1x8x16xf32>
      %c0_424 = arith.constant 0 : index
      %1119 = arith.index_cast %1088 : i32 to index
      %c131_425 = arith.constant 131 : index
      %1120 = vector.load %arg7[%c0_424, %1119, %c131_425] : memref<1x27x256xf32, #tpu.memory_space<vmem>>, vector<1x8x16xf32>
      %1121 = vector.broadcast %130 : f32 to vector<1x8x16xf32>
      %1122 = arith.mulf %1121, %1120 : vector<1x8x16xf32>
      %1123 = arith.addf %1118, %1122 : vector<1x8x16xf32>
      %c11_i32_426 = arith.constant 11 : i32
      %1124 = arith.addi %c11_i32_426, %654 : i32
      %c0_427 = arith.constant 0 : index
      %1125 = arith.index_cast %1124 : i32 to index
      %c125_428 = arith.constant 125 : index
      %1126 = vector.load %arg7[%c0_427, %1125, %c125_428] : memref<1x27x256xf32, #tpu.memory_space<vmem>>, vector<1x8x16xf32>
      %1127 = vector.broadcast %131 : f32 to vector<1x8x16xf32>
      %1128 = arith.mulf %1127, %1126 : vector<1x8x16xf32>
      %1129 = arith.addf %1123, %1128 : vector<1x8x16xf32>
      %c0_429 = arith.constant 0 : index
      %1130 = arith.index_cast %1124 : i32 to index
      %c126_430 = arith.constant 126 : index
      %1131 = vector.load %arg7[%c0_429, %1130, %c126_430] : memref<1x27x256xf32, #tpu.memory_space<vmem>>, vector<1x8x16xf32>
      %1132 = vector.broadcast %132 : f32 to vector<1x8x16xf32>
      %1133 = arith.mulf %1132, %1131 : vector<1x8x16xf32>
      %1134 = arith.addf %1129, %1133 : vector<1x8x16xf32>
      %c0_431 = arith.constant 0 : index
      %1135 = arith.index_cast %1124 : i32 to index
      %c127_432 = arith.constant 127 : index
      %1136 = vector.load %arg7[%c0_431, %1135, %c127_432] : memref<1x27x256xf32, #tpu.memory_space<vmem>>, vector<1x8x16xf32>
      %1137 = vector.broadcast %133 : f32 to vector<1x8x16xf32>
      %1138 = arith.mulf %1137, %1136 : vector<1x8x16xf32>
      %1139 = arith.addf %1134, %1138 : vector<1x8x16xf32>
      %c0_433 = arith.constant 0 : index
      %1140 = arith.index_cast %1124 : i32 to index
      %c128_434 = arith.constant 128 : index
      %1141 = vector.load %arg7[%c0_433, %1140, %c128_434] : memref<1x27x256xf32, #tpu.memory_space<vmem>>, vector<1x8x16xf32>
      %1142 = vector.broadcast %134 : f32 to vector<1x8x16xf32>
      %1143 = arith.mulf %1142, %1141 : vector<1x8x16xf32>
      %1144 = arith.addf %1139, %1143 : vector<1x8x16xf32>
      %c0_435 = arith.constant 0 : index
      %1145 = arith.index_cast %1124 : i32 to index
      %c129_436 = arith.constant 129 : index
      %1146 = vector.load %arg7[%c0_435, %1145, %c129_436] : memref<1x27x256xf32, #tpu.memory_space<vmem>>, vector<1x8x16xf32>
      %1147 = vector.broadcast %135 : f32 to vector<1x8x16xf32>
      %1148 = arith.mulf %1147, %1146 : vector<1x8x16xf32>
      %1149 = arith.addf %1144, %1148 : vector<1x8x16xf32>
      %c0_437 = arith.constant 0 : index
      %1150 = arith.index_cast %1124 : i32 to index
      %c130_438 = arith.constant 130 : index
      %1151 = vector.load %arg7[%c0_437, %1150, %c130_438] : memref<1x27x256xf32, #tpu.memory_space<vmem>>, vector<1x8x16xf32>
      %1152 = vector.broadcast %136 : f32 to vector<1x8x16xf32>
      %1153 = arith.mulf %1152, %1151 : vector<1x8x16xf32>
      %1154 = arith.addf %1149, %1153 : vector<1x8x16xf32>
      %c0_439 = arith.constant 0 : index
      %1155 = arith.index_cast %1124 : i32 to index
      %c131_440 = arith.constant 131 : index
      %1156 = vector.load %arg7[%c0_439, %1155, %c131_440] : memref<1x27x256xf32, #tpu.memory_space<vmem>>, vector<1x8x16xf32>
      %1157 = vector.broadcast %137 : f32 to vector<1x8x16xf32>
      %1158 = arith.mulf %1157, %1156 : vector<1x8x16xf32>
      %1159 = arith.addf %1154, %1158 : vector<1x8x16xf32>
      %1160 = arith.negf %1159 : vector<1x8x16xf32>
      %1161 = math.exp %1160 : vector<1x8x16xf32>
      %cst_441 = arith.constant 1.000000e+00 : f32
      %1162 = vector.broadcast %cst_441 : f32 to vector<1x8x16xf32>
      %1163 = arith.addf %1162, %1161 : vector<1x8x16xf32>
      %1164 = arith.divf %1162, %1163 : vector<1x8x16xf32>
      %c0_442 = arith.constant 0 : index
      %c0_443 = arith.constant 0 : index
      %1165 = arith.index_cast %654 : i32 to index
      %c0_444 = arith.constant 0 : index
      %1166 = vector.load %arg5[%c0_442, %c0_443, %1165, %c0_444] : memref<1x1x16x16xf32, #tpu.memory_space<vmem>>, vector<1x1x8x16xf32>
      %1167 = vector.shape_cast %1166 : vector<1x1x8x16xf32> to vector<1x8x16xf32>
      %1168 = vector.shape_cast %1164 : vector<1x8x16xf32> to vector<1x1x8x16xf32>
      tpu.vector_store %arg5[%c0_442, %c0_443, %1165, %c0_444], %1168 {strides = array<i32>} : memref<1x1x16x16xf32, #tpu.memory_space<vmem>>, vector<1x1x8x16xf32>,
      %c2_i32 = arith.constant 2 : i32
    } else {
    }
    return
  }
  func.func @transform_0(%arg0: i32, %arg1: i32) -> (i32, i32, i32) {
    %c0_i32 = arith.constant 0 : i32
    %c0_i32_0 = arith.constant 0 : i32
    return %arg0, %arg1, %c0_i32 : i32, i32, i32
  }
  func.func @transform_1(%arg0: i32, %arg1: i32) -> i32 {
    %c0_i32 = arith.constant 0 : i32
    %c0_i32_0 = arith.constant 0 : i32
    return %c0_i32 : i32
  }
  func.func @transform_2(%arg0: i32, %arg1: i32) -> i32 {
    %c0_i32 = arith.constant 0 : i32
    %c0_i32_0 = arith.constant 0 : i32
    return %c0_i32 : i32
  }
  func.func @transform_3(%arg0: i32, %arg1: i32) -> (i32, i32, i32, i32) {
    %c0_i32 = arith.constant 0 : i32
    %c0_i32_0 = arith.constant 0 : i32
    %c0_i32_1 = arith.constant 0 : i32
    %c0_i32_2 = arith.constant 0 : i32
    return %arg0, %c0_i32, %c0_i32_0, %c0_i32_1 : i32, i32, i32, i32
  }
}

</mosaic_0001>

<bundles_post_ra>
// kernel: tpu_custom_call.1
= control target key start
LH: loop header
LB: loop body
LE: loop exit
PB: predicated region body
PF: predicated region fallthrough
CT: control target
= control target key end

     0   :  { %s9247_s0 = inlined_call_operand.hbm [shape: f32[2,4,256], index: 0, kind: input, shape index: {}]   ;;  %s9248_s1 = inlined_call_operand.vmem [shape: f32[98], index: 1, kind: input, shape index: {}]   ;;  %s9249_s2 = inlined_call_operand.<no memory space> [shape: f32[1], index: 2, kind: input, shape index: {}]   ;;  %s9250_s3 = inlined_call_operand.hbm [shape: f32[2,1,16,16], index: 3, kind: output, shape index: {}]  }
   0x1   :  { %8 = sst [smem:[#allocation4]] %s9249_s2 }
   0x2   :  { %9 = vsyncpa [#allocation6], 0 }
   0x3   :  { %11 = vsyncpa [#allocation6 + $0x1], 0 }
   0x4   :  { %12 = vsyncpa [#allocation8], 0 }
   0x5   :  { %13 = vsyncpa [#allocation7], 0 }
   0x6   :  { %15 = vsyncpa [#allocation7 + $0x1], 0  ;;  %s5499_s14 = smov 0   ;;  %s5501_s15 = smov 0  }
   0x7   :  { %s5503_s16 = smov 0   ;;  %s5505_s17 = smov 0  }
   0x8   :  { %s5507_s18 = smov 0   ;;  %s5509_s19 = smov 0  }
   0x9 LB: > { %s5049_s2 = sadd.s32 4294967295, %s5454_s19   ;;  %s5050_s20 = sadd.s32 4294967294, %s5454_s19   ;;  %s5454_s19 = sphi %s5509_s19, %s21_s19   ;;  %s5450_s18 = sphi %s5507_s18, %s9823_s18   ;;  %s5446_s17 = sphi %s5505_s17, %s9822_s17   ;;  %s5442_s16 = sphi %s5503_s16, %s9821_s16   ;;  %s5438_s15 = sphi %s5501_s15, %s9820_s15   ;;  %s5434_s14 = sphi %s5499_s14, %s9819_s14  }
   0xa   : > { %p55_p0 = scmp.ne.s32.totalorder %s5438_s15, %s5434_s14  ;;  %p5533_p1 = scmp.eq.s32.totalorder %s5049_s2, 0 }
   0xb   : > { %p5537_p2 = scmp.eq.s32.totalorder %s5049_s2, 1  ;;  %p127_p3 = scmp.eq.s32.totalorder %s5050_s20, 1 }
   0xc   : > { %p5543_p4 = por %p5533_p1, %p55_p0  ;;  %p5051_p5 = scmp.ge.s32.totalorder %s5454_s19, 1 }
   0xd   : > { %p5548_p6 = por %p127_p3, %p55_p0  ;;  %p134_p7 = scmp.lt.s32.totalorder %s5454_s19, 3 }
   0xe   : > { %s146_s27 = sshll.u32 %s9248_s1, 4  ;;  %s33_s29 = sadd.s32 1, %s5450_s18  ;;  %s147_s27 = int_to_ptr.vmem [resolvable:$true] %s146_s27 }
   0xf   : > { %p5556_p8 = pnand %p5051_p5, %p134_p7  ;;  %s42_s30 = sadd.s32 1, %s5442_s16 }
  0x10   : > { %p35_p12 = scmp.ge.s32.totalorder %s33_s29, 2  ;;  %s5456_s4 = smov [#allocation9]  }
  0x11   : > { %p5181_p10 = pneg %p5556_p8  ;;  %p49_p13 = scmp.ne.s32.totalorder %s5442_s16, %s5438_s15 }
  0x12   : > { %s9825_s29 = smov (%p35_p12, %s33_s29), 0  ;;  %p50_p0 = scmp.eq.s32.totalorder %s5454_s19, 0 }
  0x13   : > { %p5182_p11 = pnand %p5181_p10, %p5533_p1  ;;  %s37_s5 = ssub.s32 %s5450_s18, %s9825_s29 }
  0x14   : > { %p5194_p3 = scmp.lt.s32.totalorder %s5454_s19, 2  ;;  %p40_p5 = scmp.eq.s32.totalorder %s37_s5, 0 }
  0x15   : > { %5184 = dma.vmem_to_smem (!%p5182_p11), %s147_s27, 16, %s5456_s4, [#allocation8]  }
  0x16   : > { %p51_p7 = por %p50_p0, %p49_p13  ;;  %p5577_p9 = por %p5537_p2, %p49_p13 }
  0x17   : > { %s160_s7 = sand.u32 1, %s5442_s16   ;;  %s5171_s10 = sshll.u32 %s5450_s18, 3 }
  0x18   : > { %s5583_s8 = scalar_select %p40_p5, %s5442_s16, %s42_s30  }
  0x19   : > { %s5054_s9 = sshll.u32 %s160_s7, 3  ;;  %s171_s13 = scalar_lea.hbm %s9247_s0, %s5171_s10 }
  0x1a   : > { %s164_s2 = scalar_lea.vmem [#allocation5], %s5054_s9  ;;  %s173_s25 = sshll.u32 %s171_s13, 4  ;;  %s174_s25 = int_to_ptr.hbm [resolvable:$true] %s173_s25 }
  0x1b   : > { %s175_s20 = sshll.u32 %s164_s2, 4  ;;  %p5186_p10 = pnand %p5194_p3, %p51_p7  ;;  %s176_s20 = int_to_ptr.vmem [resolvable:$true] %s175_s20 }
  0x1c   : > { %s161_s22 = scalar_lea.sflag [#allocation6], %s160_s7  ;;  %184 = sbr.rel (%p5556_p8) target bundleno = 1697 (0x6a1), region = 32 }
  0x1d   : > { %5188 = dma.hbm_to_vmem [thread:$0]  (!%p5186_p10), %s174_s25, 128, %s176_s20, %s161_s22  }
  0x21   : > { %s5594_s26 = sand.u32 1, %s5438_s15  }
  0x22   : > { %s5058_s27 = sshll.u32 %s5594_s26, 3  ;;  %s187_s30 = scalar_lea.sflag [#allocation6], %s5594_s26 }
  0x23   : > { %s190_s4 = scalar_lea.vmem [#allocation5], %s5058_s27 }
  0x24   : > { %5421 = dma.done.wait (%p5543_p4), %s187_s30, 128  }
  0x25   : > { %5423 = vsyncadd (%p5543_p4), %s187_s30, 4294967168 }
  0x26   : > { %5425 = dma.done.wait (%p5533_p1), [#allocation8], 16  }
  0x27   : > { %5427 = vsyncadd (%p5533_p1), [#allocation8], 4294967280 }
  0x28   : > { %201 = sfence }
  0x29   : > { %v240_v0 = vld [vmem:[%s190_s4] sm:$0xf]  ;;  %vm241_vm0 = vcmask 1043456   ;;  %s5457_s23 = smov 80   ;;  %s5458_s21 = smov 112   ;;  %v5464_v26 = vmov 0.0  }
  0x2a   : > { %v242_v1 = vsel %vm241_vm0, %v240_v0, 0.0  ;;  %v250_v3 = vsel %vm241_vm0, %v240_v0, -inf  ;;  %s5459_s28 = smov 48   ;;  %v395_v13 = vld [vmem:[%s190_s4 + $0x4] sm:$0xf]  ;;  %s5460_s5 = smov 64  }
  0x2b   : > { %v243_v2 = vrot.slane %v242_v1, 4  ;;  %v251_v6 = vrot.slane %v250_v3, 4  ;;  %s5461_s7 = smov 96   ;;  %v396_v15 = vsel %vm241_vm0, %v395_v13, 0.0  ;;  %s5462_s9 = smov 32   ;;  %v404_v22 = vsel %vm241_vm0, %v395_v13, -inf }
  0x2c   : > { %v397_v16 = vrot.slane %v396_v15, 4  ;;  %s5463_s10 = smov 16   ;;  %v405_v24 = vrot.slane %v404_v22, 4  ;;  %226 = vst [vmem:[#allocation2 + $0x10] sm:$0xff] %v5464_v26  ;;  %s5061_s11 = sld [smem:[#allocation9 + $0x1]]  ;;  %vm792_vm1 = vcmask 1046528  }
  0x2d   : > { %v244_v4 = vadd.f32 %v243_v2, %v242_v1  ;;  %v252_v9 = vmax.f32 %v250_v3, %v251_v6  ;;  %224 = vst [vmem:[#allocation2] sm:$0xff] %v5464_v26  ;;  %s5062_s12 = sld [smem:[#allocation9 + $0x2]]  ;;  %s5465_s13 = smov 127   ;;  %vm280_vm2 = vcmask 1047556   ;;  %vm381_vm3 = vcmask 130048  }
  0x2e   : > { %v398_v18 = vadd.f32 %v397_v16, %v396_v15  ;;  %v406_v25 = vmax.f32 %v404_v22, %v405_v24  ;;  %225 = vst [vmem:[#allocation2 + $0x8] sm:$0xff] %v5464_v26  ;;  %s5065_s2 = sld [smem:[#allocation9 + $0x5]]  ;;  %s5466_s20 = smov 126   ;;  %v5472_v24 = vmov 1934713408   ;;  %vm958_vm4 = vcmask 1045504  }
  0x2f   : > { %v245_v5 = vrot.slane %v244_v4, 2  ;;  %v253_v11 = vrot.slane %v252_v9, 2  ;;  %227 = vst [vmem:[#allocation2 + $0x18] sm:$0xff] %v5464_v26  ;;  %s5063_s25 = sld [smem:[#allocation9 + $0x3]]  ;;  %s5467_s27 = smov 123   ;;  %vm1384_vm5 = vcmask 1042432  }
  0x30   : > { %v399_v19 = vrot.slane %v398_v18, 2  ;;  %v407_v27 = vrot.slane %v406_v25, 2  ;;  %228 = vst [vmem:[#allocation2 + $0x20] sm:$0xff] %v5464_v26  ;;  %s5064_s22 = sld [smem:[#allocation9 + $0x4]]  ;;  %s5468_s4 = smov 124   ;;  %vm1550_vm6 = vcmask 1041408  }
  0x31   : > { %v246_v7 = vadd.f32 %v245_v5, %v244_v4  ;;  %v254_v12 = vmax.f32 %v252_v9, %v253_v11  ;;  %229 = vst [vmem:[#allocation2 + $0x28] sm:$0xff] %v5464_v26  ;;  %s5066_s30 = sld [smem:[#allocation9 + $0x6]]  ;;  %vm680_vm7 = vcmask 1039360   ;;  %vm708_vm8 = vcmask 1031168  }
  0x32   : > { %v400_v20 = vadd.f32 %v399_v19, %v398_v18  ;;  %v408_v28 = vmax.f32 %v406_v25, %v407_v27  ;;  %230 = vst [vmem:[#allocation2 + $0x30] sm:$0x7] %v5464_v26  ;;  %v5674_v32 = vstv %s5061_s11  ;;  %v307_v25 = vunpack.c.l.s4 %v5472_v24  ;;  %s5071_s11 = sld [smem:[#allocation9 + $0xb]] }
  0x33   : > { %v247_v8 = vrot.slane %v246_v7, 1  ;;  %v255_v14 = vrot.slane %v254_v12, 1  ;;  %231 = vst [vmem:[#allocation2 + $0x38] sm:$0x7] %v5464_v26  ;;  %v652_v36 = vld [vmem:[#allocation2 + $0x10] sm:$0x1f]  ;;  %v5686_v37 = vstv %s5062_s12 }
  0x34   : > { %v401_v21 = vrot.slane %v400_v20, 1  ;;  %232 = vst [vmem:[#allocation3] sm:$0xff] %v5464_v26  ;;  %v409_v29 = vrot.slane %v408_v28, 1  ;;  %v5670_v31 = vld [vmem:[#allocation2] sm:$0xe0]  ;;  %v666_v38 = vmul.f32 %v5674_v32, %v652_v36  ;;  %v694_v39 = vmul.f32 %v5686_v37, %v652_v36  ;;  %s5073_s12 = sld [smem:[#allocation9 + $0xd]] }
  0x35   : > { %v5608_v10 = vadd.f32 %v247_v8, %v246_v7  ;;  %v5623_v17 = vmax.f32 %v254_v12, %v255_v14  ;;  %233 = vst [vmem:[#allocation3 + $0x8] sm:$0xff] %v5464_v26  ;;  %v664_v33 = vmul.f32 %v5674_v32, %v5670_v31  ;;  %v5678_v34 = vld [vmem:[#allocation2 + $0x8] sm:$0xe0]  ;;  %v5692_v40 = vstv %s5065_s2  ;;  %v5717_v51 = vld [vmem:[#allocation2] sm:$0xc0]  ;;  %s5075_s2 = sld [smem:[#allocation9 + $0xf]] }
  0x36   : > { %v5638_v23 = vadd.f32 %v401_v21, %v400_v20  ;;  %234 = vst [vmem:[#allocation3 + $0x10] sm:$0xff] %v5464_v26  ;;  %v5658_v30 = vmax.f32 %v408_v28, %v409_v29  ;;  %v665_v35 = vmul.f32 %v5674_v32, %v5678_v34  ;;  %v692_v41 = vmul.f32 %v5686_v37, %v5670_v31  ;;  %v5719_v52 = vld [vmem:[#allocation2 + $0x10] sm:$0x3f] }
  0x37   : > { %264 = vrot.lane.b32.xlu1 %v5608_v10, %s5457_s23  ;;  %258 = vrot.lane.b32.xlu0 %v5608_v10, %s5458_s21  ;;  %235 = vst [vmem:[#allocation3 + $0x18] sm:$0xff] %v5464_v26  ;;  %v693_v42 = vmul.f32 %v5686_v37, %v5678_v34  ;;  %v750_v43 = vmul.f32 %v5692_v40, %v5678_v34  ;;  %v5703_v44 = vstv %s5063_s25  ;;  %v5705_v45 = vstv %s5064_s22  ;;  %s5076_s25 = sld [smem:[#allocation9 + $0x10]] }
  0x38   : > { %270 = vrot.lane.b32.xlu2 %v5608_v10, %s5459_s28  ;;  %236 = vst [vmem:[#allocation3 + $0x20] sm:$0xff] %v5464_v26  ;;  %v735_v46 = vmul.f32 %v5705_v45, %v5678_v34  ;;  %v720_v47 = vmul.f32 %v5703_v44, %v5678_v34  ;;  %v5713_v49 = vstv %s5066_s30  ;;  %v5471_v7 = vmov 1983009808   ;;  %s5077_s22 = sld [smem:[#allocation9 + $0x11]] }
  0x39   : > { %237 = vst [vmem:[#allocation3 + $0x28] sm:$0xff] %v5464_v26  ;;  %v765_v50 = vmul.f32 %v5713_v49, %v5678_v34  ;;  %v283_v8 = vunpack.c.l.s4 %v5471_v7  ;;  %s5079_s30 = sld [smem:[#allocation9 + $0x13]] }
  0x3a   : > { %238 = vst [vmem:[#allocation3 + $0x30] sm:$0x7] %v5464_v26 }
  0x3b   : > { %239 = vst [vmem:[#allocation3 + $0x38] sm:$0x7] %v5464_v26  ;;  %v5740_v14 = vunpack.c.0.s8 %v283_v8 }
  0x3c   : > { %9504 = vst [vmem:[#allocation14_spill] sm:$0xff] %v5674_v32 }
  0x3d   : > { %9505 = vst [vmem:[#allocation15_spill] sm:$0xff] %v5686_v37 }
  0x3e   : > { %9506 = vst [vmem:[#allocation16_spill] sm:$0xff] %v5692_v40 }
  0x3f   : > { %267 = vrot.lane.b32.xlu1 %v5608_v10, %s5460_s5  ;;  %261 = vrot.lane.b32.xlu0 %v5608_v10, %s5461_s7  ;;  %9507 = vst [vmem:[#allocation17_spill] sm:$0xff] %v5703_v44 }
  0x40   : > { %273 = vrot.lane.b32.xlu2 %v5608_v10, %s5462_s9  ;;  %9508 = vst [vmem:[#allocation18_spill] sm:$0xff] %v5705_v45 }
  0x41   : > { %9509 = vst [vmem:[#allocation19_spill] sm:$0xff] %v5713_v49 }
  0x47   : > { %319 = vrot.lane.b32.xlu1 %v5623_v17, %s5458_s21  ;;  %276 = vrot.lane.b32.xlu0 %v5608_v10, %s5463_s10 }
  0x48   : > { %322 = vrot.lane.b32.xlu2 %v5623_v17, %s5461_s7 }
  0x4f   : > { %328 = vrot.lane.b32.xlu1 %v5623_v17, %s5460_s5  ;;  %325 = vrot.lane.b32.xlu0 %v5623_v17, %s5457_s23 }
  0x50   : > { %331 = vrot.lane.b32.xlu2 %v5623_v17, %s5459_s28 }
  0x57   : > { %337 = vrot.lane.b32.xlu1 %v5623_v17, %s5463_s10  ;;  %334 = vrot.lane.b32.xlu0 %v5623_v17, %s5462_s9 }
  0x58   : > { %412 = vrot.lane.b32.xlu2 %v5638_v23, %s5458_s21 }
  0x5f   : > { %418 = vrot.lane.b32.xlu1 %v5638_v23, %s5457_s23  ;;  %415 = vrot.lane.b32.xlu0 %v5638_v23, %s5461_s7 }
  0x60   : > { %421 = vrot.lane.b32.xlu2 %v5638_v23, %s5460_s5 }
  0x67   : > { %427 = vrot.lane.b32.xlu1 %v5638_v23, %s5462_s9  ;;  %424 = vrot.lane.b32.xlu0 %v5638_v23, %s5459_s28 }
  0x68   : > { %430 = vrot.lane.b32.xlu2 %v5638_v23, %s5463_s10 }
  0x6f   : > { %472 = vrot.lane.b32.xlu0 %v5658_v30, %s5458_s21  ;;  %475 = vrot.lane.b32.xlu1 %v5658_v30, %s5461_s7  ;;  %s5469_s21 = smov 125   ;;  %s5067_s7 = sld [smem:[#allocation9 + $0x7]] }
  0x70   : > { %478 = vrot.lane.b32.xlu2 %v5658_v30, %s5457_s23  ;;  %s5068_s23 = sld [smem:[#allocation9 + $0x8]] }
  0x76   : > { %v5721_v53 = vstv %s5068_s23  ;;  %s5088_s23 = sld [smem:[#allocation9 + $0x1c]] }
  0x77   : > { %481 = vrot.lane.b32.xlu0 %v5658_v30, %s5460_s5  ;;  %484 = vrot.lane.b32.xlu1 %v5658_v30, %s5459_s28  ;;  %9510 = vst [vmem:[#allocation20_spill] sm:$0xff] %v5721_v53  ;;  %s5069_s28 = sld [smem:[#allocation9 + $0x9]]  ;;  %v808_v54 = vmul.f32 %v5721_v53, %v5717_v51  ;;  %v810_v55 = vmul.f32 %v5721_v53, %v5719_v52  ;;  %s5470_s5 = smov 122  }
  0x78   : > { %487 = vrot.lane.b32.xlu2 %v5658_v30, %s5462_s9  ;;  %s5072_s9 = sld [smem:[#allocation9 + $0xc]] }
  0x79   : > { %v816_v56 = vrot.slane %v808_v54, 1  ;;  %v817_v57 = vrot.slane %v810_v55, 1 }
  0x7b   : > { %v818_v59 = vsel %vm792_vm1, %v816_v56, %v817_v57 }
  0x7d   : > { %v5731_v60 = vstv %s5069_s28  ;;  %s5095_s28 = sld [smem:[#allocation9 + $0x23]] }
  0x7e   : > { %9511 = vst [vmem:[#allocation21_spill] sm:$0xff] %v5731_v60  ;;  %v841_v61 = vmul.f32 %v5731_v60, %v5717_v51  ;;  %v843_v62 = vmul.f32 %v5731_v60, %v5719_v52 }
  0x7f   : > { %490 = vrot.lane.b32.xlu0 %v5658_v30, %s5463_s10  ;;  %672 = vrot.lane.b32.xlu1 %v664_v33, %s5465_s13  ;;  %s5070_s10 = sld [smem:[#allocation9 + $0xa]] }
  0x80   : > { %674 = vrot.lane.b32.xlu2 %v665_v35, %s5465_s13  ;;  %v849_v63 = vrot.slane %v841_v61, 1  ;;  %v850_v0 = vrot.slane %v843_v62, 1 }
  0x82   : > { %v851_v3 = vsel %vm792_vm1, %v849_v63, %v850_v0 }
  0x87   : > { %676 = vrot.lane.b32.xlu0 %v666_v38, %s5465_s13  ;;  %704 = vrot.lane.b32.xlu1 %v694_v39, %s5466_s20  ;;  %v5751_v38 = vunpack.c.0.s8 %v307_v25 }
  0x88   : > { %700 = vrot.lane.b32.xlu2 %v692_v41, %s5466_s20 }
  0x8f   : > { %702 = vrot.lane.b32.xlu0 %v693_v42, %s5466_s20  ;;  %754 = vrot.lane.b32.xlu1 %v750_v43, %s5467_s27 }
  0x90   : > { %739 = vrot.lane.b32.xlu2 %v735_v46, %s5468_s4 }
  0x92   : > { %v271_v48 = vpop.permute.xlu2 %270 }
  0x97   : > { %724 = vrot.lane.b32.xlu0 %v720_v47, %s5469_s21  ;;  %826 = vrot.lane.b32.xlu1 %v817_v57, %s5465_s13 }
  0x98   : > { %822 = vrot.lane.b32.xlu2 %v818_v59, %s5465_s13 }
  0x9a   : > { %v274_v58 = vpop.permute.xlu2 %273 }
  0x9b   : > { %v292_v12 = vrot.slane %v274_v58, 4 }
  0x9f   : > { %769 = vrot.lane.b32.xlu0 %v765_v50, %s5470_s5 }
  0xa0   : > { %859 = vrot.lane.b32.xlu2 %v850_v0, %s5466_s20 }
  0xa2   : > { %v323_v4 = vpop.permute.xlu2 %322 }
  0xa7   : > { %855 = vrot.lane.b32.xlu0 %v851_v3, %s5466_s20 }
  0xa9   : > { %v265_v1 = vpop.permute.xlu1 %264  ;;  %v259_v2 = vpop.permute.xlu0 %258 }
  0xaa   : > { %v286_v9 = vrot.slane %v265_v1, 4  ;;  %v332_v11 = vpop.permute.xlu2 %331 }
  0xac   : > { %v287_v15 = vsel %vm280_vm2, %v286_v9, %v259_v2 }
  0xad   : > { %v291_v22 = vperm.slane %v287_v15, %v5740_v14 }
  0xaf   : > { %v304_v35 = vrot.slane %v291_v22, 4 }
  0xb1   : > { %v268_v5 = vpop.permute.xlu1 %267  ;;  %v262_v6 = vpop.permute.xlu0 %261 }
  0xb2   : > { %v279_v13 = vrot.slane %v262_v6, 4  ;;  %v293_v19 = vsel %vm280_vm2, %v292_v12, %v268_v5  ;;  %v413_v33 = vpop.permute.xlu2 %412 }
  0xb3   : > { %v297_v27 = vperm.slane %v293_v19, %v5740_v14 }
  0xb4   : > { %v281_v20 = vsel %vm280_vm2, %v279_v13, %v5608_v10 }
  0xb5   : > { %v285_v28 = vperm.slane %v281_v20, %v5740_v14 }
  0xb7   : > { %v305_v10 = vsel %vm280_vm2, %v304_v35, %v285_v28 }
  0xb8   : > { %v309_v47 = vperm.slane %v305_v10, %v5751_v38 }
  0xb9   : > { %v320_v16 = vpop.permute.xlu1 %319  ;;  %v277_v18 = vpop.permute.xlu0 %276 }
  0xba   : > { %v298_v21 = vrot.slane %v277_v18, 4  ;;  %v422_v58 = vpop.permute.xlu2 %421 }
  0xbc   : > { %v299_v26 = vsel %vm280_vm2, %v298_v21, %v271_v48  ;;  %v340_v48 = vrot.slane %v323_v4, 4 }
  0xbd   : > { %v303_v29 = vperm.slane %v299_v26, %v5740_v14  ;;  %v5786_v26 = vstv %s5067_s7  ;;  %s5078_s7 = sld [smem:[#allocation9 + $0x12]] }
  0xbe   : > { %v341_v57 = vsel %vm280_vm2, %v340_v48, %v5623_v17  ;;  %9512 = vst [vmem:[#allocation22_spill] sm:$0xff] %v5786_v26 }
  0xbf   : > { %v310_v36 = vrot.slane %v303_v29, 4  ;;  %v345_v0 = vperm.slane %v341_v57, %v5740_v14  ;;  %v5793_v29 = vld [vmem:[#allocation2 + $0x8] sm:$0xc0] }
  0xc1   : > { %v311_v39 = vsel %vm280_vm2, %v310_v36, %v297_v27  ;;  %v329_v41 = vpop.permute.xlu1 %328  ;;  %v326_v42 = vpop.permute.xlu0 %325 }
  0xc2   : > { %v315_v43 = vperm.slane %v311_v39, %v5751_v38  ;;  %v346_v46 = vrot.slane %v326_v42, 4  ;;  %v431_v22 = vpop.permute.xlu2 %430  ;;  %v5803_v39 = vstv %s5072_s9  ;;  %s5102_s9 = sld [smem:[#allocation9 + $0x2a]] }
  0xc3   : > { %v451_v10 = vrot.slane %v431_v22, 4  ;;  %9513 = vst [vmem:[#allocation23_spill] sm:$0xff] %v5803_v39 }
  0xc4   : > { %v316_v50 = vrot.slane %v315_v43, 4  ;;  %v347_v54 = vsel %vm280_vm2, %v346_v46, %v320_v16 }
  0xc5   : > { %v351_v56 = vperm.slane %v347_v54, %v5740_v14 }
  0xc6   : > { %v317_v55 = vsel %vm280_vm2, %v316_v50, %v309_v47 }
  0xc7   : > { %382 = vst.msk [vmem:[#allocation2 + $0x18] sm:$0xff] %vm381_vm3, %v317_v55  ;;  %v364_v1 = vrot.slane %v351_v56, 4 }
  0xc9   : > { %v338_v59 = vpop.permute.xlu1 %337  ;;  %v335_v61 = vpop.permute.xlu0 %334  ;;  %v365_v6 = vsel %vm280_vm2, %v364_v1, %v345_v0 }
  0xca   : > { %v358_v62 = vrot.slane %v338_v59, 4  ;;  %v352_v63 = vrot.slane %v335_v61, 4  ;;  %v369_v18 = vperm.slane %v365_v6, %v5751_v38 }
  0xcc   : > { %v359_v2 = vsel %vm280_vm2, %v358_v62, %v332_v11  ;;  %v353_v3 = vsel %vm280_vm2, %v352_v63, %v329_v41  ;;  %v785_v41 = vmul.f32 %v5786_v26, %v5793_v29 }
  0xcd   : > { %v363_v4 = vperm.slane %v359_v2, %v5740_v14  ;;  %v357_v5 = vperm.slane %v353_v3, %v5740_v14 }
  0xce   : > { %v5769_v7 = vld [vmem:[#allocation2 + $0x18] sm:$0x1f]  ;;  %v796_v62 = vrot.slane %v785_v41, 1 }
  0xcf   : > { %v370_v17 = vrot.slane %v363_v4, 4  ;;  %v736_v11 = vmul.f32 %v5705_v45, %v5769_v7  ;;  %v695_v13 = vmul.f32 %v5686_v37, %v5769_v7  ;;  %v667_v15 = vmul.f32 %v5674_v32, %v5769_v7  ;;  %v5778_v16 = vld [vmem:[#allocation2 + $0x18] sm:$0x3f] }
  0xd0   : > { %v5791_v28 = vmul.f32 %v5731_v60, %v5778_v16  ;;  %v721_v55 = vmul.f32 %v5703_v44, %v5769_v7  ;;  %v5823_v59 = vmul.f32 %v5803_v39, %v5778_v16  ;;  %v811_v61 = vmul.f32 %v5721_v53, %v5778_v16 }
  0xd1   : > { %v371_v8 = vsel %vm280_vm2, %v370_v17, %v357_v5  ;;  %v419_v9 = vpop.permute.xlu1 %418  ;;  %v416_v12 = vpop.permute.xlu0 %415  ;;  %741 = vrot.lane.b32.xlu0 %v736_v11, %s5468_s4  ;;  %706 = vrot.lane.b32.xlu2 %v695_v13, %s5466_s20  ;;  %v766_v11 = vmul.f32 %v5713_v49, %v5769_v7  ;;  %v809_v13 = vmul.f32 %v5721_v53, %v5793_v29 }
  0xd2   : > { %v375_v19 = vperm.slane %v371_v8, %v5751_v38  ;;  %v439_v20 = vrot.slane %v419_v9, 4  ;;  %v433_v21 = vrot.slane %v416_v12, 4  ;;  %678 = vrot.lane.b32.xlu1 %v667_v15, %s5465_s13  ;;  %v853_v48 = vrot.slane %v5791_v28, 1  ;;  %v479_v8 = vpop.permute.xlu2 %478 }
  0xd3   : > { %v915_v6 = vrot.slane %v5823_v59, 1  ;;  %v820_v17 = vrot.slane %v811_v61, 1  ;;  %v5843_v15 = vstv %s5070_s10  ;;  %s5968_s10 = sld [smem:[#allocation9 + $0x14]] }
  0xd4   : > { %v376_v24 = vrot.slane %v375_v19, 4  ;;  %v440_v25 = vsel %vm280_vm2, %v439_v20, %v413_v33  ;;  %v434_v36 = vsel %vm280_vm2, %v433_v21, %v5638_v23  ;;  %v5801_v33 = vmul.f32 %v5786_v26, %v5778_v16  ;;  %9514 = vst [vmem:[#allocation24_spill] sm:$0xff] %v5843_v15 }
  0xd5   : > { %v444_v27 = vperm.slane %v440_v25, %v5740_v14  ;;  %v438_v43 = vperm.slane %v434_v36, %v5740_v14  ;;  %v751_v23 = vmul.f32 %v5692_v40, %v5769_v7  ;;  %v5856_v20 = vmul.f32 %v5843_v15, %v5778_v16 }
  0xd6   : > { %v377_v35 = vsel %vm280_vm2, %v376_v24, %v369_v18  ;;  %v9251_v2 = vrot.slane %v5801_v33, 1  ;;  %v5849_v18 = vstv %s5071_s11  ;;  %v819_v21 = vrot.slane %v809_v13, 1  ;;  %s5083_s11 = sld [smem:[#allocation9 + $0x17]] }
  0xd7   : > { %383 = vst.msk [vmem:[#allocation3 + $0x18] sm:$0xff] %vm381_vm3, %v377_v35  ;;  %v457_v42 = vrot.slane %v444_v27, 4  ;;  %v893_v22 = vmul.f32 %v5849_v18, %v5778_v16  ;;  %v499_v25 = vrot.slane %v479_v8, 4  ;;  %v879_v35 = vrot.slane %v5856_v20, 1 }
  0xd8   : > { %v5837_v9 = vsel %vm792_vm1, %v796_v62, %v9251_v2  ;;  %9515 = vst [vmem:[#allocation25_spill] sm:$0xff] %v5849_v18  ;;  %v821_v36 = vsel %vm792_vm1, %v819_v21, %v820_v17  ;;  %v892_v41 = vmul.f32 %v5849_v18, %v5793_v29 }
  0xd9   : > { %v428_v46 = vpop.permute.xlu1 %427  ;;  %v425_v47 = vpop.permute.xlu0 %424  ;;  %861 = vrot.lane.b32.xlu0 %v853_v48, %s5466_s20  ;;  %756 = vrot.lane.b32.xlu2 %v751_v23, %s5467_s27  ;;  %v458_v63 = vsel %vm280_vm2, %v457_v42, %v438_v43  ;;  %v5864_v42 = vstv %s5073_s12  ;;  %v842_v43 = vmul.f32 %v5731_v60, %v5793_v29  ;;  %s5082_s12 = sld [smem:[#allocation9 + $0x16]] }
  0xda   : > { %v445_v50 = vrot.slane %v428_v46, 4  ;;  %v452_v54 = vsel %vm280_vm2, %v451_v10, %v425_v47  ;;  %726 = vrot.lane.b32.xlu1 %v721_v55, %s5469_s21  ;;  %v897_v10 = vrot.slane %v893_v22, 1  ;;  %9516 = vst [vmem:[#allocation26_spill] sm:$0xff] %v5864_v42  ;;  %v488_v46 = vpop.permute.xlu2 %487  ;;  %v5878_v55 = vld [vmem:[#allocation2 + $0x10] sm:$0x7f] }
  0xdb   : > { %v456_v56 = vperm.slane %v452_v54, %v5740_v14  ;;  %v5876_v54 = vld [vmem:[#allocation2] sm:$0x80]  ;;  %v852_v62 = vrot.slane %v842_v43, 1  ;;  %v5909_v43 = vld [vmem:[#allocation2 + $0x18] sm:$0x7f] }
  0xdc   : > { %v446_v57 = vsel %vm280_vm2, %v445_v50, %v422_v58  ;;  %v462_v58 = vperm.slane %v458_v63, %v5751_v38  ;;  %v5874_v50 = vmul.f32 %v5864_v42, %v5778_v16  ;;  %v5881_v63 = vstv %s5075_s2  ;;  %s6063_s2 = sld [smem:[#allocation9 + $0x19]] }
  0xdd   : > { %v450_v0 = vperm.slane %v446_v57, %v5740_v14  ;;  %v463_v1 = vrot.slane %v456_v56, 4  ;;  %v896_v56 = vrot.slane %v892_v41, 1  ;;  %v505_v57 = vrot.slane %v488_v46, 4  ;;  %9517 = vst [vmem:[#allocation27_spill] sm:$0xff] %v5881_v63 }
  0xde   : > { %v976_v16 = vmul.f32 %v5881_v63, %v5878_v55  ;;  %v854_v13 = vsel %vm792_vm1, %v852_v62, %v853_v48  ;;  %v5930_v62 = vld [vmem:[#allocation2 + $0x8] sm:$0x80]  ;;  %v1833_v60 = vld [vmem:[#allocation3 + $0x18] sm:$0x3f] }
  0xdf   : > { %v464_v3 = vsel %vm280_vm2, %v463_v1, %v450_v0  ;;  %v974_v1 = vmul.f32 %v5881_v63, %v5876_v54 }
  0xe0   : > { %v468_v4 = vperm.slane %v464_v3, %v5751_v38  ;;  %v983_v22 = vrot.slane %v976_v16, 2 }
  0xe1   : > { %v473_v5 = vpop.permute.xlu0 %472  ;;  %919 = vrot.lane.b32.xlu0 %v915_v6, %s5467_s27  ;;  %828 = vrot.lane.b32.xlu2 %v820_v17, %s5465_s13  ;;  %v476_v24 = vpop.permute.xlu1 %475  ;;  %v898_v17 = vsel %vm792_vm1, %v896_v56, %v897_v10  ;;  %v982_v21 = vrot.slane %v974_v1, 2 }
  0xe2   : > { %v469_v12 = vrot.slane %v468_v4, 4  ;;  %771 = vrot.lane.b32.xlu1 %v766_v11, %s5470_s5  ;;  %v500_v47 = vsel %vm280_vm2, %v499_v25, %v473_v5  ;;  %v493_v23 = vrot.slane %v476_v24, 4 }
  0xe3   : > { %v504_v61 = vperm.slane %v500_v47, %v5740_v14  ;;  %v984_v48 = vsel %vm958_vm4, %v982_v21, %v983_v22 }
  0xe4   : > { %v470_v19 = vsel %vm280_vm2, %v469_v12, %v462_v58  ;;  %v494_v0 = vsel %vm280_vm2, %v493_v23, %v5658_v30  ;;  %v933_v58 = vrot.slane %v5874_v50, 1  ;;  %v910_v12 = vmul.f32 %v5803_v39, %v5793_v29 }
  0xe5   : > { %535 = vst.msk [vmem:[#allocation2 + $0x28] sm:$0xff] %vm381_vm3, %v470_v19  ;;  %v517_v11 = vrot.slane %v504_v61, 4  ;;  %v498_v30 = vperm.slane %v494_v0, %v5740_v14  ;;  %v874_v19 = vmul.f32 %v5843_v15, %v5793_v29  ;;  %v928_v50 = vmul.f32 %v5864_v42, %v5793_v29  ;;  %v1831_v15 = vld [vmem:[#allocation3 + $0x8] sm:$0xc0] }
  0xe6   : > { %v5928_v61 = vstv %s5076_s25  ;;  %s6072_s25 = sld [smem:[#allocation9 + $0x18]] }
  0xe7   : > { %v878_v28 = vrot.slane %v874_v19, 1  ;;  %9518 = vst [vmem:[#allocation28_spill] sm:$0xff] %v5928_v61  ;;  %v1008_v29 = vmul.f32 %v5928_v61, %v5930_v62  ;;  %v5936_v0 = vmul.f32 %v5928_v61, %v5909_v43  ;;  %v1009_v16 = vmul.f32 %v5928_v61, %v5878_v55 }
  0xe9   : > { %v482_v27 = vpop.permute.xlu0 %481  ;;  %824 = vrot.lane.b32.xlu0 %v821_v36, %s5465_s13  ;;  %883 = vrot.lane.b32.xlu2 %v879_v35, %s5469_s21  ;;  %v485_v4 = vpop.permute.xlu1 %484  ;;  %v518_v36 = vsel %vm280_vm2, %v517_v11, %v498_v30  ;;  %v880_v23 = vsel %vm792_vm1, %v878_v28, %v879_v35  ;;  %v5949_v11 = vstv %s5077_s22  ;;  %s5089_s22 = sld [smem:[#allocation9 + $0x1d]] }
  0xea   : > { %901 = vrot.lane.b32.xlu1 %v897_v10, %s5468_s4  ;;  %v506_v8 = vsel %vm280_vm2, %v505_v57, %v482_v27  ;;  %v914_v27 = vrot.slane %v910_v12, 1  ;;  %v522_v46 = vperm.slane %v518_v36, %v5751_v38  ;;  %v5922_v57 = vpop.permute.xlu2 %674  ;;  %9519 = vst [vmem:[#allocation29_spill] sm:$0xff] %v5949_v11  ;;  %v1040_v19 = vmul.f32 %v5949_v11, %v5930_v62  ;;  %v5970_v36 = vld [vmem:[#allocation2 + $0x18] sm:$0xfe] }
  0xeb   : > { %v510_v24 = vperm.slane %v506_v8, %v5740_v14  ;;  %v1016_v8 = vrot.slane %v1009_v16, 2 }
  0xef   : > { %v6105_v42 = vstv %s5089_s22  ;;  %s5092_s22 = sld [smem:[#allocation9 + $0x20]] }
  0xf0   : > { %9535 = vst [vmem:[#allocation45_spill] sm:$0xff] %v6105_v42 }
  0xf1   : > { %v491_v3 = vpop.permute.xlu0 %490  ;;  %899 = vrot.lane.b32.xlu0 %v898_v17, %s5468_s4  ;;  %937 = vrot.lane.b32.xlu2 %v933_v58, %s5470_s5 }
  0xf2   : > { %v511_v5 = vrot.slane %v491_v3, 4  ;;  %857 = vrot.lane.b32.xlu1 %v854_v13, %s5466_s20  ;;  %v975_v3 = vmul.f32 %v5881_v63, %v5930_v62  ;;  %v5947_v17 = vpop.permute.xlu2 %700  ;;  %v1041_v13 = vmul.f32 %v5949_v11, %v5909_v43 }
  0xf4   : > { %v512_v20 = vsel %vm280_vm2, %v511_v5, %v485_v4  ;;  %v1018_v4 = vrot.slane %v1008_v29, 2  ;;  %v1019_v5 = vrot.slane %v5936_v0, 2  ;;  %v985_v12 = vrot.slane %v975_v3, 2 }
  0xf5   : > { %v516_v25 = vperm.slane %v512_v20, %v5740_v14  ;;  %v916_v14 = vsel %vm792_vm1, %v914_v27, %v915_v6  ;;  %v932_v6 = vrot.slane %v928_v50, 1  ;;  %v5966_v27 = vstv %s5088_s23  ;;  %v5988_v50 = vld [vmem:[#allocation2 + $0x18] sm:$0xfc]  ;;  %s6114_s23 = sld [smem:[#allocation9 + $0x1a]] }
  0xf6   : > { %v1020_v30 = vsel %vm958_vm4, %v1018_v4, %v1019_v5  ;;  %9521 = vst [vmem:[#allocation31_spill] sm:$0xff] %v5966_v27 }
  0xf7   : > { %v523_v10 = vrot.slane %v516_v25, 4  ;;  %v934_v1 = vsel %vm792_vm1, %v932_v6, %v933_v58  ;;  %v1007_v58 = vmul.f32 %v5928_v61, %v5876_v54  ;;  %v1044_v25 = vrot.slane %v1040_v19, 2  ;;  %v6103_v61 = vld [vmem:[#allocation2 + $0x10] sm:$0xfe] }
  0xf8   : > { %v6000_v6 = vstv %s5102_s9  ;;  %9534 = vst [vmem:[#allocation44_spill] sm:$0xff] %v6103_v61  ;;  %s5090_s9 = sld [smem:[#allocation9 + $0x1e]] }
  0xf9   : > { %v524_v41 = vsel %vm280_vm2, %v523_v10, %v510_v24  ;;  %988 = vrot.lane.b32.xlu0 %v984_v48, %s5465_s13  ;;  %917 = vrot.lane.b32.xlu2 %v916_v14, %s5467_s27  ;;  %v1015_v21 = vrot.slane %v1007_v58, 2  ;;  %v1045_v24 = vrot.slane %v1041_v13, 2  ;;  %9525 = vst [vmem:[#allocation35_spill] sm:$0xff] %v6000_v6  ;;  %v6008_v3 = vpop.permute.xlu0 %676 }
  0xfa   : > { %v528_v47 = vperm.slane %v524_v41, %v5751_v38  ;;  %881 = vrot.lane.b32.xlu1 %v880_v23, %s5469_s21  ;;  %v977_v38 = vmul.f32 %v5881_v63, %v5909_v43  ;;  %v5978_v48 = vpop.permute.xlu2 %739  ;;  %v5986_v23 = vstv %s5078_s7  ;;  %s5116_s7 = sld [smem:[#allocation9 + $0x38]] }
  0xfb   : > { %v1017_v41 = vsel %vm958_vm4, %v1015_v21, %v1016_v8  ;;  %v1046_v14 = vsel %vm958_vm4, %v1044_v25, %v1045_v24  ;;  %9523 = vst [vmem:[#allocation33_spill] sm:$0xff] %v5986_v23  ;;  %v1059_v4 = vmul.f32 %v5986_v23, %v5909_v43 }
  0xfc   : > { %v529_v56 = vrot.slane %v528_v47, 4  ;;  %v986_v35 = vrot.slane %v977_v38, 2  ;;  %v5983_v47 = vstv %s5095_s28  ;;  %v5994_v38 = vmul.f32 %v5966_v27, %v5970_v36  ;;  %s550_s28 = sld [smem:[#allocation9]] }
  0xfd   : > { %9522 = vst [vmem:[#allocation32_spill] sm:$0xff] %v5983_v47 }
  0xfe   : > { %v530_v59 = vsel %vm280_vm2, %v529_v56, %v522_v46  ;;  %v987_v20 = vsel %vm958_vm4, %v985_v12, %v986_v35  ;;  %v5981_v46 = vld [vmem:[#allocation2 + $0x28] sm:$0x1]  ;;  %9524 = vst [vmem:[#allocation34_spill] sm:$0xff] %v5994_v38  ;;  %v9253_v58 = vrot.slane %v5994_v38, 4  ;;  %v6153_v44 = vstv %s5090_s9  ;;  %s5074_s9 = sld [smem:[#allocation9 + $0xe]] }
  0xff   : > { %536 = vst.msk [vmem:[#allocation3 + $0x28] sm:$0xff] %vm381_vm3, %v530_v59  ;;  %v5990_v56 = vld [vmem:[#allocation2 + $0x28] sm:$0x3]  ;;  %v5998_v59 = vld [vmem:[#allocation2 + $0x18] sm:$0xf8]  ;;  %v1214_v16 = vmul.f32 %v5966_v27, %v5981_v46  ;;  %v1237_v18 = vmul.f32 %v6105_v42, %v5981_v46 }
 0x100   : > { %v1379_v12 = vmul.f32 %v5983_v47, %v5990_v56  ;;  %v6021_v13 = vmul.f32 %v6000_v6, %v5998_v59  ;;  %9539 = vst [vmem:[#allocation49_spill] sm:$0xff] %v6153_v44 }
 0x101   : > { %994 = vrot.lane.b32.xlu0 %v986_v35, %s5465_s13  ;;  %992 = vrot.lane.b32.xlu2 %v983_v22, %s5465_s13  ;;  %v5964_v22 = vstv %s5079_s30  ;;  %v6002_v35 = vld [vmem:[#allocation2 + $0x28] sm:$0x7]  ;;  %s6089_s30 = sld [smem:[#allocation9 + $0x1b]]  ;;  %v1246_v53 = vrot.slane %v1237_v18, 4  ;;  %v6162_v18 = vmul.f32 %v6153_v44, %v6103_v61 }
 0x102   : > { %935 = vrot.lane.b32.xlu1 %v934_v1, %s5470_s5  ;;  %9520 = vst [vmem:[#allocation30_spill] sm:$0xff] %v5964_v22  ;;  %v1076_v10 = vmul.f32 %v5964_v22, %v5930_v62  ;;  %v5976_v28 = vmul.f32 %v5964_v22, %v5909_v43  ;;  %v1545_v19 = vmul.f32 %v6000_v6, %v6002_v35  ;;  %v6070_v22 = vstv %s5082_s12  ;;  %s5123_s12 = sld [smem:[#allocation9 + $0x3f]] }
 0x103   : > { %9527 = vst [vmem:[#allocation37_spill] sm:$0xff] %v6021_v13  ;;  %v6151_v45 = vstv %s550_s28  ;;  %s5093_s28 = sld [smem:[#allocation9 + $0x21]] }
 0x104   : > { %v1080_v29 = vrot.slane %v1076_v10, 2  ;;  %v1081_v1 = vrot.slane %v5976_v28, 2  ;;  %v9256_v10 = vrot.slane %v6021_v13, 6  ;;  %v1555_v28 = vrot.slane %v1545_v19, 6  ;;  %9533 = vst [vmem:[#allocation43_spill] sm:$0xff] %v6070_v22 }
 0x105   : > { %v1058_v19 = vmul.f32 %v5986_v23, %v5930_v62  ;;  %9538 = vst [vmem:[#allocation48_spill] sm:$0xff] %v6151_v45 }
 0x106   : > { %v1082_v2 = vsel %vm958_vm4, %v1080_v29, %v1081_v1 }
 0x109   : > { %1025 = vrot.lane.b32.xlu0 %v1016_v8, %s5466_s20  ;;  %1023 = vrot.lane.b32.xlu2 %v1020_v30, %s5466_s20  ;;  %v6014_v8 = vmul.f32 %v5983_v47, %v5988_v50  ;;  %v1223_v30 = vrot.slane %v1214_v16, 4  ;;  %v1996_v47 = vld [vmem:[#allocation3 + $0x8] sm:$0x80] }
 0x10a   : > { %990 = vrot.lane.b32.xlu1 %v987_v20, %s5465_s13  ;;  %v6026_v20 = vstv %s5968_s10  ;;  %s6132_s10 = sld [smem:[#allocation4]] }
 0x10b   : > { %9526 = vst [vmem:[#allocation36_spill] sm:$0xff] %v6014_v8  ;;  %v9252_v21 = vrot.slane %v6014_v8, 5  ;;  %v6032_v25 = vsel %vm241_vm0, %v9253_v58, %v1223_v30  ;;  %v1094_v30 = vmul.f32 %v6026_v20, %v5930_v62  ;;  %v1062_v58 = vrot.slane %v1058_v19, 2 }
 0x10c   : > { %9528 = vst [vmem:[#allocation38_spill] sm:$0xff] %v6026_v20 }
 0x10d   : > { %9529 = vst [vmem:[#allocation39_spill] sm:$0xff] %v6032_v25  ;;  %v5297_v25 = vld [vmem:[#allocation2 + $0x10] sm:$0x1f] }
 0x111   : > { %1049 = vrot.lane.b32.xlu0 %v1045_v24, %s5469_s21  ;;  %1047 = vrot.lane.b32.xlu2 %v1046_v14, %s5469_s21  ;;  %v1389_v24 = vrot.slane %v1379_v12, 5  ;;  %v6035_v14 = vpop.permute.xlu2 %822  ;;  %v1095_v12 = vmul.f32 %v6026_v20, %v5909_v43  ;;  %v6061_v20 = vpop.permute.xlu1 %672 }
 0x112   : > { %1021 = vrot.lane.b32.xlu1 %v1017_v41, %s5466_s20  ;;  %v1063_v41 = vrot.slane %v1059_v4, 2  ;;  %v6050_v4 = vsel %vm1550_vm6, %v9256_v10, %v1555_v28  ;;  %v6065_v28 = vld [vmem:[#allocation2 + $0x18] sm:$0xff]  ;;  %v6068_v10 = vstv %s5083_s11  ;;  %s5091_s11 = sld [smem:[#allocation9 + $0x1f]] }
 0x113   : > { %v6040_v16 = vsel %vm1384_vm5, %v9252_v21, %v1389_v24  ;;  %9531 = vst [vmem:[#allocation41_spill] sm:$0xff] %v6050_v4  ;;  %v1099_v29 = vrot.slane %v1095_v12, 2  ;;  %v1098_v24 = vrot.slane %v1094_v30, 2  ;;  %v6059_v21 = vpop.permute.xlu0 %702  ;;  %v1145_v12 = vmul.f32 0.0, %v6068_v10 }
 0x114   : > { %9530 = vst [vmem:[#allocation40_spill] sm:$0xff] %v6040_v16  ;;  %v1064_v0 = vsel %vm958_vm4, %v1062_v58, %v1063_v41  ;;  %v1128_v30 = vmul.f32 %v6070_v22, %v6065_v28  ;;  %v9270_v58 = vstv %s6072_s25 }
 0x115   : > { %9532 = vst [vmem:[#allocation42_spill] sm:$0xff] %v6068_v10  ;;  %v1149_v19 = vrot.slane %v1145_v12, 3 }
 0x116   : > { %v1132_v23 = vrot.slane %v1128_v30, 3  ;;  %v1163_v30 = vmul.f32 %v9270_v58, %v6065_v28 }
 0x119   : > { %1083 = vrot.lane.b32.xlu0 %v1082_v2, %s5467_s27  ;;  %1067 = vrot.lane.b32.xlu2 %v1063_v41, %s5468_s4  ;;  %v1100_v2 = vsel %vm958_vm4, %v1098_v24, %v1099_v29  ;;  %v1127_v41 = vmul.f32 0.0, %v6070_v22 }
 0x11a   : > { %1027 = vrot.lane.b32.xlu1 %v1019_v5, %s5466_s20  ;;  %v6077_v5 = vpop.permute.xlu2 %859 }
 0x11b   : > { %v6083_v24 = vpop.permute.xlu0 %724  ;;  %v1131_v11 = vrot.slane %v1127_v41, 3 }
 0x121   : > { %1103 = vrot.lane.b32.xlu0 %v1099_v29, %s5470_s5  ;;  %1101 = vrot.lane.b32.xlu2 %v1100_v2, %s5470_s5  ;;  %v6085_v29 = vpop.permute.xlu1 %704  ;;  %v9269_v2 = vstv %s6063_s2 }
 0x122   : > { %1065 = vrot.lane.b32.xlu1 %v1064_v0, %s5468_s4  ;;  %v1174_v12 = vmul.f32 %v9269_v2, %v6065_v28  ;;  %v1234_v2 = vmul.f32 %v6105_v42, %v6103_v61 }
 0x124   : > { %v1176_v63 = vrot.slane %v1174_v12, 3 }
 0x129   : > { %1151 = vrot.lane.b32.xlu0 %v1149_v19, %s5466_s20  ;;  %1135 = vrot.lane.b32.xlu2 %v1132_v23, %s5465_s13  ;;  %v1165_v19 = vrot.slane %v1163_v30, 3  ;;  %v9277_v23 = vstv %s6089_s30  ;;  %v6116_v58 = vpop.permute.xlu1 %754  ;;  %v6124_v30 = vld [vmem:[#allocation2 + $0x20] sm:$0x1] }
 0x12a   : > { %1085 = vrot.lane.b32.xlu1 %v1081_v1, %s5467_s27  ;;  %v6108_v1 = vpop.permute.xlu0 %769  ;;  %v1196_v12 = vmul.f32 %v9277_v23, %v6065_v28  ;;  %9536 = vst [vmem:[#allocation46_spill] sm:$0xff] %v6124_v30  ;;  %v1236_v22 = vmul.f32 %v6105_v42, %v6124_v30 }
 0x12b   : > { %v6095_v0 = vpop.permute.xlu2 %706 }
 0x12c   : > { %v1198_v39 = vrot.slane %v1196_v12, 3  ;;  %v1235_v12 = vmul.f32 %v6105_v42, %v5970_v36 }
 0x131   : > { %1177 = vrot.lane.b32.xlu0 %v1176_v63, %s5468_s4  ;;  %1166 = vrot.lane.b32.xlu2 %v1165_v19, %s5469_s21  ;;  %v1146_v63 = vmul.f32 %v6068_v10, %v6065_v28  ;;  %v1242_v19 = vrot.slane %v1234_v2, 4  ;;  %v9298_v10 = vstv %s6114_s23  ;;  %v6140_v2 = vpop.permute.xlu1 %826 }
 0x132   : > { %1133 = vrot.lane.b32.xlu1 %v1131_v11, %s5465_s13  ;;  %v6136_v23 = vpop.permute.xlu0 %855  ;;  %v1185_v40 = vmul.f32 %v9298_v10, %v6065_v28  ;;  %v1269_v10 = vmul.f32 %v6153_v44, %v6124_v30 }
 0x133   : > { %v6119_v41 = vpop.permute.xlu2 %756  ;;  %v1150_v11 = vrot.slane %v1146_v63, 3  ;;  %v1244_v63 = vrot.slane %v1236_v22, 4  ;;  %v1243_v22 = vrot.slane %v1235_v12, 4  ;;  %v6178_v12 = vstv %s6132_s10  ;;  %s6272_s10 = sld [smem:[#allocation9 + $0x24]] }
 0x134   : > { %v1187_v13 = vrot.slane %v1185_v40, 3  ;;  %9542 = vst [vmem:[#allocation52_spill] sm:$0xff] %v6178_v12  ;;  %v1277_v40 = vrot.slane %v1269_v10, 4 }
 0x135   : > { %v1245_v37 = vsel %vm241_vm0, %v1242_v19, %v1244_v63 }
 0x139   : > { %1248 = vrot.lane.b32.xlu0 %v1242_v19, %s5465_s13  ;;  %1199 = vrot.lane.b32.xlu2 %v1198_v39, %s5470_s5  ;;  %v6149_v39 = vstv %s5116_s7  ;;  %s5094_s7 = sld [smem:[#allocation9 + $0x22]] }
 0x13a   : > { %1153 = vrot.lane.b32.xlu1 %v1150_v11, %s5466_s20  ;;  %9537 = vst [vmem:[#allocation47_spill] sm:$0xff] %v6149_v39  ;;  %v1836_v11 = vmul.f32 %v6149_v39, %v1831_v15  ;;  %v6157_v42 = vmul.f32 %v6149_v39, %v1833_v60  ;;  %v1247_v15 = vsel %vm241_vm0, %v1243_v22, %v1246_v53  ;;  %v1275_v53 = vrot.slane %v6162_v18, 4 }
 0x13b   : > { %v6144_v49 = vpop.permute.xlu2 %828  ;;  %v658_v60 = vmul.f32 %v6151_v45, %v5769_v7  ;;  %v6200_v39 = vstv %s5091_s11  ;;  %s6290_s11 = sld [smem:[#allocation9 + $0x4d]] }
 0x13c   : > { %9540 = vst [vmem:[#allocation50_spill] sm:$0xff] %v6157_v42  ;;  %v1846_v32 = vrot.slane %v1836_v11, 1  ;;  %v9302_v4 = vrot.slane %v6157_v42, 1  ;;  %v1278_v10 = vsel %vm241_vm0, %v1275_v53, %v1277_v40  ;;  %v1301_v42 = vmul.f32 %v6200_v39, %v5981_v46 }
 0x13d   : > { %9543 = vst [vmem:[#allocation53_spill] sm:$0xff] %v6200_v39  ;;  %v681_v40 = vsel %vm680_vm7, %v6061_v20, %v5922_v57 }
 0x13e   : > { %v6175_v19 = vsel %vm792_vm1, %v1846_v32, %v9302_v4  ;;  %v656_v32 = vmul.f32 %v6151_v45, %v5678_v34  ;;  %v1998_v34 = vld [vmem:[#allocation3 + $0x18] sm:$0x7f]  ;;  %v1305_v8 = vrot.slane %v1301_v42, 4 }
 0x13f   : > { %9541 = vst [vmem:[#allocation51_spill] sm:$0xff] %v6175_v19  ;;  %v6204_v19 = vstv %s5123_s12  ;;  %s6318_s12 = sld [smem:[#allocation9 + $0x25]] }
 0x140   : > { %9544 = vst [vmem:[#allocation54_spill] sm:$0xff] %v6204_v19  ;;  %v2001_v42 = vmul.f32 %v6204_v19, %v1996_v47 }
 0x141   : > { %1254 = vrot.lane.b32.xlu0 %v1247_v15, %s5465_s13  ;;  %1252 = vrot.lane.b32.xlu2 %v1245_v37, %s5465_s13  ;;  %v6188_v37 = vmul.f32 %v6153_v44, %v5970_v36  ;;  %v655_v15 = vmul.f32 %v6151_v45, %v5670_v31  ;;  %v660_v31 = vadd.f32 %v656_v32, %v6178_v12 }
 0x142   : > { %1188 = vrot.lane.b32.xlu1 %v1187_v13, %s5467_s27  ;;  %v662_v13 = vadd.f32 %v658_v60, %v6178_v12 }
 0x143   : > { %v6182_v63 = vpop.permute.xlu0 %741  ;;  %v6184_v11 = vpop.permute.xlu2 %883  ;;  %v9306_v4 = vrot.slane %v6188_v37, 4  ;;  %v659_v60 = vadd.f32 %v655_v15, %v6178_v12  ;;  %v688_v20 = vadd.f32 %v5922_v57, %v660_v31  ;;  %v6239_v57 = vstv %s5093_s28  ;;  %s6339_s28 = sld [smem:[#allocation9 + $0x5b]] }
 0x144   : > { %v6190_v7 = vpop.permute.xlu1 %678  ;;  %9547 = vst [vmem:[#allocation57_spill] sm:$0xff] %v6239_v57 }
 0x145   : > { %v690_v18 = vadd.f32 %v6190_v7, %v662_v13  ;;  %v1300_v13 = vmul.f32 %v6200_v39, %v5970_v36  ;;  %v709_v39 = vsel %vm708_vm8, %v5947_v17, %v6059_v21  ;;  %v1270_v17 = vmul.f32 %v6153_v44, %v5981_v46 }
 0x147   : > { %v718_v15 = vadd.f32 %v6095_v0, %v690_v18  ;;  %v1304_v61 = vrot.slane %v1300_v13, 4  ;;  %v6234_v18 = vstv %s5092_s22  ;;  %s6332_s22 = sld [smem:[#allocation9 + $0x54]] }
 0x148   : > { %9546 = vst [vmem:[#allocation56_spill] sm:$0xff] %v6234_v18  ;;  %v1319_v31 = vmul.f32 %v6234_v18, %v5981_v46  ;;  %v6251_v47 = vmul.f32 %v6234_v18, %v5970_v36  ;;  %v9549_v18 = vrot.slane %v5801_v33, 1 }
 0x149   : > { %1285 = vrot.lane.b32.xlu0 %v1278_v10, %s5466_s20  ;;  %1283 = vrot.lane.b32.xlu2 %v9306_v4, %s5466_s20  ;;  %v6224_v10 = vmul.f32 %v6204_v19, %v1998_v34  ;;  %v1306_v30 = vsel %vm241_vm0, %v1304_v61, %v1305_v8 }
 0x14a   : > { %1250 = vrot.lane.b32.xlu1 %v1243_v22, %s5465_s13  ;;  %v687_v22 = vadd.f32 %v681_v40, %v659_v60  ;;  %v716_v60 = vadd.f32 %v6059_v21, %v688_v20  ;;  %v2011_v40 = vrot.slane %v2001_v42, 2  ;;  %v6260_v21 = vmul.f32 %v6239_v57, %v5970_v36 }
 0x14b   : > { %v6218_v16 = vpop.permute.xlu0 %861  ;;  %v6220_v32 = vpop.permute.xlu2 %937  ;;  %9545 = vst [vmem:[#allocation55_spill] sm:$0xff] %v6224_v10  ;;  %v9322_v34 = vrot.slane %v6224_v10, 2  ;;  %v1322_v42 = vrot.slane %v6251_v47, 4 }
 0x14c   : > { %v6226_v4 = vpop.permute.xlu1 %726 }
 0x14d   : > { %v733_v6 = vadd.f32 %v6226_v4, %v718_v15 }
 0x14f   : > { %v748_v27 = vadd.f32 %v6182_v63, %v733_v6  ;;  %v715_v6 = vadd.f32 %v709_v39, %v687_v22  ;;  %v1323_v39 = vrot.slane %v1319_v31, 4  ;;  %v731_v22 = vadd.f32 %v6083_v24, %v716_v60 }
 0x150   : > { %v6282_v31 = vmul.f32 %v5786_v26, %v5719_v52  ;;  %v784_v52 = vmul.f32 %v5786_v26, %v5717_v51 }
 0x151   : > { %1309 = vrot.lane.b32.xlu0 %v1306_v30, %s5469_s21  ;;  %1307 = vrot.lane.b32.xlu2 %v1304_v61, %s5469_s21  ;;  %v763_v15 = vadd.f32 %v6119_v41, %v748_v27  ;;  %v6265_v61 = vsel %vm958_vm4, %v2011_v40, %v9322_v34  ;;  %v730_v20 = vadd.f32 %v6083_v24, %v715_v6  ;;  %v1340_v40 = vrot.slane %v6260_v21, 4 }
 0x152   : > { %1281 = vrot.lane.b32.xlu1 %v1275_v53, %s5466_s20  ;;  %9548 = vst [vmem:[#allocation58_spill] sm:$0xff] %v6265_v61  ;;  %v1279_v53 = vrot.slane %v1270_v17, 4  ;;  %v6278_v34 = vstv %s5094_s7  ;;  %v1324_v17 = vsel %vm241_vm0, %v1322_v42, %v1323_v39  ;;  %v9551_v24 = vrot.slane %v6188_v37, 4  ;;  %v6309_v39 = vld [vmem:[#allocation2 + $0x20] sm:$0x3]  ;;  %s6397_s7 = sld [smem:[#allocation9 + $0x26]] }
 0x153   : > { %v6253_v8 = vpop.permute.xlu0 %919  ;;  %v6255_v13 = vpop.permute.xlu2 %917  ;;  %9550 = vst [vmem:[#allocation59_spill] sm:$0xff] %v6278_v34  ;;  %v1355_v6 = vmul.f32 %v6278_v34, %v5981_v46  ;;  %v745_v33 = vadd.f32 %v5978_v48, %v730_v20  ;;  %v1354_v37 = vmul.f32 %v6278_v34, %v5970_v36  ;;  %v1337_v36 = vmul.f32 %v6239_v57, %v5981_v46 }
 0x154   : > { %v6267_v30 = vpop.permute.xlu1 %771  ;;  %v1280_v60 = vsel %vm241_vm0, %v9551_v24, %v1279_v53  ;;  %v6311_v53 = vstv %s5074_s9  ;;  %s5099_s9 = sld [smem:[#allocation9 + $0x27]] }
 0x155   : > { %v778_v27 = vadd.f32 %v6267_v30, %v763_v15  ;;  %9553 = vst [vmem:[#allocation61_spill] sm:$0xff] %v6311_v53  ;;  %v1358_v26 = vrot.slane %v1354_v37, 4  ;;  %v2256_v37 = vld [vmem:[#allocation3 + $0x18] sm:$0xfe] }
 0x157   : > { %v806_v44 = vadd.f32 %v9549_v18, %v778_v27  ;;  %v746_v18 = vadd.f32 %v5978_v48, %v731_v22  ;;  %v1359_v22 = vrot.slane %v1355_v6, 4  ;;  %v760_v27 = vadd.f32 %v6116_v58, %v745_v33 }
 0x158   : > { %v6336_v6 = vmul.f32 %v6311_v53, %v5909_v43 }
 0x159   : > { %v839_v47 = vadd.f32 %v6144_v49, %v806_v44  ;;  %1343 = vrot.lane.b32.xlu0 %v1340_v40, %s5467_s27  ;;  %1327 = vrot.lane.b32.xlu2 %v1324_v17, %s5468_s4  ;;  %v6307_v44 = vld [vmem:[#allocation2 + $0x10] sm:$0xfc]  ;;  %v761_v17 = vadd.f32 %v6116_v58, %v746_v18  ;;  %v1360_v33 = vsel %vm241_vm0, %v1358_v26, %v1359_v22  ;;  %v2258_v22 = vld [vmem:[#allocation3 + $0x28] sm:$0x1] }
 0x15a   : > { %1287 = vrot.lane.b32.xlu1 %v1280_v60, %s5466_s20  ;;  %v6324_v60 = vstv %s6272_s10  ;;  %v775_v34 = vadd.f32 %v6108_v1, %v760_v27  ;;  %s5100_s10 = sld [smem:[#allocation9 + $0x28]] }
 0x15b   : > { %v6302_v15 = vpop.permute.xlu0 %824  ;;  %v6304_v21 = vpop.permute.xlu2 %992  ;;  %v872_v48 = vadd.f32 %v6218_v16, %v839_v47  ;;  %9554 = vst [vmem:[#allocation62_spill] sm:$0xff] %v6324_v60  ;;  %v793_v47 = vrot.slane %v784_v52, 1  ;;  %v6328_v51 = vmul.f32 %v6324_v60, %v6307_v44  ;;  %v1402_v46 = vmul.f32 %v6324_v60, %v6309_v39 }
 0x15c   : > { %9552 = vst [vmem:[#allocation60_spill] sm:$0xff] %v6304_v21  ;;  %v6314_v20 = vpop.permute.xlu1 %901  ;;  %v6344_v18 = vmul.f32 %v6324_v60, %v5988_v50  ;;  %v1341_v52 = vrot.slane %v1337_v36, 4  ;;  %v776_v57 = vadd.f32 %v6108_v1, %v761_v17  ;;  %v2586_v21 = vld [vmem:[#allocation3 + $0x18] sm:$0xf8] }
 0x15d   : > { %v890_v24 = vadd.f32 %v6184_v11, %v872_v48  ;;  %v6347_v48 = vstv %s6290_s11  ;;  %v1410_v61 = vrot.slane %v1402_v46, 5  ;;  %s5101_s11 = sld [smem:[#allocation9 + $0x29]] }
 0x15e   : > { %9555 = vst [vmem:[#allocation63_spill] sm:$0xff] %v6347_v48  ;;  %v2263_v46 = vmul.f32 %v6347_v48, %v2258_v22  ;;  %v804_v1 = vadd.f32 %v5837_v9, %v776_v57 }
 0x15f   : > { %v908_v58 = vadd.f32 %v6314_v20, %v890_v24  ;;  %v9556_v24 = vrot.slane %v6282_v31, 1 }
 0x160   : > { %v2272_v57 = vrot.slane %v2263_v46, 4  ;;  %v9564_v46 = vrot.slane %v6344_v18, 5 }
 0x161   : > { %v926_v43 = vadd.f32 %v6253_v8, %v908_v58  ;;  %1363 = vrot.lane.b32.xlu0 %v1360_v33, %s5470_s5  ;;  %1361 = vrot.lane.b32.xlu2 %v1358_v26, %s5470_s5  ;;  %v795_v10 = vsel %vm792_vm1, %v793_v47, %v9556_v24  ;;  %v6364_v58 = vmul.f32 %v6347_v48, %v2256_v37  ;;  %v6369_v24 = vstv %s6318_s12  ;;  %v2423_v33 = vld [vmem:[#allocation3 + $0x28] sm:$0x3]  ;;  %s5103_s12 = sld [smem:[#allocation9 + $0x2b]] }
 0x162   : > { %1325 = vrot.lane.b32.xlu1 %v1322_v42, %s5468_s4  ;;  %v1342_v47 = vsel %vm241_vm0, %v1340_v40, %v1341_v52  ;;  %9557 = vst [vmem:[#allocation64_spill] sm:$0xff] %v6369_v24  ;;  %v2421_v42 = vld [vmem:[#allocation3 + $0x18] sm:$0xfc]  ;;  %v803_v36 = vadd.f32 %v795_v10, %v775_v34  ;;  %v9558_v37 = vrot.slane %v6336_v6, 2  ;;  %v2588_v40 = vld [vmem:[#allocation3 + $0x28] sm:$0x7]  ;;  %v830_v52 = vsel %vm680_vm7, %v6035_v14, %v6302_v15 }
 0x163   : > { %v900_v27 = vpop.permute.xlu0 %899  ;;  %v6359_v19 = vpop.permute.xlu2 %1023  ;;  %v944_v17 = vadd.f32 %v6220_v32, %v926_v43  ;;  %v657_v43 = vmul.f32 %v5297_v25, %v6151_v45  ;;  %v9559_v10 = vrot.slane %v6328_v51, 5  ;;  %v6388_v25 = vmul.f32 %v6369_v24, %v6307_v44 }
 0x164   : > { %v858_v26 = vpop.permute.xlu1 %857  ;;  %v836_v45 = vadd.f32 %v830_v52, %v803_v36  ;;  %v837_v34 = vadd.f32 %v6302_v15, %v804_v1  ;;  %v9565_v48 = vrot.slane %v6364_v58, 4 }
 0x165   : > { %v6376_v38 = vadd.f32 %v9558_v37, %v944_v17  ;;  %v863_v22 = vsel %vm708_vm8, %v6136_v23, %v858_v26  ;;  %v1411_v9 = vsel %vm1384_vm5, %v9559_v10, %v1410_v61  ;;  %v6392_v17 = vstv %s6332_s22  ;;  %s5104_s22 = sld [smem:[#allocation9 + $0x2c]] }
 0x166   : > { %9560 = vst [vmem:[#allocation65_spill] sm:$0xff] %v6392_v17  ;;  %v6395_v37 = vstv %s6339_s28  ;;  %v6400_v14 = vmul.f32 %v6392_v17, %v2421_v42  ;;  %v2428_v23 = vmul.f32 %v6392_v17, %v2423_v33  ;;  %v6415_v42 = vsel %vm241_vm0, %v9565_v48, %v2272_v57  ;;  %s5081_s28 = sld [smem:[#allocation9 + $0x15]] }
 0x167   : > { %9561 = vst [vmem:[#allocation66_spill] sm:$0xff] %v6395_v37  ;;  %v6404_v61 = vmul.f32 %v6395_v37, %v2586_v21  ;;  %v2593_v10 = vmul.f32 %v6395_v37, %v2588_v40  ;;  %v661_v15 = vadd.f32 %v657_v43, %v6178_v12  ;;  %v869_v1 = vadd.f32 %v863_v22, %v836_v45 }
 0x168   : > { %9562 = vst [vmem:[#allocation67_spill] sm:$0xff] %v6400_v14  ;;  %v9337_v21 = vrot.slane %v6400_v14, 5  ;;  %v2437_v33 = vrot.slane %v2428_v23, 5  ;;  %v870_v52 = vadd.f32 %v858_v26, %v837_v34  ;;  %v1434_v48 = vmul.f32 %v6369_v24, %v5988_v50 }
 0x169   : > { %9563 = vst [vmem:[#allocation68_spill] sm:$0xff] %v6404_v61  ;;  %1418 = vrot.lane.b32.xlu0 %v1411_v9, %s5465_s13  ;;  %1416 = vrot.lane.b32.xlu2 %v9564_v46, %s5465_s13  ;;  %v9341_v36 = vrot.slane %v6404_v61, 6  ;;  %v2602_v40 = vrot.slane %v2593_v10, 6  ;;  %v682_v57 = vsel %vm680_vm7, %v6008_v3, %v6190_v7  ;;  %v6445_v34 = vmul.f32 %v6311_v53, %v5878_v55 }
 0x16a   : > { %1345 = vrot.lane.b32.xlu1 %v1342_v47, %s5467_s27  ;;  %v950_v47 = vmul.f32 %v6311_v53, %v5876_v54  ;;  %v6435_v45 = vsel %vm1384_vm5, %v9337_v21, %v2437_v33  ;;  %v1441_v54 = vrot.slane %v6388_v25, 5  ;;  %v951_v3 = vmul.f32 %v6311_v53, %v5930_v62 }
 0x16b   : > { %v6421_v9 = vpop.permute.xlu0 %988  ;;  %v6423_v46 = vpop.permute.xlu2 %1047  ;;  %9566 = vst [vmem:[#allocation69_spill] sm:$0xff] %v6435_v45  ;;  %v6440_v26 = vsel %vm1550_vm6, %v9341_v36, %v2602_v40  ;;  %v689_v7 = vadd.f32 %v682_v57, %v661_v15  ;;  %v1442_v21 = vrot.slane %v1434_v48, 5  ;;  %v6450_v61 = vstv %s6397_s7  ;;  %s5105_s7 = sld [smem:[#allocation9 + $0x2d]] }
 0x16c   : > { %v882_v23 = vpop.permute.xlu1 %881  ;;  %9567 = vst [vmem:[#allocation70_spill] sm:$0xff] %v6440_v26  ;;  %v959_v12 = vrot.slane %v950_v47, 2  ;;  %v1436_v40 = vmul.f32 %v6369_v24, %v5990_v56  ;;  %v1403_v55 = vmul.f32 %v6324_v60, %v5990_v56  ;;  %v710_v62 = vsel %vm708_vm8, %v6085_v29, %v6095_v0 }
 0x16d   : > { %v887_v43 = vadd.f32 %v882_v23, %v869_v1  ;;  %v888_v22 = vadd.f32 %v882_v23, %v870_v52  ;;  %9568 = vst [vmem:[#allocation71_spill] sm:$0xff] %v6450_v61  ;;  %v9342_v25 = vrot.slane %v6445_v34, 2  ;;  %v962_v15 = vrot.slane %v951_v3, 2 }
 0x16e   : > { %v717_v1 = vadd.f32 %v710_v62, %v689_v7  ;;  %v1466_v23 = vmul.f32 %v6450_v61, %v5988_v50  ;;  %v1412_v7 = vrot.slane %v1403_v55, 5  ;;  %v9570_v62 = vrot.slane %v6336_v6, 2 }
 0x16f   : > { %v905_v10 = vadd.f32 %v900_v27, %v887_v43  ;;  %v906_v33 = vadd.f32 %v900_v27, %v888_v22  ;;  %v9569_v27 = vrot.slane %v6328_v51, 5  ;;  %v961_v29 = vsel %vm958_vm4, %v959_v12, %v9342_v25 }
 0x170   : > { %v1445_v51 = vrot.slane %v1436_v40, 5  ;;  %v732_v43 = vadd.f32 %v6226_v4, %v717_v1  ;;  %v1435_v12 = vmul.f32 %v6369_v24, %v6309_v39  ;;  %v9572_v55 = vrot.slane %v6344_v18, 5 }
 0x171   : > { %1449 = vrot.lane.b32.xlu0 %v1442_v21, %s5466_s20  ;;  %1447 = vrot.lane.b32.xlu2 %v1441_v54, %s5466_s20  ;;  %v924_v47 = vadd.f32 %v6255_v13, %v906_v33  ;;  %v923_v57 = vadd.f32 %v6255_v13, %v905_v10  ;;  %v964_v33 = vsel %vm958_vm4, %v962_v15, %v9570_v62  ;;  %v1470_v10 = vrot.slane %v1466_v23, 5 }
 0x172   : > { %1414 = vrot.lane.b32.xlu1 %v9569_v27, %s5465_s13  ;;  %v6480_v27 = vstv %s5099_s9  ;;  %v1446_v40 = vsel %vm1384_vm5, %v1442_v21, %v1445_v51  ;;  %v747_v6 = vadd.f32 %v6182_v63, %v732_v43  ;;  %v1413_v15 = vsel %vm1384_vm5, %v9572_v55, %v1412_v7  ;;  %s5106_s9 = sld [smem:[#allocation9 + $0x2e]] }
 0x173   : > { %v6465_v52 = vpop.permute.xlu0 %994  ;;  %v6467_v48 = vpop.permute.xlu2 %1067  ;;  %9571 = vst [vmem:[#allocation72_spill] sm:$0xff] %v6480_v27  ;;  %v1485_v4 = vmul.f32 %v6480_v27, %v5990_v56  ;;  %v1484_v1 = vmul.f32 %v6480_v27, %v5988_v50  ;;  %v6507_v43 = vstv %s5100_s10  ;;  %s5107_s10 = sld [smem:[#allocation9 + $0x2f]] }
 0x174   : > { %v936_v0 = vpop.permute.xlu1 %935  ;;  %9573 = vst [vmem:[#allocation73_spill] sm:$0xff] %v6507_v43  ;;  %v1503_v7 = vmul.f32 %v6507_v43, %v5990_v56 }
 0x175   : > { %v941_v22 = vadd.f32 %v936_v0, %v923_v57  ;;  %v942_v3 = vadd.f32 %v936_v0, %v924_v47  ;;  %v1443_v57 = vrot.slane %v1435_v12, 5  ;;  %v1489_v63 = vrot.slane %v1485_v4, 5 }
 0x176   : > { %v1488_v0 = vrot.slane %v1484_v1, 5 }
 0x177   : > { %v6482_v13 = vadd.f32 %v961_v29, %v941_v22  ;;  %v970_v36 = vadd.f32 %v964_v33, %v942_v3  ;;  %v762_v29 = vadd.f32 %v6119_v41, %v747_v6  ;;  %v1444_v51 = vsel %vm1384_vm5, %v1441_v54, %v1443_v57  ;;  %v6536_v57 = vld [vmem:[#allocation2 + $0x10] sm:$0xf8] }
 0x178   : > { %v1490_v22 = vsel %vm1384_vm5, %v1488_v0, %v1489_v63  ;;  %v6510_v3 = vstv %s5101_s11  ;;  %v1467_v41 = vmul.f32 %v6450_v61, %v5990_v56  ;;  %v9575_v54 = vrot.slane %v6282_v31, 1  ;;  %s5108_s11 = sld [smem:[#allocation9 + $0x30]] }
 0x179   : > { %1473 = vrot.lane.b32.xlu0 %v1470_v10, %s5469_s21  ;;  %1453 = vrot.lane.b32.xlu2 %v1446_v40, %s5466_s20  ;;  %v777_v18 = vadd.f32 %v6267_v30, %v762_v29  ;;  %9574 = vst [vmem:[#allocation74_spill] sm:$0xff] %v6510_v3  ;;  %v1502_v30 = vmul.f32 %v6507_v43, %v5988_v50  ;;  %v1507_v6 = vrot.slane %v1503_v7, 5 }
 0x17a   : > { %1420 = vrot.lane.b32.xlu1 %v1413_v15, %s5465_s13  ;;  %v6529_v40 = vmul.f32 %v6510_v3, %v5988_v50  ;;  %v1471_v55 = vrot.slane %v1467_v41, 5  ;;  %v831_v15 = vsel %vm680_vm7, %v6140_v2, %v6144_v49  ;;  %v864_v2 = vsel %vm708_vm8, %v6077_v5, %v6218_v16 }
 0x17b   : > { %v6498_v21 = vpop.permute.xlu0 %1025  ;;  %v6500_v47 = vpop.permute.xlu2 %1101  ;;  %v805_v62 = vadd.f32 %v9575_v54, %v777_v18  ;;  %v1506_v1 = vrot.slane %v1502_v30, 5  ;;  %v6563_v5 = vstv %s5104_s22  ;;  %s5111_s22 = sld [smem:[#allocation9 + $0x33]] }
 0x17c   : > { %v6502_v23 = vpop.permute.xlu1 %990  ;;  %v1524_v63 = vrot.slane %v6529_v40, 5  ;;  %v1472_v50 = vsel %vm1384_vm5, %v1470_v10, %v1471_v55  ;;  %9577 = vst [vmem:[#allocation76_spill] sm:$0xff] %v6563_v5  ;;  %v1005_v40 = vadd.f32 %v6465_v52, %v6376_v38  ;;  %v6575_v55 = vstv %s5081_s28  ;;  %s5112_s28 = sld [smem:[#allocation9 + $0x34]] }
 0x17d   : > { %v838_v31 = vadd.f32 %v831_v15, %v805_v62  ;;  %v1508_v29 = vsel %vm1384_vm5, %v1506_v1, %v1507_v6  ;;  %v1599_v6 = vmul.f32 %v6563_v5, %v6536_v57  ;;  %9578 = vst [vmem:[#allocation77_spill] sm:$0xff] %v6575_v55 }
 0x17f   : > { %v871_v18 = vadd.f32 %v864_v2, %v838_v31 }
 0x181   : > { %1493 = vrot.lane.b32.xlu0 %v1490_v22, %s5468_s4  ;;  %1491 = vrot.lane.b32.xlu2 %v1488_v0, %s5468_s4  ;;  %v6540_v0 = vstv %s5103_s12  ;;  %v889_v54 = vadd.f32 %v6184_v11, %v871_v18  ;;  %v1521_v11 = vmul.f32 %v6510_v3, %v5990_v56  ;;  %v1115_v56 = vmul.f32 %v6575_v55, %v6065_v28  ;;  %s5110_s12 = sld [smem:[#allocation9 + $0x32]] }
 0x182   : > { %1451 = vrot.lane.b32.xlu1 %v1444_v51, %s5466_s20  ;;  %9576 = vst [vmem:[#allocation75_spill] sm:$0xff] %v6540_v0  ;;  %v6547_v49 = vmul.f32 %v6540_v0, %v6536_v57  ;;  %v1003_v51 = vadd.f32 %v6502_v23, %v970_v36  ;;  %v1567_v10 = vmul.f32 %v6540_v0, %v5998_v59  ;;  %v6622_v3 = vstv %s5105_s7  ;;  %s6773_s7 = sld [smem:[#allocation9 + $0x36]] }
 0x183   : > { %v6523_v33 = vpop.permute.xlu0 %1049  ;;  %v6525_v12 = vpop.permute.xlu2 %1135  ;;  %v1569_v36 = vmul.f32 %v6540_v0, %v6002_v35  ;;  %v907_v15 = vadd.f32 %v6314_v20, %v889_v54  ;;  %v1602_v28 = vmul.f32 %v6563_v5, %v6002_v35 }
 0x184   : > { %v6531_v4 = vpop.permute.xlu1 %1021  ;;  %v1574_v30 = vrot.slane %v6547_v49, 6  ;;  %v1036_v62 = vadd.f32 %v6359_v19, %v1003_v51  ;;  %v1575_v16 = vrot.slane %v1567_v10, 6  ;;  %v6584_v49 = vld [vmem:[#allocation2 + $0x20] sm:$0x7]  ;;  %v1525_v10 = vrot.slane %v1521_v11, 5 }
 0x185   : > { %v1578_v18 = vrot.slane %v1569_v36, 6  ;;  %v1601_v20 = vmul.f32 %v6563_v5, %v6584_v49  ;;  %v925_v54 = vadd.f32 %v6253_v8, %v907_v15  ;;  %v1568_v25 = vmul.f32 %v6540_v0, %v6584_v49 }
 0x186   : > { %v1526_v8 = vsel %vm1384_vm5, %v1524_v63, %v1525_v10  ;;  %v1600_v15 = vmul.f32 %v6563_v5, %v5998_v59 }
 0x187   : > { %v1579_v36 = vsel %vm1550_vm6, %v1575_v16, %v1578_v18 }
 0x189   : > { %1527 = vrot.lane.b32.xlu0 %v1524_v63, %s5470_s5  ;;  %1511 = vrot.lane.b32.xlu2 %v1508_v29, %s5467_s27  ;;  %v9579_v63 = vld [vmem:[#allocation60_spill] sm:$0xff] }
 0x18a   : > { %1475 = vrot.lane.b32.xlu1 %v1472_v50, %s5469_s21  ;;  %v1054_v50 = vadd.f32 %v6423_v46, %v1036_v62  ;;  %v997_v10 = vsel %vm680_vm7, %v9579_v63, %v6465_v52  ;;  %9581 = vst [vmem:[#allocation60_spill] sm:$0xff] %v6622_v3  ;;  %v1633_v52 = vmul.f32 %v6622_v3, %v6002_v35 }
 0x18b   : > { %v6554_v22 = vpop.permute.xlu0 %1083  ;;  %v6556_v7 = vpop.permute.xlu2 %1166 }
 0x18c   : > { %v1028_v41 = vpop.permute.xlu1 %1027 }
 0x18d   : > { %v1038_v31 = vadd.f32 %v1028_v41, %v1005_v40 }
 0x18f   : > { %v1056_v40 = vadd.f32 %v6523_v33, %v1038_v31  ;;  %v1609_v31 = vrot.slane %v1601_v20, 6 }
 0x191   : > { %1582 = vrot.lane.b32.xlu0 %v1575_v16, %s5465_s13  ;;  %1580 = vrot.lane.b32.xlu2 %v1574_v30, %s5465_s13  ;;  %v943_v16 = vadd.f32 %v6220_v32, %v925_v54  ;;  %v9580_v32 = vrot.slane %v6445_v34, 2 }
 0x192   : > { %1509 = vrot.lane.b32.xlu1 %v1506_v1, %s5467_s27  ;;  %v1607_v1 = vrot.slane %v1599_v6, 6  ;;  %v1119_v6 = vrot.slane %v1115_v56, 3 }
 0x193   : > { %v6579_v29 = vpop.permute.xlu0 %1103  ;;  %v6581_v38 = vpop.permute.xlu2 %1199  ;;  %v971_v54 = vadd.f32 %v9580_v32, %v943_v16 }
 0x194   : > { %v6586_v2 = vpop.permute.xlu1 %1065  ;;  %v1610_v20 = vsel %vm1550_vm6, %v1607_v1, %v1609_v31 }
 0x195   : > { %v1072_v51 = vadd.f32 %v6586_v2, %v1054_v50 }
 0x197   : > { %v1090_v62 = vadd.f32 %v6554_v22, %v1072_v51  ;;  %v1074_v51 = vadd.f32 %v6467_v48, %v1056_v40 }
 0x199   : > { %v1108_v11 = vadd.f32 %v6500_v47, %v1090_v62  ;;  %1613 = vrot.lane.b32.xlu0 %v1607_v1, %s5466_s20  ;;  %1586 = vrot.lane.b32.xlu2 %v1579_v36, %s5465_s13  ;;  %v1576_v62 = vrot.slane %v1568_v25, 6  ;;  %v1611_v36 = vrot.slane %v1602_v28, 6  ;;  %v1030_v25 = vsel %vm708_vm8, %v6498_v21, %v1028_v41 }
 0x19a   : > { %1529 = vrot.lane.b32.xlu1 %v1526_v8, %s5470_s5  ;;  %v1608_v8 = vrot.slane %v1600_v15, 6  ;;  %v6627_v28 = vstv %s5106_s9  ;;  %v1004_v1 = vadd.f32 %v997_v10, %v971_v54  ;;  %s5113_s9 = sld [smem:[#allocation9 + $0x35]] }
 0x19b   : > { %v1123_v50 = vadd.f32 %v1119_v6, %v1108_v11  ;;  %v6609_v18 = vpop.permute.xlu0 %1151  ;;  %v6611_v56 = vpop.permute.xlu2 %1252  ;;  %v1577_v5 = vsel %vm1550_vm6, %v1574_v30, %v1576_v62  ;;  %9582 = vst [vmem:[#allocation78_spill] sm:$0xff] %v6627_v28  ;;  %v6642_v15 = vmul.f32 %v6627_v28, %v5998_v59  ;;  %v6646_v62 = vstv %s5107_s10  ;;  %s5115_s10 = sld [smem:[#allocation9 + $0x37]] }
 0x19c   : > { %v1086_v0 = vpop.permute.xlu1 %1085  ;;  %v1612_v40 = vsel %vm1550_vm6, %v1608_v8, %v1611_v36  ;;  %v1037_v30 = vadd.f32 %v1030_v25, %v1004_v1  ;;  %9583 = vst [vmem:[#allocation79_spill] sm:$0xff] %v6646_v62  ;;  %v1669_v63 = vmul.f32 %v6646_v62, %v6002_v35  ;;  %v1668_v10 = vmul.f32 %v6646_v62, %v5998_v59 }
 0x19d   : > { %v1092_v53 = vadd.f32 %v1086_v0, %v1074_v51  ;;  %v1141_v54 = vadd.f32 %v6525_v12, %v1123_v50 }
 0x19e   : > { %v1055_v51 = vadd.f32 %v6523_v33, %v1037_v30  ;;  %v1672_v30 = vrot.slane %v1668_v10, 6  ;;  %v6685_v10 = vld [vmem:[#allocation3] sm:$0xe0] }
 0x19f   : > { %v1110_v11 = vadd.f32 %v6579_v29, %v1092_v53  ;;  %v1632_v53 = vmul.f32 %v6622_v3, %v5998_v59 }
 0x1a0   : > { %v1073_v33 = vadd.f32 %v6467_v48, %v1055_v51  ;;  %v1651_v51 = vmul.f32 %v6627_v28, %v6002_v35 }
 0x1a1   : > { %v1125_v34 = vadd.f32 %v1119_v6, %v1110_v11  ;;  %1619 = vrot.lane.b32.xlu0 %v1612_v40, %s5466_s20  ;;  %1617 = vrot.lane.b32.xlu2 %v1610_v20, %s5466_s20  ;;  %v1637_v6 = vrot.slane %v1633_v52, 6  ;;  %v1636_v16 = vrot.slane %v1632_v53, 6  ;;  %v1673_v40 = vrot.slane %v1669_v63, 6 }
 0x1a2   : > { %1584 = vrot.lane.b32.xlu1 %v1577_v5, %s5465_s13  ;;  %v1654_v5 = vrot.slane %v6642_v15, 6  ;;  %v1091_v52 = vadd.f32 %v1086_v0, %v1073_v33  ;;  %v6667_v15 = vld [vmem:[#allocation2 + $0x10] sm:$0xff] }
 0x1a3   : > { %v6636_v21 = vpop.permute.xlu0 %1177  ;;  %v6638_v41 = vpop.permute.xlu2 %1283  ;;  %v1638_v36 = vsel %vm1550_vm6, %v1636_v16, %v1637_v6  ;;  %v1143_v11 = vadd.f32 %v6525_v12, %v1125_v34  ;;  %v6671_v6 = vmul.f32 %v6667_v15, %v6575_v55  ;;  %v1674_v0 = vsel %vm1550_vm6, %v1672_v30, %v1673_v40 }
 0x1a4   : > { %v1134_v31 = vpop.permute.xlu1 %1133  ;;  %v1109_v63 = vadd.f32 %v6579_v29, %v1091_v52 }
 0x1a9   : > { %1657 = vrot.lane.b32.xlu0 %v1654_v5, %s5468_s4  ;;  %1641 = vrot.lane.b32.xlu2 %v1638_v36, %s5469_s21  ;;  %v996_v36 = vsel %vm680_vm7, %v6421_v9, %v6502_v23  ;;  %v1118_v9 = vrot.slane %v6671_v6, 3 }
 0x1aa   : > { %1615 = vrot.lane.b32.xlu1 %v1608_v8, %s5466_s20  ;;  %v6663_v8 = vstv %s5108_s11  ;;  %s5117_s11 = sld [smem:[#allocation9 + $0x39]] }
 0x1ab   : > { %v6657_v20 = vpop.permute.xlu0 %1248  ;;  %v6659_v32 = vpop.permute.xlu2 %1307  ;;  %9584 = vst [vmem:[#allocation80_spill] sm:$0xff] %v6663_v8  ;;  %v1687_v48 = vmul.f32 %v6663_v8, %v6002_v35  ;;  %v1686_v33 = vmul.f32 %v6663_v8, %v5998_v59  ;;  %v1029_v35 = vsel %vm708_vm8, %v6531_v4, %v6359_v19  ;;  %v1137_v59 = vsel %vm680_vm7, %v1134_v31, %v6525_v12 }
 0x1ac   : > { %v1154_v25 = vpop.permute.xlu1 %1153  ;;  %v1655_v19 = vrot.slane %v1651_v51, 6  ;;  %v1124_v4 = vadd.f32 %v1118_v9, %v1109_v63  ;;  %v9586_v63 = vld [vmem:[#allocation34_spill] sm:$0xff] }
 0x1ad   : > { %v1159_v1 = vadd.f32 %v1154_v25, %v1141_v54  ;;  %v1161_v53 = vadd.f32 %v1154_v25, %v1143_v11  ;;  %v1691_v54 = vrot.slane %v1687_v48, 6 }
 0x1af   : > { %v1170_v50 = vadd.f32 %v6556_v7, %v1159_v1  ;;  %v1172_v34 = vadd.f32 %v6556_v7, %v1161_v53  ;;  %v6704_v1 = vstv %s5110_s12  ;;  %s5118_s12 = sld [smem:[#allocation9 + $0x3a]] }
 0x1b0   : > { %9585 = vst [vmem:[#allocation81_spill] sm:$0xff] %v6704_v1  ;;  %v1717_v48 = vmul.f32 %v6704_v1, %v6685_v10 }
 0x1b1   : > { %1677 = vrot.lane.b32.xlu0 %v1674_v0, %s5467_s27  ;;  %1675 = vrot.lane.b32.xlu2 %v1672_v30, %s5467_s27  ;;  %v1181_v23 = vadd.f32 %v6636_v21, %v1170_v50  ;;  %v1183_v29 = vadd.f32 %v6636_v21, %v1172_v34  ;;  %v1690_v50 = vrot.slane %v1686_v33, 6  ;;  %v1142_v34 = vadd.f32 %v1137_v59, %v1124_v4  ;;  %v9588_v33 = vld [vmem:[#allocation39_spill] sm:$0xff] }
 0x1b2   : > { %1639 = vrot.lane.b32.xlu1 %v1636_v16, %s5469_s21  ;;  %v1002_v16 = vadd.f32 %v996_v36, %v6482_v13  ;;  %v1155_v13 = vsel %vm708_vm8, %v6609_v18, %v1154_v25  ;;  %v1656_v36 = vsel %vm1550_vm6, %v1654_v5, %v1655_v19  ;;  %v1705_v25 = vld [vmem:[#allocation3 + $0x10] sm:$0x1f] }
 0x1b3   : > { %v6695_v11 = vpop.permute.xlu0 %1254  ;;  %v6697_v40 = vpop.permute.xlu2 %1327  ;;  %v1692_v0 = vsel %vm1550_vm6, %v1690_v50, %v1691_v54  ;;  %v1160_v51 = vadd.f32 %v1155_v13, %v1142_v34  ;;  %v1719_v19 = vmul.f32 %v6704_v1, %v1705_v25  ;;  %v9590_v34 = vld [vmem:[#allocation31_spill] sm:$0xff] }
 0x1b4   : > { %v6702_v52 = vpop.permute.xlu1 %1188  ;;  %v1035_v6 = vadd.f32 %v1029_v35, %v1002_v16  ;;  %v9587_v35 = vrot.slane %v9586_v63, 4 }
 0x1b5   : > { %v1192_v53 = vadd.f32 %v6702_v52, %v1181_v23  ;;  %v1194_v30 = vadd.f32 %v6702_v52, %v1183_v29  ;;  %v1171_v5 = vadd.f32 %v6556_v7, %v1160_v51  ;;  %v6745_v51 = vld [vmem:[#allocation3 + $0x8] sm:$0xe0] }
 0x1b6   : > { %v1053_v18 = vadd.f32 %v6423_v46, %v1035_v6 }
 0x1b7   : > { %v1203_v12 = vadd.f32 %v6581_v38, %v1192_v53  ;;  %v1205_v31 = vadd.f32 %v6581_v38, %v1194_v30  ;;  %v6728_v30 = vld [vmem:[#allocation3 + $0x18] sm:$0x1f]  ;;  %v1182_v6 = vadd.f32 %v6636_v21, %v1171_v5 }
 0x1b8   : > { %v1071_v54 = vadd.f32 %v6586_v2, %v1053_v18  ;;  %v1720_v46 = vmul.f32 %v6704_v1, %v6728_v30  ;;  %v9589_v2 = vld [vmem:[#allocation46_spill] sm:$0xff]  ;;  %v6752_v18 = vstv %s5111_s22  ;;  %s5119_s22 = sld [smem:[#allocation9 + $0x3b]] }
 0x1b9   : > { %1725 = vrot.lane.b32.xlu0 %v1717_v48, %s5465_s13  ;;  %1695 = vrot.lane.b32.xlu2 %v1692_v0, %s5470_s5  ;;  %v1230_v23 = vadd.f32 %v9587_v35, %v1203_v12  ;;  %v1232_v29 = vadd.f32 %v9588_v33, %v1205_v31  ;;  %v1213_v12 = vmul.f32 %v9590_v34, %v9589_v2  ;;  %v9591_v31 = vld [vmem:[#allocation44_spill] sm:$0xff] }
 0x1ba   : > { %1659 = vrot.lane.b32.xlu1 %v1656_v36, %s5468_s4  ;;  %v1089_v48 = vadd.f32 %v6554_v22, %v1071_v54  ;;  %v6742_v0 = vmul.f32 %v9590_v34, %v9591_v31  ;;  %9592 = vst [vmem:[#allocation34_spill] sm:$0xff] %v6752_v18  ;;  %v1193_v33 = vadd.f32 %v6702_v52, %v1182_v6 }
 0x1bb   : > { %v1286_v16 = vpop.permute.xlu0 %1285  ;;  %v6723_v4 = vpop.permute.xlu2 %1361  ;;  %v1746_v54 = vmul.f32 %v6752_v18, %v1705_v25  ;;  %v1745_v5 = vmul.f32 %v6752_v18, %v6745_v51 }
 0x1bc   : > { %v6726_v53 = vpop.permute.xlu1 %1250  ;;  %v1107_v22 = vadd.f32 %v6500_v47, %v1089_v48  ;;  %v1204_v47 = vadd.f32 %v6581_v38, %v1193_v33  ;;  %v3690_v33 = vld [vmem:[#allocation2 + $0x38] sm:$0x7] }
 0x1bd   : > { %v1263_v6 = vadd.f32 %v6726_v53, %v1230_v23  ;;  %v1744_v23 = vmul.f32 %v6752_v18, %v6685_v10 }
 0x1be   : > { %v1122_v2 = vadd.f32 %v1118_v9, %v1107_v22 }
 0x1c0   : > { %v1140_v48 = vadd.f32 %v1137_v59, %v1122_v2  ;;  %v3688_v59 = vld [vmem:[#allocation2 + $0x28] sm:$0xf8] }
 0x1c1   : > { %1731 = vrot.lane.b32.xlu0 %v1720_v46, %s5465_s13  ;;  %1729 = vrot.lane.b32.xlu2 %v1719_v19, %s5465_s13  ;;  %v9351_v19 = vrot.slane %v6742_v0, 4  ;;  %v1718_v46 = vmul.f32 %v6704_v1, %v6745_v51 }
 0x1c2   : > { %1693 = vrot.lane.b32.xlu1 %v1690_v50, %s5470_s5  ;;  %v1221_v50 = vrot.slane %v1213_v12, 4  ;;  %v1158_v9 = vadd.f32 %v1155_v13, %v1140_v48 }
 0x1c3   : > { %v1310_v36 = vpop.permute.xlu0 %1309  ;;  %v6747_v63 = vpop.permute.xlu2 %1416 }
 0x1c4   : > { %v6750_v35 = vpop.permute.xlu1 %1281  ;;  %v1222_v25 = vsel %vm241_vm0, %v9351_v19, %v1221_v50  ;;  %v1296_v50 = vadd.f32 %v6638_v41, %v1263_v6  ;;  %v9594_v19 = vld [vmem:[#allocation35_spill] sm:$0xff]  ;;  %v1169_v1 = vadd.f32 %v6556_v7, %v1158_v9  ;;  %v1265_v6 = vadd.f32 %v6695_v11, %v1232_v29 }
 0x1c5   : > { %v6785_v13 = vmul.f32 %v3688_v59, %v9594_v19  ;;  %v3694_v48 = vmul.f32 %v3690_v33, %v9594_v19 }
 0x1c6   : > { %v1180_v29 = vadd.f32 %v6636_v21, %v1169_v1 }
 0x1c7   : > { %9595 = vst [vmem:[#allocation46_spill] sm:$0xff] %v6785_v13  ;;  %v9359_v59 = vrot.slane %v6785_v13, 6  ;;  %v6869_v13 = vld [vmem:[#allocation3 + $0x18] sm:$0x3f] }
 0x1c9   : > { %1756 = vrot.lane.b32.xlu0 %v1746_v54, %s5466_s20  ;;  %1754 = vrot.lane.b32.xlu2 %v1745_v5, %s5466_s20  ;;  %v6775_v54 = vstv %s5112_s28  ;;  %v1231_v5 = vadd.f32 %v1222_v25, %v1204_v47  ;;  %v1257_v47 = vsel %vm680_vm7, %v6611_v56, %v6695_v11  ;;  %v1314_v56 = vadd.f32 %v6659_v32, %v1296_v50  ;;  %s5120_s28 = sld [smem:[#allocation9 + $0x3c]] }
 0x1ca   : > { %1727 = vrot.lane.b32.xlu1 %v1718_v46, %s5465_s13  ;;  %9593 = vst [vmem:[#allocation39_spill] sm:$0xff] %v6775_v54  ;;  %v1771_v46 = vmul.f32 %v6775_v54, %v6745_v51  ;;  %v1772_v2 = vmul.f32 %v6775_v54, %v6728_v30  ;;  %v3703_v54 = vrot.slane %v3694_v48, 6  ;;  %v1191_v48 = vadd.f32 %v6702_v52, %v1180_v29 }
 0x1cb   : > { %v6769_v12 = vpop.permute.xlu0 %1343  ;;  %v6771_v31 = vpop.permute.xlu2 %1447  ;;  %v1264_v34 = vadd.f32 %v1257_v47, %v1231_v5  ;;  %v6810_v5 = vstv %s6773_s7  ;;  %v1747_v47 = vmul.f32 %v6752_v18, %v6728_v30  ;;  %v6920_v18 = vstv %s5119_s22  ;;  %s5122_s7 = sld [smem:[#allocation9 + $0x3e]] }
 0x1cc   : > { %v1288_v22 = vpop.permute.xlu1 %1287  ;;  %v6804_v11 = vsel %vm1550_vm6, %v9359_v59, %v3703_v54  ;;  %9597 = vst [vmem:[#allocation82_spill] sm:$0xff] %v6810_v5  ;;  %s5126_s22 = sld [smem:[#allocation9 + $0x42]] }
 0x1cd   : > { %v1290_v25 = vsel %vm708_vm8, %v1286_v16, %v1288_v22  ;;  %v1298_v9 = vadd.f32 %v1288_v22, %v1265_v6  ;;  %9596 = vst [vmem:[#allocation44_spill] sm:$0xff] %v6804_v11  ;;  %v1801_v22 = vmul.f32 %v6810_v5, %v6745_v51  ;;  %v6849_v11 = vstv %s5117_s11  ;;  %s7045_s11 = sld [smem:[#allocation9 + $0x41]] }
 0x1ce   : > { %v1297_v7 = vadd.f32 %v1290_v25, %v1264_v34  ;;  %9603 = vst [vmem:[#allocation84_spill] sm:$0xff] %v6849_v11 }
 0x1cf   : > { %9607 = vst [vmem:[#allocation85_spill] sm:$0xff] %v6920_v18 }
 0x1d0   : > { %v1315_v54 = vadd.f32 %v1310_v36, %v1297_v7 }
 0x1d1   : > { %1777 = vrot.lane.b32.xlu0 %v1772_v2, %s5469_s21  ;;  %1775 = vrot.lane.b32.xlu2 %v1771_v46, %s5469_s21  ;;  %v6812_v46 = vstv %s5113_s9  ;;  %v1316_v2 = vadd.f32 %v1310_v36, %v1298_v9  ;;  %s5121_s9 = sld [smem:[#allocation9 + $0x3d]] }
 0x1d2   : > { %1752 = vrot.lane.b32.xlu1 %v1744_v23, %s5466_s20  ;;  %9598 = vst [vmem:[#allocation83_spill] sm:$0xff] %v6812_v46  ;;  %v9599_v23 = vld [vmem:[#allocation32_spill] sm:$0xff]  ;;  %v1787_v1 = vmul.f32 %v6812_v46, %v6728_v30  ;;  %v1333_v52 = vadd.f32 %v6697_v40, %v1315_v54  ;;  %v6853_v54 = vld [vmem:[#allocation3 + $0x10] sm:$0x3f] }
 0x1d3   : > { %v1364_v33 = vpop.permute.xlu0 %1363  ;;  %v6798_v8 = vpop.permute.xlu2 %1453  ;;  %v1378_v50 = vmul.f32 %v9599_v23, %v6309_v39  ;;  %v6827_v25 = vmul.f32 %v9599_v23, %v6307_v44  ;;  %v1334_v9 = vadd.f32 %v6697_v40, %v1316_v2  ;;  %v1786_v40 = vmul.f32 %v6812_v46, %v6745_v51 }
 0x1d4   : > { %v6807_v16 = vpop.permute.xlu1 %1325 }
 0x1d5   : > { %v1332_v34 = vadd.f32 %v6807_v16, %v1314_v56  ;;  %v1387_v39 = vrot.slane %v1378_v50, 5  ;;  %v9600_v56 = vld [vmem:[#allocation36_spill] sm:$0xff]  ;;  %v9361_v50 = vrot.slane %v6827_v25, 5 }
 0x1d6   : > { %v9601_v44 = vrot.slane %v9600_v56, 5  ;;  %v1256_v56 = vsel %vm680_vm7, %v6657_v20, %v6726_v53  ;;  %v9605_v20 = vld [vmem:[#allocation40_spill] sm:$0xff] }
 0x1d7   : > { %v1350_v21 = vadd.f32 %v6769_v12, %v1332_v34  ;;  %v1202_v34 = vadd.f32 %v6581_v38, %v1191_v48  ;;  %v1388_v38 = vsel %vm1384_vm5, %v9361_v50, %v1387_v39 }
 0x1d9   : > { %v1368_v6 = vadd.f32 %v6723_v4, %v1350_v21  ;;  %1805 = vrot.lane.b32.xlu0 %v1801_v22, %s5467_s27  ;;  %1792 = vrot.lane.b32.xlu2 %v1787_v1, %s5468_s4  ;;  %v6844_v21 = vstv %s5115_s10  ;;  %s5124_s10 = sld [smem:[#allocation9 + $0x40]] }
 0x1da   : > { %1758 = vrot.lane.b32.xlu1 %v1747_v47, %s5466_s20  ;;  %9602 = vst [vmem:[#allocation36_spill] sm:$0xff] %v6844_v21  ;;  %v1816_v59 = vmul.f32 %v6844_v21, %v6745_v51 }
 0x1db   : > { %v6833_v36 = vpop.permute.xlu0 %1418  ;;  %v6835_v7 = vpop.permute.xlu2 %1491  ;;  %v6841_v29 = vadd.f32 %v9601_v44, %v1368_v6  ;;  %v1817_v6 = vmul.f32 %v6844_v21, %v6728_v30  ;;  %v6865_v44 = vld [vmem:[#allocation3 + $0x8] sm:$0xc0] }
 0x1dc   : > { %v1346_v22 = vpop.permute.xlu1 %1345 }
 0x1dd   : > { %v1351_v1 = vadd.f32 %v1346_v22, %v1333_v52  ;;  %v1352_v47 = vadd.f32 %v1346_v22, %v1334_v9  ;;  %v9604_v52 = vrot.slane %v6742_v0, 4  ;;  %v1859_v22 = vmul.f32 %v6865_v44, %v6849_v11 }
 0x1de   : > { %v1860_v0 = vmul.f32 %v6849_v11, %v6853_v54 }
 0x1df   : > { %v1369_v2 = vadd.f32 %v1364_v33, %v1351_v1  ;;  %v1370_v48 = vadd.f32 %v1364_v33, %v1352_v47  ;;  %v1229_v9 = vadd.f32 %v9604_v52, %v1202_v34  ;;  %v6873_v33 = vmul.f32 %v6869_v13, %v6849_v11 }
 0x1e0   : > { %v1289_v34 = vsel %vm708_vm8, %v6750_v35, %v6638_v41  ;;  %v1869_v50 = vrot.slane %v1859_v22, 1  ;;  %v6993_v62 = vstv %s5124_s10  ;;  %s5129_s10 = sld [smem:[#allocation9 + $0x45]] }
 0x1e1   : > { %1822 = vrot.lane.b32.xlu0 %v1817_v6, %s5470_s5  ;;  %1820 = vrot.lane.b32.xlu2 %v1816_v59, %s5470_s5  ;;  %v6879_v39 = vadd.f32 %v1388_v38, %v1369_v2  ;;  %v6882_v53 = vadd.f32 %v9605_v20, %v1370_v48  ;;  %v1262_v1 = vadd.f32 %v1256_v56, %v1229_v9  ;;  %v6892_v59 = vld [vmem:[#allocation3] sm:$0xc0]  ;;  %v1870_v38 = vrot.slane %v6873_v33, 1 }
 0x1e2   : > { %1790 = vrot.lane.b32.xlu1 %v1786_v40, %s5468_s4  ;;  %v1867_v48 = vrot.slane %v1860_v0, 1  ;;  %v6895_v20 = vstv %s5118_s12  ;;  %v1858_v40 = vmul.f32 %v6849_v11, %v6892_v59  ;;  %v1802_v56 = vmul.f32 %v6810_v5, %v6728_v30  ;;  %9615 = vst [vmem:[#allocation91_spill] sm:$0xff] %v6993_v62  ;;  %s5127_s12 = sld [smem:[#allocation9 + $0x43]] }
 0x1e3   : > { %v6888_v47 = vpop.permute.xlu0 %1449  ;;  %v6890_v6 = vpop.permute.xlu2 %1511  ;;  %v1295_v2 = vadd.f32 %v1289_v34, %v1262_v1  ;;  %9606 = vst [vmem:[#allocation40_spill] sm:$0xff] %v6895_v20  ;;  %v1891_v41 = vmul.f32 %v6895_v20, %v6892_v59  ;;  %v6901_v35 = vmul.f32 %v6895_v20, %v6853_v54  ;;  %v1871_v9 = vsel %vm792_vm1, %v1869_v50, %v1870_v38 }
 0x1e4   : > { %v1415_v52 = vpop.permute.xlu1 %1414  ;;  %v1892_v22 = vmul.f32 %v6865_v44, %v6895_v20  ;;  %v1894_v33 = vmul.f32 %v6869_v13, %v6895_v20  ;;  %v1866_v5 = vrot.slane %v1858_v40, 1  ;;  %v1924_v40 = vmul.f32 %v6865_v44, %v6920_v18 }
 0x1e5   : > { %v1313_v0 = vadd.f32 %v6659_v32, %v1295_v2  ;;  %v1899_v34 = vrot.slane %v1891_v41, 1  ;;  %v9375_v50 = vrot.slane %v6901_v35, 1  ;;  %v4126_v32 = vld [vmem:[#allocation3 + $0x28] sm:$0x7f]  ;;  %v4124_v41 = vld [vmem:[#allocation3 + $0x18] sm:$0x80] }
 0x1e6   : > { %v1902_v23 = vrot.slane %v1892_v22, 1  ;;  %v1903_v20 = vrot.slane %v1894_v33, 1  ;;  %v6932_v22 = vmul.f32 %v6869_v13, %v6920_v18  ;;  %v9608_v33 = vld [vmem:[#allocation54_spill] sm:$0xff] }
 0x1e7   : > { %v1331_v1 = vadd.f32 %v6807_v16, %v1313_v0  ;;  %v1901_v2 = vsel %vm792_vm1, %v1899_v34, %v9375_v50  ;;  %v1868_v16 = vsel %vm792_vm1, %v1866_v5, %v1867_v48  ;;  %v6935_v0 = vmul.f32 %v4126_v32, %v9608_v33 }
 0x1e8   : > { %v1928_v32 = vrot.slane %v1924_v40, 1  ;;  %v9380_v18 = vrot.slane %v6932_v22, 1 }
 0x1e9   : > { %1876 = vrot.lane.b32.xlu0 %v1867_v48, %s5465_s13  ;;  %1874 = vrot.lane.b32.xlu2 %v1871_v9, %s5465_s13  ;;  %v1349_v9 = vadd.f32 %v6769_v12, %v1331_v1  ;;  %9609 = vst [vmem:[#allocation86_spill] sm:$0xff] %v6935_v0  ;;  %v4128_v12 = vmul.f32 %v4124_v41, %v9608_v33  ;;  %v9379_v34 = vrot.slane %v6935_v0, 2  ;;  %v9612_v41 = vrot.slane %v6827_v25, 5 }
 0x1ea   : > { %1807 = vrot.lane.b32.xlu1 %v1802_v56, %s5467_s27  ;;  %v1904_v56 = vsel %vm792_vm1, %v1902_v23, %v1903_v20  ;;  %v6966_v0 = vstv %s5122_s7  ;;  %v1429_v25 = vadd.f32 %v6747_v63, %v6841_v29  ;;  %s5109_s7 = sld [smem:[#allocation9 + $0x31]] }
 0x1eb   : > { %v1474_v21 = vpop.permute.xlu0 %1473  ;;  %v6918_v11 = vpop.permute.xlu2 %1580  ;;  %v1367_v5 = vadd.f32 %v6723_v4, %v1349_v9  ;;  %v4138_v1 = vrot.slane %v4128_v12, 2  ;;  %v1422_v4 = vsel %vm680_vm7, %v1415_v52, %v6747_v63  ;;  %9613 = vst [vmem:[#allocation89_spill] sm:$0xff] %v6966_v0 }
 0x1ec   : > { %v1421_v46 = vpop.permute.xlu1 %1420  ;;  %v1462_v29 = vadd.f32 %v6888_v47, %v1429_v25  ;;  %v7019_v25 = vld [vmem:[#allocation3 + $0x18] sm:$0x7f] }
 0x1ed   : > { %v1395_v9 = vadd.f32 %v9612_v41, %v1367_v5  ;;  %v6979_v41 = vmul.f32 %v6869_v13, %v6966_v0 }
 0x1f1   : > { %1907 = vrot.lane.b32.xlu0 %v1904_v56, %s5466_s20  ;;  %1905 = vrot.lane.b32.xlu2 %v1901_v2, %s5466_s20  ;;  %v6948_v56 = vstv %s5120_s28  ;;  %v6953_v2 = vsel %vm958_vm4, %v4138_v1, %v9379_v34  ;;  %v1428_v1 = vadd.f32 %v1422_v4, %v1395_v9  ;;  %v1455_v4 = vsel %vm708_vm8, %v6771_v31, %v6888_v47  ;;  %s5128_s28 = sld [smem:[#allocation9 + $0x44]] }
 0x1f2   : > { %1872 = vrot.lane.b32.xlu1 %v1868_v16, %s5465_s13  ;;  %9610 = vst [vmem:[#allocation87_spill] sm:$0xff] %v6948_v56  ;;  %v1930_v16 = vsel %vm792_vm1, %v1928_v32, %v9380_v18  ;;  %v1943_v40 = vmul.f32 %v6869_v13, %v6948_v56  ;;  %v1942_v12 = vmul.f32 %v6865_v44, %v6948_v56  ;;  %v6988_v18 = vstv %s5121_s9  ;;  %s5131_s9 = sld [smem:[#allocation9 + $0x47]] }
 0x1f3   : > { %v6942_v23 = vpop.permute.xlu0 %1493  ;;  %v6944_v48 = vpop.permute.xlu2 %1586  ;;  %9611 = vst [vmem:[#allocation88_spill] sm:$0xff] %v6953_v2  ;;  %v1978_v32 = vmul.f32 %v6865_v44, %v6966_v0  ;;  %v1431_v34 = vadd.f32 %v1421_v46, %v6882_v53  ;;  %v1480_v56 = vadd.f32 %v1474_v21, %v1462_v29  ;;  %v9387_v47 = vrot.slane %v6979_v41, 1  ;;  %v4372_v29 = vld [vmem:[#allocation3 + $0x38] sm:$0x1] }
 0x1f4   : > { %v1452_v50 = vpop.permute.xlu1 %1451  ;;  %v1947_v9 = vrot.slane %v1943_v40, 1  ;;  %v1946_v63 = vrot.slane %v1942_v12, 1  ;;  %9614 = vst [vmem:[#allocation90_spill] sm:$0xff] %v6988_v18  ;;  %v7005_v53 = vmul.f32 %v9594_v19, %v6536_v57  ;;  %v7023_v57 = vmul.f32 %v7019_v25, %v6993_v62 }
 0x1f5   : > { %v1456_v2 = vsel %vm708_vm8, %v1452_v50, %v6798_v8  ;;  %v1982_v12 = vrot.slane %v1978_v32, 1  ;;  %v9616_v50 = vrot.slane %v6901_v35, 1 }
 0x1f6   : > { %v1948_v40 = vsel %vm792_vm1, %v1946_v63, %v1947_v9  ;;  %v4370_v63 = vld [vmem:[#allocation3 + $0x28] sm:$0xfe] }
 0x1f9   : > { %1931 = vrot.lane.b32.xlu0 %v1930_v16, %s5469_s21  ;;  %1911 = vrot.lane.b32.xlu2 %v1903_v20, %s5466_s20  ;;  %v1461_v16 = vadd.f32 %v1455_v4, %v1428_v1  ;;  %v7013_v1 = vld [vmem:[#allocation3 + $0x8] sm:$0x80] }
 0x1fa   : > { %1878 = vrot.lane.b32.xlu1 %v1870_v38, %s5465_s13  ;;  %v1423_v38 = vsel %vm680_vm7, %v6833_v36, %v1421_v46  ;;  %v6995_v36 = vld [vmem:[#allocation3] sm:$0x80]  ;;  %v7001_v46 = vmul.f32 %v6869_v13, %v6988_v18  ;;  %v7017_v13 = vmul.f32 %v7013_v1, %v6993_v62 }
 0x1fb   : > { %v1528_v52 = vpop.permute.xlu0 %1527  ;;  %v6973_v5 = vpop.permute.xlu2 %1617  ;;  %v1479_v0 = vadd.f32 %v1474_v21, %v1461_v16  ;;  %v1430_v31 = vadd.f32 %v1423_v38, %v6879_v39  ;;  %v1464_v39 = vadd.f32 %v6798_v8, %v1431_v34  ;;  %v7025_v8 = vld [vmem:[#allocation3 + $0x10] sm:$0x7f]  ;;  %v7029_v34 = vmul.f32 %v6993_v62, %v6995_v36 }
 0x1fc   : > { %v1476_v20 = vpop.permute.xlu1 %1475  ;;  %v1498_v38 = vadd.f32 %v6835_v7, %v1480_v56  ;;  %v1551_v56 = vrot.slane %v7005_v53, 6 }
 0x1fd   : > { %v1463_v21 = vadd.f32 %v1456_v2, %v1430_v31  ;;  %v1482_v2 = vadd.f32 %v1476_v20, %v1464_v39  ;;  %v1984_v31 = vsel %vm792_vm1, %v1982_v12, %v9387_v47  ;;  %v7050_v39 = vmul.f32 %v6993_v62, %v7025_v8  ;;  %v4530_v47 = vld [vmem:[#allocation3 + $0x38] sm:$0x3] }
 0x1fe   : > { %v2034_v12 = vrot.slane %v7017_v13, 2  ;;  %v4688_v62 = vld [vmem:[#allocation3 + $0x38] sm:$0x7] }
 0x1ff   : > { %v1481_v35 = vadd.f32 %v1476_v20, %v1463_v21  ;;  %v1960_v20 = vmul.f32 %v6865_v44, %v6988_v18  ;;  %v1544_v21 = vmul.f32 %v9594_v19, %v6584_v49  ;;  %v9617_v44 = vld [vmem:[#allocation63_spill] sm:$0xff]  ;;  %v1500_v53 = vadd.f32 %v6942_v23, %v1482_v2 }
 0x200   : > { %v7055_v18 = vmul.f32 %v4370_v63, %v9617_v44  ;;  %v4376_v49 = vmul.f32 %v4372_v29, %v9617_v44  ;;  %v4534_v63 = vmul.f32 %v4530_v47, %v6392_v17  ;;  %v9622_v29 = vrot.slane %v6932_v22, 1 }
 0x201   : > { %1951 = vrot.lane.b32.xlu0 %v1947_v9, %s5468_s4  ;;  %1949 = vrot.lane.b32.xlu2 %v1948_v40, %s5468_s4  ;;  %v1497_v9 = vadd.f32 %v6835_v7, %v1479_v0  ;;  %v1965_v40 = vrot.slane %v7001_v46, 1  ;;  %v2031_v46 = vrot.slane %v7029_v34, 2  ;;  %v1499_v19 = vadd.f32 %v6942_v23, %v1481_v35  ;;  %v9620_v23 = vld [vmem:[#allocation37_spill] sm:$0xff] }
 0x202   : > { %1909 = vrot.lane.b32.xlu1 %v9616_v50, %s5466_s20  ;;  %v4528_v50 = vld [vmem:[#allocation3 + $0x28] sm:$0xfc]  ;;  %9618 = vst [vmem:[#allocation92_spill] sm:$0xff] %v7055_v18  ;;  %v1553_v28 = vrot.slane %v1544_v21, 6  ;;  %v9399_v3 = vrot.slane %v7055_v18, 4  ;;  %v4385_v13 = vrot.slane %v4376_v49, 4  ;;  %v1518_v22 = vadd.f32 %v6890_v6, %v1500_v53 }
 0x203   : > { %v7031_v32 = vpop.permute.xlu0 %1582  ;;  %v7033_v4 = vpop.permute.xlu2 %1641  ;;  %v7062_v34 = vmul.f32 %v4528_v50, %v6392_v17  ;;  %v2032_v35 = vrot.slane %v7050_v39, 2  ;;  %v9621_v2 = vrot.slane %v9620_v23, 6  ;;  %v1517_v47 = vadd.f32 %v6890_v6, %v1499_v19  ;;  %v9628_v53 = vld [vmem:[#allocation41_spill] sm:$0xff] }
 0x204   : > { %v1510_v16 = vpop.permute.xlu1 %1509  ;;  %v7080_v21 = vsel %vm241_vm0, %v9399_v3, %v4385_v13  ;;  %v2035_v49 = vrot.slane %v7023_v57, 2  ;;  %v1554_v13 = vsel %vm1550_vm6, %v1551_v56, %v1553_v28  ;;  %v7096_v23 = vstv %s7045_s11  ;;  %s5132_s11 = sld [smem:[#allocation9 + $0x48]] }
 0x205   : > { %v1515_v7 = vadd.f32 %v1510_v16, %v1497_v9  ;;  %v1516_v0 = vadd.f32 %v1510_v16, %v1498_v38  ;;  %v4686_v16 = vld [vmem:[#allocation3 + $0x28] sm:$0xf8]  ;;  %9619 = vst [vmem:[#allocation93_spill] sm:$0xff] %v7062_v34  ;;  %v1964_v3 = vrot.slane %v1960_v20, 1  ;;  %v2033_v6 = vsel %vm958_vm4, %v2031_v46, %v2032_v35 }
 0x206   : > { %9623 = vst [vmem:[#allocation37_spill] sm:$0xff] %v7080_v21  ;;  %v2056_v57 = vmul.f32 %v7096_v23, %v6995_v36  ;;  %v2058_v28 = vmul.f32 %v7096_v23, %v7025_v8 }
 0x207   : > { %v1533_v38 = vadd.f32 %v1528_v52, %v1515_v7  ;;  %v1534_v9 = vadd.f32 %v1528_v52, %v1516_v0  ;;  %v7084_v7 = vmul.f32 %v4686_v16, %v6395_v37  ;;  %v4692_v0 = vmul.f32 %v4688_v62, %v6395_v37  ;;  %9625 = vst [vmem:[#allocation95_spill] sm:$0xff] %v7096_v23 }
 0x208   : > { %v1966_v46 = vsel %vm792_vm1, %v1964_v3, %v1965_v40  ;;  %v9629_v3 = vrot.slane %v6979_v41, 1 }
 0x209   : > { %v7064_v55 = vadd.f32 %v1551_v56, %v1533_v38  ;;  %1985 = vrot.lane.b32.xlu0 %v1984_v31, %s5470_s5  ;;  %1969 = vrot.lane.b32.xlu2 %v1965_v40, %s5467_s27  ;;  %v7071_v52 = vadd.f32 %v9621_v2, %v1534_v9  ;;  %v9401_v31 = vrot.slane %v7062_v34, 5  ;;  %9624 = vst [vmem:[#allocation94_spill] sm:$0xff] %v7084_v7  ;;  %v4543_v38 = vrot.slane %v4534_v63, 5 }
 0x20a   : > { %1933 = vrot.lane.b32.xlu1 %v9622_v29, %s5469_s21  ;;  %v9400_v16 = vrot.slane %v7084_v7, 6  ;;  %v4701_v2 = vrot.slane %v4692_v0, 6  ;;  %v2036_v0 = vsel %vm958_vm4, %v2034_v12, %v2035_v49 }
 0x20b   : > { %v7087_v39 = vpop.permute.xlu0 %1613  ;;  %v7089_v50 = vpop.permute.xlu2 %1675  ;;  %v7102_v19 = vsel %vm1384_vm5, %v9401_v31, %v4543_v38  ;;  %v7167_v31 = vstv %s5128_s28  ;;  %s5138_s28 = sld [smem:[#allocation9 + $0x4e]] }
 0x20c   : > { %v1530_v9 = vpop.permute.xlu1 %1529  ;;  %9626 = vst [vmem:[#allocation96_spill] sm:$0xff] %v7102_v19  ;;  %v7112_v56 = vsel %vm1550_vm6, %v9400_v16, %v4701_v2  ;;  %v2126_v19 = vmul.f32 %v7019_v25, %v7167_v31 }
 0x20d   : > { %v1535_v62 = vadd.f32 %v1530_v9, %v1517_v47  ;;  %v1536_v29 = vadd.f32 %v1530_v9, %v1518_v22  ;;  %9627 = vst [vmem:[#allocation97_spill] sm:$0xff] %v7112_v56  ;;  %v2064_v47 = vrot.slane %v2056_v57, 2  ;;  %v2065_v22 = vrot.slane %v2058_v28, 2 }
 0x20e   : > { %v7150_v28 = vstv %s5126_s22  ;;  %9632 = vst [vmem:[#allocation99_spill] sm:$0xff] %v7167_v31  ;;  %v2130_v34 = vrot.slane %v2126_v19, 2  ;;  %s7224_s22 = sld [smem:[#allocation9 + $0x4a]] }
 0x20f   : > { %v1564_v20 = vadd.f32 %v9628_v53, %v1536_v29  ;;  %v7115_v63 = vadd.f32 %v1554_v13, %v1535_v62  ;;  %v2066_v13 = vsel %vm958_vm4, %v2064_v47, %v2065_v22  ;;  %v2059_v62 = vmul.f32 %v7019_v25, %v7096_v23  ;;  %9631 = vst [vmem:[#allocation98_spill] sm:$0xff] %v7150_v28 }
 0x210   : > { %v2057_v53 = vmul.f32 %v7013_v1, %v7096_v23  ;;  %v2090_v47 = vmul.f32 %v7019_v25, %v7150_v28 }
 0x211   : > { %2039 = vrot.lane.b32.xlu0 %v2036_v0, %s5465_s13  ;;  %2037 = vrot.lane.b32.xlu2 %v2033_v6, %s5465_s13  ;;  %v7142_v6 = vstv %s5127_s12  ;;  %v2068_v57 = vrot.slane %v2059_v62, 2  ;;  %v1597_v16 = vadd.f32 %v6944_v48, %v1564_v20  ;;  %s7218_s12 = sld [smem:[#allocation9 + $0x4b]] }
 0x212   : > { %1967 = vrot.lane.b32.xlu1 %v1966_v46, %s5467_s27  ;;  %9630 = vst [vmem:[#allocation41_spill] sm:$0xff] %v7142_v6  ;;  %v7148_v41 = vmul.f32 %v7019_v25, %v7142_v6  ;;  %v2094_v7 = vrot.slane %v2090_v47, 2 }
 0x213   : > { %v7122_v38 = vpop.permute.xlu0 %1619  ;;  %v7124_v9 = vpop.permute.xlu2 %1695 }
 0x214   : > { %v7126_v2 = vpop.permute.xlu1 %1584  ;;  %v2112_v62 = vrot.slane %v7148_v41, 2 }
 0x219   : > { %2070 = vrot.lane.b32.xlu0 %v2066_v13, %s5466_s20  ;;  %2043 = vrot.lane.b32.xlu2 %v2035_v49, %s5465_s13  ;;  %v2107_v49 = vmul.f32 %v7013_v1, %v7142_v6  ;;  %v7195_v6 = vstv %s5131_s9  ;;  %s5139_s9 = sld [smem:[#allocation9 + $0x4f]] }
 0x21a   : > { %1987 = vrot.lane.b32.xlu1 %v9629_v3, %s5470_s5  ;;  %9634 = vst [vmem:[#allocation101_spill] sm:$0xff] %v7195_v6 }
 0x21b   : > { %v7134_v40 = vpop.permute.xlu0 %1657  ;;  %v7136_v12 = vpop.permute.xlu2 %1729  ;;  %v2111_v3 = vrot.slane %v2107_v49, 2  ;;  %v2125_v49 = vmul.f32 %v7013_v1, %v7167_v31  ;;  %v7189_v31 = vstv %s5109_s7  ;;  %s7249_s7 = sld [smem:[#allocation9 + $0x49]] }
 0x21c   : > { %v7140_v29 = vpop.permute.xlu1 %1615  ;;  %9633 = vst [vmem:[#allocation100_spill] sm:$0xff] %v7189_v31 }
 0x21d   : > { %v2113_v56 = vsel %vm958_vm4, %v2111_v3, %v2112_v62  ;;  %v2129_v18 = vrot.slane %v2125_v49, 2  ;;  %v2176_v49 = vmul.f32 %v6667_v15, %v7195_v6 }
 0x21f   : > { %v7307_v26 = vstv %s5139_s9  ;;  %s5142_s9 = sld [smem:[#allocation9 + $0x52]] }
 0x220   : > { %9639 = vst [vmem:[#allocation106_spill] sm:$0xff] %v7307_v26 }
 0x221   : > { %2076 = vrot.lane.b32.xlu0 %v2068_v57, %s5466_s20  ;;  %2074 = vrot.lane.b32.xlu2 %v2065_v22, %s5466_s20  ;;  %v2067_v22 = vrot.slane %v2057_v53, 2 }
 0x222   : > { %2041 = vrot.lane.b32.xlu1 %v2032_v35, %s5465_s13  ;;  %v1630_v35 = vadd.f32 %v7122_v38, %v1597_v16  ;;  %v2089_v16 = vmul.f32 %v7013_v1, %v7150_v28  ;;  %v7197_v28 = vstv %s5129_s10  ;;  %s7281_s10 = sld [smem:[#allocation9 + $0x4c]] }
 0x223   : > { %v7157_v0 = vpop.permute.xlu0 %1677  ;;  %v7159_v46 = vpop.permute.xlu2 %1754  ;;  %v2069_v20 = vsel %vm958_vm4, %v2067_v22, %v2068_v57  ;;  %v2131_v22 = vsel %vm958_vm4, %v2129_v18, %v2130_v34  ;;  %9635 = vst [vmem:[#allocation102_spill] sm:$0xff] %v7197_v28 }
 0x224   : > { %v7163_v13 = vpop.permute.xlu1 %1639  ;;  %v1648_v47 = vadd.f32 %v7033_v4, %v1630_v35  ;;  %v2093_v21 = vrot.slane %v2089_v16, 2 }
 0x226   : > { %v2095_v19 = vsel %vm958_vm4, %v2093_v21, %v2094_v7  ;;  %v1595_v21 = vadd.f32 %v7031_v32, %v7071_v52  ;;  %v2143_v52 = vmul.f32 %v7013_v1, %v7197_v28 }
 0x229   : > { %2114 = vrot.lane.b32.xlu0 %v2113_v56, %s5468_s4  ;;  %2098 = vrot.lane.b32.xlu2 %v2094_v7, %s5469_s21 }
 0x22a   : > { %2072 = vrot.lane.b32.xlu1 %v2069_v20, %s5466_s20  ;;  %v1711_v20 = vmul.f32 %v7189_v31, %v6728_v30 }
 0x22b   : > { %v7181_v41 = vpop.permute.xlu0 %1725  ;;  %v7183_v53 = vpop.permute.xlu2 %1775 }
 0x22c   : > { %v7186_v3 = vpop.permute.xlu1 %1659 }
 0x22d   : > { %v1666_v56 = vadd.f32 %v7186_v3, %v1648_v47 }
 0x22f   : > { %v1684_v57 = vadd.f32 %v7157_v0, %v1666_v56  ;;  %v2180_v56 = vrot.slane %v2176_v49, 3 }
 0x231   : > { %2134 = vrot.lane.b32.xlu0 %v2130_v34, %s5467_s27  ;;  %2132 = vrot.lane.b32.xlu2 %v2131_v22, %s5467_s27  ;;  %v1702_v35 = vadd.f32 %v7124_v9, %v1684_v57  ;;  %v2144_v34 = vmul.f32 %v7019_v25, %v7197_v28  ;;  %v7220_v57 = vld [vmem:[#allocation3 + $0x18] sm:$0xff]  ;;  %v7222_v22 = vstv %s5132_s11  ;;  %v9421_v28 = vstv %s7218_s12  ;;  %s5140_s11 = sld [smem:[#allocation9 + $0x50]] }
 0x232   : > { %2096 = vrot.lane.b32.xlu1 %v2095_v19, %s5469_s21  ;;  %9636 = vst [vmem:[#allocation103_spill] sm:$0xff] %v7222_v22  ;;  %v2194_v25 = vmul.f32 %v6667_v15, %v7222_v22  ;;  %v2147_v15 = vrot.slane %v2143_v52, 2 }
 0x233   : > { %v7206_v18 = vpop.permute.xlu0 %1731  ;;  %v7208_v30 = vadd.f32 %v1711_v20, %v1702_v35  ;;  %v7210_v16 = vpop.permute.xlu2 %1792  ;;  %v2148_v7 = vrot.slane %v2144_v34, 2  ;;  %v1628_v20 = vadd.f32 %v7140_v29, %v1595_v21  ;;  %v2195_v34 = vmul.f32 %v7222_v22, %v7220_v57 }
 0x234   : > { %v7214_v47 = vpop.permute.xlu1 %1693  ;;  %v2198_v21 = vrot.slane %v2194_v25, 3 }
 0x235   : > { %v1646_v19 = vadd.f32 %v7163_v13, %v1628_v20  ;;  %v2199_v1 = vrot.slane %v2195_v34, 3  ;;  %v2149_v20 = vsel %vm958_vm4, %v2147_v15, %v2148_v7 }
 0x237   : > { %v1664_v23 = vadd.f32 %v7134_v40, %v1646_v19  ;;  %v2234_v19 = vmul.f32 %v9421_v28, %v7220_v57  ;;  %v7272_v28 = vstv %s5138_s28  ;;  %s5141_s28 = sld [smem:[#allocation9 + $0x51]] }
 0x238   : > { %9638 = vst [vmem:[#allocation105_spill] sm:$0xff] %v7272_v28 }
 0x239   : > { %2182 = vrot.lane.b32.xlu0 %v2180_v56, %s5465_s13  ;;  %2152 = vrot.lane.b32.xlu2 %v2148_v7, %s5470_s5  ;;  %v1682_v25 = vadd.f32 %v7089_v50, %v1664_v23  ;;  %v2177_v7 = vmul.f32 %v7195_v6, %v7220_v57  ;;  %v1709_v23 = vmul.f32 %v7189_v31, %v6745_v51  ;;  %v9433_v6 = vstv %s7249_s7 }
 0x23a   : > { %2116 = vrot.lane.b32.xlu1 %v2112_v62, %s5468_s4  ;;  %v9422_v62 = vstv %s7224_s22 }
 0x23b   : > { %v7235_v35 = vpop.permute.xlu0 %1756  ;;  %v7237_v49 = vpop.permute.xlu2 %1820  ;;  %v2223_v34 = vmul.f32 %v9422_v62, %v7220_v57  ;;  %v1700_v15 = vadd.f32 %v7214_v47, %v1682_v25  ;;  %v2181_v27 = vrot.slane %v2177_v7, 3  ;;  %v7289_v7 = vld [vmem:[#allocation3 + $0x18] sm:$0xfe] }
 0x23c   : > { %v7241_v56 = vpop.permute.xlu1 %1727 }
 0x23d   : > { %v2225_v43 = vrot.slane %v2223_v34, 3  ;;  %v1713_v62 = vadd.f32 %v1709_v23, %v1700_v15  ;;  %v2212_v23 = vmul.f32 %v9433_v6, %v7220_v57  ;;  %v7309_v6 = vld [vmem:[#allocation3 + $0x28] sm:$0x1] }
 0x23f   : > { %v1740_v51 = vadd.f32 %v7241_v56, %v1713_v62  ;;  %v1621_v62 = vsel %vm708_vm8, %v7087_v39, %v7140_v29  ;;  %v2214_v37 = vrot.slane %v2212_v23, 3 }
 0x241   : > { %2202 = vrot.lane.b32.xlu0 %v2199_v1, %s5466_s20  ;;  %2200 = vrot.lane.b32.xlu2 %v2198_v21, %s5466_s20  ;;  %v7270_v1 = vld [vmem:[#allocation3 + $0x10] sm:$0xfe]  ;;  %v1767_v24 = vadd.f32 %v7159_v46, %v1740_v51 }
 0x242   : > { %2150 = vrot.lane.b32.xlu1 %v2149_v20, %s5470_s5  ;;  %9637 = vst [vmem:[#allocation104_spill] sm:$0xff] %v7270_v1  ;;  %v2236_v20 = vrot.slane %v2234_v19, 3  ;;  %v7278_v25 = vmul.f32 %v7272_v28, %v7270_v1 }
 0x243   : > { %v7253_v22 = vpop.permute.xlu0 %1777  ;;  %v7255_v52 = vpop.permute.xlu2 %1874 }
 0x244   : > { %v7263_v21 = vpop.permute.xlu1 %1752 }
 0x249   : > { %2237 = vrot.lane.b32.xlu0 %v2236_v20, %s5467_s27  ;;  %2226 = vrot.lane.b32.xlu2 %v2225_v43, %s5468_s4  ;;  %v2284_v43 = vmul.f32 %v7289_v7, %v7272_v28  ;;  %v2291_v20 = vrot.slane %v7278_v25, 4  ;;  %v2286_v25 = vmul.f32 %v7309_v6, %v7272_v28 }
 0x24a   : > { %2184 = vrot.lane.b32.xlu1 %v2181_v27, %s5465_s13  ;;  %v1588_v27 = vsel %vm680_vm7, %v6918_v11, %v7031_v32  ;;  %v1742_v11 = vadd.f32 %v7206_v18, %v7208_v30  ;;  %v9439_v32 = vstv %s7281_s10  ;;  %v1782_v30 = vadd.f32 %v7183_v53, %v1767_v24 }
 0x24b   : > { %v7285_v19 = vpop.permute.xlu0 %1805  ;;  %v7287_v34 = vpop.permute.xlu2 %1905  ;;  %v1594_v61 = vadd.f32 %v1588_v27, %v7064_v55  ;;  %v2292_v60 = vrot.slane %v2284_v43, 4  ;;  %v2316_v55 = vmul.f32 %v7307_v26, %v7270_v1  ;;  %v7328_v43 = vld [vmem:[#allocation3 + $0x20] sm:$0x1]  ;;  %v2295_v27 = vrot.slane %v2286_v25, 4 }
 0x24c   : > { %v7293_v15 = vpop.permute.xlu1 %1758  ;;  %9640 = vst [vmem:[#allocation107_spill] sm:$0xff] %v7328_v43  ;;  %v2285_v1 = vmul.f32 %v7272_v28, %v7328_v43 }
 0x24d   : > { %v1627_v17 = vadd.f32 %v1621_v62, %v1594_v61  ;;  %v1769_v29 = vadd.f32 %v7293_v15, %v1742_v11  ;;  %v2245_v62 = vmul.f32 %v9439_v32, %v7220_v57  ;;  %v2324_v44 = vrot.slane %v2316_v55, 4 }
 0x24e   : > { %v2296_v25 = vsel %vm241_vm0, %v2292_v60, %v2295_v27 }
 0x24f   : > { %v1645_v39 = vadd.f32 %v7163_v13, %v1627_v17  ;;  %v2318_v17 = vmul.f32 %v7307_v26, %v7328_v43  ;;  %v1784_v11 = vadd.f32 %v7253_v22, %v1769_v29  ;;  %v2247_v14 = vrot.slane %v2245_v62, 3 }
 0x251   : > { %2299 = vrot.lane.b32.xlu0 %v2292_v60, %s5465_s13  ;;  %2297 = vrot.lane.b32.xlu2 %v2291_v20, %s5465_s13  ;;  %v1663_v13 = vadd.f32 %v7134_v40, %v1645_v39  ;;  %v2317_v40 = vmul.f32 %v7289_v7, %v7307_v26  ;;  %v2326_v39 = vrot.slane %v2318_v17, 4  ;;  %v1799_v62 = vadd.f32 %v7210_v16, %v1784_v11 }
 0x252   : > { %2215 = vrot.lane.b32.xlu1 %v2214_v37, %s5469_s21  ;;  %v7370_v11 = vstv %s5140_s11  ;;  %s5145_s11 = sld [smem:[#allocation9 + $0x55]] }
 0x253   : > { %v7323_v51 = vpop.permute.xlu0 %1822  ;;  %v7325_v61 = vpop.permute.xlu2 %1911  ;;  %v1681_v29 = vadd.f32 %v7089_v50, %v1663_v13  ;;  %v2325_v13 = vrot.slane %v2317_v40, 4 }
 0x254   : > { %v7330_v23 = vpop.permute.xlu1 %1790 }
 0x255   : > { %v1797_v37 = vadd.f32 %v7330_v23, %v1782_v30  ;;  %v2319_v30 = vmul.f32 %v7309_v6, %v7307_v26  ;;  %v1699_v17 = vadd.f32 %v7214_v47, %v1681_v29  ;;  %v2327_v26 = vsel %vm241_vm0, %v2324_v44, %v2326_v39 }
 0x256   : > { %v2350_v47 = vmul.f32 %v7309_v6, %v7370_v11 }
 0x257   : > { %v1812_v24 = vadd.f32 %v7285_v19, %v1797_v37  ;;  %v2293_v37 = vrot.slane %v2285_v1, 4 }
 0x259   : > { %v1827_v55 = vadd.f32 %v7237_v49, %v1812_v24  ;;  %2330 = vrot.lane.b32.xlu0 %v2324_v44, %s5466_s20  ;;  %2303 = vrot.lane.b32.xlu2 %v2296_v25, %s5465_s13  ;;  %v9641_v24 = vld [vmem:[#allocation51_spill] sm:$0xff]  ;;  %v2328_v25 = vrot.slane %v2319_v30, 4  ;;  %v2294_v1 = vsel %vm241_vm0, %v2291_v20, %v2293_v37  ;;  %v1733_v30 = vsel %vm680_vm7, %v7181_v41, %v7241_v56  ;;  %v9644_v44 = vld [vmem:[#allocation50_spill] sm:$0xff] }
 0x25a   : > { %2248 = vrot.lane.b32.xlu1 %v2247_v14, %s5470_s5  ;;  %v1708_v14 = vmul.f32 %v7189_v31, %v6685_v10  ;;  %9642 = vst [vmem:[#allocation51_spill] sm:$0xff] %v7370_v11  ;;  %v9645_v20 = vrot.slane %v9644_v44, 1  ;;  %v1760_v41 = vsel %vm708_vm8, %v7263_v21, %v7159_v46  ;;  %v2349_v56 = vmul.f32 %v7289_v7, %v7370_v11  ;;  %v9647_v44 = vld [vmem:[#allocation47_spill] sm:$0xff] }
 0x25b   : > { %v7353_v60 = vpop.permute.xlu0 %1876  ;;  %v7355_v27 = vpop.permute.xlu2 %1949  ;;  %v7359_v32 = vadd.f32 %v9641_v24, %v1827_v55  ;;  %v2329_v10 = vsel %vm241_vm0, %v2325_v13, %v2328_v25  ;;  %v7376_v55 = vstv %s5141_s28  ;;  %v7398_v46 = vstv %s5142_s9  ;;  %s5143_s28 = sld [smem:[#allocation9 + $0x53]]  ;;  %v7459_v11 = vld [vmem:[#allocation3 + $0x18] sm:$0xfc] }
 0x25c   : > { %v7361_v28 = vpop.permute.xlu1 %1807  ;;  %9643 = vst [vmem:[#allocation108_spill] sm:$0xff] %v7376_v55  ;;  %v1712_v40 = vadd.f32 %v1708_v14, %v1699_v17  ;;  %v2353_v14 = vrot.slane %v2349_v56, 4  ;;  %s5146_s9 = sld [smem:[#allocation9 + $0x56]] }
 0x25d   : > { %v1814_v50 = vadd.f32 %v7361_v28, %v1799_v62  ;;  %9646 = vst [vmem:[#allocation50_spill] sm:$0xff] %v7398_v46 }
 0x25e   : > { %v1739_v29 = vadd.f32 %v1733_v30, %v1712_v40  ;;  %v2385_v30 = vmul.f32 %v7289_v7, %v7398_v46 }
 0x25f   : > { %v1829_v43 = vadd.f32 %v7323_v51, %v1814_v50  ;;  %v2386_v50 = vmul.f32 %v7309_v6, %v7398_v46 }
 0x260   : > { %v1766_v25 = vadd.f32 %v1760_v41, %v1739_v29  ;;  %v7422_v29 = vld [vmem:[#allocation3 + $0x10] sm:$0xfc] }
 0x261   : > { %2336 = vrot.lane.b32.xlu0 %v2329_v10, %s5466_s20  ;;  %2334 = vrot.lane.b32.xlu2 %v2327_v26, %s5466_s20  ;;  %v7384_v39 = vadd.f32 %v9645_v20, %v1829_v43  ;;  %v2367_v26 = vmul.f32 %v7289_v7, %v7376_v55  ;;  %v2354_v43 = vrot.slane %v2350_v47, 4  ;;  %v1835_v20 = vmul.f32 %v9647_v44, %v6892_v59 }
 0x262   : > { %2301 = vrot.lane.b32.xlu1 %v2294_v1, %s5465_s13  ;;  %v1781_v1 = vadd.f32 %v7183_v53, %v1766_v25  ;;  %v7418_v53 = vmul.f32 %v9647_v44, %v6853_v54  ;;  %v2390_v56 = vrot.slane %v2386_v50, 4  ;;  %9648 = vst [vmem:[#allocation109_spill] sm:$0xff] %v7422_v29 }
 0x263   : > { %v7392_v62 = vpop.permute.xlu0 %1907  ;;  %v7394_v37 = vpop.permute.xlu2 %1969  ;;  %v2371_v17 = vrot.slane %v2367_v26, 4  ;;  %v2355_v21 = vsel %vm241_vm0, %v2353_v14, %v2354_v43  ;;  %v7427_v43 = vstv %s5143_s28  ;;  %v1843_v25 = vrot.slane %v1835_v20, 1  ;;  %s5148_s28 = sld [smem:[#allocation9 + $0x58]] }
 0x264   : > { %v1873_v24 = vpop.permute.xlu1 %1872  ;;  %v1796_v10 = vadd.f32 %v7330_v23, %v1781_v1  ;;  %v7425_v23 = vstv %s5145_s11  ;;  %9650 = vst [vmem:[#allocation111_spill] sm:$0xff] %v7427_v43  ;;  %v2404_v54 = vmul.f32 %v7309_v6, %v7427_v43  ;;  %v2403_v1 = vmul.f32 %v7289_v7, %v7427_v43  ;;  %s5147_s11 = sld [smem:[#allocation9 + $0x57]] }
 0x265   : > { %9649 = vst [vmem:[#allocation110_spill] sm:$0xff] %v7425_v23  ;;  %v2448_v50 = vmul.f32 %v7425_v23, %v7422_v29  ;;  %v1880_v7 = vsel %vm680_vm7, %v1873_v24, %v7255_v52 }
 0x266   : > { %v1811_v26 = vadd.f32 %v7285_v19, %v1796_v10  ;;  %v2368_v19 = vmul.f32 %v7309_v6, %v7376_v55  ;;  %v2408_v6 = vrot.slane %v2404_v54, 4 }
 0x268   : > { %v2372_v46 = vrot.slane %v2368_v19, 4 }
 0x269   : > { %2374 = vrot.lane.b32.xlu0 %v2371_v17, %s5468_s4  ;;  %2358 = vrot.lane.b32.xlu2 %v2355_v21, %s5469_s21  ;;  %v9453_v21 = vrot.slane %v7418_v53, 1 }
 0x26a   : > { %2332 = vrot.lane.b32.xlu1 %v2325_v13, %s5466_s20  ;;  %v2389_v13 = vrot.slane %v2385_v30, 4  ;;  %v1826_v30 = vadd.f32 %v7237_v49, %v1811_v26  ;;  %v2407_v49 = vrot.slane %v2403_v1, 4  ;;  %v2373_v24 = vsel %vm241_vm0, %v2371_v17, %v2372_v46 }
 0x26b   : > { %v7410_v47 = vpop.permute.xlu0 %1931  ;;  %v7412_v40 = vpop.permute.xlu2 %2037  ;;  %v1887_v1 = vadd.f32 %v7255_v52, %v7359_v32  ;;  %v2000_v17 = vmul.f32 %v9608_v33, %v6995_v36 }
 0x26c   : > { %v7420_v41 = vpop.permute.xlu1 %1878  ;;  %v2391_v59 = vsel %vm241_vm0, %v2389_v13, %v2390_v56  ;;  %v7447_v56 = vld [vmem:[#allocation3 + $0x20] sm:$0x3]  ;;  %v2409_v55 = vsel %vm241_vm0, %v2407_v49, %v2408_v6  ;;  %v1913_v6 = vsel %vm708_vm8, %v7287_v34, %v7392_v62 }
 0x26d   : > { %9651 = vst [vmem:[#allocation112_spill] sm:$0xff] %v7447_v56  ;;  %v2450_v26 = vmul.f32 %v7425_v23, %v7447_v56  ;;  %v1920_v46 = vadd.f32 %v7392_v62, %v1887_v1  ;;  %v1889_v52 = vadd.f32 %v7420_v41, %v7384_v39 }
 0x26f   : > { %v2458_v19 = vrot.slane %v2450_v26, 5  ;;  %v1938_v62 = vadd.f32 %v7410_v47, %v1920_v46  ;;  %v1922_v39 = vadd.f32 %v7325_v61, %v1889_v52 }
 0x271   : > { %2394 = vrot.lane.b32.xlu0 %v2391_v59, %s5467_s27  ;;  %2392 = vrot.lane.b32.xlu2 %v2389_v13, %s5467_s27  ;;  %v1845_v13 = vsel %vm792_vm1, %v1843_v25, %v9453_v21  ;;  %v2449_v25 = vmul.f32 %v7459_v11, %v7425_v23  ;;  %v7463_v21 = vld [vmem:[#allocation3 + $0x28] sm:$0x3] }
 0x272   : > { %2356 = vrot.lane.b32.xlu1 %v2353_v14, %s5469_s21  ;;  %v2456_v14 = vrot.slane %v2448_v50, 5  ;;  %v1853_v43 = vadd.f32 %v1845_v13, %v1826_v30  ;;  %v2451_v54 = vmul.f32 %v7463_v21, %v7425_v23 }
 0x273   : > { %v7443_v10 = vpop.permute.xlu0 %1951  ;;  %v7445_v20 = vpop.permute.xlu2 %2043 }
 0x274   : > { %v7452_v59 = vpop.permute.xlu1 %1909  ;;  %v1886_v50 = vadd.f32 %v1880_v7, %v1853_v43  ;;  %v2457_v7 = vrot.slane %v2449_v25, 5  ;;  %v2460_v23 = vrot.slane %v2451_v54, 5  ;;  %v2459_v32 = vsel %vm1384_vm5, %v2456_v14, %v2458_v19 }
 0x275   : > { %v7494_v54 = vmul.f32 %v9608_v33, %v7025_v8 }
 0x276   : > { %v1919_v26 = vadd.f32 %v1913_v6, %v1886_v50  ;;  %v2461_v50 = vsel %vm1384_vm5, %v2457_v7, %v2460_v23  ;;  %v1956_v23 = vadd.f32 %v7355_v27, %v1938_v62 }
 0x277   : > { %v9457_v8 = vrot.slane %v7494_v54, 2 }
 0x278   : > { %v1937_v36 = vadd.f32 %v7410_v47, %v1919_v26 }
 0x279   : > { %2462 = vrot.lane.b32.xlu0 %v2456_v14, %s5465_s13  ;;  %2412 = vrot.lane.b32.xlu2 %v2409_v55, %s5470_s5  ;;  %v7480_v55 = vstv %s5146_s9  ;;  %v2008_v14 = vrot.slane %v2000_v17, 2  ;;  %s5149_s9 = sld [smem:[#allocation9 + $0x59]] }
 0x27a   : > { %2376 = vrot.lane.b32.xlu1 %v2373_v24, %s5468_s4  ;;  %9652 = vst [vmem:[#allocation113_spill] sm:$0xff] %v7480_v55  ;;  %v2481_v34 = vmul.f32 %v7480_v55, %v7422_v29  ;;  %v2483_v25 = vmul.f32 %v7480_v55, %v7447_v56  ;;  %v1955_v46 = vadd.f32 %v7355_v27, %v1937_v36  ;;  %v9654_v36 = vld [vmem:[#allocation58_spill] sm:$0xff]  ;;  %v7604_v29 = vld [vmem:[#allocation3 + $0x18] sm:$0xf8] }
 0x27b   : > { %v1986_v30 = vpop.permute.xlu0 %1985  ;;  %v7473_v13 = vpop.permute.xlu2 %2074  ;;  %v2482_v26 = vmul.f32 %v7459_v11, %v7480_v55 }
 0x27c   : > { %v7478_v43 = vpop.permute.xlu1 %1933  ;;  %v2489_v24 = vrot.slane %v2481_v34, 5  ;;  %v2491_v19 = vrot.slane %v2483_v25, 5  ;;  %v7514_v34 = vstv %s5147_s11  ;;  %v2010_v25 = vsel %vm958_vm4, %v2008_v14, %v9457_v8  ;;  %s5150_s11 = sld [smem:[#allocation9 + $0x5a]] }
 0x27d   : > { %v1940_v1 = vadd.f32 %v7478_v43, %v1922_v39  ;;  %9653 = vst [vmem:[#allocation114_spill] sm:$0xff] %v7514_v34  ;;  %v2490_v33 = vrot.slane %v2482_v26, 5  ;;  %v2515_v27 = vmul.f32 %v7463_v21, %v7514_v34 }
 0x281   : > { %2468 = vrot.lane.b32.xlu0 %v2461_v50, %s5465_s13  ;;  %2466 = vrot.lane.b32.xlu2 %v2459_v32, %s5465_s13  ;;  %v2492_v32 = vsel %vm1384_vm5, %v2489_v24, %v2491_v19  ;;  %v1958_v50 = vadd.f32 %v7443_v10, %v1940_v1 }
 0x282   : > { %2410 = vrot.lane.b32.xlu1 %v2407_v49, %s5470_s5 }
 0x283   : > { %v7505_v6 = vpop.permute.xlu0 %2039  ;;  %v7507_v47 = vpop.permute.xlu2 %2098  ;;  %v1976_v1 = vadd.f32 %v7394_v37, %v1958_v50 }
 0x284   : > { %v1968_v17 = vpop.permute.xlu1 %1967 }
 0x285   : > { %v1973_v52 = vadd.f32 %v1968_v17, %v1955_v46  ;;  %v1974_v49 = vadd.f32 %v1968_v17, %v1956_v23  ;;  %v2519_v17 = vrot.slane %v2515_v27, 5  ;;  %v2484_v27 = vmul.f32 %v7463_v21, %v7480_v55 }
 0x287   : > { %v1991_v39 = vadd.f32 %v1986_v30, %v1973_v52  ;;  %v1992_v62 = vadd.f32 %v1986_v30, %v1974_v49  ;;  %v2514_v30 = vmul.f32 %v7459_v11, %v7514_v34  ;;  %v7564_v34 = vstv %s5150_s11  ;;  %s5130_s11 = sld [smem:[#allocation9 + $0x46]] }
 0x288   : > { %9660 = vst [vmem:[#allocation116_spill] sm:$0xff] %v7564_v34 }
 0x289   : > { %2499 = vrot.lane.b32.xlu0 %v2492_v32, %s5466_s20  ;;  %2497 = vrot.lane.b32.xlu2 %v2490_v33, %s5466_s20  ;;  %v7525_v19 = vadd.f32 %v9654_v36, %v1992_v62  ;;  %v7527_v23 = vadd.f32 %v2010_v25, %v1991_v39  ;;  %v2518_v49 = vrot.slane %v2514_v30, 5  ;;  %v9655_v32 = vld [vmem:[#allocation55_spill] sm:$0xff]  ;;  %v7542_v62 = vstv %s5148_s28  ;;  %s5152_s28 = sld [smem:[#allocation9 + $0x5c]] }
 0x28a   : > { %2464 = vrot.lane.b32.xlu1 %v2457_v7, %s5465_s13  ;;  %v9656_v25 = vrot.slane %v9655_v32, 2  ;;  %9657 = vst [vmem:[#allocation58_spill] sm:$0xff] %v7542_v62  ;;  %v7545_v36 = vstv %s5149_s9  ;;  %v2533_v50 = vmul.f32 %v7463_v21, %v7542_v62  ;;  %v2532_v30 = vmul.f32 %v7459_v11, %v7542_v62  ;;  %s5153_s9 = sld [smem:[#allocation9 + $0x5d]] }
 0x28b   : > { %v7532_v14 = vpop.permute.xlu0 %2070  ;;  %v7535_v46 = vpop.permute.xlu2 %2132  ;;  %v2520_v7 = vsel %vm1384_vm5, %v2518_v49, %v2519_v17  ;;  %9658 = vst [vmem:[#allocation55_spill] sm:$0xff] %v7545_v36  ;;  %v2550_v17 = vmul.f32 %v7459_v11, %v7545_v36  ;;  %v2569_v62 = vmul.f32 %v7463_v21, %v7564_v34 }
 0x28c   : > { %v7537_v26 = vpop.permute.xlu1 %1987  ;;  %v2537_v32 = vrot.slane %v2533_v50, 5  ;;  %v1589_v50 = vsel %vm680_vm7, %v7126_v2, %v6944_v48 }
 0x28d   : > { %v1994_v52 = vadd.f32 %v7537_v26, %v1976_v1  ;;  %v2554_v8 = vrot.slane %v2550_v17, 5  ;;  %v7580_v17 = vld [vmem:[#allocation3 + $0x10] sm:$0xf8] }
 0x28e   : > { %9661 = vst [vmem:[#allocation117_spill] sm:$0xff] %v7580_v17 }
 0x28f   : > { %v2021_v39 = vadd.f32 %v9656_v25, %v1994_v52  ;;  %v2493_v25 = vrot.slane %v2484_v27, 5  ;;  %v2568_v27 = vmul.f32 %v7459_v11, %v7564_v34  ;;  %v1622_v11 = vsel %vm708_vm8, %v6973_v5, %v7122_v38 }
 0x291   : > { %2523 = vrot.lane.b32.xlu0 %v2520_v7, %s5469_s21  ;;  %2521 = vrot.lane.b32.xlu2 %v2518_v49, %s5469_s21  ;;  %v2536_v49 = vrot.slane %v2532_v30, 5  ;;  %v2494_v55 = vsel %vm1384_vm5, %v2490_v33, %v2493_v25  ;;  %v1596_v33 = vadd.f32 %v1589_v50, %v7115_v63  ;;  %v7587_v25 = vstv %s5152_s28  ;;  %s5154_s28 = sld [smem:[#allocation9 + $0x5e]] }
 0x292   : > { %2495 = vrot.lane.b32.xlu1 %v2489_v24, %s5466_s20  ;;  %9662 = vst [vmem:[#allocation118_spill] sm:$0xff] %v7587_v25  ;;  %v2572_v56 = vrot.slane %v2568_v27, 5  ;;  %v2613_v48 = vmul.f32 %v7587_v25, %v7580_v17  ;;  %v2551_v63 = vmul.f32 %v7463_v21, %v7545_v36  ;;  %v7608_v5 = vmul.f32 %v7604_v29, %v7587_v25 }
 0x293   : > { %v7556_v1 = vpop.permute.xlu0 %2076  ;;  %v7562_v7 = vpop.permute.xlu2 %2152  ;;  %v2538_v24 = vsel %vm1384_vm5, %v2536_v49, %v2537_v32  ;;  %v7582_v32 = vld [vmem:[#allocation3 + $0x20] sm:$0x7]  ;;  %v1629_v34 = vadd.f32 %v1622_v11, %v1596_v33  ;;  %v2054_v33 = vadd.f32 %v7445_v20, %v2021_v39  ;;  %v7622_v36 = vstv %s5153_s9  ;;  %s5155_s9 = sld [smem:[#allocation9 + $0x5f]] }
 0x294   : > { %v7560_v52 = vpop.permute.xlu1 %2041  ;;  %9659 = vst [vmem:[#allocation115_spill] sm:$0xff] %v7562_v7  ;;  %v2615_v2 = vmul.f32 %v7587_v25, %v7582_v32  ;;  %v2621_v50 = vrot.slane %v2613_v48, 6  ;;  %v2555_v21 = vrot.slane %v2551_v63, 5  ;;  %v9471_v48 = vrot.slane %v7608_v5, 6 }
 0x295   : > { %v2087_v11 = vadd.f32 %v7556_v1, %v2054_v33  ;;  %9664 = vst [vmem:[#allocation120_spill] sm:$0xff] %v7622_v36  ;;  %v7639_v39 = vstv %s5130_s11  ;;  %s5156_s11 = sld [smem:[#allocation9 + $0x60]] }
 0x296   : > { %v2623_v27 = vrot.slane %v2615_v2, 6  ;;  %9665 = vst [vmem:[#allocation121_spill] sm:$0xff] %v7639_v39 }
 0x299   : > { %2557 = vrot.lane.b32.xlu0 %v2554_v8, %s5467_s27  ;;  %2541 = vrot.lane.b32.xlu2 %v2538_v24, %s5468_s4  ;;  %v2573_v24 = vrot.slane %v2569_v62, 5 }
 0x29a   : > { %2501 = vrot.lane.b32.xlu1 %v2494_v55, %s5466_s20 }
 0x29b   : > { %v7578_v30 = vpop.permute.xlu0 %2114  ;;  %v7596_v55 = vpop.permute.xlu2 %2200  ;;  %v2574_v62 = vsel %vm1384_vm5, %v2572_v56, %v2573_v24 }
 0x29c   : > { %v7584_v44 = vpop.permute.xlu1 %2072  ;;  %9663 = vst [vmem:[#allocation119_spill] sm:$0xff] %v7596_v55 }
 0x2a1   : > { %2577 = vrot.lane.b32.xlu0 %v2574_v62, %s5470_s5  ;;  %2575 = vrot.lane.b32.xlu2 %v2572_v56, %s5470_s5  ;;  %v1647_v56 = vadd.f32 %v7033_v4, %v1629_v34  ;;  %v2052_v62 = vadd.f32 %v7505_v6, %v7525_v19  ;;  %v2556_v4 = vsel %vm1384_vm5, %v2554_v8, %v2555_v21 }
 0x2a2   : > { %2539 = vrot.lane.b32.xlu1 %v2536_v49, %s5468_s4  ;;  %v2624_v49 = vsel %vm1550_vm6, %v2621_v50, %v2623_v27  ;;  %v2647_v19 = vmul.f32 %v7604_v29, %v7622_v36  ;;  %v2105_v8 = vadd.f32 %v7507_v47, %v2087_v11 }
 0x2a3   : > { %v7610_v38 = vpop.permute.xlu0 %2134  ;;  %v1665_v2 = vadd.f32 %v7186_v3, %v1647_v56  ;;  %v2085_v55 = vadd.f32 %v7584_v44, %v2052_v62  ;;  %v7632_v3 = vmul.f32 %v7622_v36, %v7580_v17  ;;  %v7634_v34 = vpop.permute.xlu2 %2226  ;;  %v2164_v62 = vmul.f32 %v7639_v39, %v7220_v57 }
 0x2a4   : > { %v7612_v24 = vpop.permute.xlu1 %2096  ;;  %v7656_v17 = vstv %s5154_s28  ;;  %s5157_s28 = sld [smem:[#allocation9 + $0x61]] }
 0x2a5   : > { %v1683_v63 = vadd.f32 %v7157_v0, %v1665_v2  ;;  %v2103_v27 = vadd.f32 %v7612_v24, %v2085_v55  ;;  %v5308_v0 = vld [vmem:[#allocation3 + $0x10] sm:$0x1f]  ;;  %9667 = vst [vmem:[#allocation123_spill] sm:$0xff] %v7656_v17 }
 0x2a6   : > { %v1710_v55 = vmul.f32 %v5308_v0, %v7189_v31 }
 0x2a7   : > { %v2121_v2 = vadd.f32 %v7578_v30, %v2103_v27 }
 0x2a9   : > { %2631 = vrot.lane.b32.xlu0 %v2624_v49, %s5465_s13  ;;  %2629 = vrot.lane.b32.xlu2 %v9471_v48, %s5465_s13  ;;  %v2654_v49 = vrot.slane %v7632_v3, 6  ;;  %v1701_v48 = vadd.f32 %v7124_v9, %v1683_v63  ;;  %v2168_v9 = vrot.slane %v2164_v62, 3 }
 0x2aa   : > { %2559 = vrot.lane.b32.xlu1 %v2556_v4, %s5467_s27  ;;  %v2655_v4 = vrot.slane %v2647_v19, 6 }
 0x2ab   : > { %v7643_v56 = vpop.permute.xlu0 %2182  ;;  %v1714_v63 = vadd.f32 %v1710_v55, %v1701_v48  ;;  %v7678_v62 = vpop.permute.xlu2 %2297  ;;  %v1761_v55 = vsel %vm708_vm8, %v7235_v35, %v7293_v15  ;;  %v9669_v35 = vrot.slane %v7608_v5, 6 }
 0x2ac   : > { %9666 = vst [vmem:[#allocation122_spill] sm:$0xff] %v7643_v56  ;;  %v7646_v33 = vpop.permute.xlu1 %2116  ;;  %v7658_v56 = vld [vmem:[#allocation3 + $0x28] sm:$0x7] }
 0x2ad   : > { %v2123_v21 = vadd.f32 %v7646_v33, %v2105_v8  ;;  %v2649_v3 = vmul.f32 %v7658_v56, %v7622_v36  ;;  %v2616_v19 = vmul.f32 %v7658_v56, %v7587_v25  ;;  %v2139_v8 = vadd.f32 %v7535_v46, %v2121_v2 }
 0x2ae   : > { %v7686_v2 = vstv %s5155_s9  ;;  %s5473_s9 = smov 3  }
 0x2af   : > { %v2141_v11 = vadd.f32 %v7610_v38, %v2123_v21  ;;  %v7673_v21 = vmul.f32 %v7604_v29, %v7656_v17  ;;  %v2658_v25 = vrot.slane %v2649_v3, 6  ;;  %v2625_v48 = vrot.slane %v2616_v19, 6  ;;  %9668 = vst [vmem:[#allocation124_spill] sm:$0xff] %v7686_v2 }
 0x2b0   : > { %v2698_v3 = vmul.f32 %v7658_v56, %v7686_v2 }
 0x2b1   : > { %v2159_v57 = vadd.f32 %v7562_v7, %v2141_v11  ;;  %2662 = vrot.lane.b32.xlu0 %v2655_v4, %s5466_s20  ;;  %2660 = vrot.lane.b32.xlu2 %v2654_v49, %s5466_s20  ;;  %v1734_v11 = vsel %vm680_vm7, %v7136_v12, %v7206_v18  ;;  %v2683_v7 = vrot.slane %v7673_v21, 6  ;;  %v2648_v12 = vmul.f32 %v7622_v36, %v7582_v32  ;;  %v8293_v36 = vld [vmem:[#allocation2 + $0x28] sm:$0xfc] }
 0x2b2   : > { %2627 = vrot.lane.b32.xlu1 %v2621_v50, %s5465_s13  ;;  %v1741_v45 = vadd.f32 %v1734_v11, %v1714_v63  ;;  %v2659_v18 = vsel %vm1550_vm6, %v2655_v4, %v2658_v25  ;;  %v2626_v15 = vsel %vm1550_vm6, %v9669_v35, %v2625_v48  ;;  %v7715_v35 = vstv %s5157_s28 }
 0x2b3   : > { %v7668_v27 = vpop.permute.xlu0 %2202  ;;  %v2174_v0 = vadd.f32 %v2168_v9, %v2159_v57  ;;  %v2656_v25 = vrot.slane %v2648_v12, 6  ;;  %v7707_v21 = vpop.permute.xlu2 %2303  ;;  %9671 = vst [vmem:[#allocation126_spill] sm:$0xff] %v7715_v35 }
 0x2b4   : > { %v7680_v31 = vpop.permute.xlu1 %2150  ;;  %v1768_v19 = vadd.f32 %v1761_v55, %v1741_v45  ;;  %v7712_v55 = vstv %s5156_s11  ;;  %s5060_s11 = sshll.u32 %s5594_s26, 4 }
 0x2b5   : > { %v2157_v50 = vadd.f32 %v7680_v31, %v2139_v8  ;;  %v2702_v8 = vrot.slane %v2698_v3, 6  ;;  %v2657_v48 = vsel %vm1550_vm6, %v2654_v49, %v2656_v25  ;;  %9670 = vst [vmem:[#allocation125_spill] sm:$0xff] %v7712_v55  ;;  %v2716_v12 = vmul.f32 %v7658_v56, %v7712_v55  ;;  %s8106_s28 = scalar_lea.vmem [#allocation10], %s5060_s11 }
 0x2b6   : > { %v1783_v45 = vadd.f32 %v7253_v22, %v1768_v19  ;;  %v2715_v49 = vmul.f32 %v7604_v29, %v7712_v55 }
 0x2b7   : > { %v2172_v57 = vadd.f32 %v2168_v9, %v2157_v50  ;;  %v2697_v9 = vmul.f32 %v7604_v29, %v7686_v2  ;;  %v2720_v25 = vrot.slane %v2716_v12, 6 }
 0x2b8   : > { %v1798_v22 = vadd.f32 %v7210_v16, %v1783_v45  ;;  %v2733_v16 = vmul.f32 %v7604_v29, %v7715_v35 }
 0x2b9   : > { %2686 = vrot.lane.b32.xlu0 %v2683_v7, %s5469_s21  ;;  %2666 = vrot.lane.b32.xlu2 %v2659_v18, %s5466_s20  ;;  %v2701_v11 = vrot.slane %v2697_v9, 6 }
 0x2ba   : > { %2633 = vrot.lane.b32.xlu1 %v2626_v15, %s5465_s13 }
 0x2bb   : > { %v7702_v63 = vpop.permute.xlu0 %2237  ;;  %v2703_v18 = vsel %vm1550_vm6, %v2701_v11, %v2702_v8 }
 0x2bc   : > { %v7704_v4 = vpop.permute.xlu1 %2184 }
 0x2bd   : > { %v2190_v5 = vadd.f32 %v7704_v4, %v2172_v57  ;;  %v2192_v50 = vadd.f32 %v7704_v4, %v2174_v0  ;;  %v2680_v0 = vmul.f32 %v7658_v56, %v7656_v17  ;;  %v1813_v57 = vadd.f32 %v7361_v28, %v1798_v22  ;;  %v7741_v22 = vpop.permute.xlu2 %2334 }
 0x2bf   : > { %v2208_v3 = vadd.f32 %v7668_v27, %v2190_v5  ;;  %v2210_v19 = vadd.f32 %v7668_v27, %v2192_v50  ;;  %v1828_v28 = vadd.f32 %v7323_v51, %v1813_v57  ;;  %v9672_v51 = vrot.slane %v7418_v53, 1 }
 0x2c1   : > { %2706 = vrot.lane.b32.xlu0 %v2703_v18, %s5468_s4  ;;  %2704 = vrot.lane.b32.xlu2 %v2701_v11, %s5468_s4  ;;  %v2684_v11 = vrot.slane %v2680_v0, 6  ;;  %v2737_v18 = vrot.slane %v2733_v16, 6  ;;  %v1881_v0 = vsel %vm680_vm7, %v7353_v60, %v7420_v41  ;;  %v1914_v16 = vsel %vm708_vm8, %v7452_v59, %v7325_v61 }
 0x2c2   : > { %2664 = vrot.lane.b32.xlu1 %v2657_v48, %s5466_s20  ;;  %v2719_v48 = vrot.slane %v2715_v49, 6  ;;  %v1855_v49 = vadd.f32 %v9672_v51, %v1828_v28  ;;  %v2046_v51 = vsel %vm680_vm7, %v7560_v52, %v7445_v20  ;;  %v2079_v20 = vsel %vm708_vm8, %v7473_v13, %v7556_v1 }
 0x2c3   : > { %v7730_v15 = vpop.permute.xlu0 %2299  ;;  %v2685_v12 = vsel %vm1550_vm6, %v2683_v7, %v2684_v11 }
 0x2c4   : > { %v7734_v9 = vpop.permute.xlu1 %2215  ;;  %v2721_v29 = vsel %vm1550_vm6, %v2719_v48, %v2720_v25  ;;  %v1888_v25 = vadd.f32 %v1881_v0, %v1855_v49 }
 0x2c5   : > { %v2219_v8 = vadd.f32 %v7734_v9, %v2208_v3  ;;  %v2221_v45 = vadd.f32 %v7734_v9, %v2210_v19 }
 0x2c7   : > { %v2230_v5 = vadd.f32 %v7634_v34, %v2219_v8  ;;  %v2232_v50 = vadd.f32 %v7634_v34, %v2221_v45  ;;  %v1921_v8 = vadd.f32 %v1914_v16, %v1888_v25  ;;  %v9673_v45 = vrot.slane %v6364_v58, 4 }
 0x2c9   : > { %2740 = vrot.lane.b32.xlu0 %v2737_v18, %s5470_s5  ;;  %2724 = vrot.lane.b32.xlu2 %v2721_v29, %s5467_s27  ;;  %v2241_v3 = vadd.f32 %v7702_v63, %v2230_v5  ;;  %v2243_v19 = vadd.f32 %v7702_v63, %v2232_v50  ;;  %v1939_v28 = vadd.f32 %v7478_v43, %v1921_v8  ;;  %v7770_v50 = vpop.permute.xlu2 %2358 }
 0x2ca   : > { %2688 = vrot.lane.b32.xlu1 %v2685_v12, %s5469_s21  ;;  %v2734_v5 = vmul.f32 %v7658_v56, %v7715_v35  ;;  %v9727_v35 = vld [vmem:[#allocation48_spill] sm:$0xff] }
 0x2cb   : > { %v7753_v57 = vpop.permute.xlu0 %2330  ;;  %v1957_v29 = vadd.f32 %v7443_v10, %v1939_v28  ;;  %v9674_v10 = vrot.slane %v7494_v54, 2  ;;  %v7824_v28 = vld [vmem:[#allocation2 + $0x10] sm:$0xff] }
 0x2cc   : > { %v7760_v7 = vpop.permute.xlu1 %2248  ;;  %v2738_v12 = vrot.slane %v2734_v5, 6 }
 0x2cd   : > { %v2252_v60 = vadd.f32 %v7760_v7, %v2241_v3  ;;  %v2254_v41 = vadd.f32 %v7760_v7, %v2243_v19 }
 0x2ce   : > { %v2739_v58 = vsel %vm1550_vm6, %v2737_v18, %v2738_v12  ;;  %v2045_v18 = vsel %vm680_vm7, %v7412_v40, %v7505_v6 }
 0x2cf   : > { %v2281_v53 = vadd.f32 %v6415_v42, %v2254_v41  ;;  %v2279_v11 = vadd.f32 %v9673_v45, %v2252_v60  ;;  %v1975_v42 = vadd.f32 %v7394_v37, %v1957_v29  ;;  %v2051_v3 = vadd.f32 %v2045_v18, %v7527_v23 }
 0x2d1   : > { %v1993_v43 = vadd.f32 %v7537_v26, %v1975_v42  ;;  %v7784_v0 = vpop.permute.xlu2 %2392  ;;  %v2078_v26 = vsel %vm708_vm8, %v7532_v14, %v7584_v44  ;;  %v2314_v25 = vadd.f32 %v7707_v21, %v2281_v53  ;;  %v2312_v6 = vadd.f32 %v7730_v15, %v2279_v11 }
 0x2d2   : > { %2722 = vrot.lane.b32.xlu1 %v2719_v48, %s5467_s27  ;;  %v2084_v16 = vadd.f32 %v2078_v26, %v2051_v3 }
 0x2d3   : > { %v7773_v61 = vpop.permute.xlu0 %2336  ;;  %v2020_v49 = vadd.f32 %v9674_v10, %v1993_v43 }
 0x2d4   : > { %v7775_v59 = vpop.permute.xlu1 %2301  ;;  %v2102_v40 = vadd.f32 %v7612_v24, %v2084_v16  ;;  %v2347_v44 = vadd.f32 %v7773_v61, %v2314_v25  ;;  %v9678_v16 = vld [vmem:[#allocation67_spill] sm:$0xff] }
 0x2d5   : > { %v2053_v37 = vadd.f32 %v2046_v51, %v2020_v49  ;;  %v9676_v49 = vld [vmem:[#allocation69_spill] sm:$0xff]  ;;  %v9679_v25 = vrot.slane %v9678_v16, 5 }
 0x2d6   : > { %v2120_v13 = vadd.f32 %v7578_v30, %v2102_v40  ;;  %v2365_v53 = vadd.f32 %v7770_v50, %v2347_v44 }
 0x2d7   : > { %v2086_v54 = vadd.f32 %v2079_v20, %v2053_v37 }
 0x2d8   : > { %v2138_v30 = vadd.f32 %v7535_v46, %v2120_v13  ;;  %v9677_v46 = vld [vmem:[#allocation122_spill] sm:$0xff] }
 0x2d9   : > { %v7808_v60 = vpop.permute.xlu2 %2412  ;;  %v2104_v23 = vadd.f32 %v7507_v47, %v2086_v54  ;;  %v2163_v47 = vmul.f32 %v7824_v28, %v7639_v39  ;;  %v2186_v18 = vsel %vm680_vm7, %v9677_v46, %v7704_v4 }
 0x2da   : > { %2742 = vrot.lane.b32.xlu1 %v2739_v58, %s5470_s5  ;;  %v2156_v12 = vadd.f32 %v7680_v31, %v2138_v30  ;;  %v9675_v58 = vld [vmem:[#allocation115_spill] sm:$0xff] }
 0x2db   : > { %v7782_v56 = vpop.permute.xlu0 %2374  ;;  %v2122_v1 = vadd.f32 %v7646_v33, %v2104_v23  ;;  %v2167_v51 = vrot.slane %v2163_v47, 3  ;;  %v9682_v30 = vld [vmem:[#allocation63_spill] sm:$0xff] }
 0x2dc   : > { %v7786_v48 = vpop.permute.xlu1 %2332 }
 0x2dd   : > { %v2345_v14 = vadd.f32 %v7786_v48, %v2312_v6  ;;  %v2140_v11 = vadd.f32 %v7610_v38, %v2122_v1  ;;  %v2171_v3 = vadd.f32 %v2167_v51, %v2156_v12  ;;  %v9680_v6 = vld [vmem:[#allocation119_spill] sm:$0xff] }
 0x2de   : > { %v2204_v23 = vsel %vm708_vm8, %v9680_v6, %v7668_v27 }
 0x2df   : > { %v2158_v43 = vadd.f32 %v9675_v58, %v2140_v11  ;;  %v2189_v54 = vadd.f32 %v2186_v18, %v2171_v3  ;;  %v9681_v11 = vld [vmem:[#allocation104_spill] sm:$0xff] }
 0x2e1   : > { %v7832_v29 = vpop.permute.xlu2 %2466  ;;  %v2173_v20 = vadd.f32 %v2167_v51, %v2158_v43  ;;  %v2207_v13 = vadd.f32 %v2204_v23, %v2189_v54  ;;  %v2306_v54 = vsel %vm680_vm7, %v7775_v59, %v7707_v21  ;;  %v2339_v21 = vsel %vm708_vm8, %v7741_v22, %v7773_v61  ;;  %v9684_v61 = vld [vmem:[#allocation109_spill] sm:$0xff] }
 0x2e3   : > { %v7800_v19 = vpop.permute.xlu0 %2394  ;;  %v2191_v44 = vadd.f32 %v2186_v18, %v2173_v20 }
 0x2e4   : > { %v7805_v52 = vpop.permute.xlu1 %2356 }
 0x2e5   : > { %v2363_v41 = vadd.f32 %v7805_v52, %v2345_v14 }
 0x2e7   : > { %v2381_v33 = vadd.f32 %v7782_v56, %v2363_v41  ;;  %v2209_v41 = vadd.f32 %v2204_v23, %v2191_v44  ;;  %v2305_v44 = vsel %vm680_vm7, %v7678_v62, %v7730_v15 }
 0x2e9   : > { %v2399_v38 = vadd.f32 %v7784_v0, %v2381_v33  ;;  %v7852_v14 = vpop.permute.xlu2 %2497  ;;  %v2260_v33 = vmul.f32 %v9682_v30, %v9681_v11 }
 0x2eb   : > { %v7818_v8 = vpop.permute.xlu0 %2462 }
 0x2ec   : > { %v7821_v45 = vpop.permute.xlu1 %2376 }
 0x2ed   : > { %v2383_v24 = vadd.f32 %v7821_v45, %v2365_v53  ;;  %v2218_v53 = vadd.f32 %v7734_v9, %v2207_v13 }
 0x2ef   : > { %v2401_v5 = vadd.f32 %v7800_v19, %v2383_v24  ;;  %v2220_v24 = vadd.f32 %v7734_v9, %v2209_v41  ;;  %v2229_v47 = vadd.f32 %v7634_v34, %v2218_v53 }
 0x2f1   : > { %v2419_v42 = vadd.f32 %v7808_v60, %v2401_v5  ;;  %v9683_v5 = vld [vmem:[#allocation107_spill] sm:$0xff]  ;;  %v2231_v27 = vadd.f32 %v7634_v34, %v2220_v24  ;;  %v7866_v58 = vpop.permute.xlu2 %2521  ;;  %v2240_v51 = vadd.f32 %v7702_v63, %v2229_v47 }
 0x2f2   : > { %v2262_v12 = vmul.f32 %v9682_v30, %v9683_v5 }
 0x2f3   : > { %v7837_v10 = vpop.permute.xlu0 %2468  ;;  %v2446_v37 = vadd.f32 %v9676_v49, %v2419_v42  ;;  %v2268_v49 = vrot.slane %v2260_v33, 4  ;;  %v2251_v9 = vadd.f32 %v7760_v7, %v2240_v51  ;;  %v2242_v46 = vadd.f32 %v7702_v63, %v2231_v27  ;;  %v9685_v27 = vld [vmem:[#allocation65_spill] sm:$0xff]  ;;  %v9686_v51 = vld [vmem:[#allocation112_spill] sm:$0xff] }
 0x2f4   : > { %v7844_v26 = vpop.permute.xlu1 %2410  ;;  %v2338_v63 = vsel %vm708_vm8, %v7753_v57, %v7786_v48 }
 0x2f5   : > { %v2417_v31 = vadd.f32 %v7844_v26, %v2399_v38  ;;  %v2270_v38 = vrot.slane %v2262_v12, 4  ;;  %v2253_v18 = vadd.f32 %v7760_v7, %v2242_v46  ;;  %v2479_v41 = vadd.f32 %v7837_v10, %v2446_v37  ;;  %v9687_v46 = vld [vmem:[#allocation68_spill] sm:$0xff] }
 0x2f7   : > { %v2444_v40 = vadd.f32 %v9679_v25, %v2417_v31  ;;  %v2271_v3 = vsel %vm241_vm0, %v2268_v49, %v2270_v38  ;;  %v2278_v31 = vadd.f32 %v2268_v49, %v2251_v9  ;;  %v2427_v49 = vmul.f32 %v9685_v27, %v9686_v51 }
 0x2f8   : > { %v2280_v25 = vadd.f32 %v2271_v3, %v2253_v18 }
 0x2f9   : > { %v2542_v7 = vpop.permute.xlu2 %2541  ;;  %v2311_v23 = vadd.f32 %v2305_v44, %v2278_v31 }
 0x2fa   : > { %v2313_v6 = vadd.f32 %v2306_v54, %v2280_v25  ;;  %v2435_v54 = vrot.slane %v2427_v49, 5 }
 0x2fb   : > { %v7854_v1 = vpop.permute.xlu0 %2499  ;;  %v2344_v13 = vadd.f32 %v2338_v63, %v2311_v23  ;;  %v9689_v23 = vld [vmem:[#allocation70_spill] sm:$0xff] }
 0x2fc   : > { %v2465_v4 = vpop.permute.xlu1 %2464  ;;  %v2346_v59 = vadd.f32 %v2339_v21, %v2313_v6 }
 0x2fd   : > { %v2477_v20 = vadd.f32 %v2465_v4, %v2444_v40  ;;  %v2362_v53 = vadd.f32 %v7805_v52, %v2344_v13  ;;  %v2425_v52 = vmul.f32 %v9685_v27, %v9684_v61  ;;  %v2470_v63 = vsel %vm680_vm7, %v7818_v8, %v2465_v4 }
 0x2fe   : > { %v2364_v11 = vadd.f32 %v7770_v50, %v2346_v59 }
 0x2ff   : > { %v2510_v40 = vadd.f32 %v7852_v14, %v2477_v20  ;;  %v2380_v47 = vadd.f32 %v7782_v56, %v2362_v53  ;;  %v9688_v56 = vrot.slane %v9687_v46, 6 }
 0x300   : > { %v2382_v12 = vadd.f32 %v7821_v45, %v2364_v11  ;;  %v2433_v45 = vrot.slane %v2425_v52, 5 }
 0x301   : > { %v2528_v15 = vadd.f32 %v7866_v58, %v2510_v40  ;;  %v2576_v5 = vpop.permute.xlu2 %2575  ;;  %v2398_v38 = vadd.f32 %v7784_v0, %v2380_v47 }
 0x302   : > { %v2400_v3 = vadd.f32 %v7800_v19, %v2382_v12  ;;  %v2436_v13 = vsel %vm1384_vm5, %v2433_v45, %v2435_v54  ;;  %v9691_v12 = vld [vmem:[#allocation66_spill] sm:$0xff] }
 0x303   : > { %v7864_v42 = vpop.permute.xlu0 %2523  ;;  %v2416_v31 = vadd.f32 %v7844_v26, %v2398_v38 }
 0x304   : > { %v2496_v43 = vpop.permute.xlu1 %2495  ;;  %v2418_v6 = vadd.f32 %v7808_v60, %v2400_v3 }
 0x305   : > { %v2443_v0 = vadd.f32 %v2433_v45, %v2416_v31  ;;  %v2503_v19 = vsel %vm708_vm8, %v2496_v43, %v7852_v14 }
 0x306   : > { %v2445_v59 = vadd.f32 %v2436_v13, %v2418_v6 }
 0x307   : > { %v2476_v26 = vadd.f32 %v2470_v63, %v2443_v0 }
 0x309   : > { %v2509_v53 = vadd.f32 %v2503_v19, %v2476_v26 }
 0x30b   : > { %v2558_v34 = vpop.permute.xlu0 %2557 }
 0x30c   : > { %v2502_v16 = vpop.permute.xlu1 %2501 }
 0x30d   : > { %v2512_v62 = vadd.f32 %v2502_v16, %v2479_v41  ;;  %v2630_v41 = vpop.permute.xlu2 %2629  ;;  %v2504_v60 = vsel %vm708_vm8, %v7854_v1, %v2502_v16 }
 0x30f   : > { %v2530_v33 = vadd.f32 %v7864_v42, %v2512_v62  ;;  %v2471_v62 = vsel %vm680_vm7, %v7832_v29, %v7837_v10  ;;  %v2592_v29 = vmul.f32 %v9691_v12, %v7582_v32 }
 0x310   : > { %v2478_v4 = vadd.f32 %v2471_v62, %v2445_v59 }
 0x311   : > { %v2548_v9 = vadd.f32 %v2542_v7, %v2530_v33  ;;  %v2600_v49 = vrot.slane %v2592_v29, 6 }
 0x313   : > { %v2578_v24 = vpop.permute.xlu0 %2577 }
 0x314   : > { %v2540_v57 = vpop.permute.xlu1 %2539 }
 0x315   : > { %v2546_v48 = vadd.f32 %v2540_v57, %v2528_v15  ;;  %v2527_v15 = vadd.f32 %v7866_v58, %v2509_v53  ;;  %v2661_v11 = vpop.permute.xlu2 %2660 }
 0x317   : > { %v2564_v37 = vadd.f32 %v2558_v34, %v2546_v48  ;;  %v2511_v48 = vadd.f32 %v2504_v60, %v2478_v4  ;;  %v2545_v47 = vadd.f32 %v2540_v57, %v2527_v15 }
 0x319   : > { %v2582_v22 = vadd.f32 %v2576_v5, %v2564_v37  ;;  %v2529_v14 = vadd.f32 %v7864_v42, %v2511_v48  ;;  %v2563_v43 = vadd.f32 %v2558_v34, %v2545_v47  ;;  %v9690_v37 = vld [vmem:[#allocation117_spill] sm:$0xff] }
 0x31b   : > { %v2609_v18 = vadd.f32 %v9688_v56, %v2582_v22  ;;  %v2632_v25 = vpop.permute.xlu0 %2631  ;;  %v2590_v22 = vmul.f32 %v9691_v12, %v9690_v37  ;;  %v2547_v10 = vadd.f32 %v2542_v7, %v2529_v14  ;;  %v2581_v16 = vadd.f32 %v2576_v5, %v2563_v43 }
 0x31c   : > { %v2560_v50 = vpop.permute.xlu1 %2559 }
 0x31d   : > { %v2566_v20 = vadd.f32 %v2560_v50, %v2548_v9  ;;  %v2598_v1 = vrot.slane %v2590_v22, 6  ;;  %v2565_v51 = vadd.f32 %v2560_v50, %v2547_v10  ;;  %v2667_v58 = vpop.permute.xlu2 %2666  ;;  %v2642_v46 = vadd.f32 %v2630_v41, %v2609_v18 }
 0x31f   : > { %v2584_v44 = vadd.f32 %v2578_v24, %v2566_v20  ;;  %v2608_v38 = vadd.f32 %v2598_v1, %v2581_v16  ;;  %v2583_v9 = vadd.f32 %v2578_v24, %v2565_v51  ;;  %v2601_v34 = vsel %vm1550_vm6, %v2598_v1, %v2600_v49 }
 0x321   : > { %v2611_v40 = vadd.f32 %v9689_v23, %v2584_v44  ;;  %v2610_v20 = vadd.f32 %v2601_v34, %v2583_v9 }
 0x323   : > { %v2663_v8 = vpop.permute.xlu0 %2662 }
 0x324   : > { %v2628_v21 = vpop.permute.xlu1 %2627  ;;  %v2668_v56 = vsel %vm708_vm8, %v2661_v11, %v2663_v8  ;;  %v2675_v31 = vadd.f32 %v2663_v8, %v2642_v46 }
 0x325   : > { %v2635_v57 = vsel %vm680_vm7, %v2628_v21, %v2630_v41  ;;  %v2705_v24 = vpop.permute.xlu2 %2704 }
 0x326   : > { %v2641_v42 = vadd.f32 %v2635_v57, %v2608_v38 }
 0x328   : > { %v2674_v5 = vadd.f32 %v2668_v56, %v2641_v42 }
 0x32b   : > { %v2687_v61 = vpop.permute.xlu0 %2686 }
 0x32c   : > { %v2634_v33 = vpop.permute.xlu1 %2633  ;;  %v2692_v54 = vadd.f32 %v2687_v61, %v2674_v5  ;;  %v2693_v44 = vadd.f32 %v2687_v61, %v2675_v31 }
 0x32d   : > { %v2636_v3 = vsel %vm680_vm7, %v2632_v25, %v2634_v33  ;;  %v2644_v50 = vadd.f32 %v2634_v33, %v2611_v40  ;;  %v2725_v4 = vpop.permute.xlu2 %2724 }
 0x32e   : > { %v2643_v63 = vadd.f32 %v2636_v3, %v2610_v20  ;;  %v2711_v13 = vadd.f32 %v2705_v24, %v2693_v44  ;;  %v2710_v41 = vadd.f32 %v2705_v24, %v2692_v54 }
 0x32f   : > { %v2677_v0 = vadd.f32 %v2667_v58, %v2644_v50 }
 0x333   : > { %v2707_v32 = vpop.permute.xlu0 %2706 }
 0x334   : > { %v2665_v52 = vpop.permute.xlu1 %2664 }
 0x335   : > { %v2669_v45 = vsel %vm708_vm8, %v2665_v52, %v2667_v58 }
 0x336   : > { %v2676_v6 = vadd.f32 %v2669_v45, %v2643_v63 }
 0x33b   : > { %v2741_v21 = vpop.permute.xlu0 %2740 }
 0x33c   : > { %v2689_v7 = vpop.permute.xlu1 %2688 }
 0x33d   : > { %v2694_v23 = vadd.f32 %v2689_v7, %v2676_v6  ;;  %v2695_v18 = vadd.f32 %v2689_v7, %v2677_v0 }
 0x33f   : > { %v2712_v59 = vadd.f32 %v2707_v32, %v2694_v23  ;;  %v2713_v53 = vadd.f32 %v2707_v32, %v2695_v18 }
 0x341   : > { %v2730_v15 = vadd.f32 %v2725_v4, %v2712_v59  ;;  %v2731_v48 = vadd.f32 %v2725_v4, %v2713_v53  ;;  %v7932_v59 = vld [vmem:[#allocation2 + $0x10] sm:$0xe0] }
 0x342   : > { %v9692_v4 = vld [vmem:[#allocation14_spill] sm:$0xff] }
 0x344   : > { %v2723_v19 = vpop.permute.xlu1 %2722 }
 0x345   : > { %v2728_v25 = vadd.f32 %v2723_v19, %v2710_v41  ;;  %v2729_v26 = vadd.f32 %v2723_v19, %v2711_v13 }
 0x347   : > { %v2746_v62 = vadd.f32 %v2741_v21, %v2728_v25  ;;  %v2747_v40 = vadd.f32 %v2741_v21, %v2729_v26 }
 0x349   : > { %v5158_v60 = vmul.f32 -1.442695, %v2746_v62  ;;  %v5159_v8 = vmul.f32 -1.442695, %v2747_v40 }
 0x34b   : > { %5265 = vpow2.f32 %v5158_v60 }
 0x34c   : > { %5267 = vpow2.f32 %v5159_v8  ;;  %v2743_v47 = vpop.permute.xlu1 %2742 }
 0x34d   : > { %v2748_v11 = vadd.f32 %v2743_v47, %v2730_v15  ;;  %v2749_v33 = vadd.f32 %v2743_v47, %v2731_v48  ;;  %v2859_v15 = vmul.f32 %v7932_v59, %v9692_v4 }
 0x34f   : > { %v5160_v14 = vmul.f32 -1.442695, %v2748_v11  ;;  %v5161_v43 = vmul.f32 -1.442695, %v2749_v33  ;;  %v7940_v33 = vld [vmem:[#allocation2 + $0x18] sm:$0xe0] }
 0x351   : > { %v5266_v37 = vpop.eup %5265  ;;  %5269 = vpow2.f32 %v5160_v14  ;;  %v7943_v14 = vld [vmem:[#allocation2 + $0x20] sm:$0x1f] }
 0x352   : > { %v5268_v22 = vpop.eup %5267  ;;  %v2762_v61 = vadd.f32 1.0, %v5266_v37  ;;  %5271 = vpow2.f32 %v5161_v43  ;;  %v7945_v43 = vld [vmem:[#allocation2 + $0x28] sm:$0x1f]  ;;  %v2860_v37 = vmul.f32 %v7940_v33, %v9692_v4 }
 0x353   : > { %v2763_v29 = vadd.f32 1.0, %v5268_v22  ;;  %v2861_v22 = vmul.f32 %v7943_v14, %v9692_v4 }
 0x354   : > { %5273 = vrcp.f32 %v2762_v61  ;;  %v2775_v42 = vand.u32 2147483647, %v2762_v61  ;;  %v2777_v34 = vand.u32 2147483648, %v2762_v61  ;;  %vm2771_vm12 = vweird.f32 %v2762_v61 }
 0x355   : > { %5275 = vrcp.f32 %v2763_v29  ;;  %v2790_v46 = vand.u32 2147483647, %v2763_v29  ;;  %v2792_v56 = vand.u32 2147483648, %v2763_v29  ;;  %vm2786_vm11 = vweird.f32 %v2763_v29 }
 0x356   : > { %vm2776_vm14 = vcmp.eq.f32.partialorder %v2775_v42, 8.507059e+37  ;;  %v2778_v45 = vor.u32 1.1754944e-38, %v2777_v34  ;;  %v9696_v42 = vld [vmem:[#allocation16_spill] sm:$0xff] }
 0x357   : > { %v5270_v10 = vpop.eup %5269  ;;  %vm2791_vm2 = vcmp.eq.f32.partialorder %v2790_v46, 8.507059e+37  ;;  %v2793_v44 = vor.u32 1.1754944e-38, %v2792_v56  ;;  %v2939_v34 = vmul.f32 %v7940_v33, %v9696_v42  ;;  %v7982_v46 = vld [vmem:[#allocation2 + $0x10] sm:$0xc0]  ;;  %v7984_v56 = vld [vmem:[#allocation2 + $0x20] sm:$0x3f] }
 0x358   : > { %v5272_v1 = vpop.eup %5271  ;;  %v2764_v16 = vadd.f32 1.0, %v5270_v10 }
 0x359   : > { %v7925_v52 = vadd.f32 1.0, %v5272_v1 }
 0x35a   : > { %v5274_v51 = vpop.eup %5273  ;;  %5277 = vrcp.f32 %v2764_v16  ;;  %v2807_v23 = vand.u32 2147483648, %v2764_v16  ;;  %v2805_v19 = vand.u32 2147483647, %v2764_v16 }
 0x35b   : > { %v5276_v58 = vpop.eup %5275  ;;  %5279 = vrcp.f32 %v7925_v52  ;;  %v2767_v57 = vmul.f32 %v5274_v51, %v2762_v61  ;;  %vm2772_vm9 = vweird.f32 %v5274_v51  ;;  %v2822_v26 = vand.u32 2147483648, %v7925_v52 }
 0x35c   : > { %v2782_v49 = vmul.f32 %v5276_v58, %v2763_v29  ;;  %vm2787_vm10 = vweird.f32 %v5276_v58  ;;  %vm2773_vm13 = vmor %vm2771_vm12, %vm2772_vm9  ;;  %v2820_v53 = vand.u32 2147483647, %v7925_v52  ;;  %v2808_v62 = vor.u32 1.1754944e-38, %v2807_v23  ;;  %v9693_v29 = vld [vmem:[#allocation15_spill] sm:$0xff] }
 0x35d   : > { %v2768_v38 = vsub.f32 1.0, %v2767_v57  ;;  %vm2788_vm15 = vmor %vm2786_vm11, %vm2787_vm10  ;;  %vm2801_vm10 = vweird.f32 %v2764_v16  ;;  %vm2816_vm12 = vweird.f32 %v7925_v52  ;;  %v2823_v47 = vor.u32 1.1754944e-38, %v2822_v26 }
 0x35e   : > { %v2783_v9 = vsub.f32 1.0, %v2782_v49  ;;  %v2862_v61 = vmul.f32 %v7945_v43, %v9692_v4  ;;  %v2885_v10 = vmul.f32 %v7932_v59, %v9693_v29  ;;  %v2887_v1 = vmul.f32 %v7943_v14, %v9693_v29  ;;  %v9695_v49 = vld [vmem:[#allocation18_spill] sm:$0xff] }
 0x35f   : > { %v2769_v3 = vmul.f32 %v5274_v51, %v2768_v38  ;;  %v2925_v38 = vmul.f32 %v7940_v33, %v9695_v49 }
 0x360   : > { %v5278_v32 = vpop.eup %5277  ;;  %v2784_v7 = vmul.f32 %v5276_v58, %v2783_v9  ;;  %v2926_v9 = vmul.f32 %v7945_v43, %v9695_v49  ;;  %v9703_v49 = vld [vmem:[#allocation26_spill] sm:$0xff] }
 0x361   : > { %v5280_v31 = vpop.eup %5279  ;;  %v2770_v5 = vadd.f32 %v5274_v51, %v2769_v3  ;;  %v2797_v20 = vmul.f32 %v5278_v32, %v2764_v16  ;;  %vm2802_vm3 = vweird.f32 %v5278_v32  ;;  %v2886_v16 = vmul.f32 %v7940_v33, %v9693_v29  ;;  %v9697_v3 = vld [vmem:[#allocation20_spill] sm:$0xff] }
 0x362   : > { %v2785_v50 = vadd.f32 %v5276_v58, %v2784_v7  ;;  %v2812_v54 = vmul.f32 %v5280_v31, %v7925_v52  ;;  %vm2817_vm9 = vweird.f32 %v5280_v31  ;;  %vm2803_vm11 = vmor %vm2801_vm10, %vm2802_vm3  ;;  %v2888_v52 = vmul.f32 %v7945_v43, %v9693_v29 }
 0x363   : > { %v2774_v63 = vsel %vm2773_vm13, %v5274_v51, %v2770_v5  ;;  %v2798_v24 = vsub.f32 1.0, %v2797_v20  ;;  %vm2806_vm13 = vcmp.eq.f32.partialorder %v2805_v19, 8.507059e+37  ;;  %v9694_v51 = vld [vmem:[#allocation17_spill] sm:$0xff]  ;;  %v2995_v7 = vmul.f32 %v7984_v56, %v9697_v3  ;;  %v7995_v20 = vld [vmem:[#allocation2 + $0x18] sm:$0xc0] }
 0x364   : > { %v2789_v6 = vsel %vm2788_vm15, %v5276_v58, %v2785_v50  ;;  %v2779_v0 = vsel %vm2776_vm14, %v2778_v45, %v2774_v63  ;;  %v2813_v18 = vsub.f32 1.0, %v2812_v54  ;;  %vm2818_vm14 = vmor %vm2816_vm12, %vm2817_vm9  ;;  %vm2821_vm15 = vcmp.eq.f32.partialorder %v2820_v53, 8.507059e+37  ;;  %v9698_v50 = vld [vmem:[#allocation19_spill] sm:$0xff] }
 0x365   : > { %v2794_v13 = vsel %vm2791_vm2, %v2793_v44, %v2789_v6  ;;  %2830 = vrot.lane.b32.xlu2 %v2779_v0, %s5473_s9  ;;  %v2799_v41 = vmul.f32 %v5278_v32, %v2798_v24  ;;  %v2911_v58 = vmul.f32 %v7940_v33, %v9694_v51  ;;  %v2912_v57 = vmul.f32 %v7945_v43, %v9694_v51 }
 0x366   : > { %2832 = vrot.lane.b32.xlu0 %v2794_v13, %s5473_s9  ;;  %v2814_v25 = vmul.f32 %v5280_v31, %v2813_v18  ;;  %v2940_v5 = vmul.f32 %v7945_v43, %v9696_v42  ;;  %v2953_v45 = vmul.f32 %v7940_v33, %v9698_v50  ;;  %v2954_v54 = vmul.f32 %v7945_v43, %v9698_v50  ;;  %v9699_v13 = vld [vmem:[#allocation21_spill] sm:$0xff] }
 0x367   : > { %v2800_v21 = vadd.f32 %v5278_v32, %v2799_v41  ;;  %v3002_v63 = vrot.slane %v2995_v7, 1  ;;  %v2994_v6 = vmul.f32 %v7995_v20, %v9697_v3  ;;  %v3025_v41 = vmul.f32 %v7982_v46, %v9699_v13 }
 0x368   : > { %v2815_v40 = vadd.f32 %v5280_v31, %v2814_v25  ;;  %v3027_v19 = vmul.f32 %v7984_v56, %v9699_v13  ;;  %v3108_v42 = vmul.f32 %v7995_v20, %v9703_v49  ;;  %vm2838_vm2 = vcmask 23552  }
 0x369   : > { %v2804_v60 = vsel %vm2803_vm11, %v5278_v32, %v2800_v21  ;;  %v2993_v32 = vmul.f32 %v7982_v46, %v9697_v3  ;;  %v3004_v18 = vrot.slane %v2994_v6, 1  ;;  %v3033_v21 = vrot.slane %v3025_v41, 1 }
 0x36a   : > { %v2809_v8 = vsel %vm2806_vm13, %v2808_v62, %v2804_v60  ;;  %v2819_v48 = vsel %vm2818_vm14, %v5280_v31, %v2815_v40  ;;  %v7991_v31 = vld [vmem:[#allocation2 + $0x28] sm:$0x3f]  ;;  %v3034_v53 = vrot.slane %v3027_v19, 1  ;;  %v3026_v62 = vmul.f32 %v7995_v20, %v9699_v13 }
 0x36b   : > { %2834 = vrot.lane.b32.xlu1 %v2809_v8, %s5473_s9  ;;  %v2824_v11 = vsel %vm2821_vm15, %v2823_v47, %v2819_v48  ;;  %v3001_v44 = vrot.slane %v2993_v32, 1  ;;  %v2996_v24 = vmul.f32 %v7991_v31, %v9697_v3  ;;  %v3028_v26 = vmul.f32 %v7991_v31, %v9699_v13  ;;  %v8052_v3 = vld [vmem:[#allocation2 + $0x20] sm:$0x7f] }
 0x36c   : > { %v3035_v60 = vsel %vm792_vm1, %v3033_v21, %v3034_v53  ;;  %v3036_v8 = vrot.slane %v3026_v62, 1  ;;  %v9705_v21 = vld [vmem:[#allocation28_spill] sm:$0xff]  ;;  %vm2843_vm3 = vcmask 130053   ;;  %vm2845_vm9 = vcmask 126976  }
 0x36d   : > { %2836 = vrot.lane.b32.xlu2 %v2824_v11, %s5473_s9  ;;  %v3003_v0 = vsel %vm792_vm1, %v3001_v44, %v3002_v63  ;;  %v3005_v23 = vrot.slane %v2996_v24, 1  ;;  %v3037_v40 = vrot.slane %v3028_v26, 1  ;;  %v8062_v24 = vld [vmem:[#allocation2 + $0x18] sm:$0x80]  ;;  %v3185_v62 = vmul.f32 %v8052_v3, %v9705_v21 }
 0x36e   : > { %2867 = vrot.lane.b32.xlu0 %v2859_v15, %s5465_s13  ;;  %v9700_v15 = vld [vmem:[#allocation24_spill] sm:$0xff] }
 0x36f   : > { %v3006_v25 = vsel %vm792_vm1, %v3004_v18, %v3005_v23  ;;  %v3038_v4 = vsel %vm792_vm1, %v3036_v8, %v3037_v40  ;;  %v3058_v48 = vmul.f32 %v7991_v31, %v9700_v15  ;;  %v3057_v47 = vmul.f32 %v7995_v20, %v9700_v15 }
 0x371   : > { %v3062_v11 = vrot.slane %v3058_v48, 1 }
 0x373   : > { %2869 = vrot.lane.b32.xlu1 %v2860_v37, %s5465_s13  ;;  %v3061_v37 = vrot.slane %v3057_v47, 1  ;;  %v3184_v47 = vmul.f32 %v8062_v24, %v9705_v21 }
 0x375   : > { %2871 = vrot.lane.b32.xlu2 %v2861_v22, %s5465_s13  ;;  %v9701_v22 = vld [vmem:[#allocation25_spill] sm:$0xff]  ;;  %v3063_v29 = vsel %vm792_vm1, %v3061_v37, %v3062_v11 }
 0x376   : > { %2873 = vrot.lane.b32.xlu0 %v2862_v61, %s5465_s13  ;;  %v3075_v61 = vmul.f32 %v7991_v31, %v9701_v22 }
 0x37b   : > { %2893 = vrot.lane.b32.xlu1 %v2885_v10, %s5466_s20  ;;  %v3074_v10 = vmul.f32 %v7995_v20, %v9701_v22  ;;  %v3194_v22 = vrot.slane %v3184_v47, 2 }
 0x37d   : > { %2895 = vrot.lane.b32.xlu2 %v2886_v16, %s5466_s20  ;;  %v3078_v16 = vrot.slane %v3074_v10, 1 }
 0x37e   : > { %2897 = vrot.lane.b32.xlu0 %v2887_v1, %s5466_s20  ;;  %v3079_v1 = vrot.slane %v3075_v61, 1 }
 0x383   : > { %2899 = vrot.lane.b32.xlu1 %v2888_v52, %s5466_s20  ;;  %v9702_v52 = vld [vmem:[#allocation23_spill] sm:$0xff] }
 0x384   : > { %v3092_v51 = vmul.f32 %v7991_v31, %v9702_v52 }
 0x385   : > { %2915 = vrot.lane.b32.xlu2 %v2911_v58, %s5469_s21  ;;  %v3080_v58 = vsel %vm792_vm1, %v3078_v16, %v3079_v1  ;;  %v9707_v16 = vld [vmem:[#allocation33_spill] sm:$0xff] }
 0x386   : > { %2917 = vrot.lane.b32.xlu0 %v2912_v57, %s5469_s21  ;;  %v3091_v57 = vmul.f32 %v7995_v20, %v9702_v52 }
 0x388   : > { %v3095_v32 = vrot.slane %v3091_v57, 1  ;;  %v3232_v57 = vmul.f32 %v8062_v24, %v9707_v16 }
 0x38b   : > { %2929 = vrot.lane.b32.xlu1 %v2925_v38, %s5468_s4  ;;  %v3109_v38 = vmul.f32 %v7991_v31, %v9703_v49 }
 0x38d   : > { %2931 = vrot.lane.b32.xlu2 %v2926_v9, %s5468_s4  ;;  %v3096_v9 = vrot.slane %v3092_v51, 1  ;;  %v3113_v7 = vrot.slane %v3109_v38, 1 }
 0x38e   : > { %2943 = vrot.lane.b32.xlu0 %v2939_v34, %s5467_s27  ;;  %v8050_v34 = vld [vmem:[#allocation2 + $0x10] sm:$0x80] }
 0x38f   : > { %v3097_v50 = vsel %vm792_vm1, %v3095_v32, %v3096_v9 }
 0x393   : > { %2945 = vrot.lane.b32.xlu1 %v2940_v5, %s5467_s27  ;;  %v8054_v5 = vld [vmem:[#allocation2 + $0x28] sm:$0x7f] }
 0x394   : > { %v3186_v15 = vmul.f32 %v8054_v5, %v9705_v21  ;;  %v3233_v52 = vmul.f32 %v8054_v5, %v9707_v16 }
 0x395   : > { %2957 = vrot.lane.b32.xlu2 %v2953_v45, %s5470_s5  ;;  %v9704_v45 = vld [vmem:[#allocation27_spill] sm:$0xff] }
 0x396   : > { %2959 = vrot.lane.b32.xlu0 %v2954_v54, %s5470_s5  ;;  %v3151_v54 = vmul.f32 %v8050_v34, %v9704_v45  ;;  %v3153_v44 = vmul.f32 %v8052_v3, %v9704_v45  ;;  %v3152_v41 = vmul.f32 %v8062_v24, %v9704_v45 }
 0x398   : > { %v3160_v18 = vrot.slane %v3153_v44, 2  ;;  %v3162_v26 = vrot.slane %v3152_v41, 2  ;;  %v9709_v41 = vld [vmem:[#allocation38_spill] sm:$0xff] }
 0x39b   : > { %3007 = vrot.lane.b32.xlu1 %v3003_v0, %s5465_s13  ;;  %v3154_v0 = vmul.f32 %v8054_v5, %v9704_v45 }
 0x39d   : > { %3009 = vrot.lane.b32.xlu2 %v3006_v25, %s5465_s13  ;;  %v3163_v19 = vrot.slane %v3154_v0, 2 }
 0x39e   : > { %3011 = vrot.lane.b32.xlu0 %v3002_v63, %s5465_s13  ;;  %v3112_v63 = vrot.slane %v3108_v42, 1  ;;  %v3237_v42 = vrot.slane %v3233_v52, 2 }
 0x3a0   : > { %v3114_v6 = vsel %vm792_vm1, %v3112_v63, %v3113_v7 }
 0x3a3   : > { %3013 = vrot.lane.b32.xlu1 %v3005_v23, %s5465_s13  ;;  %v3159_v23 = vrot.slane %v3151_v54, 2 }
 0x3a5   : > { %3039 = vrot.lane.b32.xlu2 %v3035_v60, %s5466_s20  ;;  %v3161_v25 = vsel %vm958_vm4, %v3159_v23, %v3160_v18 }
 0x3a6   : > { %3041 = vrot.lane.b32.xlu0 %v3038_v4, %s5466_s20  ;;  %v3192_v4 = vrot.slane %v3185_v62, 2  ;;  %v9710_v62 = vld [vmem:[#allocation43_spill] sm:$0xff] }
 0x3ab   : > { %3043 = vrot.lane.b32.xlu1 %v3034_v53, %s5466_s20  ;;  %v3183_v53 = vmul.f32 %v8050_v34, %v9705_v21 }
 0x3ad   : > { %3045 = vrot.lane.b32.xlu2 %v3037_v40, %s5466_s20  ;;  %v3164_v40 = vsel %vm958_vm4, %v3162_v26, %v3163_v19  ;;  %v3191_v8 = vrot.slane %v3183_v53, 2  ;;  %v3266_v26 = vmul.f32 %v8062_v24, %v9709_v41 }
 0x3ae   : > { %3064 = vrot.lane.b32.xlu0 %v3063_v29, %s5469_s21  ;;  %v9706_v29 = vld [vmem:[#allocation29_spill] sm:$0xff] }
 0x3af   : > { %v3193_v48 = vsel %vm958_vm4, %v3191_v8, %v3192_v4  ;;  %v3216_v10 = vmul.f32 %v8054_v5, %v9706_v29 }
 0x3b1   : > { %v3220_v51 = vrot.slane %v3216_v10, 2 }
 0x3b3   : > { %3066 = vrot.lane.b32.xlu1 %v3062_v11, %s5469_s21  ;;  %v3195_v11 = vrot.slane %v3186_v15, 2  ;;  %v8142_v15 = vld [vmem:[#allocation2 + $0x28] sm:$0xff] }
 0x3b4   : > { %9711 = vst [vmem:[#allocation115_spill] sm:$0xff] %v8142_v15 }
 0x3b5   : > { %3081 = vrot.lane.b32.xlu2 %v3080_v58, %s5468_s4  ;;  %v3196_v61 = vsel %vm958_vm4, %v3194_v22, %v3195_v11  ;;  %v3298_v22 = vmul.f32 %v8142_v15, %v9710_v62 }
 0x3b6   : > { %3083 = vrot.lane.b32.xlu0 %v3079_v1, %s5468_s4  ;;  %v3215_v1 = vmul.f32 %v8062_v24, %v9706_v29 }
 0x3b7   : > { %v3302_v52 = vrot.slane %v3298_v22, 3 }
 0x3b8   : > { %v3219_v38 = vrot.slane %v3215_v1, 2 }
 0x3ba   : > { %v3221_v32 = vsel %vm958_vm4, %v3219_v38, %v3220_v51 }
 0x3bb   : > { %3098 = vrot.lane.b32.xlu1 %v3097_v50, %s5467_s27  ;;  %v9708_v50 = vld [vmem:[#allocation30_spill] sm:$0xff] }
 0x3bc   : > { %v3250_v45 = vmul.f32 %v8054_v5, %v9708_v50 }
 0x3bd   : > { %3100 = vrot.lane.b32.xlu2 %v3096_v9, %s5467_s27 }
 0x3be   : > { %3115 = vrot.lane.b32.xlu0 %v3114_v6, %s5470_s5  ;;  %v3249_v6 = vmul.f32 %v8062_v24, %v9708_v50 }
 0x3bf   : > { %v2831_v13 = vpop.permute.xlu2 %2830 }
 0x3c3   : > { %3117 = vrot.lane.b32.xlu1 %v3113_v7, %s5470_s5  ;;  %v3236_v7 = vrot.slane %v3232_v57, 2 }
 0x3c5   : > { %3165 = vrot.lane.b32.xlu2 %v3161_v25, %s5465_s13  ;;  %v3238_v54 = vsel %vm958_vm4, %v3236_v7, %v3237_v42  ;;  %v9715_v7 = vstv %s6114_s23 }
 0x3c6   : > { %3167 = vrot.lane.b32.xlu0 %v3164_v40, %s5465_s13  ;;  %v3297_v40 = vmul.f32 %v7824_v28, %v9710_v62  ;;  %v3351_v50 = vmul.f32 %v8142_v15, %v9715_v7 }
 0x3c7   : > { %v2837_v60 = vpop.permute.xlu2 %2836 }
 0x3c8   : > { %v3301_v47 = vrot.slane %v3297_v40, 3 }
 0x3cb   : > { %3169 = vrot.lane.b32.xlu1 %v3160_v18, %s5465_s13  ;;  %v3254_v18 = vrot.slane %v3250_v45, 2 }
 0x3cd   : > { %3171 = vrot.lane.b32.xlu2 %v3163_v19, %s5465_s13  ;;  %v3267_v19 = vmul.f32 %v8054_v5, %v9709_v41 }
 0x3ce   : > { %3197 = vrot.lane.b32.xlu0 %v3193_v48, %s5466_s20 }
 0x3cf   : > { %v8088_v37 = vpop.permute.xlu2 %2871  ;;  %v3271_v53 = vrot.slane %v3267_v19, 2 }
 0x3d3   : > { %3199 = vrot.lane.b32.xlu1 %v3196_v61, %s5466_s20  ;;  %v9712_v61 = vld [vmem:[#allocation42_spill] sm:$0xff] }
 0x3d4   : > { %v3314_v29 = vmul.f32 %v7824_v28, %v9712_v61  ;;  %v3315_v16 = vmul.f32 %v8142_v15, %v9712_v61  ;;  %v9714_v28 = vstv %s6063_s2  ;;  %v8202_v61 = vld [vmem:[#allocation2 + $0x38] sm:$0x1] }
 0x3d5   : > { %3201 = vrot.lane.b32.xlu2 %v3192_v4, %s5466_s20  ;;  %v3270_v4 = vrot.slane %v3266_v26, 2  ;;  %9721 = vst [vmem:[#allocation119_spill] sm:$0xff] %v8202_v61 }
 0x3d6   : > { %3203 = vrot.lane.b32.xlu0 %v3195_v11, %s5466_s20  ;;  %v3319_v57 = vrot.slane %v3315_v16, 3 }
 0x3d7   : > { %v8101_v58 = vpop.permute.xlu2 %2895  ;;  %v3272_v48 = vsel %vm958_vm4, %v3270_v4, %v3271_v53 }
 0x3d8   : > { %v2833_v49 = vpop.permute.xlu0 %2832 }
 0x3d9   : > { %v2839_v9 = vsel %vm2838_vm2, %v2831_v13, %v2833_v49  ;;  %v3253_v13 = vrot.slane %v3249_v6, 2  ;;  %v9713_v49 = vstv %s6072_s25  ;;  %v3353_v6 = vrot.slane %v3351_v50, 3 }
 0x3da   : > { %2844 = vst.msk [vmem:[%s8106_s28 - $0x5] sm:$0xe0] %vm2843_vm3, %v2839_v9  ;;  %v3331_v38 = vmul.f32 %v8142_v15, %v9713_v49 }
 0x3db   : > { %3222 = vrot.lane.b32.xlu1 %v3221_v32, %s5469_s21  ;;  %v3255_v25 = vsel %vm958_vm4, %v3253_v13, %v3254_v18  ;;  %v9718_v13 = vstv %s6089_s30 }
 0x3dc   : > { %v3361_v41 = vmul.f32 %v8142_v15, %v9718_v13 }
 0x3dd   : > { %v2835_v44 = vpop.permute.xlu1 %2834  ;;  %3224 = vrot.lane.b32.xlu2 %v3220_v51, %s5469_s21  ;;  %v3318_v51 = vrot.slane %v3314_v29, 3 }
 0x3de   : > { %3239 = vrot.lane.b32.xlu0 %v3238_v54, %s5468_s4  ;;  %v2840_v63 = vsel %vm2838_vm2, %v2835_v44, %v2837_v60  ;;  %v3333_v54 = vrot.slane %v3331_v38, 3  ;;  %v8178_v44 = vld [vmem:[#allocation2 + $0x20] sm:$0xfe] }
 0x3df   : > { %2846 = vst.msk [vmem:[%s8106_s28 + $0x3] sm:$0x1f] %vm2845_vm9, %v2840_v63  ;;  %v8122_v0 = vpop.permute.xlu2 %2915 }
 0x3e0   : > { %v8124_v23 = vpop.permute.xlu0 %2867  ;;  %9716 = vst [vmem:[#allocation69_spill] sm:$0xff] %v8178_v44 }
 0x3e3   : > { %3241 = vrot.lane.b32.xlu1 %v3237_v42, %s5468_s4  ;;  %v3341_v42 = vmul.f32 %v8142_v15, %v9714_v28 }
 0x3e5   : > { %v8132_v21 = vpop.permute.xlu1 %2869  ;;  %3256 = vrot.lane.b32.xlu2 %v3255_v25, %s5467_s27  ;;  %v3343_v63 = vrot.slane %v3341_v42, 3  ;;  %v9719_v25 = vld [vmem:[#allocation45_spill] sm:$0xff] }
 0x3e6   : > { %3258 = vrot.lane.b32.xlu0 %v3254_v18, %s5467_s27  ;;  %v8181_v18 = vld [vmem:[#allocation2 + $0x28] sm:$0xfe]  ;;  %v3397_v26 = vmul.f32 %v8178_v44, %v9719_v25 }
 0x3e7   : > { %v8138_v60 = vpop.permute.xlu2 %2931  ;;  %9717 = vst [vmem:[#allocation122_spill] sm:$0xff] %v8181_v18  ;;  %v3398_v4 = vmul.f32 %v8181_v18, %v9719_v25 }
 0x3e8   : > { %v8140_v8 = vpop.permute.xlu0 %2873  ;;  %v3405_v22 = vrot.slane %v3397_v26, 4 }
 0x3e9   : > { %v3406_v29 = vrot.slane %v3398_v4, 4 }
 0x3eb   : > { %3273 = vrot.lane.b32.xlu1 %v3272_v48, %s5470_s5 }
 0x3ed   : > { %v8146_v11 = vpop.permute.xlu1 %2893  ;;  %3275 = vrot.lane.b32.xlu2 %v3271_v53, %s5470_s5  ;;  %v8191_v53 = vld [vmem:[#allocation2 + $0x30] sm:$0x1] }
 0x3ee   : > { %3303 = vrot.lane.b32.xlu0 %v3301_v47, %s5465_s13  ;;  %9720 = vst [vmem:[#allocation67_spill] sm:$0xff] %v8191_v53  ;;  %v3399_v48 = vmul.f32 %v8191_v53, %v9719_v25  ;;  %v3363_v47 = vrot.slane %v3361_v41, 3 }
 0x3ef   : > { %v8154_v10 = vpop.permute.xlu2 %2957 }
 0x3f0   : > { %v8156_v1 = vpop.permute.xlu0 %2897  ;;  %v3407_v16 = vrot.slane %v3399_v48, 4 }
 0x3f2   : > { %v3408_v42 = vsel %vm241_vm0, %v3405_v22, %v3407_v16 }
 0x3f3   : > { %3305 = vrot.lane.b32.xlu1 %v3302_v52, %s5465_s13  ;;  %v3400_v52 = vmul.f32 %v8202_v61, %v9719_v25 }
 0x3f5   : > { %v8164_v9 = vpop.permute.xlu1 %2899  ;;  %3320 = vrot.lane.b32.xlu2 %v3318_v51, %s5466_s20  ;;  %v3409_v7 = vrot.slane %v3400_v52, 4 }
 0x3f6   : > { %3322 = vrot.lane.b32.xlu0 %v3319_v57, %s5466_s20  ;;  %v9722_v57 = vld [vmem:[#allocation49_spill] sm:$0xff] }
 0x3f7   : > { %v8171_v32 = vpop.permute.xlu2 %3009  ;;  %v3429_v49 = vmul.f32 %v8178_v44, %v9722_v57  ;;  %v3430_v13 = vmul.f32 %v8181_v18, %v9722_v57  ;;  %v3432_v41 = vmul.f32 %v8202_v61, %v9722_v57 }
 0x3f8   : > { %v8176_v45 = vpop.permute.xlu0 %2917 }
 0x3f9   : > { %v3437_v50 = vrot.slane %v3429_v49, 4  ;;  %v3438_v48 = vrot.slane %v3430_v13, 4 }
 0x3fb   : > { %3334 = vrot.lane.b32.xlu1 %v3333_v54, %s5469_s21  ;;  %v3431_v54 = vmul.f32 %v8191_v53, %v9722_v57 }
 0x3fd   : > { %v8186_v19 = vpop.permute.xlu1 %2929  ;;  %3344 = vrot.lane.b32.xlu2 %v3343_v63, %s5468_s4  ;;  %v3410_v63 = vsel %vm241_vm0, %v3406_v29, %v3409_v7  ;;  %v3439_v25 = vrot.slane %v3431_v54, 4  ;;  %v9724_v54 = vld [vmem:[#allocation56_spill] sm:$0xff] }
 0x3fe   : > { %3354 = vrot.lane.b32.xlu0 %v3353_v6, %s5467_s27 }
 0x3ff   : > { %v8194_v62 = vpop.permute.xlu2 %3039 }
 0x400   : > { %v8196_v40 = vpop.permute.xlu0 %2943 }
 0x403   : > { %3364 = vrot.lane.b32.xlu1 %v3363_v47, %s5470_s5  ;;  %v3441_v47 = vrot.slane %v3432_v41, 4  ;;  %v3479_v41 = vmul.f32 %v8202_v61, %v9724_v54 }
 0x405   : > { %v8207_v51 = vpop.permute.xlu1 %2945  ;;  %3411 = vrot.lane.b32.xlu2 %v3405_v22, %s5465_s13  ;;  %v3440_v22 = vsel %vm241_vm0, %v3437_v50, %v3439_v25  ;;  %v3442_v57 = vsel %vm241_vm0, %v3438_v48, %v3441_v47 }
 0x406   : > { %3413 = vrot.lane.b32.xlu0 %v3406_v29, %s5465_s13  ;;  %v9723_v29 = vld [vmem:[#allocation53_spill] sm:$0xff] }
 0x407   : > { %v8213_v38 = vpop.permute.xlu2 %3045  ;;  %v3461_v16 = vmul.f32 %v8181_v18, %v9723_v29  ;;  %v3462_v52 = vmul.f32 %v8202_v61, %v9723_v29 }
 0x408   : > { %v8215_v28 = vpop.permute.xlu0 %2959 }
 0x409   : > { %v3466_v13 = vrot.slane %v3462_v52, 4  ;;  %v3483_v52 = vrot.slane %v3479_v41, 4  ;;  %v2854_v41 = vmul.f32 %v7945_v43, %v9727_v35  ;;  %v9729_v43 = vld [vmem:[#allocation52_spill] sm:$0xff] }
 0x40b   : > { %3415 = vrot.lane.b32.xlu1 %v3408_v42, %s5465_s13  ;;  %v2858_v17 = vadd.f32 %v2854_v41, %v9729_v43 }
 0x40d   : > { %v8222_v6 = vpop.permute.xlu1 %3007  ;;  %3417 = vrot.lane.b32.xlu2 %v3410_v63, %s5465_s13  ;;  %v3478_v63 = vmul.f32 %v8181_v18, %v9724_v54  ;;  %v2884_v53 = vadd.f32 %v8140_v8, %v2858_v17 }
 0x40e   : > { %3443 = vrot.lane.b32.xlu0 %v3437_v50, %s5466_s20  ;;  %v3465_v50 = vrot.slane %v3461_v16, 4 }
 0x40f   : > { %v8230_v26 = vpop.permute.xlu2 %3081  ;;  %v3482_v25 = vrot.slane %v3478_v63, 4  ;;  %v2910_v41 = vadd.f32 %v8164_v9, %v2884_v53 }
 0x410   : > { %v8232_v4 = vpop.permute.xlu0 %3011 }
 0x413   : > { %3445 = vrot.lane.b32.xlu1 %v3438_v48, %s5466_s20  ;;  %v3467_v48 = vsel %vm241_vm0, %v3465_v50, %v3466_v13  ;;  %v8269_v13 = vld [vmem:[#allocation2 + $0x20] sm:$0xfc] }
 0x415   : > { %v8241_v49 = vpop.permute.xlu1 %3013  ;;  %3447 = vrot.lane.b32.xlu2 %v3440_v22, %s5466_s20  ;;  %v9725_v22 = vld [vmem:[#allocation57_spill] sm:$0xff] }
 0x416   : > { %3449 = vrot.lane.b32.xlu0 %v3442_v57, %s5466_s20  ;;  %v3495_v29 = vmul.f32 %v8181_v18, %v9725_v22  ;;  %v3496_v16 = vmul.f32 %v8202_v61, %v9725_v22 }
 0x417   : > { %v8245_v42 = vpop.permute.xlu2 %3100 }
 0x418   : > { %v8247_v7 = vpop.permute.xlu0 %3041  ;;  %v3499_v63 = vrot.slane %v3495_v29, 4  ;;  %v3500_v12 = vrot.slane %v3496_v16, 4 }
 0x41a   : > { %v3501_v55 = vsel %vm241_vm0, %v3499_v63, %v3500_v12  ;;  %v2852_v12 = vmul.f32 %v7940_v33, %v9727_v35 }
 0x41b   : > { %3468 = vrot.lane.b32.xlu1 %v3465_v50, %s5469_s21  ;;  %v3484_v50 = vsel %vm241_vm0, %v3482_v25, %v3483_v52  ;;  %v8286_v52 = vld [vmem:[#allocation2 + $0x30] sm:$0x3] }
 0x41c   : > { %v2856_v17 = vadd.f32 %v2852_v12, %v9729_v43  ;;  %v2924_v12 = vadd.f32 %v8176_v45, %v2910_v41 }
 0x41d   : > { %v8255_v47 = vpop.permute.xlu1 %3043  ;;  %3470 = vrot.lane.b32.xlu2 %v3467_v48, %s5469_s21  ;;  %v9726_v48 = vld [vmem:[#allocation59_spill] sm:$0xff] }
 0x41e   : > { %3485 = vrot.lane.b32.xlu0 %v3482_v25, %s5468_s4  ;;  %v3512_v27 = vmul.f32 %v8181_v18, %v9726_v48  ;;  %v3513_v22 = vmul.f32 %v8202_v61, %v9726_v48  ;;  %v9728_v25 = vld [vmem:[#allocation62_spill] sm:$0xff]  ;;  %v2882_v53 = vadd.f32 %v8132_v21, %v2856_v17  ;;  %v9731_v17 = vld [vmem:[#allocation64_spill] sm:$0xff] }
 0x41f   : > { %v8263_v57 = vpop.permute.xlu2 %3165  ;;  %v3555_v29 = vmul.f32 %v8269_v13, %v9728_v25  ;;  %v3557_v39 = vmul.f32 %v8286_v52, %v9728_v25 }
 0x420   : > { %v8265_v54 = vpop.permute.xlu0 %3064  ;;  %v3516_v48 = vrot.slane %v3512_v27, 4  ;;  %v3517_v2 = vrot.slane %v3513_v22, 4  ;;  %v2851_v27 = vmul.f32 %v7932_v59, %v9727_v35 }
 0x421   : > { %v3565_v61 = vrot.slane %v3557_v39, 5 }
 0x422   : > { %v3518_v22 = vsel %vm241_vm0, %v3516_v48, %v3517_v2  ;;  %v2855_v2 = vadd.f32 %v2851_v27, %v9729_v43  ;;  %v2901_v27 = vsel %vm708_vm8, %v8146_v11, %v8101_v58 }
 0x423   : > { %3487 = vrot.lane.b32.xlu1 %v3484_v50, %s5468_s4 }
 0x425   : > { %v8278_v30 = vpop.permute.xlu1 %3066  ;;  %3502 = vrot.lane.b32.xlu2 %v3499_v63, %s5467_s27  ;;  %v3563_v63 = vrot.slane %v3555_v29, 5  ;;  %v3556_v29 = vmul.f32 %v8293_v36, %v9728_v25 }
 0x426   : > { %3504 = vrot.lane.b32.xlu0 %v3501_v55, %s5467_s27  ;;  %v8295_v55 = vld [vmem:[#allocation2 + $0x38] sm:$0x3] }
 0x427   : > { %v8284_v16 = vpop.permute.xlu2 %3171  ;;  %v3558_v44 = vmul.f32 %v8295_v55, %v9728_v25  ;;  %v2875_v25 = vsel %vm680_vm7, %v8124_v23, %v8132_v21  ;;  %v3564_v18 = vrot.slane %v3556_v29, 5  ;;  %v3566_v39 = vsel %vm1384_vm5, %v3563_v63, %v3565_v61 }
 0x428   : > { %v8288_v50 = vpop.permute.xlu0 %3083  ;;  %v2908_v23 = vadd.f32 %v8101_v58, %v2882_v53  ;;  %v2938_v61 = vadd.f32 %v8138_v60, %v2924_v12  ;;  %v3588_v58 = vmul.f32 %v8293_v36, %v9731_v17 }
 0x429   : > { %v3567_v15 = vrot.slane %v3558_v44, 5  ;;  %v2876_v44 = vsel %vm680_vm7, %v8088_v37, %v8140_v8 }
 0x42a   : > { %v2952_v37 = vadd.f32 %v8207_v51, %v2938_v61 }
 0x42b   : > { %3519 = vrot.lane.b32.xlu1 %v3516_v48, %s5470_s5  ;;  %v2853_v48 = vmul.f32 %v7943_v14, %v9727_v35  ;;  %v3587_v35 = vmul.f32 %v8269_v13, %v9731_v17  ;;  %v3589_v14 = vmul.f32 %v8286_v52, %v9731_v17  ;;  %v3568_v11 = vsel %vm1384_vm5, %v3564_v18, %v3567_v15 }
 0x42d   : > { %v8305_v33 = vpop.permute.xlu1 %3098  ;;  %3521 = vrot.lane.b32.xlu2 %v3518_v22, %s5470_s5  ;;  %v2857_v21 = vadd.f32 %v2853_v48, %v9729_v43  ;;  %v2902_v43 = vsel %vm708_vm8, %v8156_v1, %v8164_v9  ;;  %v3595_v29 = vrot.slane %v3587_v35, 5  ;;  %v3597_v15 = vrot.slane %v3589_v14, 5 }
 0x42e   : > { %3569 = vrot.lane.b32.xlu0 %v3563_v63, %s5465_s13  ;;  %v3590_v1 = vmul.f32 %v8295_v55, %v9731_v17  ;;  %v2966_v9 = vadd.f32 %v8215_v28, %v2952_v37  ;;  %v3596_v35 = vrot.slane %v3588_v58, 5 }
 0x42f   : > { %v8314_v59 = vpop.permute.xlu2 %3201 }
 0x430   : > { %9730 = vst [vmem:[#allocation104_spill] sm:$0xff] %v8314_v59  ;;  %v8320_v22 = vpop.permute.xlu0 %3115  ;;  %v2881_v59 = vadd.f32 %v2875_v25, %v2855_v2  ;;  %v2883_v2 = vadd.f32 %v2876_v44, %v2857_v21 }
 0x432   : > { %v2907_v41 = vadd.f32 %v2901_v27, %v2881_v59  ;;  %v9732_v59 = vld [vmem:[#allocation22_spill] sm:$0xff]  ;;  %v2909_v12 = vadd.f32 %v2902_v43, %v2883_v2  ;;  %v3598_v27 = vsel %vm1384_vm5, %v3595_v29, %v3597_v15 }
 0x433   : > { %3571 = vrot.lane.b32.xlu1 %v3564_v18, %s5465_s13  ;;  %v2922_v18 = vadd.f32 %v8122_v0, %v2908_v23  ;;  %v2974_v48 = vmul.f32 %v7991_v31, %v9732_v59  ;;  %v9733_v23 = vld [vmem:[#allocation71_spill] sm:$0xff]  ;;  %v2971_v44 = vmul.f32 %v7982_v46, %v9732_v59 }
 0x434   : > { %v2921_v25 = vadd.f32 %v8122_v0, %v2907_v41  ;;  %v3619_v31 = vmul.f32 %v8293_v36, %v9733_v23  ;;  %v2973_v0 = vmul.f32 %v7984_v56, %v9732_v59  ;;  %v3620_v61 = vmul.f32 %v8295_v55, %v9733_v23 }
 0x435   : > { %v8342_v63 = vpop.permute.xlu1 %3117  ;;  %3573 = vrot.lane.b32.xlu2 %v3566_v39, %s5465_s13  ;;  %v2936_v39 = vadd.f32 %v8186_v19, %v2922_v18  ;;  %v2983_v21 = vrot.slane %v2974_v48, 1  ;;  %v3599_v41 = vrot.slane %v3590_v1, 5  ;;  %v2972_v56 = vmul.f32 %v7995_v20, %v9732_v59 }
 0x436   : > { %3575 = vrot.lane.b32.xlu0 %v3568_v11, %s5465_s13  ;;  %v2935_v14 = vadd.f32 %v8186_v19, %v2921_v25  ;;  %v2923_v11 = vadd.f32 %v8176_v45, %v2909_v12  ;;  %v2980_v15 = vrot.slane %v2973_v0, 1  ;;  %v2979_v18 = vrot.slane %v2971_v44, 1  ;;  %v9735_v0 = vld [vmem:[#allocation73_spill] sm:$0xff] }
 0x437   : > { %v8352_v8 = vpop.permute.xlu2 %3224  ;;  %v2950_v19 = vadd.f32 %v8196_v40, %v2936_v39  ;;  %v2992_v58 = vadd.f32 %v2983_v21, %v2966_v9  ;;  %v3624_v2 = vrot.slane %v3620_v61, 5  ;;  %v3600_v12 = vsel %vm1384_vm5, %v3596_v35, %v3599_v41  ;;  %v9734_v39 = vld [vmem:[#allocation72_spill] sm:$0xff] }
 0x438   : > { %v8355_v53 = vpop.permute.xlu0 %3167  ;;  %v2949_v46 = vadd.f32 %v8196_v40, %v2935_v14  ;;  %v2937_v25 = vadd.f32 %v8138_v60, %v2923_v11  ;;  %v2982_v20 = vrot.slane %v2972_v56, 1  ;;  %v3636_v1 = vmul.f32 %v8293_v36, %v9734_v39 }
 0x439   : > { %v3024_v45 = vadd.f32 %v8241_v49, %v2992_v58  ;;  %v2964_v48 = vadd.f32 %v8154_v10, %v2950_v19  ;;  %v3637_v9 = vmul.f32 %v8295_v55, %v9734_v39  ;;  %v2981_v14 = vsel %vm792_vm1, %v2979_v18, %v2980_v15  ;;  %v9737_v39 = vld [vmem:[#allocation61_spill] sm:$0xff] }
 0x43a   : > { %v2963_v59 = vadd.f32 %v8154_v10, %v2949_v46  ;;  %v2951_v40 = vadd.f32 %v8207_v51, %v2937_v25  ;;  %v3015_v51 = vsel %vm680_vm7, %v8222_v6, %v8171_v32  ;;  %v3653_v44 = vmul.f32 %v8293_v36, %v9735_v0 }
 0x43b   : > { %3601 = vrot.lane.b32.xlu1 %v3595_v29, %s5466_s20  ;;  %v3623_v29 = vrot.slane %v3619_v31, 5  ;;  %v3056_v60 = vadd.f32 %v8213_v38, %v3024_v45  ;;  %v3640_v41 = vrot.slane %v3636_v1, 5  ;;  %v3641_v56 = vrot.slane %v3637_v9, 5 }
 0x43c   : > { %v2965_v61 = vadd.f32 %v8215_v28, %v2951_v40  ;;  %v2989_v11 = vadd.f32 %v2981_v14, %v2963_v59  ;;  %v3047_v58 = vsel %vm708_vm8, %v8194_v62, %v8247_v7  ;;  %v3016_v18 = vsel %vm680_vm7, %v8232_v4, %v8241_v49 }
 0x43d   : > { %v8373_v17 = vpop.permute.xlu1 %3169  ;;  %3603 = vrot.lane.b32.xlu2 %v3596_v35, %s5466_s20  ;;  %v3625_v35 = vsel %vm1384_vm5, %v3623_v29, %v3624_v2  ;;  %v3073_v31 = vadd.f32 %v8278_v30, %v3056_v60  ;;  %v3657_v45 = vrot.slane %v3653_v44, 5  ;;  %v9736_v2 = vld [vmem:[#allocation74_spill] sm:$0xff]  ;;  %v3132_v1 = vmul.f32 %v8054_v5, %v9737_v39  ;;  %v8451_v60 = vld [vmem:[#allocation2 + $0x20] sm:$0xf8] }
 0x43e   : > { %3605 = vrot.lane.b32.xlu0 %v3598_v27, %s5466_s20  ;;  %v2984_v27 = vsel %vm792_vm1, %v2982_v20, %v2983_v21  ;;  %v3021_v46 = vadd.f32 %v3015_v51, %v2989_v11  ;;  %v2991_v25 = vadd.f32 %v2980_v15, %v2965_v61  ;;  %v3048_v20 = vsel %vm708_vm8, %v8255_v47, %v8213_v38 }
 0x43f   : > { %v8383_v43 = vpop.permute.xlu2 %3256  ;;  %v2990_v10 = vadd.f32 %v2984_v27, %v2964_v48  ;;  %v3090_v28 = vadd.f32 %v8288_v50, %v3073_v31  ;;  %v3670_v48 = vmul.f32 %v8293_v36, %v9736_v2  ;;  %v3671_v4 = vmul.f32 %v8295_v55, %v9736_v2 }
 0x440   : > { %v8386_v37 = vpop.permute.xlu0 %3197  ;;  %v3053_v62 = vadd.f32 %v3047_v58, %v3021_v46  ;;  %v3023_v49 = vadd.f32 %v3016_v18, %v2991_v25  ;;  %v3141_v11 = vrot.slane %v3132_v1, 2 }
 0x441   : > { %v3022_v6 = vadd.f32 %v8171_v32, %v2990_v10  ;;  %v3107_v38 = vadd.f32 %v8245_v42, %v3090_v28  ;;  %v3674_v14 = vrot.slane %v3670_v48, 5  ;;  %v3131_v10 = vmul.f32 %v8052_v3, %v9737_v39  ;;  %v8481_v48 = vld [vmem:[#allocation2 + $0x28] sm:$0xf8] }
 0x442   : > { %v3070_v40 = vadd.f32 %v8265_v54, %v3053_v62  ;;  %v3055_v9 = vadd.f32 %v3048_v20, %v3023_v49  ;;  %v3675_v51 = vrot.slane %v3671_v4, 5 }
 0x443   : > { %3607 = vrot.lane.b32.xlu1 %v3600_v12, %s5466_s20  ;;  %v3054_v32 = vadd.f32 %v8247_v7, %v3022_v6  ;;  %v3642_v12 = vsel %vm1384_vm5, %v3640_v41, %v3641_v56  ;;  %v3124_v5 = vadd.f32 %v8342_v63, %v3107_v38 }
 0x444   : > { %v3087_v44 = vadd.f32 %v8230_v26, %v3070_v40  ;;  %v8493_v40 = vld [vmem:[#allocation2 + $0x38] sm:$0x7] }
 0x445   : > { %v8403_v23 = vpop.permute.xlu1 %3199  ;;  %3626 = vrot.lane.b32.xlu2 %v3623_v29, %s5469_s21  ;;  %v3654_v29 = vmul.f32 %v8295_v55, %v9735_v0  ;;  %v3071_v15 = vadd.f32 %v8265_v54, %v3054_v32  ;;  %v3129_v54 = vmul.f32 %v8050_v34, %v9737_v39  ;;  %v3072_v0 = vadd.f32 %v8278_v30, %v3055_v9 }
 0x446   : > { %3628 = vrot.lane.b32.xlu0 %v3625_v35, %s5469_s21  ;;  %v8453_v35 = vld [vmem:[#allocation2 + $0x30] sm:$0x7]  ;;  %v3104_v56 = vadd.f32 %v8305_v33, %v3087_v44  ;;  %v3130_v30 = vmul.f32 %v8062_v24, %v9737_v39  ;;  %v3150_v46 = vadd.f32 %v3141_v11, %v3124_v5 }
 0x447   : > { %v8411_v21 = vpop.permute.xlu2 %3275  ;;  %v3658_v7 = vrot.slane %v3654_v29, 5  ;;  %v3088_v31 = vadd.f32 %v8230_v26, %v3071_v15  ;;  %v3137_v6 = vrot.slane %v3129_v54, 2  ;;  %v3138_v26 = vrot.slane %v3131_v10, 2  ;;  %v9739_v10 = vld [vmem:[#allocation76_spill] sm:$0xff] }
 0x448   : > { %v8416_v19 = vpop.permute.xlu0 %3203  ;;  %v3676_v29 = vsel %vm1384_vm5, %v3674_v14, %v3675_v51  ;;  %v3089_v28 = vadd.f32 %v8288_v50, %v3072_v0  ;;  %v3140_v25 = vrot.slane %v3130_v30, 2  ;;  %v3121_v62 = vadd.f32 %v8320_v22, %v3104_v56 }
 0x449   : > { %v3659_v61 = vsel %vm1384_vm5, %v3657_v45, %v3658_v7  ;;  %v3105_v58 = vadd.f32 %v8305_v33, %v3088_v31  ;;  %v3139_v50 = vsel %vm958_vm4, %v3137_v6, %v3138_v26  ;;  %v3182_v20 = vadd.f32 %v8284_v16, %v3150_v46 }
 0x44a   : > { %v3142_v4 = vsel %vm958_vm4, %v3140_v25, %v3141_v11  ;;  %v3106_v49 = vadd.f32 %v8245_v42, %v3089_v28  ;;  %v3173_v7 = vsel %vm680_vm7, %v8263_v57, %v8355_v53  ;;  %v3147_v38 = vadd.f32 %v3139_v50, %v3121_v62  ;;  %v9742_v25 = vld [vmem:[#allocation115_spill] sm:$0xff] }
 0x44b   : > { %3643 = vrot.lane.b32.xlu1 %v3640_v41, %s5468_s4  ;;  %v9738_v41 = vld [vmem:[#allocation75_spill] sm:$0xff]  ;;  %v3122_v32 = vadd.f32 %v8320_v22, %v3105_v58  ;;  %v3214_v22 = vadd.f32 %v8416_v19, %v3182_v20  ;;  %v3745_v57 = vmul.f32 %v8451_v60, %v9739_v10  ;;  %v3748_v28 = vmul.f32 %v8493_v40, %v9739_v10 }
 0x44c   : > { %v3713_v34 = vmul.f32 %v8451_v60, %v9738_v41  ;;  %v3715_v3 = vmul.f32 %v8453_v35, %v9738_v41  ;;  %v3714_v24 = vmul.f32 %v8481_v48, %v9738_v41  ;;  %v3716_v15 = vmul.f32 %v8493_v40, %v9738_v41 }
 0x44d   : > { %v8436_v59 = vpop.permute.xlu1 %3222  ;;  %3645 = vrot.lane.b32.xlu2 %v3642_v12, %s5468_s4  ;;  %v3148_v9 = vadd.f32 %v3142_v4, %v3122_v32  ;;  %v3123_v42 = vadd.f32 %v8342_v63, %v3106_v49  ;;  %v3179_v5 = vadd.f32 %v3173_v7, %v3147_v38  ;;  %v3174_v63 = vsel %vm680_vm7, %v8373_v17, %v8284_v16  ;;  %v9743_v49 = vld [vmem:[#allocation60_spill] sm:$0xff]  ;;  %v8551_v38 = vld [vmem:[#allocation2 + $0x10] sm:$0xff] }
 0x44e   : > { %3660 = vrot.lane.b32.xlu0 %v3657_v45, %s5467_s27  ;;  %v3721_v2 = vrot.slane %v3713_v34, 6  ;;  %v3723_v33 = vrot.slane %v3715_v3, 6  ;;  %v3722_v1 = vrot.slane %v3714_v24, 6  ;;  %v3725_v31 = vrot.slane %v3716_v15, 6  ;;  %v9740_v3 = vld [vmem:[#allocation104_spill] sm:$0xff] }
 0x44f   : > { %v8447_v47 = vpop.permute.xlu2 %3320  ;;  %v3180_v51 = vadd.f32 %v8355_v53, %v3148_v9  ;;  %v3231_v0 = vadd.f32 %v8352_v8, %v3214_v22  ;;  %v3747_v53 = vmul.f32 %v8453_v35, %v9739_v10  ;;  %v3206_v56 = vsel %vm708_vm8, %v9740_v3, %v8416_v19 }
 0x450   : > { %v8449_v27 = vpop.permute.xlu0 %3239  ;;  %v3724_v39 = vsel %vm1550_vm6, %v3721_v2, %v3723_v33  ;;  %v3753_v17 = vrot.slane %v3745_v57, 6  ;;  %v3777_v15 = vmul.f32 %v8481_v48, %v9743_v49  ;;  %v3757_v7 = vrot.slane %v3748_v28, 6 }
 0x451   : > { %v3212_v41 = vadd.f32 %v8403_v23, %v3180_v51 }
 0x452   : > { %v3781_v57 = vrot.slane %v3777_v15, 6 }
 0x453   : > { %3662 = vrot.lane.b32.xlu1 %v3659_v61, %s5467_s27  ;;  %v3149_v61 = vadd.f32 %v3138_v26, %v3123_v42  ;;  %v3229_v6 = vadd.f32 %v8436_v59, %v3212_v41  ;;  %v3726_v26 = vsel %vm1550_vm6, %v3722_v1, %v3725_v31 }
 0x455   : > { %v8474_v18 = vpop.permute.xlu1 %3241  ;;  %3677 = vrot.lane.b32.xlu2 %v3674_v14, %s5470_s5  ;;  %v3205_v14 = vsel %vm708_vm8, %v8386_v37, %v8403_v23  ;;  %v3746_v37 = vmul.f32 %v8481_v48, %v9739_v10  ;;  %v3181_v58 = vadd.f32 %v3174_v63, %v3149_v61  ;;  %v3246_v24 = vadd.f32 %v8449_v27, %v3229_v6 }
 0x456   : > { %3679 = vrot.lane.b32.xlu0 %v3676_v29, %s5470_s5  ;;  %v3211_v11 = vadd.f32 %v3205_v14, %v3179_v5  ;;  %v3248_v16 = vadd.f32 %v8474_v18, %v3231_v0  ;;  %v3755_v29 = vrot.slane %v3747_v53, 6 }
 0x457   : > { %v8479_v45 = vpop.permute.xlu2 %3344  ;;  %v3213_v23 = vadd.f32 %v3206_v56, %v3181_v58  ;;  %v3754_v46 = vrot.slane %v3746_v37, 6 }
 0x458   : > { %v8487_v12 = vpop.permute.xlu0 %3258  ;;  %v3228_v30 = vadd.f32 %v8436_v59, %v3211_v11  ;;  %v9741_v59 = vld [vmem:[#allocation77_spill] sm:$0xff]  ;;  %v3756_v4 = vsel %vm1550_vm6, %v3753_v17, %v3755_v29 }
 0x459   : > { %v3265_v19 = vadd.f32 %v8487_v12, %v3248_v16  ;;  %v3286_v62 = vmul.f32 %v9742_v25, %v9741_v59  ;;  %v3230_v50 = vadd.f32 %v8352_v8, %v3213_v23  ;;  %v3285_v8 = vmul.f32 %v8551_v38, %v9741_v59  ;;  %v9746_v25 = vld [vmem:[#allocation80_spill] sm:$0xff] }
 0x45a   : > { %v3245_v33 = vadd.f32 %v8449_v27, %v3228_v30  ;;  %v3778_v27 = vmul.f32 %v8493_v40, %v9743_v49  ;;  %v3758_v5 = vsel %vm1550_vm6, %v3754_v46, %v3757_v7 }
 0x45b   : > { %3727 = vrot.lane.b32.xlu1 %v3721_v2, %s5465_s13  ;;  %v3282_v22 = vadd.f32 %v8411_v21, %v3265_v19  ;;  %v3290_v42 = vrot.slane %v3286_v62, 3  ;;  %v3289_v37 = vrot.slane %v3285_v8, 3  ;;  %v3828_v62 = vmul.f32 %v8481_v48, %v9746_v25 }
 0x45c   : > { %v3262_v9 = vadd.f32 %v8383_v43, %v3245_v33  ;;  %v3782_v61 = vrot.slane %v3778_v27, 6  ;;  %v9748_v27 = vld [vmem:[#allocation122_spill] sm:$0xff] }
 0x45d   : > { %v3274_v54 = vpop.permute.xlu1 %3273  ;;  %3729 = vrot.lane.b32.xlu2 %v3722_v1, %s5465_s13  ;;  %v3247_v1 = vadd.f32 %v8474_v18, %v3230_v50  ;;  %v3296_v51 = vadd.f32 %v3290_v42, %v3282_v22  ;;  %v9744_v18 = vld [vmem:[#allocation78_spill] sm:$0xff]  ;;  %v9747_v22 = vld [vmem:[#allocation31_spill] sm:$0xff] }
 0x45e   : > { %3731 = vrot.lane.b32.xlu0 %v3724_v39, %s5465_s13  ;;  %v3263_v39 = vadd.f32 %v8383_v43, %v3246_v24  ;;  %v3279_v14 = vadd.f32 %v3274_v54, %v3262_v9  ;;  %v3794_v63 = vmul.f32 %v8481_v48, %v9744_v18  ;;  %v3795_v0 = vmul.f32 %v8493_v40, %v9744_v18 }
 0x45f   : > { %v8516_v44 = vpop.permute.xlu2 %3411  ;;  %v3264_v43 = vadd.f32 %v8487_v12, %v3247_v1  ;;  %v3783_v12 = vsel %vm1550_vm6, %v3781_v57, %v3782_v61  ;;  %v3829_v9 = vmul.f32 %v8493_v40, %v9746_v25  ;;  %v8604_v61 = vld [vmem:[#allocation3 + $0x10] sm:$0xe0] }
 0x460   : > { %v3304_v34 = vpop.permute.xlu0 %3303  ;;  %v3280_v10 = vadd.f32 %v3274_v54, %v3263_v39  ;;  %v3293_v53 = vadd.f32 %v3289_v37, %v3279_v14  ;;  %v3798_v16 = vrot.slane %v3794_v63, 6  ;;  %v3376_v39 = vmul.f32 %v9748_v27, %v9747_v22  ;;  %v8634_v27 = vld [vmem:[#allocation3 + $0x28] sm:$0x1f] }
 0x461   : > { %v3281_v58 = vadd.f32 %v8411_v21, %v3264_v43 }
 0x462   : > { %v3294_v3 = vadd.f32 %v3290_v42, %v3280_v10  ;;  %v3832_v42 = vrot.slane %v3828_v62, 6 }
 0x463   : > { %3733 = vrot.lane.b32.xlu1 %v3726_v26, %s5465_s13 }
 0x465   : > { %v3306_v2 = vpop.permute.xlu1 %3305  ;;  %3759 = vrot.lane.b32.xlu2 %v3753_v17, %s5466_s20  ;;  %v3799_v17 = vrot.slane %v3795_v0, 6  ;;  %v3833_v0 = vrot.slane %v3829_v9, 6  ;;  %v9753_v9 = vld [vmem:[#allocation34_spill] sm:$0xff] }
 0x466   : > { %3761 = vrot.lane.b32.xlu0 %v3754_v46, %s5466_s20  ;;  %v3307_v54 = vsel %vm680_vm7, %v3304_v34, %v3306_v2  ;;  %v3313_v11 = vadd.f32 %v3306_v2, %v3296_v51  ;;  %v3311_v6 = vadd.f32 %v3306_v2, %v3294_v3  ;;  %v9745_v34 = vld [vmem:[#allocation79_spill] sm:$0xff]  ;;  %v3295_v2 = vadd.f32 %v3289_v37, %v3281_v58 }
 0x467   : > { %v8540_v32 = vpop.permute.xlu2 %3417  ;;  %v3310_v30 = vadd.f32 %v3307_v54, %v3293_v53  ;;  %v3811_v46 = vmul.f32 %v8481_v48, %v9745_v34  ;;  %v3812_v29 = vmul.f32 %v8493_v40, %v9745_v34  ;;  %v3800_v19 = vsel %vm1550_vm6, %v3798_v16, %v3799_v17  ;;  %v9750_v40 = vld [vmem:[#allocation69_spill] sm:$0xff]  ;;  %v9751_v58 = vld [vmem:[#allocation67_spill] sm:$0xff] }
 0x468   : > { %v3323_v20 = vpop.permute.xlu0 %3322  ;;  %v3312_v50 = vadd.f32 %v3307_v54, %v3295_v2  ;;  %v3384_v51 = vrot.slane %v3376_v39, 4  ;;  %v3375_v43 = vmul.f32 %v9750_v40, %v9747_v22  ;;  %v8623_v2 = vld [vmem:[#allocation3 + $0x20] sm:$0x1f] }
 0x469   : > { %v3324_v26 = vsel %vm708_vm8, %v8447_v47, %v3323_v20  ;;  %v3330_v23 = vadd.f32 %v3323_v20, %v3313_v11  ;;  %v3328_v24 = vadd.f32 %v3323_v20, %v3311_v6  ;;  %v3815_v59 = vrot.slane %v3811_v46, 6  ;;  %v9749_v20 = vld [vmem:[#allocation119_spill] sm:$0xff] }
 0x46a   : > { %v3327_v33 = vadd.f32 %v3324_v26, %v3310_v30  ;;  %v3816_v7 = vrot.slane %v3812_v29, 6  ;;  %v3378_v8 = vmul.f32 %v9749_v20, %v9747_v22  ;;  %v3329_v48 = vadd.f32 %v3324_v26, %v3312_v50  ;;  %v8613_v6 = vld [vmem:[#allocation3 + $0x18] sm:$0xe0] }
 0x46b   : > { %3763 = vrot.lane.b32.xlu1 %v3756_v4, %s5466_s20  ;;  %v3834_v30 = vsel %vm1550_vm6, %v3832_v42, %v3833_v0  ;;  %v3383_v46 = vrot.slane %v3375_v43, 4 }
 0x46c   : > { %v3387_v18 = vrot.slane %v3378_v8, 4 }
 0x46d   : > { %v3335_v31 = vpop.permute.xlu1 %3334  ;;  %3765 = vrot.lane.b32.xlu2 %v3758_v5, %s5466_s20 }
 0x46e   : > { %3784 = vrot.lane.b32.xlu0 %v3781_v57, %s5469_s21  ;;  %v3340_v28 = vadd.f32 %v3335_v31, %v3330_v23  ;;  %v3337_v4 = vadd.f32 %v3335_v31, %v3327_v33  ;;  %v3338_v49 = vadd.f32 %v3335_v31, %v3328_v24  ;;  %v3817_v57 = vsel %vm1550_vm6, %v3815_v59, %v3816_v7 }
 0x46f   : > { %v8566_v41 = vpop.permute.xlu2 %3447  ;;  %v3339_v37 = vadd.f32 %v3335_v31, %v3329_v48  ;;  %v3388_v17 = vsel %vm241_vm0, %v3384_v51, %v3387_v18  ;;  %v3377_v31 = vmul.f32 %v9751_v58, %v9747_v22  ;;  %v3886_v58 = vmul.f32 %v8634_v27, %v9753_v9 }
 0x470   : > { %v8568_v56 = vpop.permute.xlu0 %3354  ;;  %v3350_v1 = vadd.f32 %v8479_v45, %v3340_v28  ;;  %v3348_v14 = vadd.f32 %v8479_v45, %v3338_v49  ;;  %v3347_v10 = vadd.f32 %v8479_v45, %v3337_v4 }
 0x471   : > { %v3349_v23 = vadd.f32 %v8479_v45, %v3339_v37  ;;  %v3385_v33 = vrot.slane %v3377_v31, 4 }
 0x472   : > { %v3360_v5 = vadd.f32 %v8568_v56, %v3350_v1  ;;  %v3357_v53 = vadd.f32 %v8568_v56, %v3347_v10  ;;  %v3358_v3 = vadd.f32 %v8568_v56, %v3348_v14 }
 0x473   : > { %3786 = vrot.lane.b32.xlu1 %v3783_v12, %s5469_s21  ;;  %v9752_v12 = vld [vmem:[#allocation81_spill] sm:$0xff] }
 0x474   : > { %v3857_v26 = vmul.f32 %v8604_v61, %v9752_v12  ;;  %v3859_v49 = vmul.f32 %v8623_v2, %v9752_v12 }
 0x475   : > { %v8580_v21 = vpop.permute.xlu1 %3364  ;;  %3801 = vrot.lane.b32.xlu2 %v3798_v16, %s5468_s4 }
 0x476   : > { %3803 = vrot.lane.b32.xlu0 %v3800_v19, %s5468_s4  ;;  %v3370_v54 = vadd.f32 %v8580_v21, %v3360_v5  ;;  %v3368_v34 = vadd.f32 %v8580_v21, %v3358_v3  ;;  %v3367_v29 = vadd.f32 %v8580_v21, %v3357_v53  ;;  %v3858_v19 = vmul.f32 %v8613_v6, %v9752_v12 }
 0x477   : > { %v8584_v47 = vpop.permute.xlu2 %3470 }
 0x478   : > { %v3414_v15 = vpop.permute.xlu0 %3413  ;;  %v3396_v28 = vadd.f32 %v3388_v17, %v3370_v54  ;;  %v3394_v45 = vadd.f32 %v3384_v51, %v3368_v34  ;;  %v3393_v25 = vadd.f32 %v3383_v46, %v3367_v29  ;;  %v3884_v54 = vmul.f32 %v8613_v6, %v9753_v9 }
 0x479   : > { %v3419_v50 = vsel %vm680_vm7, %v8516_v44, %v3414_v15 }
 0x47a   : > { %v3428_v62 = vadd.f32 %v8540_v32, %v3396_v28  ;;  %v3425_v20 = vadd.f32 %v3419_v50, %v3393_v25  ;;  %v3426_v8 = vadd.f32 %v3414_v15, %v3394_v45  ;;  %v9756_v45 = vld [vmem:[#allocation83_spill] sm:$0xff] }
 0x47b   : > { %3818 = vrot.lane.b32.xlu1 %v3815_v59, %s5467_s27  ;;  %v3359_v59 = vadd.f32 %v8568_v56, %v3349_v23  ;;  %v3386_v56 = vsel %vm241_vm0, %v3383_v46, %v3385_v33  ;;  %v3923_v25 = vmul.f32 %v8613_v6, %v9756_v45 }
 0x47d   : > { %v3416_v63 = vpop.permute.xlu1 %3415  ;;  %3820 = vrot.lane.b32.xlu2 %v3817_v57, %s5467_s27  ;;  %v3369_v7 = vadd.f32 %v8580_v21, %v3359_v59  ;;  %v3860_v21 = vmul.f32 %v8634_v27, %v9752_v12 }
 0x47e   : > { %3835 = vrot.lane.b32.xlu0 %v3832_v42, %s5470_s5  ;;  %v3883_v42 = vmul.f32 %v8604_v61, %v9753_v9  ;;  %v3420_v44 = vsel %vm680_vm7, %v3416_v63, %v8540_v32 }
 0x47f   : > { %v3503_v11 = vpop.permute.xlu2 %3502  ;;  %v3395_v14 = vadd.f32 %v3386_v56, %v3369_v7 }
 0x480   : > { %v3444_v16 = vpop.permute.xlu0 %3443 }
 0x481   : > { %v3427_v51 = vadd.f32 %v3420_v44, %v3395_v14  ;;  %v9758_v44 = vld [vmem:[#allocation84_spill] sm:$0xff] }
 0x483   : > { %3837 = vrot.lane.b32.xlu1 %v3834_v30, %s5470_s5 }
 0x485   : > { %v3446_v24 = vpop.permute.xlu1 %3445  ;;  %3865 = vrot.lane.b32.xlu2 %v3857_v26, %s5465_s13 }
 0x486   : > { %3867 = vrot.lane.b32.xlu0 %v3858_v19, %s5465_s13  ;;  %v3451_v39 = vsel %vm708_vm8, %v3444_v16, %v3446_v24  ;;  %v3458_v57 = vadd.f32 %v3446_v24, %v3426_v8  ;;  %v9754_v16 = vld [vmem:[#allocation32_spill] sm:$0xff]  ;;  %v9755_v19 = vld [vmem:[#allocation39_spill] sm:$0xff] }
 0x487   : > { %v3522_v4 = vpop.permute.xlu2 %3521  ;;  %v3457_v10 = vadd.f32 %v3451_v39, %v3425_v20  ;;  %v3534_v17 = vmul.f32 %v8293_v36, %v9754_v16  ;;  %v3536_v30 = vmul.f32 %v8295_v55, %v9754_v16  ;;  %v3910_v55 = vmul.f32 %v8634_v27, %v9755_v19  ;;  %v8684_v20 = vld [vmem:[#allocation3 + $0x20] sm:$0x3f] }
 0x488   : > { %v3450_v22 = vpop.permute.xlu0 %3449  ;;  %v3533_v50 = vmul.f32 %v8269_v13, %v9754_v16  ;;  %v3924_v13 = vmul.f32 %v8634_v27, %v9756_v45 }
 0x489   : > { %v3460_v1 = vadd.f32 %v3450_v22, %v3428_v62  ;;  %v3452_v5 = vsel %vm708_vm8, %v8566_v41, %v3450_v22  ;;  %v3885_v41 = vmul.f32 %v8623_v2, %v9753_v9  ;;  %v3545_v46 = vrot.slane %v3536_v30, 5 }
 0x48a   : > { %v3459_v0 = vadd.f32 %v3452_v5, %v3427_v51  ;;  %v3541_v8 = vrot.slane %v3533_v50, 5 }
 0x48b   : > { %v3477_v48 = vadd.f32 %v8584_v47, %v3460_v1  ;;  %3869 = vrot.lane.b32.xlu1 %v3859_v49, %s5465_s13  ;;  %v8682_v1 = vld [vmem:[#allocation3 + $0x10] sm:$0xc0] }
 0x48c   : > { %v3476_v31 = vadd.f32 %v8584_v47, %v3459_v0  ;;  %v3909_v47 = vmul.f32 %v8613_v6, %v9755_v19 }
 0x48d   : > { %v3469_v15 = vpop.permute.xlu1 %3468  ;;  %3871 = vrot.lane.b32.xlu2 %v3860_v21, %s5465_s13  ;;  %v3993_v21 = vmul.f32 %v8684_v20, %v9758_v44 }
 0x48e   : > { %3891 = vrot.lane.b32.xlu0 %v3883_v42, %s5466_s20  ;;  %v3474_v32 = vadd.f32 %v3469_v15, %v3457_v10  ;;  %v3475_v18 = vadd.f32 %v3469_v15, %v3458_v57  ;;  %v9757_v42 = vld [vmem:[#allocation82_spill] sm:$0xff] }
 0x48f   : > { %v8650_v63 = vpop.permute.xlu2 %3573  ;;  %v3938_v10 = vmul.f32 %v8634_v27, %v9757_v42 }
 0x490   : > { %v3486_v37 = vpop.permute.xlu0 %3485 }
 0x491   : > { %v3491_v40 = vadd.f32 %v3486_v37, %v3474_v32  ;;  %v3492_v43 = vadd.f32 %v3486_v37, %v3475_v18 }
 0x493   : > { %v3509_v53 = vadd.f32 %v3503_v11, %v3492_v43  ;;  %3893 = vrot.lane.b32.xlu1 %v3884_v54, %s5466_s20  ;;  %v3508_v3 = vadd.f32 %v3503_v11, %v3491_v40  ;;  %v3542_v11 = vrot.slane %v3534_v17, 5  ;;  %v4000_v40 = vrot.slane %v3993_v21, 1  ;;  %v8701_v43 = vld [vmem:[#allocation3 + $0x28] sm:$0x3f]  ;;  %v9759_v17 = vld [vmem:[#allocation36_spill] sm:$0xff] }
 0x495   : > { %v3488_v12 = vpop.permute.xlu1 %3487  ;;  %3895 = vrot.lane.b32.xlu2 %v3885_v41, %s5466_s20  ;;  %v3546_v59 = vsel %vm1384_vm5, %v3542_v11, %v3545_v46 }
 0x496   : > { %3897 = vrot.lane.b32.xlu0 %v3886_v58, %s5466_s20  ;;  %v3493_v26 = vadd.f32 %v3488_v12, %v3476_v31  ;;  %v3494_v23 = vadd.f32 %v3488_v12, %v3477_v48  ;;  %v3991_v48 = vmul.f32 %v8682_v1, %v9758_v44  ;;  %v3951_v58 = vmul.f32 %v8613_v6, %v9759_v17  ;;  %v8708_v31 = vld [vmem:[#allocation3 + $0x18] sm:$0xc0] }
 0x497   : > { %v8666_v34 = vpop.permute.xlu2 %3603  ;;  %v3994_v12 = vmul.f32 %v8701_v43, %v9758_v44 }
 0x498   : > { %v3505_v36 = vpop.permute.xlu0 %3504  ;;  %v3999_v37 = vrot.slane %v3991_v48, 1 }
 0x499   : > { %v3510_v29 = vadd.f32 %v3505_v36, %v3493_v26  ;;  %v3511_v28 = vadd.f32 %v3505_v36, %v3494_v23 }
 0x49a   : > { %v4001_v23 = vsel %vm792_vm1, %v3999_v37, %v4000_v40 }
 0x49b   : > { %v3527_v33 = vadd.f32 %v3522_v4, %v3510_v29  ;;  %v3528_v24 = vadd.f32 %v3522_v4, %v3511_v28  ;;  %3913 = vrot.lane.b32.xlu1 %v3909_v47, %s5469_s21  ;;  %v3535_v4 = vmul.f32 %v8286_v52, %v9754_v16  ;;  %v3937_v52 = vmul.f32 %v8613_v6, %v9757_v42 }
 0x49c   : > { %v4003_v29 = vrot.slane %v3994_v12, 1 }
 0x49d   : > { %v3554_v62 = vadd.f32 %v3546_v59, %v3528_v24  ;;  %v3520_v49 = vpop.permute.xlu1 %3519  ;;  %3915 = vrot.lane.b32.xlu2 %v3910_v55, %s5469_s21  ;;  %v3543_v9 = vrot.slane %v3535_v4, 5  ;;  %v9760_v24 = vld [vmem:[#allocation40_spill] sm:$0xff] }
 0x49e   : > { %3927 = vrot.lane.b32.xlu0 %v3923_v25, %s5468_s4  ;;  %v3525_v7 = vadd.f32 %v3520_v49, %v3508_v3  ;;  %v3526_v22 = vadd.f32 %v3520_v49, %v3509_v53  ;;  %v4023_v55 = vmul.f32 %v8682_v1, %v9760_v24  ;;  %v4025_v59 = vmul.f32 %v8684_v20, %v9760_v24 }
 0x49f   : > { %v3627_v56 = vpop.permute.xlu2 %3626  ;;  %v3544_v15 = vsel %vm1384_vm5, %v3541_v8, %v3543_v9 }
 0x4a0   : > { %v3570_v39 = vpop.permute.xlu0 %3569  ;;  %v3552_v14 = vadd.f32 %v3542_v11, %v3526_v22  ;;  %v3551_v57 = vadd.f32 %v3541_v8, %v3525_v7  ;;  %v3553_v53 = vadd.f32 %v3544_v15, %v3527_v33  ;;  %v3952_v11 = vmul.f32 %v8634_v27, %v9759_v17 }
 0x4a1   : > { %v4032_v50 = vrot.slane %v4025_v59, 1  ;;  %v4024_v22 = vmul.f32 %v8708_v31, %v9760_v24 }
 0x4a3   : > { %3929 = vrot.lane.b32.xlu1 %v3924_v13, %s5468_s4 }
 0x4a5   : > { %v3572_v5 = vpop.permute.xlu1 %3571  ;;  %3941 = vrot.lane.b32.xlu2 %v3937_v52, %s5467_s27 }
 0x4a6   : > { %3943 = vrot.lane.b32.xlu0 %v3938_v10, %s5467_s27  ;;  %v3577_v51 = vsel %vm680_vm7, %v3570_v39, %v3572_v5  ;;  %v3584_v32 = vadd.f32 %v3572_v5, %v3552_v14  ;;  %v9761_v10 = vld [vmem:[#allocation85_spill] sm:$0xff] }
 0x4a7   : > { %v3583_v18 = vadd.f32 %v3577_v51, %v3551_v57  ;;  %v3646_v0 = vpop.permute.xlu2 %3645  ;;  %v4056_v57 = vmul.f32 %v8701_v43, %v9761_v10 }
 0x4a8   : > { %v3616_v54 = vadd.f32 %v8666_v34, %v3584_v32  ;;  %v3576_v41 = vpop.permute.xlu0 %3575  ;;  %v4055_v32 = vmul.f32 %v8708_v31, %v9761_v10 }
 0x4a9   : > { %v3578_v3 = vsel %vm680_vm7, %v8650_v63, %v3576_v41  ;;  %v3586_v16 = vadd.f32 %v3576_v41, %v3554_v62  ;;  %v3992_v63 = vmul.f32 %v8708_v31, %v9758_v44  ;;  %v4031_v62 = vrot.slane %v4023_v55, 1 }
 0x4aa   : > { %v3585_v30 = vadd.f32 %v3578_v3, %v3553_v53  ;;  %v3633_v26 = vadd.f32 %v3627_v56, %v3616_v54  ;;  %v4034_v44 = vrot.slane %v4024_v22, 1  ;;  %v4059_v41 = vrot.slane %v4055_v32, 1  ;;  %v9762_v53 = vld [vmem:[#allocation87_spill] sm:$0xff] }
 0x4ab   : > { %3955 = vrot.lane.b32.xlu1 %v3951_v58, %s5470_s5  ;;  %v4002_v33 = vrot.slane %v3992_v63, 1  ;;  %v4033_v13 = vsel %vm792_vm1, %v4031_v62, %v4032_v50  ;;  %v4073_v3 = vmul.f32 %v8701_v43, %v9762_v53 }
 0x4ad   : > { %v3602_v46 = vpop.permute.xlu1 %3601  ;;  %3957 = vrot.lane.b32.xlu2 %v3952_v11, %s5470_s5  ;;  %v4004_v25 = vsel %vm792_vm1, %v4002_v33, %v4003_v29  ;;  %v9764_v11 = vld [vmem:[#allocation90_spill] sm:$0xff] }
 0x4ae   : > { %4005 = vrot.lane.b32.xlu0 %v4001_v23, %s5465_s13  ;;  %v3609_v36 = vsel %vm708_vm8, %v3602_v46, %v8666_v34  ;;  %v4026_v34 = vmul.f32 %v8701_v43, %v9760_v24  ;;  %v4090_v63 = vmul.f32 %v8701_v43, %v9764_v11  ;;  %v9765_v46 = vld [vmem:[#allocation46_spill] sm:$0xff]  ;;  %v4089_v24 = vmul.f32 %v8708_v31, %v9764_v11 }
 0x4af   : > { %v3615_v28 = vadd.f32 %v3609_v36, %v3583_v18  ;;  %v3678_v19 = vpop.permute.xlu2 %3677  ;;  %v9766_v36 = vrot.slane %v9765_v46, 6 }
 0x4b0   : > { %v3606_v47 = vpop.permute.xlu0 %3605  ;;  %v4035_v9 = vrot.slane %v4026_v34, 1 }
 0x4b1   : > { %v3632_v45 = vadd.f32 %v3627_v56, %v3615_v28 }
 0x4b2   : > { %v4036_v14 = vsel %vm792_vm1, %v4034_v44, %v4035_v9  ;;  %v8778_v44 = vld [vmem:[#allocation3 + $0x20] sm:$0x7f] }
 0x4b3   : > { %4007 = vrot.lane.b32.xlu1 %v4004_v25, %s5465_s13 }
 0x4b5   : > { %v3608_v49 = vpop.permute.xlu1 %3607  ;;  %4009 = vrot.lane.b32.xlu2 %v4000_v40, %s5465_s13  ;;  %v4060_v40 = vrot.slane %v4056_v57, 1 }
 0x4b6   : > { %4011 = vrot.lane.b32.xlu0 %v4003_v29, %s5465_s13  ;;  %v3610_v4 = vsel %vm708_vm8, %v3606_v47, %v3608_v49  ;;  %v3618_v7 = vadd.f32 %v3608_v49, %v3586_v16  ;;  %v4077_v47 = vrot.slane %v4073_v3, 1 }
 0x4b7   : > { %v3617_v56 = vadd.f32 %v3610_v4, %v3585_v30  ;;  %v8735_v39 = vpop.permute.xlu2 %3729  ;;  %v4061_v58 = vsel %vm792_vm1, %v4059_v41, %v4060_v40  ;;  %v4072_v30 = vmul.f32 %v8708_v31, %v9762_v53  ;;  %v4093_v4 = vrot.slane %v4089_v24, 1  ;;  %v8792_v41 = vld [vmem:[#allocation3 + $0x28] sm:$0x7f]  ;;  %v9770_v24 = vld [vmem:[#allocation95_spill] sm:$0xff] }
 0x4b8   : > { %v3629_v8 = vpop.permute.xlu0 %3628 }
 0x4b9   : > { %v3634_v42 = vadd.f32 %v3629_v8, %v3617_v56  ;;  %v3635_v52 = vadd.f32 %v3629_v8, %v3618_v7  ;;  %v9767_v7 = vld [vmem:[#allocation44_spill] sm:$0xff]  ;;  %v9768_v56 = vld [vmem:[#allocation89_spill] sm:$0xff] }
 0x4ba   : > { %v4107_v8 = vmul.f32 %v8701_v43, %v9768_v56 }
 0x4bb   : > { %v3652_v48 = vadd.f32 %v3646_v0, %v3635_v52  ;;  %4037 = vrot.lane.b32.xlu1 %v4033_v13, %s5466_s20  ;;  %v3651_v21 = vadd.f32 %v3646_v0, %v3634_v42  ;;  %v8776_v52 = vld [vmem:[#allocation3 + $0x10] sm:$0x80] }
 0x4bd   : > { %v3644_v5 = vpop.permute.xlu1 %3643  ;;  %4039 = vrot.lane.b32.xlu2 %v4036_v14, %s5466_s20 }
 0x4be   : > { %4041 = vrot.lane.b32.xlu0 %v4032_v50, %s5466_s20  ;;  %v3649_v15 = vadd.f32 %v3644_v5, %v3632_v45  ;;  %v3650_v51 = vadd.f32 %v3644_v5, %v3633_v26  ;;  %v9763_v26 = vld [vmem:[#allocation35_spill] sm:$0xff]  ;;  %v4094_v50 = vrot.slane %v4090_v63, 1  ;;  %v4111_v5 = vrot.slane %v4107_v8, 1 }
 0x4bf   : > { %v8746_v18 = vpop.permute.xlu2 %3759  ;;  %v3691_v23 = vmul.f32 %v8451_v60, %v9763_v26  ;;  %v4076_v60 = vrot.slane %v4072_v30, 1  ;;  %v3693_v34 = vmul.f32 %v8453_v35, %v9763_v26  ;;  %v8799_v30 = vld [vmem:[#allocation3 + $0x18] sm:$0x80] }
 0x4c0   : > { %v3661_v37 = vpop.permute.xlu0 %3660  ;;  %v4095_v13 = vsel %vm792_vm1, %v4093_v4, %v4094_v50  ;;  %v4182_v4 = vmul.f32 %v8799_v30, %v9770_v24 }
 0x4c1   : > { %v3666_v0 = vadd.f32 %v3661_v37, %v3649_v15  ;;  %v3667_v54 = vadd.f32 %v3661_v37, %v3650_v51  ;;  %v3699_v45 = vrot.slane %v3691_v23, 6  ;;  %v4078_v49 = vsel %vm792_vm1, %v4076_v60, %v4077_v47  ;;  %v9769_v15 = vld [vmem:[#allocation91_spill] sm:$0xff] }
 0x4c2   : > { %v3701_v35 = vrot.slane %v3693_v34, 6  ;;  %v4149_v51 = vmul.f32 %v8776_v52, %v9769_v15  ;;  %v4151_v32 = vmul.f32 %v8778_v44, %v9769_v15  ;;  %v4152_v53 = vmul.f32 %v8792_v41, %v9769_v15 }
 0x4c3   : > { %v3683_v16 = vadd.f32 %v3678_v19, %v3666_v0  ;;  %v3684_v17 = vadd.f32 %v3678_v19, %v3667_v54  ;;  %4043 = vrot.lane.b32.xlu1 %v4035_v9, %s5466_s20  ;;  %v4183_v60 = vmul.f32 %v8778_v44, %v9770_v24 }
 0x4c4   : > { %v3702_v37 = vsel %vm1550_vm6, %v3699_v45, %v3701_v35  ;;  %v4157_v0 = vrot.slane %v4149_v51, 2  ;;  %v4158_v54 = vrot.slane %v4151_v32, 2  ;;  %v4161_v46 = vrot.slane %v4152_v53, 2  ;;  %v9772_v53 = vld [vmem:[#allocation41_spill] sm:$0xff] }
 0x4c5   : > { %v3663_v12 = vpop.permute.xlu1 %3662  ;;  %4062 = vrot.lane.b32.xlu2 %v4061_v58, %s5469_s21  ;;  %v3710_v29 = vadd.f32 %v9766_v36, %v3684_v17  ;;  %v3709_v42 = vadd.f32 %v3699_v45, %v3683_v16 }
 0x4c6   : > { %4064 = vrot.lane.b32.xlu0 %v4060_v40, %s5469_s21  ;;  %v3668_v28 = vadd.f32 %v3663_v12, %v3651_v21  ;;  %v3669_v19 = vadd.f32 %v3663_v12, %v3652_v48  ;;  %v4106_v21 = vmul.f32 %v8708_v31, %v9768_v56  ;;  %v4150_v12 = vmul.f32 %v8799_v30, %v9769_v15 }
 0x4c7   : > { %v8762_v33 = vpop.permute.xlu2 %3765  ;;  %v3742_v55 = vadd.f32 %v8735_v39, %v3710_v29  ;;  %v4159_v63 = vsel %vm958_vm4, %v4157_v0, %v4158_v54 }
 0x4c8   : > { %v3680_v59 = vpop.permute.xlu0 %3679  ;;  %v4110_v40 = vrot.slane %v4106_v21, 1  ;;  %v9771_v21 = vld [vmem:[#allocation98_spill] sm:$0xff] }
 0x4c9   : > { %v3685_v25 = vadd.f32 %v3680_v59, %v3668_v28  ;;  %v3686_v62 = vadd.f32 %v3680_v59, %v3669_v19  ;;  %v4181_v59 = vmul.f32 %v8776_v52, %v9770_v24  ;;  %v4213_v51 = vmul.f32 %v8799_v30, %v9771_v21 }
 0x4cb   : > { %4079 = vrot.lane.b32.xlu1 %v4078_v49, %s5468_s4  ;;  %v3712_v22 = vadd.f32 %v9767_v7, %v3686_v62  ;;  %v3711_v3 = vadd.f32 %v3702_v37, %v3685_v25  ;;  %v4184_v62 = vmul.f32 %v8792_v41, %v9770_v24 }
 0x4cd   : > { %v3728_v9 = vpop.permute.xlu1 %3727  ;;  %4081 = vrot.lane.b32.xlu2 %v4077_v47, %s5468_s4  ;;  %v4160_v47 = vrot.slane %v4150_v12, 2  ;;  %v4193_v8 = vrot.slane %v4184_v62, 2  ;;  %v9775_v62 = vld [vmem:[#allocation102_spill] sm:$0xff] }
 0x4ce   : > { %4096 = vrot.lane.b32.xlu0 %v4095_v13, %s5467_s27  ;;  %v3735_v48 = vsel %vm680_vm7, %v3728_v9, %v8735_v39  ;;  %v4112_v39 = vsel %vm792_vm1, %v4110_v40, %v4111_v5  ;;  %v4192_v9 = vrot.slane %v4182_v4, 2 }
 0x4cf   : > { %v3741_v14 = vadd.f32 %v3735_v48, %v3709_v42  ;;  %v3802_v10 = vpop.permute.xlu2 %3801  ;;  %v4162_v45 = vsel %vm958_vm4, %v4160_v47, %v4161_v46  ;;  %v9774_v47 = vld [vmem:[#allocation100_spill] sm:$0xff] }
 0x4d0   : > { %v3732_v57 = vpop.permute.xlu0 %3731  ;;  %v3849_v24 = vmul.f32 %v8604_v61, %v9774_v47 }
 0x4d3   : > { %4098 = vrot.lane.b32.xlu1 %v4094_v50, %s5467_s27  ;;  %v4190_v50 = vrot.slane %v4183_v60, 2 }
 0x4d5   : > { %v3734_v16 = vpop.permute.xlu1 %3733  ;;  %4113 = vrot.lane.b32.xlu2 %v4112_v39, %s5470_s5  ;;  %v4217_v39 = vrot.slane %v4213_v51, 2 }
 0x4d6   : > { %4115 = vrot.lane.b32.xlu0 %v4111_v5, %s5470_s5  ;;  %v3736_v17 = vsel %vm680_vm7, %v3732_v57, %v3734_v16  ;;  %v3744_v58 = vadd.f32 %v3734_v16, %v3712_v22 }
 0x4d7   : > { %v3743_v26 = vadd.f32 %v3736_v17, %v3711_v3  ;;  %v3821_v23 = vpop.permute.xlu2 %3820  ;;  %v4231_v3 = vmul.f32 %v8792_v41, %v9772_v53 }
 0x4d8   : > { %v3762_v11 = vpop.permute.xlu0 %3761  ;;  %v3776_v36 = vadd.f32 %v8762_v33, %v3744_v58 }
 0x4d9   : > { %v3767_v29 = vsel %vm708_vm8, %v8746_v18, %v3762_v11  ;;  %v3774_v28 = vadd.f32 %v3762_v11, %v3742_v55  ;;  %v4189_v55 = vrot.slane %v4181_v59, 2 }
 0x4da   : > { %v3773_v19 = vadd.f32 %v3767_v29, %v3741_v14  ;;  %v4214_v14 = vmul.f32 %v8792_v41, %v9771_v21 }
 0x4db   : > { %4163 = vrot.lane.b32.xlu1 %v4159_v63, %s5465_s13  ;;  %v4191_v13 = vsel %vm958_vm4, %v4189_v55, %v4190_v50  ;;  %v3852_v55 = vmul.f32 %v8634_v27, %v9774_v47 }
 0x4dd   : > { %v3764_v25 = vpop.permute.xlu1 %3763  ;;  %4165 = vrot.lane.b32.xlu2 %v4162_v45, %s5465_s13 }
 0x4de   : > { %4167 = vrot.lane.b32.xlu0 %v4158_v54, %s5465_s13  ;;  %v3768_v18 = vsel %vm708_vm8, %v3764_v25, %v8762_v33  ;;  %v4194_v33 = vsel %vm958_vm4, %v4192_v9, %v4193_v8  ;;  %v3850_v25 = vmul.f32 %v8613_v6, %v9774_v47 }
 0x4df   : > { %v3775_v34 = vadd.f32 %v3768_v18, %v3743_v26  ;;  %v8819_v49 = vpop.permute.xlu2 %3865  ;;  %v4230_v26 = vmul.f32 %v8799_v30, %v9772_v53  ;;  %v4265_v18 = vmul.f32 %v8792_v41, %v9775_v62 }
 0x4e0   : > { %v3785_v7 = vpop.permute.xlu0 %3784 }
 0x4e1   : > { %v3790_v22 = vadd.f32 %v3785_v7, %v3773_v19  ;;  %v3791_v56 = vadd.f32 %v3785_v7, %v3774_v28  ;;  %v4234_v29 = vrot.slane %v4230_v26, 2  ;;  %v9773_v28 = vld [vmem:[#allocation99_spill] sm:$0xff]  ;;  %v4269_v27 = vrot.slane %v4265_v18, 2 }
 0x4e2   : > { %v4248_v19 = vmul.f32 %v8792_v41, %v9773_v28  ;;  %v4247_v60 = vmul.f32 %v8799_v30, %v9773_v28  ;;  %v3851_v41 = vmul.f32 %v8623_v2, %v9774_v47  ;;  %v9776_v2 = vld [vmem:[#allocation101_spill] sm:$0xff] }
 0x4e3   : > { %4169 = vrot.lane.b32.xlu1 %v4161_v46, %s5465_s13  ;;  %v3807_v42 = vadd.f32 %v3802_v10, %v3790_v22  ;;  %v3808_v35 = vadd.f32 %v3802_v10, %v3791_v56  ;;  %v4218_v10 = vrot.slane %v4214_v14, 2  ;;  %v4235_v46 = vrot.slane %v4231_v3, 2 }
 0x4e4   : > { %v4264_v22 = vmul.f32 %v8799_v30, %v9775_v62  ;;  %v4251_v6 = vrot.slane %v4247_v60, 2  ;;  %v9779_v60 = vstv %s7224_s22 }
 0x4e5   : > { %v3787_v48 = vpop.permute.xlu1 %3786  ;;  %4195 = vrot.lane.b32.xlu2 %v4191_v13, %s5466_s20  ;;  %v4219_v16 = vsel %vm958_vm4, %v4217_v39, %v4218_v10  ;;  %v4236_v59 = vsel %vm958_vm4, %v4234_v29, %v4235_v46 }
 0x4e6   : > { %4197 = vrot.lane.b32.xlu0 %v4194_v33, %s5466_s20  ;;  %v3792_v57 = vadd.f32 %v3787_v48, %v3775_v34  ;;  %v3793_v5 = vadd.f32 %v3787_v48, %v3776_v36  ;;  %v4252_v34 = vrot.slane %v4248_v19, 2  ;;  %v4268_v21 = vrot.slane %v4264_v22, 2 }
 0x4e7   : > { %v3872_v15 = vpop.permute.xlu2 %3871 }
 0x4e8   : > { %v3804_v32 = vpop.permute.xlu0 %3803  ;;  %v4253_v33 = vsel %vm958_vm4, %v4251_v6, %v4252_v34  ;;  %v4270_v14 = vsel %vm958_vm4, %v4268_v21, %v4269_v27  ;;  %v9782_v6 = vld [vmem:[#allocation105_spill] sm:$0xff] }
 0x4e9   : > { %v3809_v37 = vadd.f32 %v3804_v32, %v3792_v57  ;;  %v3810_v40 = vadd.f32 %v3804_v32, %v3793_v5  ;;  %v8868_v5 = vld [vmem:[#allocation3 + $0x28] sm:$0xff] }
 0x4eb   : > { %4199 = vrot.lane.b32.xlu1 %v4190_v50, %s5466_s20  ;;  %v3826_v0 = vadd.f32 %v3821_v23, %v3809_v37  ;;  %v3827_v54 = vadd.f32 %v3821_v23, %v3810_v40 }
 0x4ed   : > { %v3819_v17 = vpop.permute.xlu1 %3818  ;;  %4201 = vrot.lane.b32.xlu2 %v4193_v8, %s5466_s20 }
 0x4ee   : > { %4220 = vrot.lane.b32.xlu0 %v4219_v16, %s5469_s21  ;;  %v3824_v58 = vadd.f32 %v3819_v17, %v3807_v42  ;;  %v3825_v12 = vadd.f32 %v3819_v17, %v3808_v35 }
 0x4ef   : > { %v8840_v11 = vpop.permute.xlu2 %3895 }
 0x4f0   : > { %v3836_v63 = vpop.permute.xlu0 %3835 }
 0x4f1   : > { %v3841_v23 = vadd.f32 %v3836_v63, %v3824_v58  ;;  %v3842_v36 = vadd.f32 %v3836_v63, %v3825_v12 }
 0x4f3   : > { %4222 = vrot.lane.b32.xlu1 %v4218_v10, %s5469_s21  ;;  %v3854_v4 = vadd.f32 %v3850_v25, %v3842_v36  ;;  %v3853_v56 = vadd.f32 %v3849_v24, %v3841_v23  ;;  %v4296_v10 = vmul.f32 %v8868_v5, %v9776_v2 }
 0x4f5   : > { %v3838_v45 = vpop.permute.xlu1 %3837  ;;  %4237 = vrot.lane.b32.xlu2 %v4236_v59, %s5468_s4  ;;  %v4300_v53 = vrot.slane %v4296_v10, 3 }
 0x4f6   : > { %4239 = vrot.lane.b32.xlu0 %v4235_v46, %s5468_s4  ;;  %v3843_v61 = vadd.f32 %v3838_v45, %v3826_v0  ;;  %v3844_v50 = vadd.f32 %v3838_v45, %v3827_v54  ;;  %v9777_v0 = vld [vmem:[#allocation103_spill] sm:$0xff]  ;;  %v9778_v46 = vstv %s7249_s7  ;;  %v4339_v45 = vmul.f32 %v8868_v5, %v9779_v60 }
 0x4f7   : > { %v3916_v7 = vpop.permute.xlu2 %3915  ;;  %v4312_v54 = vmul.f32 %v8551_v38, %v9777_v0  ;;  %v4313_v26 = vmul.f32 %v8868_v5, %v9777_v0  ;;  %v8922_v0 = vld [vmem:[#allocation3 + $0x38] sm:$0x1] }
 0x4f8   : > { %v3856_v8 = vadd.f32 %v3852_v55, %v3844_v50  ;;  %v3868_v13 = vpop.permute.xlu0 %3867  ;;  %v3855_v30 = vadd.f32 %v3851_v41, %v3843_v61  ;;  %v9781_v50 = vstv %s7281_s10 }
 0x4f9   : > { %v3873_v9 = vsel %vm680_vm7, %v8819_v49, %v3868_v13  ;;  %v3880_v42 = vadd.f32 %v3868_v13, %v3854_v4  ;;  %v4295_v49 = vmul.f32 %v8551_v38, %v9776_v2  ;;  %v4316_v12 = vrot.slane %v4312_v54, 3  ;;  %v8903_v4 = vld [vmem:[#allocation3 + $0x20] sm:$0xfe] }
 0x4fa   : > { %v3879_v35 = vadd.f32 %v3873_v9, %v3853_v56  ;;  %v3882_v48 = vadd.f32 %v3872_v15, %v3856_v8  ;;  %v4329_v38 = vmul.f32 %v8868_v5, %v9778_v46  ;;  %v4317_v28 = vrot.slane %v4313_v26, 3  ;;  %v9784_v26 = vld [vmem:[#allocation106_spill] sm:$0xff] }
 0x4fb   : > { %4254 = vrot.lane.b32.xlu1 %v4253_v33, %s5467_s27  ;;  %v4299_v39 = vrot.slane %v4295_v49, 3  ;;  %v4341_v8 = vrot.slane %v4339_v45, 3  ;;  %v4395_v41 = vmul.f32 %v8903_v4, %v9782_v6  ;;  %v4398_v54 = vmul.f32 %v8922_v0, %v9782_v6 }
 0x4fc   : > { %v4331_v47 = vrot.slane %v4329_v38, 3 }
 0x4fd   : > { %v3870_v57 = vpop.permute.xlu1 %3869  ;;  %4256 = vrot.lane.b32.xlu2 %v4252_v34, %s5467_s27  ;;  %v4359_v34 = vmul.f32 %v8868_v5, %v9781_v50  ;;  %v4403_v2 = vrot.slane %v4395_v41, 4 }
 0x4fe   : > { %4271 = vrot.lane.b32.xlu0 %v4270_v14, %s5470_s5  ;;  %v3874_v51 = vsel %vm680_vm7, %v3870_v57, %v3872_v15 }
 0x4ff   : > { %v3881_v32 = vadd.f32 %v3874_v51, %v3855_v30  ;;  %v3942_v37 = vpop.permute.xlu2 %3941  ;;  %v8914_v30 = vld [vmem:[#allocation3 + $0x28] sm:$0xfe] }
 0x500   : > { %v3892_v40 = vpop.permute.xlu0 %3891  ;;  %v4396_v14 = vmul.f32 %v8914_v30, %v9782_v6 }
 0x503   : > { %4273 = vrot.lane.b32.xlu1 %v4269_v27, %s5470_s5 }
 0x505   : > { %v3894_v3 = vpop.permute.xlu1 %3893  ;;  %4301 = vrot.lane.b32.xlu2 %v4299_v39, %s5465_s13  ;;  %v4404_v39 = vrot.slane %v4396_v14, 4 }
 0x506   : > { %4303 = vrot.lane.b32.xlu0 %v4300_v53, %s5465_s13  ;;  %v3899_v15 = vsel %vm708_vm8, %v3892_v40, %v3894_v3  ;;  %v3906_v16 = vadd.f32 %v3894_v3, %v3880_v42  ;;  %v9783_v40 = vld [vmem:[#allocation47_spill] sm:$0xff] }
 0x507   : > { %v3905_v17 = vadd.f32 %v3899_v15, %v3879_v35  ;;  %v3958_v58 = vpop.permute.xlu2 %3957  ;;  %v4361_v35 = vrot.slane %v4359_v34, 3  ;;  %v3969_v10 = vmul.f32 %v8682_v1, %v9783_v40  ;;  %v3970_v1 = vmul.f32 %v8708_v31, %v9783_v40 }
 0x508   : > { %v3898_v63 = vpop.permute.xlu0 %3897 }
 0x509   : > { %v3900_v23 = vsel %vm708_vm8, %v8840_v11, %v3898_v63  ;;  %v3908_v36 = vadd.f32 %v3898_v63, %v3882_v48  ;;  %v9780_v11 = vstv %s7218_s12  ;;  %v4427_v63 = vmul.f32 %v8903_v4, %v9784_v26  ;;  %s5388_s12 = scalar_lea.hbm %s9250_s3, 32 }
 0x50a   : > { %v3907_v29 = vadd.f32 %v3900_v23, %v3881_v32  ;;  %v4349_v18 = vmul.f32 %v8868_v5, %v9780_v11  ;;  %v4407_v23 = vrot.slane %v4398_v54, 4  ;;  %v3980_v31 = vrot.slane %v3970_v1, 1  ;;  %v9787_v1 = vld [vmem:[#allocation50_spill] sm:$0xff] }
 0x50b   : > { %4318 = vrot.lane.b32.xlu1 %v4316_v12, %s5466_s20  ;;  %v3922_v19 = vadd.f32 %v3916_v7, %v3908_v36  ;;  %v4430_v11 = vmul.f32 %v8922_v0, %v9784_v26 }
 0x50c   : > { %v3921_v24 = vadd.f32 %v3916_v7, %v3907_v29  ;;  %v8905_v7 = vld [vmem:[#allocation3 + $0x30] sm:$0x1]  ;;  %v4351_v13 = vrot.slane %v4349_v18, 3 }
 0x50d   : > { %v3914_v59 = vpop.permute.xlu1 %3913  ;;  %4320 = vrot.lane.b32.xlu2 %v4317_v28, %s5466_s20  ;;  %v4397_v9 = vmul.f32 %v8905_v7, %v9782_v6 }
 0x50e   : > { %4332 = vrot.lane.b32.xlu0 %v4331_v47, %s5469_s21  ;;  %v3919_v25 = vadd.f32 %v3914_v59, %v3905_v17  ;;  %v3920_v62 = vadd.f32 %v3914_v59, %v3906_v16  ;;  %v3972_v16 = vmul.f32 %v8701_v43, %v9783_v40  ;;  %v3971_v17 = vmul.f32 %v8684_v20, %v9783_v40 }
 0x50f   : > { %v8898_v55 = vpop.permute.xlu2 %4009  ;;  %v4405_v49 = vrot.slane %v4397_v9, 4  ;;  %v4428_v20 = vmul.f32 %v8914_v30, %v9784_v26  ;;  %v4435_v47 = vrot.slane %v4427_v63, 4  ;;  %v4408_v59 = vsel %vm241_vm0, %v4404_v39, %v4407_v23 }
 0x510   : > { %v3928_v61 = vpop.permute.xlu0 %3927  ;;  %v3981_v43 = vrot.slane %v3972_v16, 1  ;;  %v3978_v29 = vrot.slane %v3971_v17, 1  ;;  %v4494_v63 = vmul.f32 %v8922_v0, %v9787_v1 }
 0x511   : > { %v3933_v22 = vadd.f32 %v3928_v61, %v3919_v25  ;;  %v3934_v56 = vadd.f32 %v3928_v61, %v3920_v62  ;;  %v4406_v15 = vsel %vm241_vm0, %v4403_v2, %v4405_v49  ;;  %v4436_v45 = vrot.slane %v4428_v20, 4 }
 0x512   : > { %v3982_v60 = vsel %vm792_vm1, %v3980_v31, %v3981_v43 }
 0x513   : > { %4342 = vrot.lane.b32.xlu1 %v4341_v8, %s5468_s4  ;;  %v3947_v42 = vadd.f32 %v3942_v37, %v3933_v22  ;;  %v3948_v27 = vadd.f32 %v3942_v37, %v3934_v56 }
 0x515   : > { %v3930_v33 = vpop.permute.xlu1 %3929  ;;  %4352 = vrot.lane.b32.xlu2 %v4351_v13, %s5467_s27  ;;  %v9785_v13 = vld [vmem:[#allocation51_spill] sm:$0xff] }
 0x516   : > { %4362 = vrot.lane.b32.xlu0 %v4361_v35, %s5470_s5  ;;  %v3935_v48 = vadd.f32 %v3930_v33, %v3921_v24  ;;  %v3936_v21 = vadd.f32 %v3930_v33, %v3922_v19  ;;  %v4429_v19 = vmul.f32 %v8905_v7, %v9784_v26  ;;  %v4459_v6 = vmul.f32 %v8914_v30, %v9785_v13 }
 0x517   : > { %v8918_v57 = vpop.permute.xlu2 %4039  ;;  %v4439_v35 = vrot.slane %v4430_v11, 4  ;;  %v4460_v14 = vmul.f32 %v8922_v0, %v9785_v13  ;;  %v4493_v26 = vmul.f32 %v8914_v30, %v9787_v1 }
 0x518   : > { %v3944_v51 = vpop.permute.xlu0 %3943  ;;  %v4437_v62 = vrot.slane %v4429_v19, 4  ;;  %v4463_v49 = vrot.slane %v4459_v6, 4  ;;  %v4498_v19 = vrot.slane %v4494_v63, 4 }
 0x519   : > { %v3949_v32 = vadd.f32 %v3944_v51, %v3935_v48  ;;  %v3950_v37 = vadd.f32 %v3944_v51, %v3936_v21  ;;  %v4440_v51 = vsel %vm241_vm0, %v4436_v45, %v4439_v35 }
 0x51b   : > { %v3963_v53 = vadd.f32 %v3958_v58, %v3949_v32  ;;  %v3964_v3 = vadd.f32 %v3958_v58, %v3950_v37  ;;  %4409 = vrot.lane.b32.xlu1 %v4403_v2, %s5465_s13  ;;  %v3977_v58 = vrot.slane %v3969_v10, 1  ;;  %v9786_v37 = vld [vmem:[#allocation108_spill] sm:$0xff] }
 0x51c   : > { %v4476_v40 = vmul.f32 %v8914_v30, %v9786_v37 }
 0x51d   : > { %v3956_v12 = vpop.permute.xlu1 %3955  ;;  %4411 = vrot.lane.b32.xlu2 %v4404_v39, %s5465_s13  ;;  %v3979_v24 = vsel %vm792_vm1, %v3977_v58, %v3978_v29  ;;  %v3990_v56 = vadd.f32 %v3981_v43, %v3964_v3  ;;  %v4464_v39 = vrot.slane %v4460_v14, 4 }
 0x51e   : > { %4413 = vrot.lane.b32.xlu0 %v4406_v15, %s5465_s13  ;;  %v3961_v46 = vadd.f32 %v3956_v12, %v3947_v42  ;;  %v3962_v38 = vadd.f32 %v3956_v12, %v3948_v27  ;;  %v3989_v42 = vadd.f32 %v3978_v29, %v3963_v53  ;;  %v4438_v27 = vsel %vm241_vm0, %v4435_v47, %v4437_v62 }
 0x51f   : > { %v4063_v36 = vpop.permute.xlu2 %4062  ;;  %v4480_v15 = vrot.slane %v4476_v40, 4  ;;  %v4465_v12 = vsel %vm241_vm0, %v4463_v49, %v4464_v39  ;;  %v4497_v29 = vrot.slane %v4493_v26, 4  ;;  %v9791_v40 = vld [vmem:[#allocation88_spill] sm:$0xff]  ;;  %v9792_v39 = vld [vmem:[#allocation113_spill] sm:$0xff] }
 0x520   : > { %v4006_v28 = vpop.permute.xlu0 %4005  ;;  %v3988_v25 = vadd.f32 %v3982_v60, %v3962_v38  ;;  %v3987_v18 = vadd.f32 %v3979_v24, %v3961_v46 }
 0x521   : > { %v4499_v62 = vsel %vm241_vm0, %v4497_v29, %v4498_v19 }
 0x523   : > { %4415 = vrot.lane.b32.xlu1 %v4408_v59, %s5465_s13  ;;  %v8985_v59 = vld [vmem:[#allocation3 + $0x20] sm:$0xfc] }
 0x525   : > { %v4008_v61 = vpop.permute.xlu1 %4007  ;;  %4441 = vrot.lane.b32.xlu2 %v4435_v47, %s5466_s20 }
 0x526   : > { %4443 = vrot.lane.b32.xlu0 %v4436_v45, %s5466_s20  ;;  %v4013_v50 = vsel %vm680_vm7, %v4006_v28, %v4008_v61  ;;  %v4020_v34 = vadd.f32 %v4008_v61, %v3988_v25  ;;  %v9788_v28 = vld [vmem:[#allocation111_spill] sm:$0xff]  ;;  %v8992_v61 = vld [vmem:[#allocation3 + $0x30] sm:$0x3] }
 0x527   : > { %v4019_v22 = vadd.f32 %v4013_v50, %v3987_v18  ;;  %v4082_v8 = vpop.permute.xlu2 %4081  ;;  %v4510_v20 = vmul.f32 %v8914_v30, %v9788_v28  ;;  %v4511_v24 = vmul.f32 %v8922_v0, %v9788_v28  ;;  %v9789_v18 = vld [vmem:[#allocation110_spill] sm:$0xff] }
 0x528   : > { %v4052_v41 = vadd.f32 %v8918_v57, %v4020_v34  ;;  %v4012_v9 = vpop.permute.xlu0 %4011  ;;  %v4553_v30 = vmul.f32 %v8985_v59, %v9789_v18  ;;  %v4555_v6 = vmul.f32 %v8992_v61, %v9789_v18 }
 0x529   : > { %v4014_v33 = vsel %vm680_vm7, %v8898_v55, %v4012_v9  ;;  %v4022_v48 = vadd.f32 %v4012_v9, %v3990_v56  ;;  %v4477_v55 = vmul.f32 %v8922_v0, %v9786_v37  ;;  %v4514_v25 = vrot.slane %v4510_v20, 4 }
 0x52a   : > { %v4021_v21 = vadd.f32 %v4014_v33, %v3989_v42  ;;  %v4069_v2 = vadd.f32 %v4063_v36, %v4052_v41  ;;  %v4515_v34 = vrot.slane %v4511_v24, 4  ;;  %v4561_v42 = vrot.slane %v4553_v30, 5 }
 0x52b   : > { %4445 = vrot.lane.b32.xlu1 %v4438_v27, %s5466_s20  ;;  %v4481_v16 = vrot.slane %v4477_v55, 4  ;;  %v9790_v27 = vld [vmem:[#allocation54_spill] sm:$0xff] }
 0x52c   : > { %v4129_v35 = vmul.f32 %v8778_v44, %v9790_v27  ;;  %v4516_v33 = vsel %vm241_vm0, %v4514_v25, %v4515_v34 }
 0x52d   : > { %v4038_v32 = vpop.permute.xlu1 %4037  ;;  %4447 = vrot.lane.b32.xlu2 %v4440_v51, %s5466_s20  ;;  %v4482_v58 = vsel %vm241_vm0, %v4480_v15, %v4481_v16  ;;  %v9009_v51 = vld [vmem:[#allocation3 + $0x38] sm:$0x3] }
 0x52e   : > { %4466 = vrot.lane.b32.xlu0 %v4463_v49, %s5469_s21  ;;  %v4045_v10 = vsel %vm708_vm8, %v4038_v32, %v8918_v57  ;;  %v4563_v49 = vrot.slane %v4555_v6, 5  ;;  %v4556_v32 = vmul.f32 %v9009_v51, %v9789_v18  ;;  %v4136_v44 = vrot.slane %v4129_v35, 2 }
 0x52f   : > { %v4051_v54 = vadd.f32 %v4045_v10, %v4019_v22  ;;  %v4114_v53 = vpop.permute.xlu2 %4113  ;;  %v4588_v19 = vmul.f32 %v9009_v51, %v9792_v39 }
 0x530   : > { %v4042_v3 = vpop.permute.xlu0 %4041 }
 0x531   : > { %v4068_v17 = vadd.f32 %v4063_v36, %v4051_v54  ;;  %v4585_v54 = vmul.f32 %v8985_v59, %v9792_v39 }
 0x533   : > { %4468 = vrot.lane.b32.xlu1 %v4465_v12, %s5469_s21  ;;  %v4565_v12 = vrot.slane %v4556_v32, 5  ;;  %v4593_v63 = vrot.slane %v4585_v54, 5 }
 0x535   : > { %v4044_v57 = vpop.permute.xlu1 %4043  ;;  %4483 = vrot.lane.b32.xlu2 %v4480_v15, %s5468_s4 }
 0x536   : > { %4485 = vrot.lane.b32.xlu0 %v4482_v58, %s5468_s4  ;;  %v4046_v46 = vsel %vm708_vm8, %v4042_v3, %v4044_v57  ;;  %v4054_v38 = vadd.f32 %v4044_v57, %v4022_v48  ;;  %v4127_v48 = vmul.f32 %v8776_v52, %v9790_v27  ;;  %v4587_v57 = vmul.f32 %v8992_v61, %v9792_v39  ;;  %v9796_v27 = vld [vmem:[#allocation58_spill] sm:$0xff] }
 0x537   : > { %v4053_v23 = vadd.f32 %v4046_v46, %v4021_v21  ;;  %v8979_v36 = vpop.permute.xlu2 %4165  ;;  %v9793_v46 = vld [vmem:[#allocation86_spill] sm:$0xff] }
 0x538   : > { %v4065_v43 = vpop.permute.xlu0 %4064 }
 0x539   : > { %v4070_v31 = vadd.f32 %v4065_v43, %v4053_v23  ;;  %v4071_v47 = vadd.f32 %v4065_v43, %v4054_v38  ;;  %v9794_v38 = vrot.slane %v9793_v46, 2 }
 0x53b   : > { %4500 = vrot.lane.b32.xlu1 %v4497_v29, %s5467_s27  ;;  %v4087_v60 = vadd.f32 %v4082_v8, %v4070_v31  ;;  %v4088_v45 = vadd.f32 %v4082_v8, %v4071_v47  ;;  %v8997_v8 = vld [vmem:[#allocation3 + $0x28] sm:$0xfc]  ;;  %v4595_v47 = vrot.slane %v4587_v57, 5  ;;  %v9798_v57 = vld [vmem:[#allocation116_spill] sm:$0xff] }
 0x53c   : > { %v4554_v13 = vmul.f32 %v8997_v8, %v9789_v18  ;;  %v4586_v20 = vmul.f32 %v8997_v8, %v9792_v39  ;;  %v9795_v18 = vld [vmem:[#allocation114_spill] sm:$0xff]  ;;  %v4634_v35 = vmul.f32 %v8997_v8, %v9796_v27  ;;  %v4669_v46 = vmul.f32 %v9009_v51, %v9798_v57 }
 0x53d   : > { %v4080_v11 = vpop.permute.xlu1 %4079  ;;  %4502 = vrot.lane.b32.xlu2 %v4499_v62, %s5467_s27  ;;  %v4597_v62 = vrot.slane %v4588_v19, 5  ;;  %v4617_v30 = vmul.f32 %v8997_v8, %v9795_v18 }
 0x53e   : > { %4517 = vrot.lane.b32.xlu0 %v4514_v25, %s5470_s5  ;;  %v4085_v0 = vadd.f32 %v4080_v11, %v4068_v17  ;;  %v4086_v50 = vadd.f32 %v4080_v11, %v4069_v2  ;;  %v4562_v2 = vrot.slane %v4554_v13, 5  ;;  %v4564_v17 = vsel %vm1384_vm5, %v4561_v42, %v4563_v49 }
 0x53f   : > { %v8995_v22 = vpop.permute.xlu2 %4195  ;;  %v4594_v25 = vrot.slane %v4586_v20, 5  ;;  %v4596_v11 = vsel %vm1384_vm5, %v4593_v63, %v4595_v47  ;;  %v4635_v49 = vmul.f32 %v9009_v51, %v9796_v27  ;;  %v4638_v32 = vrot.slane %v4634_v35, 5 }
 0x540   : > { %v4097_v56 = vpop.permute.xlu0 %4096  ;;  %v4566_v43 = vsel %vm1384_vm5, %v4562_v2, %v4565_v12 }
 0x541   : > { %v4102_v41 = vadd.f32 %v4097_v56, %v4085_v0  ;;  %v4103_v9 = vadd.f32 %v4097_v56, %v4086_v50  ;;  %v4618_v0 = vmul.f32 %v9009_v51, %v9795_v18  ;;  %v4598_v34 = vsel %vm1384_vm5, %v4594_v25, %v4597_v62 }
 0x543   : > { %v4119_v21 = vadd.f32 %v4114_v53, %v4102_v41  ;;  %v4120_v14 = vadd.f32 %v4114_v53, %v4103_v9  ;;  %4519 = vrot.lane.b32.xlu1 %v4516_v33, %s5470_s5  ;;  %v4135_v53 = vrot.slane %v4127_v48, 2  ;;  %v4622_v33 = vrot.slane %v4618_v0, 5 }
 0x545   : > { %v4099_v37 = vpop.permute.xlu1 %4098  ;;  %4567 = vrot.lane.b32.xlu2 %v4561_v42, %s5465_s13  ;;  %v4146_v55 = vadd.f32 %v9791_v40, %v4120_v14  ;;  %v4137_v58 = vsel %vm958_vm4, %v4135_v53, %v4136_v44  ;;  %v4621_v42 = vrot.slane %v4617_v30, 5  ;;  %v9797_v40 = vld [vmem:[#allocation55_spill] sm:$0xff]  ;;  %v9800_v30 = vld [vmem:[#allocation121_spill] sm:$0xff] }
 0x546   : > { %4569 = vrot.lane.b32.xlu0 %v4562_v2, %s5465_s13  ;;  %v4104_v52 = vadd.f32 %v4099_v37, %v4087_v60  ;;  %v4105_v10 = vadd.f32 %v4099_v37, %v4088_v45  ;;  %v4145_v28 = vadd.f32 %v4137_v58, %v4119_v21  ;;  %v4284_v0 = vmul.f32 %v8868_v5, %v9800_v30  ;;  %v5322_v5 = vld [vmem:[#allocation2 + $0x10] sm:$0xff] }
 0x547   : > { %v4202_v3 = vpop.permute.xlu2 %4201  ;;  %v4178_v15 = vadd.f32 %v8979_v36, %v4146_v55  ;;  %v4623_v37 = vsel %vm1384_vm5, %v4621_v42, %v4622_v33  ;;  %v4651_v55 = vmul.f32 %v8997_v8, %v9797_v40  ;;  %v4283_v27 = vmul.f32 %v5322_v5, %v9800_v30 }
 0x548   : > { %v4116_v16 = vpop.permute.xlu0 %4115  ;;  %v4288_v35 = vrot.slane %v4284_v0, 3 }
 0x549   : > { %v4121_v1 = vadd.f32 %v4116_v16, %v4104_v52  ;;  %v4122_v26 = vadd.f32 %v4116_v16, %v4105_v10  ;;  %v4652_v52 = vmul.f32 %v9009_v51, %v9797_v40  ;;  %v4639_v10 = vrot.slane %v4635_v49, 5 }
 0x54b   : > { %4571 = vrot.lane.b32.xlu1 %v4564_v17, %s5465_s13  ;;  %v4148_v23 = vadd.f32 %v9794_v38, %v4122_v26  ;;  %v4147_v50 = vadd.f32 %v4136_v44, %v4121_v1  ;;  %v4655_v17 = vrot.slane %v4651_v55, 5  ;;  %v4656_v12 = vrot.slane %v4652_v52, 5  ;;  %v9064_v26 = vld [vmem:[#allocation3 + $0x20] sm:$0xf8] }
 0x54c   : > { %v4640_v1 = vsel %vm1384_vm5, %v4638_v32, %v4639_v10  ;;  %v4287_v55 = vrot.slane %v4283_v27, 3 }
 0x54d   : > { %v4164_v29 = vpop.permute.xlu1 %4163  ;;  %4573 = vrot.lane.b32.xlu2 %v4566_v43, %s5465_s13  ;;  %v4657_v38 = vsel %vm1384_vm5, %v4655_v17, %v4656_v12 }
 0x54e   : > { %4599 = vrot.lane.b32.xlu0 %v4593_v63, %s5466_s20  ;;  %v4171_v31 = vsel %vm680_vm7, %v4164_v29, %v8979_v36 }
 0x54f   : > { %v4177_v24 = vadd.f32 %v4171_v31, %v4145_v28  ;;  %v4238_v60 = vpop.permute.xlu2 %4237  ;;  %v9799_v28 = vld [vmem:[#allocation118_spill] sm:$0xff] }
 0x550   : > { %v4168_v45 = vpop.permute.xlu0 %4167  ;;  %v4711_v20 = vmul.f32 %v9064_v26, %v9799_v28  ;;  %v9077_v31 = vld [vmem:[#allocation3 + $0x30] sm:$0x7] }
 0x553   : > { %4601 = vrot.lane.b32.xlu1 %v4594_v25, %s5466_s20  ;;  %v4713_v25 = vmul.f32 %v9077_v31, %v9799_v28 }
 0x555   : > { %v4170_v36 = vpop.permute.xlu1 %4169  ;;  %4603 = vrot.lane.b32.xlu2 %v4596_v11, %s5466_s20 }
 0x556   : > { %4605 = vrot.lane.b32.xlu0 %v4598_v34, %s5466_s20  ;;  %v4172_v56 = vsel %vm680_vm7, %v4168_v45, %v4170_v36  ;;  %v4180_v13 = vadd.f32 %v4170_v36, %v4148_v23  ;;  %v4719_v45 = vrot.slane %v4711_v20, 6  ;;  %v9086_v34 = vld [vmem:[#allocation3 + $0x28] sm:$0xf8] }
 0x557   : > { %v4179_v6 = vadd.f32 %v4172_v56, %v4147_v50  ;;  %v4257_v41 = vpop.permute.xlu2 %4256  ;;  %v4712_v36 = vmul.f32 %v9086_v34, %v9799_v28  ;;  %v9090_v56 = vld [vmem:[#allocation3 + $0x38] sm:$0x7] }
 0x558   : > { %v4198_v9 = vpop.permute.xlu0 %4197  ;;  %v4212_v48 = vadd.f32 %v4202_v3, %v4180_v13  ;;  %v4714_v13 = vmul.f32 %v9090_v56, %v9799_v28 }
 0x559   : > { %v4203_v21 = vsel %vm708_vm8, %v8995_v22, %v4198_v9  ;;  %v4210_v14 = vadd.f32 %v4198_v9, %v4178_v15  ;;  %v4721_v9 = vrot.slane %v4713_v25, 6 }
 0x55a   : > { %v4209_v2 = vadd.f32 %v4203_v21, %v4177_v24  ;;  %v4673_v24 = vrot.slane %v4669_v46, 5 }
 0x55b   : > { %4624 = vrot.lane.b32.xlu1 %v4621_v42, %s5469_s21  ;;  %v4722_v49 = vsel %vm1550_vm6, %v4719_v45, %v4721_v9  ;;  %v9803_v9 = vld [vmem:[#allocation124_spill] sm:$0xff] }
 0x55c   : > { %v4792_v5 = vmul.f32 %v9086_v34, %v9803_v9 }
 0x55d   : > { %v4200_v44 = vpop.permute.xlu1 %4199  ;;  %4626 = vrot.lane.b32.xlu2 %v4623_v37, %s5469_s21  ;;  %v9801_v37 = vld [vmem:[#allocation120_spill] sm:$0xff] }
 0x55e   : > { %4641 = vrot.lane.b32.xlu0 %v4638_v32, %s5468_s4  ;;  %v4204_v22 = vsel %vm708_vm8, %v4200_v44, %v4202_v3  ;;  %v4668_v3 = vmul.f32 %v8997_v8, %v9798_v57  ;;  %v4743_v44 = vmul.f32 %v9064_v26, %v9801_v37  ;;  %v4745_v40 = vmul.f32 %v9077_v31, %v9801_v37 }
 0x55f   : > { %v4211_v39 = vadd.f32 %v4204_v22, %v4179_v6  ;;  %v9060_v54 = vpop.permute.xlu2 %4301 }
 0x560   : > { %v4221_v53 = vpop.permute.xlu0 %4220  ;;  %v4672_v47 = vrot.slane %v4668_v3, 5 }
 0x561   : > { %v4226_v15 = vadd.f32 %v4221_v53, %v4209_v2  ;;  %v4227_v16 = vadd.f32 %v4221_v53, %v4210_v14  ;;  %v4720_v14 = vrot.slane %v4712_v36, 6  ;;  %v4723_v2 = vrot.slane %v4714_v13, 6 }
 0x562   : > { %v4674_v18 = vsel %vm1384_vm5, %v4672_v47, %v4673_v24 }
 0x563   : > { %4643 = vrot.lane.b32.xlu1 %v4640_v1, %s5468_s4  ;;  %v4243_v63 = vadd.f32 %v4238_v60, %v4226_v15  ;;  %v4244_v58 = vadd.f32 %v4238_v60, %v4227_v16  ;;  %v4724_v52 = vsel %vm1550_vm6, %v4720_v14, %v4723_v2  ;;  %v4751_v15 = vrot.slane %v4743_v44, 6  ;;  %v9805_v44 = vld [vmem:[#allocation125_spill] sm:$0xff] }
 0x564   : > { %v4753_v16 = vrot.slane %v4745_v40, 6  ;;  %v4809_v40 = vmul.f32 %v9086_v34, %v9805_v44 }
 0x565   : > { %v4223_v23 = vpop.permute.xlu1 %4222  ;;  %4658 = vrot.lane.b32.xlu2 %v4655_v17, %s5467_s27  ;;  %v4744_v17 = vmul.f32 %v9086_v34, %v9801_v37 }
 0x566   : > { %4660 = vrot.lane.b32.xlu0 %v4657_v38, %s5467_s27  ;;  %v4228_v43 = vadd.f32 %v4223_v23, %v4211_v39  ;;  %v4229_v29 = vadd.f32 %v4223_v23, %v4212_v48  ;;  %v4754_v28 = vsel %vm1550_vm6, %v4751_v15, %v4753_v16  ;;  %v4810_v16 = vmul.f32 %v9090_v56, %v9805_v44 }
 0x567   : > { %v9075_v19 = vpop.permute.xlu2 %4320  ;;  %v4752_v20 = vrot.slane %v4744_v17, 6 }
 0x568   : > { %v4240_v8 = vpop.permute.xlu0 %4239 }
 0x569   : > { %v4245_v51 = vadd.f32 %v4240_v8, %v4228_v43  ;;  %v4246_v60 = vadd.f32 %v4240_v8, %v4229_v29  ;;  %v4746_v43 = vmul.f32 %v9090_v56, %v9801_v37  ;;  %v4796_v37 = vrot.slane %v4792_v5, 6 }
 0x56b   : > { %4675 = vrot.lane.b32.xlu1 %v4672_v47, %s5470_s5  ;;  %v4262_v62 = vadd.f32 %v4257_v41, %v4245_v51  ;;  %v4263_v11 = vadd.f32 %v4257_v41, %v4246_v60  ;;  %v9802_v47 = vld [vmem:[#allocation123_spill] sm:$0xff] }
 0x56c   : > { %v4775_v24 = vmul.f32 %v9086_v34, %v9802_v47 }
 0x56d   : > { %v4255_v50 = vpop.permute.xlu1 %4254  ;;  %4677 = vrot.lane.b32.xlu2 %v4674_v18, %s5470_s5 }
 0x56e   : > { %4725 = vrot.lane.b32.xlu0 %v4719_v45, %s5465_s13  ;;  %v4260_v6 = vadd.f32 %v4255_v50, %v4243_v63  ;;  %v4261_v41 = vadd.f32 %v4255_v50, %v4244_v58  ;;  %v4755_v45 = vrot.slane %v4746_v43, 6  ;;  %v4779_v30 = vrot.slane %v4775_v24, 6  ;;  %v9807_v43 = vld [vmem:[#allocation92_spill] sm:$0xff] }
 0x56f   : > { %v9095_v42 = vpop.permute.xlu2 %4352  ;;  %v4814_v24 = vrot.slane %v4810_v16, 6 }
 0x570   : > { %v4272_v33 = vpop.permute.xlu0 %4271 }
 0x571   : > { %v4277_v48 = vadd.f32 %v4272_v33, %v4260_v6  ;;  %v4278_v21 = vadd.f32 %v4272_v33, %v4261_v41  ;;  %v4756_v41 = vsel %vm1550_vm6, %v4752_v20, %v4755_v45 }
 0x573   : > { %v4292_v32 = vadd.f32 %v4288_v35, %v4278_v21  ;;  %4727 = vrot.lane.b32.xlu1 %v4720_v14, %s5465_s13  ;;  %v4291_v12 = vadd.f32 %v4287_v55, %v4277_v48 }
 0x575   : > { %v4274_v22 = vpop.permute.xlu1 %4273  ;;  %4729 = vrot.lane.b32.xlu2 %v4722_v49, %s5465_s13 }
 0x576   : > { %4731 = vrot.lane.b32.xlu0 %v4724_v52, %s5465_s13  ;;  %v4279_v10 = vadd.f32 %v4274_v22, %v4262_v62  ;;  %v4280_v39 = vadd.f32 %v4274_v22, %v4263_v11  ;;  %s5172_s13 = sshll.u32 %s5446_s17, 4  ;;  %s4938_s17 = scalar_lea.sflag [#allocation7], %s5594_s26 }
 0x577   : > { %v9107_v53 = vpop.permute.xlu2 %4411 }
 0x578   : > { %v4293_v1 = vadd.f32 %v4287_v55, %v4279_v10  ;;  %v4294_v63 = vadd.f32 %v4288_v35, %v4280_v39  ;;  %v4304_v58 = vpop.permute.xlu0 %4303  ;;  %v4793_v35 = vmul.f32 %v9090_v56, %v9803_v9 }
 0x579   : > { %v4305_v57 = vsel %vm680_vm7, %v9060_v54, %v4304_v58  ;;  %v4309_v3 = vadd.f32 %v4304_v58, %v4292_v32  ;;  %v4776_v54 = vmul.f32 %v9090_v56, %v9802_v47 }
 0x57a   : > { %v4308_v46 = vadd.f32 %v4305_v57, %v4291_v12  ;;  %v4310_v38 = vadd.f32 %v4305_v57, %v4293_v1  ;;  %v4311_v23 = vadd.f32 %v4304_v58, %v4294_v63  ;;  %v4797_v55 = vrot.slane %v4793_v35, 6 }
 0x57b   : > { %v4326_v29 = vadd.f32 %v9075_v19, %v4309_v3  ;;  %4757 = vrot.lane.b32.xlu1 %v4751_v15, %s5466_s20  ;;  %v4780_v0 = vrot.slane %v4776_v54, 6  ;;  %v4813_v57 = vrot.slane %v4809_v40, 6 }
 0x57c   : > { %v4328_v8 = vadd.f32 %v9075_v19, %v4311_v23 }
 0x57d   : > { %v4319_v51 = vpop.permute.xlu1 %4318  ;;  %4759 = vrot.lane.b32.xlu2 %v4752_v20, %s5466_s20  ;;  %v4781_v33 = vsel %vm1550_vm6, %v4779_v30, %v4780_v0  ;;  %v9809_v20 = vld [vmem:[#allocation126_spill] sm:$0xff] }
 0x57e   : > { %4761 = vrot.lane.b32.xlu0 %v4754_v28, %s5466_s20  ;;  %v4322_v60 = vsel %vm708_vm8, %v4319_v51, %v9075_v19  ;;  %v9804_v19 = vld [vmem:[#allocation63_spill] sm:$0xff] }
 0x57f   : > { %v4325_v25 = vadd.f32 %v4322_v60, %v4308_v46  ;;  %v4327_v62 = vadd.f32 %v4322_v60, %v4310_v38  ;;  %v9127_v11 = vpop.permute.xlu2 %4441  ;;  %v4373_v27 = vmul.f32 %v8903_v4, %v9804_v19  ;;  %v4375_v17 = vmul.f32 %v8905_v7, %v9804_v19  ;;  %v9806_v38 = vld [vmem:[#allocation37_spill] sm:$0xff] }
 0x580   : > { %v4333_v18 = vpop.permute.xlu0 %4332  ;;  %v4798_v46 = vsel %vm1550_vm6, %v4796_v37, %v4797_v55  ;;  %v4826_v7 = vmul.f32 %v9086_v34, %v9809_v20 }
 0x581   : > { %v4335_v50 = vadd.f32 %v4333_v18, %v4325_v25  ;;  %v4336_v36 = vadd.f32 %v4333_v18, %v4326_v29  ;;  %v4337_v13 = vadd.f32 %v4333_v18, %v4327_v62  ;;  %v4338_v6 = vadd.f32 %v4333_v18, %v4328_v8 }
 0x582   : > { %v4381_v4 = vrot.slane %v4373_v27, 4  ;;  %v4827_v8 = vmul.f32 %v9090_v56, %v9809_v20  ;;  %v4383_v54 = vrot.slane %v4375_v17, 4  ;;  %v4830_v62 = vrot.slane %v4826_v7, 6 }
 0x583   : > { %4763 = vrot.lane.b32.xlu1 %v4756_v41, %s5466_s20 }
 0x584   : > { %v4831_v18 = vrot.slane %v4827_v8, 6  ;;  %v4384_v34 = vsel %vm241_vm0, %v4381_v4, %v4383_v54 }
 0x585   : > { %v4343_v48 = vpop.permute.xlu1 %4342  ;;  %4782 = vrot.lane.b32.xlu2 %v4779_v30, %s5469_s21  ;;  %v4815_v30 = vsel %vm1550_vm6, %v4813_v57, %v4814_v24 }
 0x586   : > { %4784 = vrot.lane.b32.xlu0 %v4781_v33, %s5469_s21  ;;  %v4345_v21 = vadd.f32 %v4343_v48, %v4335_v50  ;;  %v4346_v14 = vadd.f32 %v4343_v48, %v4336_v36  ;;  %v4347_v2 = vadd.f32 %v4343_v48, %v4337_v13  ;;  %v4348_v49 = vadd.f32 %v4343_v48, %v4338_v6  ;;  %s4950_s21 = sshll.u32 %s8106_s28, 4  ;;  %s4951_s21 = int_to_ptr.vmem [resolvable:$true] %s4950_s21 }
 0x587   : > { %v4448_v32 = vpop.permute.xlu2 %4447  ;;  %v4832_v56 = vsel %vm1550_vm6, %v4830_v62, %v4831_v18 }
 0x588   : > { %v4363_v52 = vpop.permute.xlu0 %4362  ;;  %v4355_v22 = vadd.f32 %v9095_v42, %v4345_v21  ;;  %v4356_v10 = vadd.f32 %v9095_v42, %v4346_v14  ;;  %v4357_v39 = vadd.f32 %v9095_v42, %v4347_v2  ;;  %v4358_v15 = vadd.f32 %v9095_v42, %v4348_v49 }
 0x589   : > { %v9808_v42 = vrot.slane %v9807_v43, 4 }
 0x58a   : > { %v4365_v12 = vadd.f32 %v4363_v52, %v4355_v22  ;;  %v4366_v1 = vadd.f32 %v4363_v52, %v4356_v10  ;;  %v4367_v63 = vadd.f32 %v4363_v52, %v4357_v39  ;;  %v4368_v58 = vadd.f32 %v4363_v52, %v4358_v15 }
 0x58b   : > { %4799 = vrot.lane.b32.xlu1 %v4796_v37, %s5468_s4 }
 0x58c   : > { %v4391_v3 = vadd.f32 %v4381_v4, %v4365_v12  ;;  %v4394_v23 = vadd.f32 %v9806_v38, %v4368_v58  ;;  %v4392_v29 = vadd.f32 %v9808_v42, %v4366_v1  ;;  %v4393_v50 = vadd.f32 %v4384_v34, %v4367_v63  ;;  %v9810_v63 = vld [vmem:[#allocation93_spill] sm:$0xff]  ;;  %v9812_v38 = vld [vmem:[#allocation96_spill] sm:$0xff] }
 0x58d   : > { %v4410_v28 = vpop.permute.xlu1 %4409  ;;  %4801 = vrot.lane.b32.xlu2 %v4798_v46, %s5468_s4  ;;  %v9811_v58 = vrot.slane %v9810_v63, 5  ;;  %s4949_s4 = scalar_lea.hbm %s9250_s3, %s5172_s13 }
 0x58e   : > { %4816 = vrot.lane.b32.xlu0 %v4813_v57, %s5467_s27  ;;  %v4417_v47 = vsel %vm680_vm7, %v4410_v28, %v9107_v53  ;;  %v4424_v51 = vadd.f32 %v9107_v53, %v4392_v29 }
 0x58f   : > { %v4423_v60 = vadd.f32 %v4417_v47, %v4391_v3  ;;  %v4484_v45 = vpop.permute.xlu2 %4483 }
 0x590   : > { %v4414_v25 = vpop.permute.xlu0 %4413 }
 0x593   : > { %4818 = vrot.lane.b32.xlu1 %v4815_v30, %s5467_s27 }
 0x595   : > { %v4416_v0 = vpop.permute.xlu1 %4415  ;;  %4833 = vrot.lane.b32.xlu2 %v4830_v62, %s5470_s5 }
 0x596   : > { %4835 = vrot.lane.b32.xlu0 %v4832_v56, %s5470_s5  ;;  %v4418_v53 = vsel %vm680_vm7, %v4414_v25, %v4416_v0  ;;  %v4426_v36 = vadd.f32 %v4416_v0, %v4394_v23  ;;  %v9813_v56 = vld [vmem:[#allocation65_spill] sm:$0xff]  ;;  %s4952_s5 = sshll.u32 %s4949_s4, 4  ;;  %s4953_s5 = int_to_ptr.hbm [resolvable:$true] %s4952_s5 }
 0x597   : > { %v4425_v13 = vadd.f32 %v4418_v53, %v4393_v50  ;;  %v4503_v6 = vpop.permute.xlu2 %4502  ;;  %v4533_v0 = vmul.f32 %v8992_v61, %v9813_v56  ;;  %v4531_v53 = vmul.f32 %v8985_v59, %v9813_v56  ;;  %s5382_s2 = sshra.s32 %s4953_s5, 4  ;;  %s5383_s2 = int_to_ptr.hbm [resolvable:$true] %s5382_s2 }
 0x598   : > { %v4444_v41 = vpop.permute.xlu0 %4443  ;;  %v4458_v9 = vadd.f32 %v4448_v32, %v4426_v36  ;;  %s5384_s25 = scalar_lea.hbm %s5383_s2, 16  ;;  %p5389_p8 = scmp.lt.s32.totalorder %s5383_s2, %s9250_s3 }
 0x599   : > { %v4449_v5 = vsel %vm708_vm8, %v9127_v11, %v4444_v41  ;;  %v4456_v19 = vadd.f32 %v4444_v41, %v4424_v51  ;;  %p5385_p1 = scmp.ne.s32.totalorder %s5383_s2, %s5384_s25  ;;  %p5390_p11 = scmp.lt.s32.totalorder %s5388_s12, %s5384_s25 }
 0x59a   : > { %v4455_v27 = vadd.f32 %v4449_v5, %v4423_v60 }
 0x59b   : > { %p5386_p2 = pnand %p5385_p1, %p5577_p9  ;;  %p5391_p12 = por %p5390_p11, %p5389_p8 }
 0x59d   : > { %v4446_v35 = vpop.permute.xlu1 %4445  ;;  %p5387_p4 = pneg %p5386_p2 }
 0x59e   : > { %v4450_v33 = vsel %vm708_vm8, %v4446_v35, %v4448_v32 }
 0x59f   : > { %v4457_v48 = vadd.f32 %v4450_v33, %v4425_v13  ;;  %v4568_v21 = vpop.permute.xlu2 %4567  ;;  %p5392_p13 = pnand %p5391_p12, %p5387_p4 }
 0x5a0   : > { %v4467_v14 = vpop.permute.xlu0 %4466 }
 0x5a1   : > { %v4472_v2 = vadd.f32 %v4467_v14, %v4455_v27  ;;  %v4473_v49 = vadd.f32 %v4467_v14, %v4456_v19  ;;  %v4539_v19 = vrot.slane %v4531_v53, 5 }
 0x5a3   : > { %v4489_v37 = vadd.f32 %v4484_v45, %v4472_v2  ;;  %v4490_v44 = vadd.f32 %v4484_v45, %v4473_v49 }
 0x5a5   : > { %v4469_v40 = vpop.permute.xlu1 %4468 }
 0x5a6   : > { %v4474_v4 = vadd.f32 %v4469_v40, %v4457_v48  ;;  %v4475_v55 = vadd.f32 %v4469_v40, %v4458_v9  ;;  %v4541_v9 = vrot.slane %v4533_v0, 5  ;;  %v9814_v48 = vld [vmem:[#allocation97_spill] sm:$0xff]  ;;  %v9815_v40 = vld [vmem:[#allocation94_spill] sm:$0xff] }
 0x5a7   : > { %v4574_v22 = vpop.permute.xlu2 %4573 }
 0x5a8   : > { %v4486_v52 = vpop.permute.xlu0 %4485  ;;  %v4542_v61 = vsel %vm1384_vm5, %v4539_v19, %v4541_v9 }
 0x5a9   : > { %v4491_v10 = vadd.f32 %v4486_v52, %v4474_v4  ;;  %v4492_v39 = vadd.f32 %v4486_v52, %v4475_v55  ;;  %v9816_v4 = vrot.slane %v9815_v40, 6 }
 0x5ab   : > { %v4508_v11 = vadd.f32 %v4503_v6, %v4491_v10  ;;  %v4509_v15 = vadd.f32 %v4503_v6, %v4492_v39 }
 0x5ad   : > { %v4501_v16 = vpop.permute.xlu1 %4500 }
 0x5ae   : > { %v4507_v17 = vadd.f32 %v4501_v16, %v4490_v44  ;;  %v4506_v50 = vadd.f32 %v4501_v16, %v4489_v37 }
 0x5af   : > { %v4604_v1 = vpop.permute.xlu2 %4603 }
 0x5b0   : > { %v4518_v12 = vpop.permute.xlu0 %4517 }
 0x5b1   : > { %v4524_v32 = vadd.f32 %v4518_v12, %v4507_v17  ;;  %v4523_v27 = vadd.f32 %v4518_v12, %v4506_v50 }
 0x5b3   : > { %v4550_v57 = vadd.f32 %v9811_v58, %v4524_v32  ;;  %v4549_v44 = vadd.f32 %v4539_v19, %v4523_v27 }
 0x5b5   : > { %v4520_v3 = vpop.permute.xlu1 %4519 }
 0x5b6   : > { %v4526_v46 = vadd.f32 %v4520_v3, %v4509_v15  ;;  %v4525_v2 = vadd.f32 %v4520_v3, %v4508_v11 }
 0x5b7   : > { %v4627_v42 = vpop.permute.xlu2 %4626 }
 0x5b8   : > { %v4552_v23 = vadd.f32 %v9812_v38, %v4526_v46  ;;  %v4570_v43 = vpop.permute.xlu0 %4569  ;;  %v4551_v39 = vadd.f32 %v4542_v61, %v4525_v2  ;;  %v9817_v38 = vld [vmem:[#allocation66_spill] sm:$0xff] }
 0x5b9   : > { %v4582_v54 = vadd.f32 %v4570_v43, %v4550_v57  ;;  %v4575_v37 = vsel %vm680_vm7, %v4568_v21, %v4570_v43 }
 0x5ba   : > { %v4584_v24 = vadd.f32 %v4574_v22, %v4552_v23  ;;  %v4581_v15 = vadd.f32 %v4575_v37, %v4549_v44  ;;  %v4689_v23 = vmul.f32 %v9064_v26, %v9817_v38 }
 0x5bd   : > { %v4572_v29 = vpop.permute.xlu1 %4571 }
 0x5be   : > { %v4576_v52 = vsel %vm680_vm7, %v4572_v29, %v4574_v22  ;;  %v4691_v22 = vmul.f32 %v9077_v31, %v9817_v38 }
 0x5bf   : > { %v4659_v7 = vpop.permute.xlu2 %4658  ;;  %v4583_v17 = vadd.f32 %v4576_v52, %v4551_v39 }
 0x5c0   : > { %v4600_v28 = vpop.permute.xlu0 %4599 }
 0x5c5   : > { %v4602_v20 = vpop.permute.xlu1 %4601 }
 0x5c6   : > { %v4614_v25 = vadd.f32 %v4602_v20, %v4582_v54  ;;  %v4607_v10 = vsel %vm708_vm8, %v4600_v28, %v4602_v20  ;;  %v4699_v54 = vrot.slane %v4691_v22, 6 }
 0x5c7   : > { %v4678_v60 = vpop.permute.xlu2 %4677  ;;  %v4613_v11 = vadd.f32 %v4607_v10, %v4581_v15 }
 0x5c8   : > { %v4606_v8 = vpop.permute.xlu0 %4605 }
 0x5c9   : > { %v4616_v51 = vadd.f32 %v4606_v8, %v4584_v24  ;;  %v4608_v16 = vsel %vm708_vm8, %v4604_v1, %v4606_v8  ;;  %v4697_v24 = vrot.slane %v4689_v23, 6 }
 0x5ca   : > { %v4615_v63 = vadd.f32 %v4608_v16, %v4583_v17 }
 0x5cb   : > { %v4633_v18 = vadd.f32 %v4627_v42, %v4616_v51 }
 0x5cc   : > { %v4632_v3 = vadd.f32 %v4627_v42, %v4615_v63 }
 0x5cd   : > { %v4625_v47 = vpop.permute.xlu1 %4624 }
 0x5ce   : > { %v4631_v62 = vadd.f32 %v4625_v47, %v4614_v25  ;;  %v4630_v58 = vadd.f32 %v4625_v47, %v4613_v11  ;;  %v4700_v25 = vsel %vm1550_vm6, %v4697_v24, %v4699_v54 }
 0x5cf   : > { %v4730_v41 = vpop.permute.xlu2 %4729 }
 0x5d0   : > { %v4642_v45 = vpop.permute.xlu0 %4641 }
 0x5d1   : > { %v4648_v36 = vadd.f32 %v4642_v45, %v4631_v62  ;;  %v4647_v57 = vadd.f32 %v4642_v45, %v4630_v58 }
 0x5d3   : > { %v4665_v35 = vadd.f32 %v4659_v7, %v4648_v36  ;;  %v4664_v29 = vadd.f32 %v4659_v7, %v4647_v57 }
 0x5d5   : > { %v4644_v30 = vpop.permute.xlu1 %4643 }
 0x5d6   : > { %v4650_v34 = vadd.f32 %v4644_v30, %v4633_v18  ;;  %v4649_v46 = vadd.f32 %v4644_v30, %v4632_v3 }
 0x5d7   : > { %v4760_v12 = vpop.permute.xlu2 %4759 }
 0x5d8   : > { %v4661_v13 = vpop.permute.xlu0 %4660 }
 0x5d9   : > { %v4667_v6 = vadd.f32 %v4661_v13, %v4650_v34  ;;  %v4666_v1 = vadd.f32 %v4661_v13, %v4649_v46 }
 0x5db   : > { %v4684_v5 = vadd.f32 %v4678_v60, %v4667_v6  ;;  %v4683_v51 = vadd.f32 %v4678_v60, %v4666_v1 }
 0x5dd   : > { %v4676_v33 = vpop.permute.xlu1 %4675  ;;  %v4710_v14 = vadd.f32 %v9814_v48, %v4684_v5  ;;  %v4709_v30 = vadd.f32 %v4700_v25, %v4683_v51 }
 0x5de   : > { %v4682_v49 = vadd.f32 %v4676_v33, %v4665_v35  ;;  %v4681_v20 = vadd.f32 %v4676_v33, %v4664_v29 }
 0x5df   : > { %v4783_v28 = vpop.permute.xlu2 %4782 }
 0x5e0   : > { %v4726_v59 = vpop.permute.xlu0 %4725  ;;  %v4708_v55 = vadd.f32 %v9816_v4, %v4682_v49  ;;  %v4707_v45 = vadd.f32 %v4697_v24, %v4681_v20 }
 0x5e5   : > { %v4728_v32 = vpop.permute.xlu1 %4727 }
 0x5e6   : > { %v4733_v47 = vsel %vm680_vm7, %v4726_v59, %v4728_v32  ;;  %v4740_v42 = vadd.f32 %v4728_v32, %v4708_v55 }
 0x5e7   : > { %v4739_v18 = vadd.f32 %v4733_v47, %v4707_v45  ;;  %v4802_v34 = vpop.permute.xlu2 %4801 }
 0x5e8   : > { %v4732_v21 = vpop.permute.xlu0 %4731  ;;  %v4772_v7 = vadd.f32 %v4760_v12, %v4740_v42 }
 0x5e9   : > { %v4734_v31 = vsel %vm680_vm7, %v4730_v41, %v4732_v21  ;;  %v4742_v36 = vadd.f32 %v4732_v21, %v4710_v14 }
 0x5ea   : > { %v4741_v53 = vadd.f32 %v4734_v31, %v4709_v30  ;;  %v4789_v9 = vadd.f32 %v4783_v28, %v4772_v7 }
 0x5ed   : > { %v4758_v43 = vpop.permute.xlu1 %4757 }
 0x5ee   : > { %v4765_v26 = vsel %vm708_vm8, %v4758_v43, %v4760_v12 }
 0x5ef   : > { %v4771_v56 = vadd.f32 %v4765_v26, %v4739_v18  ;;  %v4834_v49 = vpop.permute.xlu2 %4833 }
 0x5f0   : > { %v4762_v8 = vpop.permute.xlu0 %4761 }
 0x5f1   : > { %v4788_v6 = vadd.f32 %v4783_v28, %v4771_v56 }
 0x5f5   : > { %v4764_v62 = vpop.permute.xlu1 %4763 }
 0x5f6   : > { %v4766_v50 = vsel %vm708_vm8, %v4762_v8, %v4764_v62  ;;  %v4774_v13 = vadd.f32 %v4764_v62, %v4742_v36 }
 0x5f7   : > { %v4773_v60 = vadd.f32 %v4766_v50, %v4741_v53 }
 0x5f8   : > { %v4785_v0 = vpop.permute.xlu0 %4784 }
 0x5f9   : > { %v4790_v35 = vadd.f32 %v4785_v0, %v4773_v60  ;;  %v4791_v33 = vadd.f32 %v4785_v0, %v4774_v13 }
 0x5fb   : > { %v4807_v44 = vadd.f32 %v4802_v34, %v4790_v35  ;;  %v4808_v59 = vadd.f32 %v4802_v34, %v4791_v33 }
 0x5fd   : > { %v4800_v5 = vpop.permute.xlu1 %4799 }
 0x5fe   : > { %v4805_v19 = vadd.f32 %v4800_v5, %v4788_v6  ;;  %v4806_v27 = vadd.f32 %v4800_v5, %v4789_v9 }
 0x600   : > { %v4817_v48 = vpop.permute.xlu0 %4816 }
 0x601   : > { %v4822_v41 = vadd.f32 %v4817_v48, %v4805_v19  ;;  %v4823_v2 = vadd.f32 %v4817_v48, %v4806_v27 }
 0x603   : > { %v4839_v61 = vadd.f32 %v4834_v49, %v4822_v41  ;;  %v4840_v37 = vadd.f32 %v4834_v49, %v4823_v2 }
 0x605   : > { %v5162_v40 = vmul.f32 -1.442695, %v4839_v61  ;;  %v5163_v4 = vmul.f32 -1.442695, %v4840_v37  ;;  %v4819_v14 = vpop.permute.xlu1 %4818 }
 0x606   : > { %v4824_v55 = vadd.f32 %v4819_v14, %v4807_v44  ;;  %v4825_v52 = vadd.f32 %v4819_v14, %v4808_v59 }
 0x607   : > { %5281 = vpow2.f32 %v5162_v40 }
 0x608   : > { %5283 = vpow2.f32 %v5163_v4  ;;  %v4836_v10 = vpop.permute.xlu0 %4835 }
 0x609   : > { %v4841_v39 = vadd.f32 %v4836_v10, %v4824_v55  ;;  %v4842_v15 = vadd.f32 %v4836_v10, %v4825_v52 }
 0x60b   : > { %v5164_v16 = vmul.f32 -1.442695, %v4841_v39  ;;  %v5165_v17 = vmul.f32 -1.442695, %v4842_v15 }
 0x60d   : > { %v5282_v11 = vpop.eup %5281  ;;  %5285 = vpow2.f32 %v5164_v16 }
 0x60e   : > { %v5284_v12 = vpop.eup %5283  ;;  %v4855_v32 = vadd.f32 1.0, %v5282_v11  ;;  %5287 = vpow2.f32 %v5165_v17 }
 0x60f   : > { %v4856_v63 = vadd.f32 1.0, %v5284_v12 }
 0x610   : > { %5289 = vrcp.f32 %v4855_v32  ;;  %v4868_v28 = vand.u32 2147483647, %v4855_v32  ;;  %v4870_v1 = vand.u32 2147483648, %v4855_v32  ;;  %vm4864_vm5 = vweird.f32 %v4855_v32 }
 0x611   : > { %5291 = vrcp.f32 %v4856_v63  ;;  %v4883_v20 = vand.u32 2147483647, %v4856_v63  ;;  %v4885_v8 = vand.u32 2147483648, %v4856_v63  ;;  %vm4879_vm4 = vweird.f32 %v4856_v63 }
 0x612   : > { %vm4869_vm7 = vcmp.eq.f32.partialorder %v4868_v28, 8.507059e+37  ;;  %v4871_v26 = vor.u32 1.1754944e-38, %v4870_v1 }
 0x613   : > { %v5286_v58 = vpop.eup %5285  ;;  %vm4884_vm10 = vcmp.eq.f32.partialorder %v4883_v20, 8.507059e+37  ;;  %v4886_v18 = vor.u32 1.1754944e-38, %v4885_v8 }
 0x614   : > { %v5288_v21 = vpop.eup %5287  ;;  %v4857_v57 = vadd.f32 1.0, %v5286_v58 }
 0x615   : > { %v4858_v3 = vadd.f32 1.0, %v5288_v21 }
 0x616   : > { %v5290_v46 = vpop.eup %5289  ;;  %5293 = vrcp.f32 %v4857_v57  ;;  %v4900_v56 = vand.u32 2147483648, %v4857_v57  ;;  %v4898_v36 = vand.u32 2147483647, %v4857_v57  ;;  %vm4894_vm13 = vweird.f32 %v4857_v57 }
 0x617   : > { %v5292_v38 = vpop.eup %5291  ;;  %5295 = vrcp.f32 %v4858_v3  ;;  %v4860_v23 = vmul.f32 %v5290_v46, %v4855_v32  ;;  %vm4865_vm0 = vweird.f32 %v5290_v46  ;;  %v4915_v13 = vand.u32 2147483648, %v4858_v3 }
 0x618   : > { %v4875_v22 = vmul.f32 %v5292_v38, %v4856_v63  ;;  %vm4880_vm1 = vweird.f32 %v5292_v38  ;;  %vm4866_vm6 = vmor %vm4864_vm5, %vm4865_vm0  ;;  %v4913_v9 = vand.u32 2147483647, %v4858_v3  ;;  %v4901_v5 = vor.u32 1.1754944e-38, %v4900_v56 }
 0x619   : > { %v4861_v43 = vsub.f32 1.0, %v4860_v23  ;;  %vm4881_vm8 = vmor %vm4879_vm4, %vm4880_vm1  ;;  %vm4909_vm15 = vweird.f32 %v4858_v3  ;;  %vm4899_vm0 = vcmp.eq.f32.partialorder %v4898_v36, 8.507059e+37  ;;  %v4916_v48 = vor.u32 1.1754944e-38, %v4915_v13 }
 0x61a   : > { %v4876_v29 = vsub.f32 1.0, %v4875_v22  ;;  %vm4914_vm4 = vcmp.eq.f32.partialorder %v4913_v9, 8.507059e+37 }
 0x61b   : > { %v4862_v24 = vmul.f32 %v5290_v46, %v4861_v43 }
 0x61c   : > { %v5294_v54 = vpop.eup %5293  ;;  %v4877_v47 = vmul.f32 %v5292_v38, %v4876_v29 }
 0x61d   : > { %v5296_v51 = vpop.eup %5295  ;;  %v4863_v45 = vadd.f32 %v5290_v46, %v4862_v24  ;;  %v4890_v42 = vmul.f32 %v5294_v54, %v4857_v57  ;;  %vm4895_vm11 = vweird.f32 %v5294_v54 }
 0x61e   : > { %v4878_v25 = vadd.f32 %v5292_v38, %v4877_v47  ;;  %v4905_v62 = vmul.f32 %v5296_v51, %v4858_v3  ;;  %vm4910_vm12 = vweird.f32 %v5296_v51  ;;  %vm4896_vm14 = vmor %vm4894_vm13, %vm4895_vm11 }
 0x61f   : > { %v4867_v31 = vsel %vm4866_vm6, %v5290_v46, %v4863_v45  ;;  %v4891_v7 = vsub.f32 1.0, %v4890_v42  ;;  %vm4911_vm1 = vmor %vm4909_vm15, %vm4910_vm12 }
 0x620   : > { %v4882_v30 = vsel %vm4881_vm8, %v5292_v38, %v4878_v25  ;;  %v4872_v34 = vsel %vm4869_vm7, %v4871_v26, %v4867_v31  ;;  %v4906_v0 = vsub.f32 1.0, %v4905_v62 }
 0x621   : > { %v4887_v50 = vsel %vm4884_vm10, %v4886_v18, %v4882_v30  ;;  %4923 = vrot.lane.b32.xlu1 %v4872_v34, %s5473_s9  ;;  %v4892_v53 = vmul.f32 %v5294_v54, %v4891_v7 }
 0x622   : > { %4925 = vrot.lane.b32.xlu2 %v4887_v50, %s5473_s9  ;;  %v4907_v60 = vmul.f32 %v5296_v51, %v4906_v0 }
 0x623   : > { %v4893_v6 = vadd.f32 %v5294_v54, %v4892_v53 }
 0x624   : > { %v4908_v19 = vadd.f32 %v5296_v51, %v4907_v60 }
 0x625   : > { %v4897_v27 = vsel %vm4896_vm14, %v5294_v54, %v4893_v6 }
 0x626   : > { %v4902_v35 = vsel %vm4899_vm0, %v4901_v5, %v4897_v27  ;;  %v4912_v33 = vsel %vm4911_vm1, %v5296_v51, %v4908_v19 }
 0x627   : > { %4927 = vrot.lane.b32.xlu0 %v4902_v35, %s5473_s9  ;;  %v4917_v41 = vsel %vm4914_vm4, %v4916_v48, %v4912_v33 }
 0x629   : > { %4929 = vrot.lane.b32.xlu1 %v4917_v41, %s5473_s9 }
 0x67c   : > { %v4926_v2 = vpop.permute.xlu2 %4925 }
 0x693   : > { %v4924_v49 = vpop.permute.xlu1 %4923 }
 0x694   : > { %v4931_v61 = vsel %vm2838_vm2, %v4924_v49, %v4926_v2 }
 0x695   : > { %4935 = vst.msk [vmem:[%s8106_s28 + $0x3] sm:$0xe0] %vm2843_vm3, %v4931_v61 }
 0x699   : > { %v4928_v37 = vpop.permute.xlu0 %4927 }
 0x69b   : > { %v4930_v44 = vpop.permute.xlu1 %4929 }
 0x69c   : > { %v4932_v59 = vsel %vm2838_vm2, %v4928_v37, %v4930_v44 }
 0x69d   : > { %4936 = vst.msk [vmem:[%s8106_s28 + $0xb] sm:$0x1f] %vm2845_vm9, %v4932_v59 }
 0x69e   : > { %5395 = shalt.err (!%p5392_p13)
}
 0x69f   : > { %s5474_s26 = smov 128   ;;  %s5475_s10 = smov 8  }
 0x6a0   : > { %5179 = dma.vmem_to_hbm [thread:$0]  (%p5577_p9), %s4951_s21, 256, %s4953_s5, %s4938_s17, %s5474_s26, %s5474_s26, %s5475_s10  }
 0x6a1 PF: > { %s4967_s9 = sand.u32 1, %s5434_s14   ;;  %p9818_p0 = scmp.ge.s32.totalorder %s5454_s19, 2 }
 0x6a2   : > { %s4968_s11 = scalar_lea.sflag [#allocation7], %s4967_s9 }
 0x6a3   : > { %p5190_p3 = pnand %p9818_p0, %p5548_p6 }
 0x6a5   : > { %p5191_p5 = pneg %p5190_p3 }
 0x6a7   : > { %5429 = dma.done.wait (%p5191_p5), %s4968_s11, 256  }
 0x6a8   : > { %5431 = vsyncadd (%p5191_p5), %s4968_s11, 4294967040  ;;  %s21_s19 = sadd.s32 1, %s5454_s19   ;;  %s9819_s14 = smov %s5438_s15 }
 0x6a9   : > { %p18_p7 = scmp.ge.s32.totalorder %s21_s19, 4   ;;  %s9820_s15 = smov %s5442_s16 }
 0x6aa   : > { %s9821_s16 = smov %s5583_s8  ;;  %s9822_s17 = smov %s5450_s18 }
 0x6ab   : > { %s9823_s18 = smov %s9825_s29  ;;  %20 = sbr.rel (!%p18_p7) target bundleno = 9 (0x9), region = 106 }
 0x6b0   :  { %4974 = vsyncpa [#allocation6], 1 }
 0x6b1   :  { %4976 = vsyncpa [#allocation6 + $0x1], 1 }
 0x6b2   :  { %4977 = vsyncpa [#allocation7], 1 }
 0x6b3   :  { %4979 = vsyncpa [#allocation7 + $0x1], 1 }
 0x6b4   :  { %4980 = vsyncpa [#allocation8], 1 }
 0x6b5   :  { %4982 = vsyncpa [#allocation8 + $0x1], 1 }

</bundles_post_ra>
